<compile_context>
chip_gen: v6e
topology: v6e:2x2x1
jax: 0.10.0
libtpu: 0.0.40
codegen_flags: <defaults>
</compile_context>

<pallas_src>
import jax
import jax.numpy as jnp
from jax import lax
from jax.experimental import pallas as pl
from jax.experimental.pallas import tpu as pltpu


# ---------------------------------------------------------------------------
# Pallas kernels
# ---------------------------------------------------------------------------
def _conv_bn_pool_kernel(xcol_ref, w_ref, b_ref, scale_ref, shift_ref, o_ref):
    """Fused Conv(3x3 as ONE GEMM) + bias + ReLU + BatchNorm(affine) + MaxPool2x2.

    xcol_ref : (B, 4, Qp, K) bf16 -- axis 1 = 2x2 pool-window position,
               Qp = pooled output positions (padded to a multiple of 16),
               K = 9*Cin.
    w_ref    : (K, C) bf16
    b_ref / scale_ref / shift_ref : (1, C) f32
    o_ref    : (B, Qp, C) bf16
    """
    bt, _, qp, k = xcol_ref.shape
    c = w_ref.shape[1]
    # Single GEMM with M = B*4*Qp instead of 4 tiny dots: fewer MXU
    # start/drain sequences, one epilogue pass, one set of (masked) stores.
    # The reshape only merges leading dims and is tile-preserving (Qp % 16 == 0).
    x2d = xcol_ref[...].reshape(bt * 4 * qp, k)
    acc = jnp.dot(x2d, w_ref[...], preferred_element_type=jnp.float32)
    y = jnp.maximum(acc + b_ref[...], 0.0)            # conv bias + ReLU   (f32)
    y = y * scale_ref[...] + shift_ref[...]           # BatchNorm2d affine (f32)
    y4 = y.reshape(bt, 4, qp, c)                      # tile-preserving split
    pooled = jnp.maximum(jnp.maximum(y4[:, 0], y4[:, 1]),
                         jnp.maximum(y4[:, 2], y4[:, 3]))
    o_ref[...] = pooled.astype(o_ref.dtype)


def _fc_head_kernel(x_ref, w1_ref, b1_ref, scale_ref, shift_ref,
                    w2_ref, b2_ref, o_ref):
    """Fused fc1 + ReLU + BatchNorm1d(affine) + (Dropout p=0 identity) + fc2."""
    h = jnp.dot(x_ref[...], w1_ref[...], preferred_element_type=jnp.float32)
    h = jnp.maximum(h + b1_ref[...], 0.0)
    h = h * scale_ref[...] + shift_ref[...]
    # TODO(synk): Dropout(p=0) == identity here; p > 0 would need pltpu.prng_*.
    o_ref[...] = (jnp.dot(h, w2_ref[...], preferred_element_type=jnp.float32)
                  + b2_ref[...]).astype(o_ref.dtype)


# ---------------------------------------------------------------------------
# Wrappers around pallas_call
# ---------------------------------------------------------------------------
_VMEM_LIMIT = 48 * 1024 * 1024   # actual usage <= ~20 MiB; < v7x 64 MiB physical


def conv_bn_pool(xcol, w_flat, b, scale, shift, b_tile):
    """xcol: (N, 4, Qp, K) bf16; w_flat: (K, C) bf16. Returns (N, Qp, C) bf16."""
    n, _, qp, k = xcol.shape
    cout = w_flat.shape[1]
    assert n % b_tile == 0
    return pl.pallas_call(
        _conv_bn_pool_kernel,
        out_shape=jax.ShapeDtypeStruct((n, qp, cout), jnp.bfloat16),
        grid=(n // b_tile,),
        in_specs=[
            pl.BlockSpec((b_tile, 4, qp, k), lambda i: (i, 0, 0, 0)),
            pl.BlockSpec((k, cout), lambda i: (0, 0)),
            pl.BlockSpec((1, cout), lambda i: (0, 0)),
            pl.BlockSpec((1, cout), lambda i: (0, 0)),
            pl.BlockSpec((1, cout), lambda i: (0, 0)),
        ],
        out_specs=pl.BlockSpec((b_tile, qp, cout), lambda i: (i, 0, 0)),
        compiler_params=pltpu.CompilerParams(
            dimension_semantics=("parallel",),
            vmem_limit_bytes=_VMEM_LIMIT),
    )(xcol, w_flat, b, scale, shift)


def fc_head(x, w1, b1, scale, shift, w2, b2):
    n, d = x.shape
    h = w1.shape[1]
    o = w2.shape[1]
    return pl.pallas_call(
        _fc_head_kernel,
        out_shape=jax.ShapeDtypeStruct((n, o), jnp.float32),
        grid=(1,),
        in_specs=[
            pl.BlockSpec((n, d), lambda i: (0, 0)),
            pl.BlockSpec((d, h), lambda i: (0, 0)),
            pl.BlockSpec((1, h), lambda i: (0, 0)),
            pl.BlockSpec((1, h), lambda i: (0, 0)),
            pl.BlockSpec((1, h), lambda i: (0, 0)),
            pl.BlockSpec((h, o), lambda i: (0, 0)),
            pl.BlockSpec((1, o), lambda i: (0, 0)),
        ],
        out_specs=pl.BlockSpec((n, o), lambda i: (0, 0)),
        compiler_params=pltpu.CompilerParams(vmem_limit_bytes=_VMEM_LIMIT),
    )(x, w1, b1, scale, shift, w2, b2)


# ---------------------------------------------------------------------------
# Plain-JAX glue: im2col arranged so pooling is 4 contiguous GEMM row blocks
# ---------------------------------------------------------------------------
def _im2col_pool_arrange(x, pad):
    """x: (N, H, W, C) NHWC -> (N, 4, Qp, 9*C) bf16, plus (Hp, Wp, Qp).

    axis 1 indexes the 2x2 pool-window position (u, v) -> 2*u + v,
    axis 2 is the pooled output position (i, j) -> i*Wp + j (row-major),
    Qp = Hp*Wp rounded up to a multiple of 16 (bf16 sublane tile), zero padded.
    """
    n, h, w, c = x.shape
    if pad:
        x = jnp.pad(x, ((0, 0), (pad, pad), (pad, pad), (0, 0)))
    ho, wo = h + 2 * pad - 2, w + 2 * pad - 2
    patches = jnp.concatenate(
        [x[:, dy:dy + ho, dx:dx + wo, :] for dy in range(3) for dx in range(3)],
        axis=-1)                                            # (N, Ho, Wo, 9*C)
    hp, wp = ho // 2, wo // 2
    patches = patches.reshape(n, hp, 2, wp, 2, 9 * c)
    patches = patches.transpose(0, 2, 4, 1, 3, 5)           # (N, 2, 2, Hp, Wp, 9C)
    patches = patches.reshape(n, 4, hp * wp, 9 * c)
    q = hp * wp
    qp = ((q + 15) // 16) * 16
    if qp != q:
        patches = jnp.pad(patches, ((0, 0), (0, 0), (0, qp - q), (0, 0)))
    return patches.astype(jnp.bfloat16), hp, wp, qp


def simple_cnn_forward(x_nchw, kp):
    """Forward pass of Simple_CNN. x_nchw: (N, 1, 48, 48) float32 -> (N, 7)."""
    n = x_nchw.shape[0]
    # Batch tile: large enough to amortize the ~0.35us per-grid-step overhead,
    # small enough that double-buffered blocks + f32 intermediates stay well
    # inside VMEM on every generation (incl. v7x's 64 MiB), and chosen so the
    # grid has >= 2 steps when possible so both v7x TensorCores get work.
    b_tile = max(1, min(4, pl.cdiv(n, 2)))
    n_pad = pl.cdiv(n, b_tile) * b_tile

    x = jnp.transpose(x_nchw, (0, 2, 3, 1))                 # NCHW -> NHWC
    if n_pad != n:
        x = jnp.pad(x, ((0, n_pad - n), (0, 0), (0, 0), (0, 0)))

    # conv1 (same) -> ReLU -> bn1 -> pool1
    xcol, hp, wp, _ = _im2col_pool_arrange(x, pad=1)
    x = conv_bn_pool(xcol, kp["w_c1"], kp["b_c1"], kp["s_bn1"], kp["t_bn1"], b_tile)
    x = x[:, :hp * wp, :].reshape(n_pad, hp, wp, 32)        # (Np, 24, 24, 32) bf16

    # conv2 (same) -> ReLU -> bn2 -> pool2
    xcol, hp, wp, _ = _im2col_pool_arrange(x, pad=1)
    x = conv_bn_pool(xcol, kp["w_c2"], kp["b_c2"], kp["s_bn2"], kp["t_bn2"], b_tile)
    x = x[:, :hp * wp, :].reshape(n_pad, hp, wp, 32)        # (Np, 12, 12, 32)

    # conv3 (valid) -> ReLU -> bn3 -> pool3
    xcol, hp, wp, _ = _im2col_pool_arrange(x, pad=0)
    x = conv_bn_pool(xcol, kp["w_c3"], kp["b_c3"], kp["s_bn3"], kp["t_bn3"], b_tile)
    x = x[:, :hp * wp, :]                                   # (Np, 25, 32)

    # Flatten in natural (H, W, C) order; w_fc1 was pre-permuted at prep time,
    # so this matches PyTorch's (C, H, W) flatten with no runtime transpose.
    xf = x.reshape(n_pad, hp * wp * 32)                     # (Np, 800) bf16
    out = fc_head(xf, kp["w_fc1"], kp["b_fc1"], kp["s_bnfc"], kp["t_bnfc"],
                  kp["w_fc2"], kp["b_fc2"])
    return out[:n]


# ---------------------------------------------------------------------------
# Parameters: PyTorch-semantic init + one-time kernel-layout preparation
# ---------------------------------------------------------------------------
def _bn_affine(key, c, eps=1e-5):
    k1, k2, k3, k4 = jax.random.split(key, 4)
    gamma = 1.0 + 0.1 * jax.random.normal(k1, (c,), jnp.float32)
    beta = 0.1 * jax.random.normal(k2, (c,), jnp.float32)
    mean = 0.1 * jax.random.normal(k3, (c,), jnp.float32)
    var = jax.random.uniform(k4, (c,), jnp.float32, minval=0.5, maxval=1.5)
    scale = gamma / jnp.sqrt(var + eps)
    shift = beta - mean * scale
    return scale[None, :], shift[None, :]


def init_params(key):
    ks = jax.random.split(key, 14)

    def conv_w(k, cin, cout):
        return jax.random.normal(k, (3, 3, cin, cout), jnp.float32) * jnp.sqrt(
            2.0 / (9 * cin))

    def lin_w(k, din, dout):
        return jax.random.normal(k, (din, dout), jnp.float32) * jnp.sqrt(2.0 / din)

    def bias(k, c):
        return 0.05 * jax.random.normal(k, (1, c), jnp.float32)

    p = {}
    p["w_c1"], p["b_c1"] = conv_w(ks[0], 1, 32), bias(ks[1], 32)
    p["s_bn1"], p["t_bn1"] = _bn_affine(ks[2], 32)
    p["w_c2"], p["b_c2"] = conv_w(ks[3], 32, 32), bias(ks[4], 32)
    p["s_bn2"], p["t_bn2"] = _bn_affine(ks[5], 32)
    p["w_c3"], p["b_c3"] = conv_w(ks[6], 32, 32), bias(ks[7], 32)
    p["s_bn3"], p["t_bn3"] = _bn_affine(ks[8], 32)
    p["w_fc1"], p["b_fc1"] = lin_w(ks[9], 5 * 5 * 32, 32), bias(ks[10], 32)
    p["s_bnfc"], p["t_bnfc"] = _bn_affine(ks[11], 32)
    p["w_fc2"], p["b_fc2"] = lin_w(ks[12], 32, 7), bias(ks[13], 7)
    return p


def prepare_params(p):
    """PyTorch-layout f32 params -> kernel-ready layouts/dtypes (done once)."""
    kp = {}
    for i in (1, 2, 3):
        w = p[f"w_c{i}"]                                 # (3, 3, Cin, Cout) HWIO
        kh, kw, cin, cout = w.shape
        kp[f"w_c{i}"] = w.reshape(kh * kw * cin, cout).astype(jnp.bfloat16)
        kp[f"b_c{i}"] = p[f"b_c{i}"]
        kp[f"s_bn{i}"] = p[f"s_bn{i}"]
        kp[f"t_bn{i}"] = p[f"t_bn{i}"]
    # fc1 rows: PyTorch flatten order is (C, H, W); pre-permute to (H, W, C) so
    # the hot path needs no transpose before the FC head.
    w1 = p["w_fc1"].reshape(32, 5, 5, 32).transpose(1, 2, 0, 3).reshape(800, 32)
    kp["w_fc1"] = w1.astype(jnp.bfloat16)
    kp["b_fc1"], kp["s_bnfc"], kp["t_bnfc"] = p["b_fc1"], p["s_bnfc"], p["t_bnfc"]
    kp["w_fc2"], kp["b_fc2"] = p["w_fc2"], p["b_fc2"]
    return kp


# ---------------------------------------------------------------------------
# Pure-JAX f32 reference (PyTorch layouts/semantics) for a sanity check
# ---------------------------------------------------------------------------
def reference_forward(x_nchw, p):
    x = jnp.transpose(x_nchw, (0, 2, 3, 1))

    def block(x, w, b, s, t, pad):
        y = lax.conv_general_dilated(
            x, w, (1, 1), [(pad, pad), (pad, pad)],
            dimension_numbers=("NHWC", "HWIO", "NHWC"),
            precision=lax.Precision.HIGHEST)
        y = jnp.maximum(y + b, 0.0)
        y = y * s + t
        n, h, wd, c = y.shape
        return y.reshape(n, h // 2, 2, wd // 2, 2, c).max(axis=(2, 4))

    x = block(x, p["w_c1"], p["b_c1"], p["s_bn1"], p["t_bn1"], 1)
    x = block(x, p["w_c2"], p["b_c2"], p["s_bn2"], p["t_bn2"], 1)
    x = block(x, p["w_c3"], p["b_c3"], p["s_bn3"], p["t_bn3"], 0)
    xf = jnp.transpose(x, (0, 3, 1, 2)).reshape(x.shape[0], -1)   # (C,H,W) flatten
    h = jnp.maximum(
        jnp.dot(xf, p["w_fc1"], precision=lax.Precision.HIGHEST) + p["b_fc1"], 0.0)
    h = h * p["s_bnfc"] + p["t_bnfc"]
    return jnp.dot(h, p["w_fc2"], precision=lax.Precision.HIGHEST) + p["b_fc2"]


if __name__ == "__main__":
    key = jax.random.PRNGKey(0)
    pkey, xkey = jax.random.split(key)
    params = init_params(pkey)

    # Module docstring: input is N x 1 x 48 x 48 (NCHW, as in PyTorch).
    x = jax.random.normal(xkey, (2, 1, 48, 48), jnp.float32)

    # Round params & input to bf16-representable values so the f32 reference and
    # the bf16-input kernels consume identical operand values; the remaining
    # difference is only the bf16 storage of intermediate activations.
    rnd = lambda a: a.astype(jnp.bfloat16).astype(jnp.float32)
    params = jax.tree_util.tree_map(rnd, params)
    x = rnd(x)

    kparams = prepare_params(params)

    out = jax.jit(simple_cnn_forward)(x, kparams)
    out = jax.block_until_ready(out)

    assert out.shape == (2, 7), out.shape
    assert bool(jnp.all(jnp.isfinite(out)))

    ref = reference_forward(x, params)
    max_err = float(jnp.max(jnp.abs(out - ref)))
    assert max_err < 1e-1, f"mismatch vs reference: {max_err}"

    print("KERNEL_OK")
</pallas_src>

<mosaic_0001>
module attributes {stable_mosaic.version = 11 : i64} {
  func.func @_conv_bn_pool_kernel(%arg0: i32, %arg1: memref<1x4x576x9xbf16, #tpu.memory_space<vmem>>, %arg2: memref<9x32xbf16, #tpu.memory_space<vmem>>, %arg3: memref<1x32xf32, #tpu.memory_space<vmem>>, %arg4: memref<1x32xf32, #tpu.memory_space<vmem>>, %arg5: memref<1x32xf32, #tpu.memory_space<vmem>>, %arg6: memref<1x576x32xbf16, #tpu.memory_space<vmem>>) attributes {dimension_semantics = [#tpu.dimension_semantics<parallel>], iteration_bounds = array<i64: 2>, scalar_prefetch = 0 : i64, scratch_operands = 0 : i64, tpu.core_type = #tpu.core_type<tc>, window_params = [{transform_indices = @transform_0, window_bounds = array<i64: 1, 4, 576, 9>}, {pipeline_mode = #tpu.pipeline_mode<synchronous>, transform_indices = @transform_1, window_bounds = array<i64: 9, 32>}, {pipeline_mode = #tpu.pipeline_mode<synchronous>, transform_indices = @transform_2, window_bounds = array<i64: 1, 32>}, {pipeline_mode = #tpu.pipeline_mode<synchronous>, transform_indices = @transform_3, window_bounds = array<i64: 1, 32>}, {pipeline_mode = #tpu.pipeline_mode<synchronous>, transform_indices = @transform_4, window_bounds = array<i64: 1, 32>}, {transform_indices = @transform_5, window_bounds = array<i64: 1, 576, 32>}]} {
    %c0 = arith.constant 0 : index
    %c0_0 = arith.constant 0 : index
    %c0_1 = arith.constant 0 : index
    %c0_2 = arith.constant 0 : index
    %0 = vector.load %arg1[%c0, %c0_0, %c0_1, %c0_2] : memref<1x4x576x9xbf16, #tpu.memory_space<vmem>>, vector<1x4x576x9xbf16>
    %1 = vector.shape_cast %0 : vector<1x4x576x9xbf16> to vector<2304x9xbf16>
    %c0_3 = arith.constant 0 : index
    %c0_4 = arith.constant 0 : index
    %2 = vector.load %arg2[%c0_3, %c0_4] : memref<9x32xbf16, #tpu.memory_space<vmem>>, vector<9x32xbf16>
    %cst = arith.constant dense<0.000000e+00> : vector<2304x32xf32>
    %3 = tpu.matmul %1, %2, %cst {dimension_numbers = #tpu.dot_dimension_numbers<[1], [0], [0], [1], [0, 0, 1, 1], [], []>} : vector<2304x9xbf16>, vector<9x32xbf16>, vector<2304x32xf32> -> vector<2304x32xf32>
    %c0_5 = arith.constant 0 : index
    %c0_6 = arith.constant 0 : index
    %4 = vector.load %arg3[%c0_5, %c0_6] : memref<1x32xf32, #tpu.memory_space<vmem>>, vector<1x32xf32>
    %5 = vector.broadcast %4 : vector<1x32xf32> to vector<2304x32xf32>
    %6 = arith.addf %3, %5 : vector<2304x32xf32>
    %cst_7 = arith.constant 0.000000e+00 : f32
    %7 = vector.broadcast %cst_7 : f32 to vector<2304x32xf32>
    %8 = arith.maximumf %6, %7 : vector<2304x32xf32>
    %c0_8 = arith.constant 0 : index
    %c0_9 = arith.constant 0 : index
    %9 = vector.load %arg4[%c0_8, %c0_9] : memref<1x32xf32, #tpu.memory_space<vmem>>, vector<1x32xf32>
    %10 = vector.broadcast %9 : vector<1x32xf32> to vector<2304x32xf32>
    %11 = arith.mulf %8, %10 : vector<2304x32xf32>
    %c0_10 = arith.constant 0 : index
    %c0_11 = arith.constant 0 : index
    %12 = vector.load %arg5[%c0_10, %c0_11] : memref<1x32xf32, #tpu.memory_space<vmem>>, vector<1x32xf32>
    %13 = vector.broadcast %12 : vector<1x32xf32> to vector<2304x32xf32>
    %14 = arith.addf %11, %13 : vector<2304x32xf32>
    %15 = vector.shape_cast %14 : vector<2304x32xf32> to vector<1x4x576x32xf32>
    %16 = vector.extract_strided_slice %15 {offsets = [0, 0, 0, 0], sizes = [1, 1, 576, 32], strides = [1, 1, 1, 1]} : vector<1x4x576x32xf32> to vector<1x1x576x32xf32>
    %17 = vector.shape_cast %16 : vector<1x1x576x32xf32> to vector<1x576x32xf32>
    %18 = vector.extract_strided_slice %15 {offsets = [0, 1, 0, 0], sizes = [1, 1, 576, 32], strides = [1, 1, 1, 1]} : vector<1x4x576x32xf32> to vector<1x1x576x32xf32>
    %19 = vector.shape_cast %18 : vector<1x1x576x32xf32> to vector<1x576x32xf32>
    %20 = arith.maximumf %17, %19 : vector<1x576x32xf32>
    %21 = vector.extract_strided_slice %15 {offsets = [0, 2, 0, 0], sizes = [1, 1, 576, 32], strides = [1, 1, 1, 1]} : vector<1x4x576x32xf32> to vector<1x1x576x32xf32>
    %22 = vector.shape_cast %21 : vector<1x1x576x32xf32> to vector<1x576x32xf32>
    %23 = vector.extract_strided_slice %15 {offsets = [0, 3, 0, 0], sizes = [1, 1, 576, 32], strides = [1, 1, 1, 1]} : vector<1x4x576x32xf32> to vector<1x1x576x32xf32>
    %24 = vector.shape_cast %23 : vector<1x1x576x32xf32> to vector<1x576x32xf32>
    %25 = arith.maximumf %22, %24 : vector<1x576x32xf32>
    %26 = arith.maximumf %20, %25 : vector<1x576x32xf32>
    %27 = arith.truncf %26 : vector<1x576x32xf32> to vector<1x576x32xbf16>
    %c0_12 = arith.constant 0 : index
    %c0_13 = arith.constant 0 : index
    %c0_14 = arith.constant 0 : index
    %28 = vector.load %arg6[%c0_12, %c0_13, %c0_14] : memref<1x576x32xbf16, #tpu.memory_space<vmem>>, vector<1x576x32xbf16>
    tpu.vector_store %arg6[%c0_12, %c0_13, %c0_14], %27 {strides = array<i32>} : memref<1x576x32xbf16, #tpu.memory_space<vmem>>, vector<1x576x32xbf16>,
    return
  }
  func.func @transform_0(%arg0: i32) -> (i32, i32, i32, i32) {
    %c0_i32 = arith.constant 0 : i32
    %c0_i32_0 = arith.constant 0 : i32
    %c0_i32_1 = arith.constant 0 : i32
    %c0_i32_2 = arith.constant 0 : i32
    return %arg0, %c0_i32, %c0_i32_0, %c0_i32_1 : i32, i32, i32, i32
  }
  func.func @transform_1(%arg0: i32) -> (i32, i32) {
    %c0_i32 = arith.constant 0 : i32
    %c0_i32_0 = arith.constant 0 : i32
    %c0_i32_1 = arith.constant 0 : i32
    return %c0_i32, %c0_i32_0 : i32, i32
  }
  func.func @transform_2(%arg0: i32) -> (i32, i32) {
    %c0_i32 = arith.constant 0 : i32
    %c0_i32_0 = arith.constant 0 : i32
    %c0_i32_1 = arith.constant 0 : i32
    return %c0_i32, %c0_i32_0 : i32, i32
  }
  func.func @transform_3(%arg0: i32) -> (i32, i32) {
    %c0_i32 = arith.constant 0 : i32
    %c0_i32_0 = arith.constant 0 : i32
    %c0_i32_1 = arith.constant 0 : i32
    return %c0_i32, %c0_i32_0 : i32, i32
  }
  func.func @transform_4(%arg0: i32) -> (i32, i32) {
    %c0_i32 = arith.constant 0 : i32
    %c0_i32_0 = arith.constant 0 : i32
    %c0_i32_1 = arith.constant 0 : i32
    return %c0_i32, %c0_i32_0 : i32, i32
  }
  func.func @transform_5(%arg0: i32) -> (i32, i32, i32) {
    %c0_i32 = arith.constant 0 : i32
    %c0_i32_0 = arith.constant 0 : i32
    %c0_i32_1 = arith.constant 0 : i32
    return %arg0, %c0_i32, %c0_i32_0 : i32, i32, i32
  }
}

module attributes {stable_mosaic.version = 11 : i64} {
  func.func @_conv_bn_pool_kernel(%arg0: i32, %arg1: memref<1x4x144x288xbf16, #tpu.memory_space<vmem>>, %arg2: memref<288x32xbf16, #tpu.memory_space<vmem>>, %arg3: memref<1x32xf32, #tpu.memory_space<vmem>>, %arg4: memref<1x32xf32, #tpu.memory_space<vmem>>, %arg5: memref<1x32xf32, #tpu.memory_space<vmem>>, %arg6: memref<1x144x32xbf16, #tpu.memory_space<vmem>>) attributes {dimension_semantics = [#tpu.dimension_semantics<parallel>], iteration_bounds = array<i64: 2>, scalar_prefetch = 0 : i64, scratch_operands = 0 : i64, tpu.core_type = #tpu.core_type<tc>, window_params = [{transform_indices = @transform_0, window_bounds = array<i64: 1, 4, 144, 288>}, {pipeline_mode = #tpu.pipeline_mode<synchronous>, transform_indices = @transform_1, window_bounds = array<i64: 288, 32>}, {pipeline_mode = #tpu.pipeline_mode<synchronous>, transform_indices = @transform_2, window_bounds = array<i64: 1, 32>}, {pipeline_mode = #tpu.pipeline_mode<synchronous>, transform_indices = @transform_3, window_bounds = array<i64: 1, 32>}, {pipeline_mode = #tpu.pipeline_mode<synchronous>, transform_indices = @transform_4, window_bounds = array<i64: 1, 32>}, {transform_indices = @transform_5, window_bounds = array<i64: 1, 144, 32>}]} {
    %c0 = arith.constant 0 : index
    %c0_0 = arith.constant 0 : index
    %c0_1 = arith.constant 0 : index
    %c0_2 = arith.constant 0 : index
    %0 = vector.load %arg1[%c0, %c0_0, %c0_1, %c0_2] : memref<1x4x144x288xbf16, #tpu.memory_space<vmem>>, vector<1x4x144x288xbf16>
    %1 = vector.shape_cast %0 : vector<1x4x144x288xbf16> to vector<576x288xbf16>
    %c0_3 = arith.constant 0 : index
    %c0_4 = arith.constant 0 : index
    %2 = vector.load %arg2[%c0_3, %c0_4] : memref<288x32xbf16, #tpu.memory_space<vmem>>, vector<288x32xbf16>
    %cst = arith.constant dense<0.000000e+00> : vector<576x32xf32>
    %3 = tpu.matmul %1, %2, %cst {dimension_numbers = #tpu.dot_dimension_numbers<[1], [0], [0], [1], [0, 0, 1, 1], [], []>} : vector<576x288xbf16>, vector<288x32xbf16>, vector<576x32xf32> -> vector<576x32xf32>
    %c0_5 = arith.constant 0 : index
    %c0_6 = arith.constant 0 : index
    %4 = vector.load %arg3[%c0_5, %c0_6] : memref<1x32xf32, #tpu.memory_space<vmem>>, vector<1x32xf32>
    %5 = vector.broadcast %4 : vector<1x32xf32> to vector<576x32xf32>
    %6 = arith.addf %3, %5 : vector<576x32xf32>
    %cst_7 = arith.constant 0.000000e+00 : f32
    %7 = vector.broadcast %cst_7 : f32 to vector<576x32xf32>
    %8 = arith.maximumf %6, %7 : vector<576x32xf32>
    %c0_8 = arith.constant 0 : index
    %c0_9 = arith.constant 0 : index
    %9 = vector.load %arg4[%c0_8, %c0_9] : memref<1x32xf32, #tpu.memory_space<vmem>>, vector<1x32xf32>
    %10 = vector.broadcast %9 : vector<1x32xf32> to vector<576x32xf32>
    %11 = arith.mulf %8, %10 : vector<576x32xf32>
    %c0_10 = arith.constant 0 : index
    %c0_11 = arith.constant 0 : index
    %12 = vector.load %arg5[%c0_10, %c0_11] : memref<1x32xf32, #tpu.memory_space<vmem>>, vector<1x32xf32>
    %13 = vector.broadcast %12 : vector<1x32xf32> to vector<576x32xf32>
    %14 = arith.addf %11, %13 : vector<576x32xf32>
    %15 = vector.shape_cast %14 : vector<576x32xf32> to vector<1x4x144x32xf32>
    %16 = vector.extract_strided_slice %15 {offsets = [0, 0, 0, 0], sizes = [1, 1, 144, 32], strides = [1, 1, 1, 1]} : vector<1x4x144x32xf32> to vector<1x1x144x32xf32>
    %17 = vector.shape_cast %16 : vector<1x1x144x32xf32> to vector<1x144x32xf32>
    %18 = vector.extract_strided_slice %15 {offsets = [0, 1, 0, 0], sizes = [1, 1, 144, 32], strides = [1, 1, 1, 1]} : vector<1x4x144x32xf32> to vector<1x1x144x32xf32>
    %19 = vector.shape_cast %18 : vector<1x1x144x32xf32> to vector<1x144x32xf32>
    %20 = arith.maximumf %17, %19 : vector<1x144x32xf32>
    %21 = vector.extract_strided_slice %15 {offsets = [0, 2, 0, 0], sizes = [1, 1, 144, 32], strides = [1, 1, 1, 1]} : vector<1x4x144x32xf32> to vector<1x1x144x32xf32>
    %22 = vector.shape_cast %21 : vector<1x1x144x32xf32> to vector<1x144x32xf32>
    %23 = vector.extract_strided_slice %15 {offsets = [0, 3, 0, 0], sizes = [1, 1, 144, 32], strides = [1, 1, 1, 1]} : vector<1x4x144x32xf32> to vector<1x1x144x32xf32>
    %24 = vector.shape_cast %23 : vector<1x1x144x32xf32> to vector<1x144x32xf32>
    %25 = arith.maximumf %22, %24 : vector<1x144x32xf32>
    %26 = arith.maximumf %20, %25 : vector<1x144x32xf32>
    %27 = arith.truncf %26 : vector<1x144x32xf32> to vector<1x144x32xbf16>
    %c0_12 = arith.constant 0 : index
    %c0_13 = arith.constant 0 : index
    %c0_14 = arith.constant 0 : index
    %28 = vector.load %arg6[%c0_12, %c0_13, %c0_14] : memref<1x144x32xbf16, #tpu.memory_space<vmem>>, vector<1x144x32xbf16>
    tpu.vector_store %arg6[%c0_12, %c0_13, %c0_14], %27 {strides = array<i32>} : memref<1x144x32xbf16, #tpu.memory_space<vmem>>, vector<1x144x32xbf16>,
    return
  }
  func.func @transform_0(%arg0: i32) -> (i32, i32, i32, i32) {
    %c0_i32 = arith.constant 0 : i32
    %c0_i32_0 = arith.constant 0 : i32
    %c0_i32_1 = arith.constant 0 : i32
    %c0_i32_2 = arith.constant 0 : i32
    return %arg0, %c0_i32, %c0_i32_0, %c0_i32_1 : i32, i32, i32, i32
  }
  func.func @transform_1(%arg0: i32) -> (i32, i32) {
    %c0_i32 = arith.constant 0 : i32
    %c0_i32_0 = arith.constant 0 : i32
    %c0_i32_1 = arith.constant 0 : i32
    return %c0_i32, %c0_i32_0 : i32, i32
  }
  func.func @transform_2(%arg0: i32) -> (i32, i32) {
    %c0_i32 = arith.constant 0 : i32
    %c0_i32_0 = arith.constant 0 : i32
    %c0_i32_1 = arith.constant 0 : i32
    return %c0_i32, %c0_i32_0 : i32, i32
  }
  func.func @transform_3(%arg0: i32) -> (i32, i32) {
    %c0_i32 = arith.constant 0 : i32
    %c0_i32_0 = arith.constant 0 : i32
    %c0_i32_1 = arith.constant 0 : i32
    return %c0_i32, %c0_i32_0 : i32, i32
  }
  func.func @transform_4(%arg0: i32) -> (i32, i32) {
    %c0_i32 = arith.constant 0 : i32
    %c0_i32_0 = arith.constant 0 : i32
    %c0_i32_1 = arith.constant 0 : i32
    return %c0_i32, %c0_i32_0 : i32, i32
  }
  func.func @transform_5(%arg0: i32) -> (i32, i32, i32) {
    %c0_i32 = arith.constant 0 : i32
    %c0_i32_0 = arith.constant 0 : i32
    %c0_i32_1 = arith.constant 0 : i32
    return %arg0, %c0_i32, %c0_i32_0 : i32, i32, i32
  }
}

module attributes {stable_mosaic.version = 11 : i64} {
  func.func @_conv_bn_pool_kernel(%arg0: i32, %arg1: memref<1x4x32x288xbf16, #tpu.memory_space<vmem>>, %arg2: memref<288x32xbf16, #tpu.memory_space<vmem>>, %arg3: memref<1x32xf32, #tpu.memory_space<vmem>>, %arg4: memref<1x32xf32, #tpu.memory_space<vmem>>, %arg5: memref<1x32xf32, #tpu.memory_space<vmem>>, %arg6: memref<1x32x32xbf16, #tpu.memory_space<vmem>>) attributes {dimension_semantics = [#tpu.dimension_semantics<parallel>], iteration_bounds = array<i64: 2>, scalar_prefetch = 0 : i64, scratch_operands = 0 : i64, tpu.core_type = #tpu.core_type<tc>, window_params = [{transform_indices = @transform_0, window_bounds = array<i64: 1, 4, 32, 288>}, {pipeline_mode = #tpu.pipeline_mode<synchronous>, transform_indices = @transform_1, window_bounds = array<i64: 288, 32>}, {pipeline_mode = #tpu.pipeline_mode<synchronous>, transform_indices = @transform_2, window_bounds = array<i64: 1, 32>}, {pipeline_mode = #tpu.pipeline_mode<synchronous>, transform_indices = @transform_3, window_bounds = array<i64: 1, 32>}, {pipeline_mode = #tpu.pipeline_mode<synchronous>, transform_indices = @transform_4, window_bounds = array<i64: 1, 32>}, {transform_indices = @transform_5, window_bounds = array<i64: 1, 32, 32>}]} {
    %c0 = arith.constant 0 : index
    %c0_0 = arith.constant 0 : index
    %c0_1 = arith.constant 0 : index
    %c0_2 = arith.constant 0 : index
    %0 = vector.load %arg1[%c0, %c0_0, %c0_1, %c0_2] : memref<1x4x32x288xbf16, #tpu.memory_space<vmem>>, vector<1x4x32x288xbf16>
    %1 = vector.shape_cast %0 : vector<1x4x32x288xbf16> to vector<128x288xbf16>
    %c0_3 = arith.constant 0 : index
    %c0_4 = arith.constant 0 : index
    %2 = vector.load %arg2[%c0_3, %c0_4] : memref<288x32xbf16, #tpu.memory_space<vmem>>, vector<288x32xbf16>
    %cst = arith.constant dense<0.000000e+00> : vector<128x32xf32>
    %3 = tpu.matmul %1, %2, %cst {dimension_numbers = #tpu.dot_dimension_numbers<[1], [0], [0], [1], [0, 0, 1, 1], [], []>} : vector<128x288xbf16>, vector<288x32xbf16>, vector<128x32xf32> -> vector<128x32xf32>
    %c0_5 = arith.constant 0 : index
    %c0_6 = arith.constant 0 : index
    %4 = vector.load %arg3[%c0_5, %c0_6] : memref<1x32xf32, #tpu.memory_space<vmem>>, vector<1x32xf32>
    %5 = vector.broadcast %4 : vector<1x32xf32> to vector<128x32xf32>
    %6 = arith.addf %3, %5 : vector<128x32xf32>
    %cst_7 = arith.constant 0.000000e+00 : f32
    %7 = vector.broadcast %cst_7 : f32 to vector<128x32xf32>
    %8 = arith.maximumf %6, %7 : vector<128x32xf32>
    %c0_8 = arith.constant 0 : index
    %c0_9 = arith.constant 0 : index
    %9 = vector.load %arg4[%c0_8, %c0_9] : memref<1x32xf32, #tpu.memory_space<vmem>>, vector<1x32xf32>
    %10 = vector.broadcast %9 : vector<1x32xf32> to vector<128x32xf32>
    %11 = arith.mulf %8, %10 : vector<128x32xf32>
    %c0_10 = arith.constant 0 : index
    %c0_11 = arith.constant 0 : index
    %12 = vector.load %arg5[%c0_10, %c0_11] : memref<1x32xf32, #tpu.memory_space<vmem>>, vector<1x32xf32>
    %13 = vector.broadcast %12 : vector<1x32xf32> to vector<128x32xf32>
    %14 = arith.addf %11, %13 : vector<128x32xf32>
    %15 = vector.shape_cast %14 : vector<128x32xf32> to vector<1x4x32x32xf32>
    %16 = vector.extract_strided_slice %15 {offsets = [0, 0, 0, 0], sizes = [1, 1, 32, 32], strides = [1, 1, 1, 1]} : vector<1x4x32x32xf32> to vector<1x1x32x32xf32>
    %17 = vector.shape_cast %16 : vector<1x1x32x32xf32> to vector<1x32x32xf32>
    %18 = vector.extract_strided_slice %15 {offsets = [0, 1, 0, 0], sizes = [1, 1, 32, 32], strides = [1, 1, 1, 1]} : vector<1x4x32x32xf32> to vector<1x1x32x32xf32>
    %19 = vector.shape_cast %18 : vector<1x1x32x32xf32> to vector<1x32x32xf32>
    %20 = arith.maximumf %17, %19 : vector<1x32x32xf32>
    %21 = vector.extract_strided_slice %15 {offsets = [0, 2, 0, 0], sizes = [1, 1, 32, 32], strides = [1, 1, 1, 1]} : vector<1x4x32x32xf32> to vector<1x1x32x32xf32>
    %22 = vector.shape_cast %21 : vector<1x1x32x32xf32> to vector<1x32x32xf32>
    %23 = vector.extract_strided_slice %15 {offsets = [0, 3, 0, 0], sizes = [1, 1, 32, 32], strides = [1, 1, 1, 1]} : vector<1x4x32x32xf32> to vector<1x1x32x32xf32>
    %24 = vector.shape_cast %23 : vector<1x1x32x32xf32> to vector<1x32x32xf32>
    %25 = arith.maximumf %22, %24 : vector<1x32x32xf32>
    %26 = arith.maximumf %20, %25 : vector<1x32x32xf32>
    %27 = arith.truncf %26 : vector<1x32x32xf32> to vector<1x32x32xbf16>
    %c0_12 = arith.constant 0 : index
    %c0_13 = arith.constant 0 : index
    %c0_14 = arith.constant 0 : index
    %28 = vector.load %arg6[%c0_12, %c0_13, %c0_14] : memref<1x32x32xbf16, #tpu.memory_space<vmem>>, vector<1x32x32xbf16>
    tpu.vector_store %arg6[%c0_12, %c0_13, %c0_14], %27 {strides = array<i32>} : memref<1x32x32xbf16, #tpu.memory_space<vmem>>, vector<1x32x32xbf16>,
    return
  }
  func.func @transform_0(%arg0: i32) -> (i32, i32, i32, i32) {
    %c0_i32 = arith.constant 0 : i32
    %c0_i32_0 = arith.constant 0 : i32
    %c0_i32_1 = arith.constant 0 : i32
    %c0_i32_2 = arith.constant 0 : i32
    return %arg0, %c0_i32, %c0_i32_0, %c0_i32_1 : i32, i32, i32, i32
  }
  func.func @transform_1(%arg0: i32) -> (i32, i32) {
    %c0_i32 = arith.constant 0 : i32
    %c0_i32_0 = arith.constant 0 : i32
    %c0_i32_1 = arith.constant 0 : i32
    return %c0_i32, %c0_i32_0 : i32, i32
  }
  func.func @transform_2(%arg0: i32) -> (i32, i32) {
    %c0_i32 = arith.constant 0 : i32
    %c0_i32_0 = arith.constant 0 : i32
    %c0_i32_1 = arith.constant 0 : i32
    return %c0_i32, %c0_i32_0 : i32, i32
  }
  func.func @transform_3(%arg0: i32) -> (i32, i32) {
    %c0_i32 = arith.constant 0 : i32
    %c0_i32_0 = arith.constant 0 : i32
    %c0_i32_1 = arith.constant 0 : i32
    return %c0_i32, %c0_i32_0 : i32, i32
  }
  func.func @transform_4(%arg0: i32) -> (i32, i32) {
    %c0_i32 = arith.constant 0 : i32
    %c0_i32_0 = arith.constant 0 : i32
    %c0_i32_1 = arith.constant 0 : i32
    return %c0_i32, %c0_i32_0 : i32, i32
  }
  func.func @transform_5(%arg0: i32) -> (i32, i32, i32) {
    %c0_i32 = arith.constant 0 : i32
    %c0_i32_0 = arith.constant 0 : i32
    %c0_i32_1 = arith.constant 0 : i32
    return %arg0, %c0_i32, %c0_i32_0 : i32, i32, i32
  }
}

module attributes {stable_mosaic.version = 11 : i64} {
  func.func @_fc_head_kernel(%arg0: i32, %arg1: memref<2x800xbf16, #tpu.memory_space<vmem>>, %arg2: memref<800x32xbf16, #tpu.memory_space<vmem>>, %arg3: memref<1x32xf32, #tpu.memory_space<vmem>>, %arg4: memref<1x32xf32, #tpu.memory_space<vmem>>, %arg5: memref<1x32xf32, #tpu.memory_space<vmem>>, %arg6: memref<32x7xf32, #tpu.memory_space<vmem>>, %arg7: memref<1x7xf32, #tpu.memory_space<vmem>>, %arg8: memref<2x7xf32, #tpu.memory_space<vmem>>) attributes {dimension_semantics = [#tpu.dimension_semantics<arbitrary>], iteration_bounds = array<i64: 1>, scalar_prefetch = 0 : i64, scratch_operands = 0 : i64, tpu.core_type = #tpu.core_type<tc>, window_params = [{pipeline_mode = #tpu.pipeline_mode<synchronous>, transform_indices = @transform_0, window_bounds = array<i64: 2, 800>}, {pipeline_mode = #tpu.pipeline_mode<synchronous>, transform_indices = @transform_1, window_bounds = array<i64: 800, 32>}, {pipeline_mode = #tpu.pipeline_mode<synchronous>, transform_indices = @transform_2, window_bounds = array<i64: 1, 32>}, {pipeline_mode = #tpu.pipeline_mode<synchronous>, transform_indices = @transform_3, window_bounds = array<i64: 1, 32>}, {pipeline_mode = #tpu.pipeline_mode<synchronous>, transform_indices = @transform_4, window_bounds = array<i64: 1, 32>}, {pipeline_mode = #tpu.pipeline_mode<synchronous>, transform_indices = @transform_5, window_bounds = array<i64: 32, 7>}, {pipeline_mode = #tpu.pipeline_mode<synchronous>, transform_indices = @transform_6, window_bounds = array<i64: 1, 7>}, {pipeline_mode = #tpu.pipeline_mode<synchronous>, transform_indices = @transform_7, window_bounds = array<i64: 2, 7>}]} {
    %c0 = arith.constant 0 : index
    %c0_0 = arith.constant 0 : index
    %0 = vector.load %arg1[%c0, %c0_0] : memref<2x800xbf16, #tpu.memory_space<vmem>>, vector<2x800xbf16>
    %c0_1 = arith.constant 0 : index
    %c0_2 = arith.constant 0 : index
    %1 = vector.load %arg2[%c0_1, %c0_2] : memref<800x32xbf16, #tpu.memory_space<vmem>>, vector<800x32xbf16>
    %cst = arith.constant dense<0.000000e+00> : vector<2x32xf32>
    %2 = tpu.matmul %0, %1, %cst {dimension_numbers = #tpu.dot_dimension_numbers<[1], [0], [0], [1], [0, 0, 1, 1], [], []>} : vector<2x800xbf16>, vector<800x32xbf16>, vector<2x32xf32> -> vector<2x32xf32>
    %c0_3 = arith.constant 0 : index
    %c0_4 = arith.constant 0 : index
    %3 = vector.load %arg3[%c0_3, %c0_4] : memref<1x32xf32, #tpu.memory_space<vmem>>, vector<1x32xf32>
    %4 = vector.broadcast %3 : vector<1x32xf32> to vector<2x32xf32>
    %5 = arith.addf %2, %4 : vector<2x32xf32>
    %cst_5 = arith.constant 0.000000e+00 : f32
    %6 = vector.broadcast %cst_5 : f32 to vector<2x32xf32>
    %7 = arith.maximumf %5, %6 : vector<2x32xf32>
    %c0_6 = arith.constant 0 : index
    %c0_7 = arith.constant 0 : index
    %8 = vector.load %arg4[%c0_6, %c0_7] : memref<1x32xf32, #tpu.memory_space<vmem>>, vector<1x32xf32>
    %9 = vector.broadcast %8 : vector<1x32xf32> to vector<2x32xf32>
    %10 = arith.mulf %7, %9 : vector<2x32xf32>
    %c0_8 = arith.constant 0 : index
    %c0_9 = arith.constant 0 : index
    %11 = vector.load %arg5[%c0_8, %c0_9] : memref<1x32xf32, #tpu.memory_space<vmem>>, vector<1x32xf32>
    %12 = vector.broadcast %11 : vector<1x32xf32> to vector<2x32xf32>
    %13 = arith.addf %10, %12 : vector<2x32xf32>
    %c0_10 = arith.constant 0 : index
    %c0_11 = arith.constant 0 : index
    %14 = vector.load %arg6[%c0_10, %c0_11] : memref<32x7xf32, #tpu.memory_space<vmem>>, vector<32x7xf32>
    %cst_12 = arith.constant dense<0.000000e+00> : vector<2x7xf32>
    %15 = tpu.matmul %13, %14, %cst_12 {dimension_numbers = #tpu.dot_dimension_numbers<[1], [0], [0], [1], [0, 0, 1, 1], [], []>} : vector<2x32xf32>, vector<32x7xf32>, vector<2x7xf32> -> vector<2x7xf32>
    %c0_13 = arith.constant 0 : index
    %c0_14 = arith.constant 0 : index
    %16 = vector.load %arg7[%c0_13, %c0_14] : memref<1x7xf32, #tpu.memory_space<vmem>>, vector<1x7xf32>
    %17 = vector.broadcast %16 : vector<1x7xf32> to vector<2x7xf32>
    %18 = arith.addf %15, %17 : vector<2x7xf32>
    %c0_15 = arith.constant 0 : index
    %c0_16 = arith.constant 0 : index
    %19 = vector.load %arg8[%c0_15, %c0_16] : memref<2x7xf32, #tpu.memory_space<vmem>>, vector<2x7xf32>
    tpu.vector_store %arg8[%c0_15, %c0_16], %18 {strides = array<i32>} : memref<2x7xf32, #tpu.memory_space<vmem>>, vector<2x7xf32>,
    return
  }
  func.func @transform_0(%arg0: i32) -> (i32, i32) {
    %c0_i32 = arith.constant 0 : i32
    %c0_i32_0 = arith.constant 0 : i32
    %c0_i32_1 = arith.constant 0 : i32
    return %c0_i32, %c0_i32_0 : i32, i32
  }
  func.func @transform_1(%arg0: i32) -> (i32, i32) {
    %c0_i32 = arith.constant 0 : i32
    %c0_i32_0 = arith.constant 0 : i32
    %c0_i32_1 = arith.constant 0 : i32
    return %c0_i32, %c0_i32_0 : i32, i32
  }
  func.func @transform_2(%arg0: i32) -> (i32, i32) {
    %c0_i32 = arith.constant 0 : i32
    %c0_i32_0 = arith.constant 0 : i32
    %c0_i32_1 = arith.constant 0 : i32
    return %c0_i32, %c0_i32_0 : i32, i32
  }
  func.func @transform_3(%arg0: i32) -> (i32, i32) {
    %c0_i32 = arith.constant 0 : i32
    %c0_i32_0 = arith.constant 0 : i32
    %c0_i32_1 = arith.constant 0 : i32
    return %c0_i32, %c0_i32_0 : i32, i32
  }
  func.func @transform_4(%arg0: i32) -> (i32, i32) {
    %c0_i32 = arith.constant 0 : i32
    %c0_i32_0 = arith.constant 0 : i32
    %c0_i32_1 = arith.constant 0 : i32
    return %c0_i32, %c0_i32_0 : i32, i32
  }
  func.func @transform_5(%arg0: i32) -> (i32, i32) {
    %c0_i32 = arith.constant 0 : i32
    %c0_i32_0 = arith.constant 0 : i32
    %c0_i32_1 = arith.constant 0 : i32
    return %c0_i32, %c0_i32_0 : i32, i32
  }
  func.func @transform_6(%arg0: i32) -> (i32, i32) {
    %c0_i32 = arith.constant 0 : i32
    %c0_i32_0 = arith.constant 0 : i32
    %c0_i32_1 = arith.constant 0 : i32
    return %c0_i32, %c0_i32_0 : i32, i32
  }
  func.func @transform_7(%arg0: i32) -> (i32, i32) {
    %c0_i32 = arith.constant 0 : i32
    %c0_i32_0 = arith.constant 0 : i32
    %c0_i32_1 = arith.constant 0 : i32
    return %c0_i32, %c0_i32_0 : i32, i32
  }
}

</mosaic_0001>

<bundles_post_ra>
// kernel: simple_cnn_forward.4
= control target key start
LH: loop header
LB: loop body
LE: loop exit
PB: predicated region body
PF: predicated region fallthrough
CT: control target
= control target key end

     0   :  { %s5469_s18 = smov 0   ;;  %s7584_s0 = inlined_call_operand.vmem [shape: bf16[2,4,576,9], index: 0, kind: input, shape index: {}]   ;;  %s7585_s1 = inlined_call_operand.vmem [shape: bf16[9,32], index: 1, kind: input, shape index: {}]   ;;  %s7586_s2 = inlined_call_operand.vmem [shape: f32[1,32], index: 2, kind: input, shape index: {}]   ;;  %s7587_s3 = inlined_call_operand.vmem [shape: f32[1,32], index: 3, kind: input, shape index: {}]   ;;  %s7588_s4 = inlined_call_operand.vmem [shape: f32[1,32], index: 4, kind: input, shape index: {}]   ;;  %s7589_s5 = inlined_call_operand.vmem [shape: bf16[2,576,32], index: 5, kind: output, shape index: {}]  }
   0x1 LB: > { %s4383_s19 = sadd.s32 4294967295, %s5436_s18   ;;  %p4387_p0 = scmp.ge.s32.totalorder %s5436_s18, 1  ;;  %s5436_s18 = sphi %s5469_s18, %s15_s18  }
   0x2   : > { %p187_p1 = scmp.lt.s32.totalorder %s5436_s18, 3 }
   0x4   : > { %p188_p2 = pnand %p4387_p0, %p187_p1 }
   0x6   : > { %191 = sbr.rel (%p188_p2) target bundleno = 584 (0x248), region = 40 }
   0xb   : > { %v5276_v0 = vld [vmem:[%s7585_s1] sm:$0x1f]   ;;  %vm1681_vm0 = vcmask 1043456   ;;  %vm1682_vm1 = vcmask 1044480   ;;  %p215_p3 = scmp.lt.s32.totalorder %s4383_s19, 1  ;;  %v5438_v1 = vmov 65535  }
   0xc   : > { %v1683_v2 = vsel %vm1681_vm0, 4294967295, %v5438_v1  ;;  %vm1248_vm2 = vcmask 72704   ;;  %vm4255_vm3 = vcmask 257024  }
   0xd   : > { %v1684_v3 = vsel %vm1682_vm1, %v1683_v2, 0  ;;  %s7803_s19 = smov (!%p215_p3, %s4383_s19), 1 }
   0xe   : > { %v1686_v4 = vand.u32 %v5276_v0, %v1684_v3  ;;  %s5265_s22 = smul.u32 1152, %s7803_s19 }
   0xf   : > { %s5266_s13 = smul.u32 288, %s7803_s19 }
  0x10   : > { %4973 = vmatprep.subr.bf16.mxu0 %v1686_v4  ;;  %5263 = vmatprep.subr.bf16.mxu1 %v1686_v4  ;;  %s5486_s25 = scalar_lea.vmem %s7584_s0, %s5265_s22 }
  0x11   : > { %4974 = vmatpush3.bf16.msra.mxu0 %v1686_v4  ;;  %5264 = vmatpush3.bf16.msra.mxu1 %v1686_v4  ;;  %v5277_v5 = vld [vmem:[%s5486_s25] sm:$0xff]   ;;  %v5279_v7 = vld [vmem:[%s5486_s25 + $0x8] sm:$0xff]   ;;  %v5281_v9 = vld [vmem:[%s5486_s25 + $0x10] sm:$0xff]   ;;  %s6554_s16 = scalar_lea.vmem %s7589_s5, %s5266_s13 }
  0x12   : > { %v5278_v6 = vld [vmem:[%s5486_s25 + $0x240] sm:$0xff]   ;;  %4975 = vmatprep.mubr.msk.bf16.mxu0 %vm1248_vm2, %v5277_v5  ;;  %v5280_v8 = vld [vmem:[%s5486_s25 + $0x248] sm:$0xff]   ;;  %v5282_v10 = vld [vmem:[%s5486_s25 + $0x250] sm:$0xff]  }
  0x13   : > { %5119 = vmatprep.mubr.msk.bf16.mxu1 %vm1248_vm2, %v5278_v6  ;;  %v5283_v11 = vld [vmem:[%s5486_s25 + $0x18] sm:$0xff]   ;;  %v5285_v13 = vld [vmem:[%s5486_s25 + $0x20] sm:$0xff]   ;;  %v5287_v15 = vld [vmem:[%s5486_s25 + $0x28] sm:$0xff]  }
  0x14   : > { %4976 = vmatmul.mubr.msk.bf16.vlgmr.msra.gmra.mxu0 %vm1248_vm2, %v5279_v7  ;;  %5120 = vmatmul.mubr.msk.bf16.vlgmr.msra.gmra.mxu1 %vm1248_vm2, %v5280_v8  ;;  %v5284_v12 = vld [vmem:[%s5486_s25 + $0x258] sm:$0xff]   ;;  %v5286_v14 = vld [vmem:[%s5486_s25 + $0x260] sm:$0xff]   ;;  %v5288_v16 = vld [vmem:[%s5486_s25 + $0x268] sm:$0xff]  }
  0x15   : > { %4979 = vmatprep.mubr.msk.bf16.mxu0 %vm1248_vm2, %v5281_v9  ;;  %5123 = vmatprep.mubr.msk.bf16.mxu1 %vm1248_vm2, %v5282_v10  ;;  %v5289_v17 = vld [vmem:[%s5486_s25 + $0x30] sm:$0xff]   ;;  %v5291_v19 = vld [vmem:[%s5486_s25 + $0x38] sm:$0xff]   ;;  %v5293_v21 = vld [vmem:[%s5486_s25 + $0x40] sm:$0xff]  }
  0x16   : > { %v5290_v18 = vld [vmem:[%s5486_s25 + $0x270] sm:$0xff]   ;;  %v5292_v20 = vld [vmem:[%s5486_s25 + $0x278] sm:$0xff]   ;;  %v5294_v22 = vld [vmem:[%s5486_s25 + $0x280] sm:$0xff]  }
  0x17   : > { %v5295_v23 = vld [vmem:[%s5486_s25 + $0x48] sm:$0xff]   ;;  %v5297_v25 = vld [vmem:[%s5486_s25 + $0x50] sm:$0xff]   ;;  %v5299_v27 = vld [vmem:[%s5486_s25 + $0x58] sm:$0xff]  }
  0x18   : > { %v5296_v24 = vld [vmem:[%s5486_s25 + $0x288] sm:$0xff]   ;;  %v5298_v26 = vld [vmem:[%s5486_s25 + $0x290] sm:$0xff]   ;;  %v5300_v28 = vld [vmem:[%s5486_s25 + $0x298] sm:$0xff]  }
  0x19   : > { %v5301_v29 = vld [vmem:[%s5486_s25 + $0x60] sm:$0xff]   ;;  %v5303_v31 = vld [vmem:[%s5486_s25 + $0x68] sm:$0xff]   ;;  %v5305_v33 = vld [vmem:[%s5486_s25 + $0x70] sm:$0xff]  }
  0x1a   : > { %v5302_v30 = vld [vmem:[%s5486_s25 + $0x2a0] sm:$0xff]   ;;  %v5304_v32 = vld [vmem:[%s5486_s25 + $0x2a8] sm:$0xff]   ;;  %v5306_v34 = vld [vmem:[%s5486_s25 + $0x2b0] sm:$0xff]  }
  0x1b   : > { %v5307_v35 = vld [vmem:[%s5486_s25 + $0x78] sm:$0xff]   ;;  %v5309_v37 = vld [vmem:[%s5486_s25 + $0x80] sm:$0xff]   ;;  %v5311_v39 = vld [vmem:[%s5486_s25 + $0x88] sm:$0xff]  }
  0x1c   : > { %4980 = vmatmul.mubr.msk.bf16.gmra.mxu0 %vm1248_vm2, %v5283_v11  ;;  %5124 = vmatmul.mubr.msk.bf16.gmra.mxu1 %vm1248_vm2, %v5284_v12  ;;  %v5308_v36 = vld [vmem:[%s5486_s25 + $0x2b8] sm:$0xff]   ;;  %v5310_v38 = vld [vmem:[%s5486_s25 + $0x2c0] sm:$0xff]   ;;  %v5312_v40 = vld [vmem:[%s5486_s25 + $0x2c8] sm:$0xff]  }
  0x1d   : > { %4983 = vmatprep.mubr.msk.bf16.mxu0 %vm1248_vm2, %v5285_v13  ;;  %5127 = vmatprep.mubr.msk.bf16.mxu1 %vm1248_vm2, %v5286_v14  ;;  %v5313_v41 = vld [vmem:[%s5486_s25 + $0x90] sm:$0xff]   ;;  %v5315_v43 = vld [vmem:[%s5486_s25 + $0x98] sm:$0xff]   ;;  %v5317_v45 = vld [vmem:[%s5486_s25 + $0xa0] sm:$0xff]  }
  0x1e   : > { %v5314_v42 = vld [vmem:[%s5486_s25 + $0x2d0] sm:$0xff]   ;;  %v5316_v44 = vld [vmem:[%s5486_s25 + $0x2d8] sm:$0xff]   ;;  %v5318_v46 = vld [vmem:[%s5486_s25 + $0x2e0] sm:$0xff]  }
  0x1f   : > { %v5319_v47 = vld [vmem:[%s5486_s25 + $0xa8] sm:$0xff]   ;;  %v5321_v49 = vld [vmem:[%s5486_s25 + $0xb0] sm:$0xff]   ;;  %v5323_v51 = vld [vmem:[%s5486_s25 + $0xb8] sm:$0xff]  }
  0x20   : > { %v5320_v48 = vld [vmem:[%s5486_s25 + $0x2e8] sm:$0xff]   ;;  %v5322_v50 = vld [vmem:[%s5486_s25 + $0x2f0] sm:$0xff]   ;;  %v5324_v52 = vld [vmem:[%s5486_s25 + $0x2f8] sm:$0xff]  }
  0x21   : > { %v5325_v53 = vld [vmem:[%s5486_s25 + $0xc0] sm:$0xff]   ;;  %v5327_v55 = vld [vmem:[%s5486_s25 + $0xc8] sm:$0xff]   ;;  %v5329_v57 = vld [vmem:[%s5486_s25 + $0xd0] sm:$0xff]  }
  0x22   : > { %v5326_v54 = vld [vmem:[%s5486_s25 + $0x300] sm:$0xff]   ;;  %v5328_v56 = vld [vmem:[%s5486_s25 + $0x308] sm:$0xff]   ;;  %v5330_v58 = vld [vmem:[%s5486_s25 + $0x310] sm:$0xff]  }
  0x23   : > { %v5331_v59 = vld [vmem:[%s5486_s25 + $0xd8] sm:$0xff]   ;;  %v5333_v61 = vld [vmem:[%s5486_s25 + $0xe0] sm:$0xff]   ;;  %v5335_v63 = vld [vmem:[%s5486_s25 + $0xe8] sm:$0xff]  }
  0x24   : > { %4984 = vmatmul.mubr.msk.bf16.gmra.mxu0 %vm1248_vm2, %v5287_v15  ;;  %5128 = vmatmul.mubr.msk.bf16.gmra.mxu1 %vm1248_vm2, %v5288_v16  ;;  %v5332_v60 = vld [vmem:[%s5486_s25 + $0x318] sm:$0xff]   ;;  %v5334_v62 = vld [vmem:[%s5486_s25 + $0x320] sm:$0xff]   ;;  %v5336_v0 = vld [vmem:[%s5486_s25 + $0x328] sm:$0xff]  }
  0x25   : > { %4987 = vmatprep.mubr.msk.bf16.mxu0 %vm1248_vm2, %v5289_v17  ;;  %5131 = vmatprep.mubr.msk.bf16.mxu1 %vm1248_vm2, %v5290_v18  ;;  %v5337_v1 = vld [vmem:[%s5486_s25 + $0xf0] sm:$0xff]   ;;  %v5339_v3 = vld [vmem:[%s5486_s25 + $0xf8] sm:$0xff]   ;;  %v5341_v5 = vld [vmem:[%s5486_s25 + $0x100] sm:$0xff]  }
  0x26   : > { %v5338_v2 = vld [vmem:[%s5486_s25 + $0x330] sm:$0xff]   ;;  %v5340_v4 = vld [vmem:[%s5486_s25 + $0x338] sm:$0xff]   ;;  %v5342_v6 = vld [vmem:[%s5486_s25 + $0x340] sm:$0xff]  }
  0x27   : > { %v5343_v7 = vld [vmem:[%s5486_s25 + $0x108] sm:$0xff]   ;;  %v5345_v9 = vld [vmem:[%s5486_s25 + $0x110] sm:$0xff]   ;;  %v5347_v11 = vld [vmem:[%s5486_s25 + $0x118] sm:$0xff]  }
  0x28   : > { %v5344_v8 = vld [vmem:[%s5486_s25 + $0x348] sm:$0xff]   ;;  %v5346_v10 = vld [vmem:[%s5486_s25 + $0x350] sm:$0xff]   ;;  %v5348_v12 = vld [vmem:[%s5486_s25 + $0x358] sm:$0xff]  }
  0x29   : > { %v5349_v13 = vld [vmem:[%s5486_s25 + $0x120] sm:$0xff]   ;;  %v5351_v15 = vld [vmem:[%s5486_s25 + $0x128] sm:$0xff]   ;;  %v5353_v17 = vld [vmem:[%s5486_s25 + $0x130] sm:$0xff]  }
  0x2a   : > { %v5350_v14 = vld [vmem:[%s5486_s25 + $0x360] sm:$0xff]   ;;  %v5352_v16 = vld [vmem:[%s5486_s25 + $0x368] sm:$0xff]   ;;  %v5354_v18 = vld [vmem:[%s5486_s25 + $0x370] sm:$0xff]  }
  0x2c   : > { %4988 = vmatmul.mubr.msk.bf16.gmra.mxu0 %vm1248_vm2, %v5291_v19  ;;  %5132 = vmatmul.mubr.msk.bf16.gmra.mxu1 %vm1248_vm2, %v5292_v20  ;;  %v5355_v19 = vld [vmem:[%s5486_s25 + $0x138] sm:$0xff]  }
  0x2d   : > { %4991 = vmatprep.mubr.msk.bf16.mxu0 %vm1248_vm2, %v5293_v21  ;;  %5135 = vmatprep.mubr.msk.bf16.mxu1 %vm1248_vm2, %v5294_v22  ;;  %v5356_v20 = vld [vmem:[%s5486_s25 + $0x378] sm:$0xff]   ;;  %v5357_v21 = vld [vmem:[%s5486_s25 + $0x140] sm:$0xff]  }
  0x2e   : > { %v5358_v22 = vld [vmem:[%s5486_s25 + $0x380] sm:$0xff]  }
  0x34   : > { %4992 = vmatmul.mubr.msk.bf16.gmra.mxu0 %vm1248_vm2, %v5295_v23  ;;  %5136 = vmatmul.mubr.msk.bf16.gmra.mxu1 %vm1248_vm2, %v5296_v24  ;;  %v5359_v23 = vld [vmem:[%s5486_s25 + $0x148] sm:$0xff]  }
  0x35   : > { %4995 = vmatprep.mubr.msk.bf16.mxu0 %vm1248_vm2, %v5297_v25  ;;  %5139 = vmatprep.mubr.msk.bf16.mxu1 %vm1248_vm2, %v5298_v26  ;;  %v5360_v24 = vld [vmem:[%s5486_s25 + $0x388] sm:$0xff]   ;;  %v5361_v25 = vld [vmem:[%s5486_s25 + $0x150] sm:$0xff]  }
  0x36   : > { %v5362_v26 = vld [vmem:[%s5486_s25 + $0x390] sm:$0xff]  }
  0x3c   : > { %4996 = vmatmul.mubr.msk.bf16.gmra.mxu0 %vm1248_vm2, %v5299_v27  ;;  %5140 = vmatmul.mubr.msk.bf16.gmra.mxu1 %vm1248_vm2, %v5300_v28  ;;  %v5363_v27 = vld [vmem:[%s5486_s25 + $0x158] sm:$0xff]  }
  0x3d   : > { %4999 = vmatprep.mubr.msk.bf16.mxu0 %vm1248_vm2, %v5301_v29  ;;  %5143 = vmatprep.mubr.msk.bf16.mxu1 %vm1248_vm2, %v5302_v30  ;;  %v5364_v28 = vld [vmem:[%s5486_s25 + $0x398] sm:$0xff]   ;;  %v5365_v29 = vld [vmem:[%s5486_s25 + $0x160] sm:$0xff]  }
  0x3e   : > { %v5366_v30 = vld [vmem:[%s5486_s25 + $0x3a0] sm:$0xff]  }
  0x44   : > { %5000 = vmatmul.mubr.msk.bf16.gmra.mxu0 %vm1248_vm2, %v5303_v31  ;;  %5144 = vmatmul.mubr.msk.bf16.gmra.mxu1 %vm1248_vm2, %v5304_v32  ;;  %v5367_v31 = vld [vmem:[%s5486_s25 + $0x168] sm:$0xff]  }
  0x45   : > { %5003 = vmatprep.mubr.msk.bf16.mxu0 %vm1248_vm2, %v5305_v33  ;;  %5147 = vmatprep.mubr.msk.bf16.mxu1 %vm1248_vm2, %v5306_v34  ;;  %v5368_v32 = vld [vmem:[%s5486_s25 + $0x3a8] sm:$0xff]   ;;  %v5369_v33 = vld [vmem:[%s5486_s25 + $0x170] sm:$0xff]  }
  0x46   : > { %v5370_v34 = vld [vmem:[%s5486_s25 + $0x3b0] sm:$0xff]  }
  0x4c   : > { %5004 = vmatmul.mubr.msk.bf16.gmra.mxu0 %vm1248_vm2, %v5307_v35  ;;  %5148 = vmatmul.mubr.msk.bf16.gmra.mxu1 %vm1248_vm2, %v5308_v36  ;;  %v5371_v35 = vld [vmem:[%s5486_s25 + $0x178] sm:$0xff]  }
  0x4d   : > { %5007 = vmatprep.mubr.msk.bf16.mxu0 %vm1248_vm2, %v5309_v37  ;;  %5151 = vmatprep.mubr.msk.bf16.mxu1 %vm1248_vm2, %v5310_v38  ;;  %v5372_v36 = vld [vmem:[%s5486_s25 + $0x3b8] sm:$0xff]   ;;  %v5373_v37 = vld [vmem:[%s5486_s25 + $0x180] sm:$0xff]  }
  0x4e   : > { %v5374_v38 = vld [vmem:[%s5486_s25 + $0x3c0] sm:$0xff]  }
  0x54   : > { %5008 = vmatmul.mubr.msk.bf16.gmra.mxu0 %vm1248_vm2, %v5311_v39  ;;  %5152 = vmatmul.mubr.msk.bf16.gmra.mxu1 %vm1248_vm2, %v5312_v40  ;;  %v5375_v39 = vld [vmem:[%s5486_s25 + $0x188] sm:$0xff]  }
  0x55   : > { %5011 = vmatprep.mubr.msk.bf16.mxu0 %vm1248_vm2, %v5313_v41  ;;  %5155 = vmatprep.mubr.msk.bf16.mxu1 %vm1248_vm2, %v5314_v42  ;;  %v5376_v40 = vld [vmem:[%s5486_s25 + $0x3c8] sm:$0xff]   ;;  %v5377_v41 = vld [vmem:[%s5486_s25 + $0x190] sm:$0xff]   ;;  %v5690_v42 = vld [vmem:[%s7586_s2] ss:$0 sm:$0xff] }
  0x5c   : > { %5012 = vmatmul.mubr.msk.bf16.gmra.mxu0 %vm1248_vm2, %v5315_v43  ;;  %5156 = vmatmul.mubr.msk.bf16.gmra.mxu1 %vm1248_vm2, %v5316_v44  ;;  %v5378_v43 = vld [vmem:[%s5486_s25 + $0x3d0] sm:$0xff]  }
  0x5d   : > { %5015 = vmatprep.mubr.msk.bf16.mxu0 %vm1248_vm2, %v5317_v45  ;;  %5159 = vmatprep.mubr.msk.bf16.mxu1 %vm1248_vm2, %v5318_v46 }
  0x64   : > { %5016 = vmatmul.mubr.msk.bf16.gmra.mxu0 %vm1248_vm2, %v5319_v47  ;;  %5160 = vmatmul.mubr.msk.bf16.gmra.mxu1 %vm1248_vm2, %v5320_v48 }
  0x65   : > { %5019 = vmatprep.mubr.msk.bf16.mxu0 %vm1248_vm2, %v5321_v49  ;;  %5163 = vmatprep.mubr.msk.bf16.mxu1 %vm1248_vm2, %v5322_v50  ;;  %v5702_v50 = vld [vmem:[%s7587_s3] ss:$0 sm:$0xff] }
  0x6c   : > { %5020 = vmatmul.mubr.msk.bf16.gmra.mxu0 %vm1248_vm2, %v5323_v51  ;;  %5164 = vmatmul.mubr.msk.bf16.gmra.mxu1 %vm1248_vm2, %v5324_v52 }
  0x6d   : > { %5023 = vmatprep.mubr.msk.bf16.mxu0 %vm1248_vm2, %v5325_v53  ;;  %5167 = vmatprep.mubr.msk.bf16.mxu1 %vm1248_vm2, %v5326_v54 }
  0x74   : > { %5024 = vmatmul.mubr.msk.bf16.gmra.mxu0 %vm1248_vm2, %v5327_v55  ;;  %5168 = vmatmul.mubr.msk.bf16.gmra.mxu1 %vm1248_vm2, %v5328_v56  ;;  %v5379_v56 = vld [vmem:[%s5486_s25 + $0x198] sm:$0xff]  }
  0x75   : > { %5027 = vmatprep.mubr.msk.bf16.mxu0 %vm1248_vm2, %v5329_v57  ;;  %5171 = vmatprep.mubr.msk.bf16.mxu1 %vm1248_vm2, %v5330_v58 }
  0x7c   : > { %5028 = vmatmul.mubr.msk.bf16.gmra.mxu0 %vm1248_vm2, %v5331_v59  ;;  %5172 = vmatmul.mubr.msk.bf16.gmra.mxu1 %vm1248_vm2, %v5332_v60  ;;  %v5380_v60 = vld [vmem:[%s5486_s25 + $0x3d8] sm:$0xff]  }
  0x7d   : > { %5031 = vmatprep.mubr.msk.bf16.mxu0 %vm1248_vm2, %v5333_v61  ;;  %5175 = vmatprep.mubr.msk.bf16.mxu1 %vm1248_vm2, %v5334_v62  ;;  %v5381_v61 = vld [vmem:[%s5486_s25 + $0x1a0] sm:$0xff]  }
  0x84   : > { %5032 = vmatmul.mubr.msk.bf16.gmra.mxu0 %vm1248_vm2, %v5335_v63  ;;  %5176 = vmatmul.mubr.msk.bf16.gmra.mxu1 %vm1248_vm2, %v5336_v0 }
  0x85   : > { %5035 = vmatprep.mubr.msk.bf16.mxu0 %vm1248_vm2, %v5337_v1  ;;  %5179 = vmatprep.mubr.msk.bf16.mxu1 %vm1248_vm2, %v5338_v2 }
  0x8c   : > { %5036 = vmatmul.mubr.msk.bf16.gmra.mxu0 %vm1248_vm2, %v5339_v3  ;;  %5180 = vmatmul.mubr.msk.bf16.gmra.mxu1 %vm1248_vm2, %v5340_v4  ;;  %v5382_v3 = vld [vmem:[%s5486_s25 + $0x3e0] sm:$0xff]  }
  0x8d   : > { %5039 = vmatprep.mubr.msk.bf16.mxu0 %vm1248_vm2, %v5341_v5  ;;  %5183 = vmatprep.mubr.msk.bf16.mxu1 %vm1248_vm2, %v5342_v6  ;;  %v5717_v4 = vld [vmem:[%s7588_s4] ss:$0 sm:$0xff] }
  0x94   : > { %5040 = vmatmul.mubr.msk.bf16.gmra.mxu0 %vm1248_vm2, %v5343_v7  ;;  %5184 = vmatmul.mubr.msk.bf16.gmra.mxu1 %vm1248_vm2, %v5344_v8 }
  0x95   : > { %5043 = vmatprep.mubr.msk.bf16.mxu0 %vm1248_vm2, %v5345_v9  ;;  %5187 = vmatprep.mubr.msk.bf16.mxu1 %vm1248_vm2, %v5346_v10 }
  0x9c   : > { %5044 = vmatmul.mubr.msk.bf16.gmra.mxu0 %vm1248_vm2, %v5347_v11  ;;  %5188 = vmatmul.mubr.msk.bf16.gmra.mxu1 %vm1248_vm2, %v5348_v12 }
  0x9d   : > { %5047 = vmatprep.mubr.msk.bf16.mxu0 %vm1248_vm2, %v5349_v13  ;;  %5191 = vmatprep.mubr.msk.bf16.mxu1 %vm1248_vm2, %v5350_v14 }
  0xa4   : > { %5048 = vmatmul.mubr.msk.bf16.gmra.mxu0 %vm1248_vm2, %v5351_v15  ;;  %5192 = vmatmul.mubr.msk.bf16.gmra.mxu1 %vm1248_vm2, %v5352_v16 }
  0xa5   : > { %5051 = vmatprep.mubr.msk.bf16.mxu0 %vm1248_vm2, %v5353_v17  ;;  %5195 = vmatprep.mubr.msk.bf16.mxu1 %vm1248_vm2, %v5354_v18 }
  0xac   : > { %5052 = vmatmul.mubr.msk.bf16.gmra.mxu0 %vm1248_vm2, %v5355_v19  ;;  %5196 = vmatmul.mubr.msk.bf16.gmra.mxu1 %vm1248_vm2, %v5356_v20 }
  0xad   : > { %5055 = vmatprep.mubr.msk.bf16.mxu0 %vm1248_vm2, %v5357_v21  ;;  %5199 = vmatprep.mubr.msk.bf16.mxu1 %vm1248_vm2, %v5358_v22 }
  0xb4   : > { %5056 = vmatmul.mubr.msk.bf16.gmra.mxu0 %vm1248_vm2, %v5359_v23  ;;  %5200 = vmatmul.mubr.msk.bf16.gmra.mxu1 %vm1248_vm2, %v5360_v24 }
  0xb5   : > { %5059 = vmatprep.mubr.msk.bf16.mxu0 %vm1248_vm2, %v5361_v25  ;;  %5203 = vmatprep.mubr.msk.bf16.mxu1 %vm1248_vm2, %v5362_v26 }
  0xbc   : > { %5060 = vmatmul.mubr.msk.bf16.gmra.mxu0 %vm1248_vm2, %v5363_v27  ;;  %5204 = vmatmul.mubr.msk.bf16.gmra.mxu1 %vm1248_vm2, %v5364_v28 }
  0xbd   : > { %5063 = vmatprep.mubr.msk.bf16.mxu0 %vm1248_vm2, %v5365_v29  ;;  %5207 = vmatprep.mubr.msk.bf16.mxu1 %vm1248_vm2, %v5366_v30 }
  0xc4   : > { %5064 = vmatmul.mubr.msk.bf16.gmra.mxu0 %vm1248_vm2, %v5367_v31  ;;  %5208 = vmatmul.mubr.msk.bf16.gmra.mxu1 %vm1248_vm2, %v5368_v32  ;;  %v5383_v32 = vld [vmem:[%s5486_s25 + $0x1a8] sm:$0xff]  }
  0xc5   : > { %5067 = vmatprep.mubr.msk.bf16.mxu0 %vm1248_vm2, %v5369_v33  ;;  %5211 = vmatprep.mubr.msk.bf16.mxu1 %vm1248_vm2, %v5370_v34 }
  0xcc   : > { %5068 = vmatmul.mubr.msk.bf16.gmra.mxu0 %vm1248_vm2, %v5371_v35  ;;  %5212 = vmatmul.mubr.msk.bf16.gmra.mxu1 %vm1248_vm2, %v5372_v36 }
  0xcd   : > { %5071 = vmatprep.mubr.msk.bf16.mxu0 %vm1248_vm2, %v5373_v37  ;;  %5215 = vmatprep.mubr.msk.bf16.mxu1 %vm1248_vm2, %v5374_v38  ;;  %v5384_v38 = vld [vmem:[%s5486_s25 + $0x3e8] sm:$0xff]  }
  0xd4   : > { %v4977_v44 = vpop.f32.mrf.mxu0  ;;  %5072 = vmatmul.mubr.msk.bf16.gmra.mxu0 %vm1248_vm2, %v5375_v39  ;;  %v5121_v46 = vpop.f32.mrf.mxu1  ;;  %5216 = vmatmul.mubr.msk.bf16.gmra.mxu1 %vm1248_vm2, %v5376_v40  ;;  %v5385_v39 = vld [vmem:[%s5486_s25 + $0x1b0] sm:$0xff]  }
  0xd5   : > { %v1731_v45 = vadd.f32 %v4977_v44, %v5690_v42  ;;  %5075 = vmatprep.mubr.msk.bf16.mxu0 %vm1248_vm2, %v5377_v41  ;;  %v2307_v47 = vadd.f32 %v5121_v46, %v5690_v42  ;;  %5219 = vmatprep.mubr.msk.bf16.mxu1 %vm1248_vm2, %v5378_v43  ;;  %v5386_v46 = vld [vmem:[%s5486_s25 + $0x3f0] sm:$0xff]  }
  0xd6   : > { %v1722_v48 = vpop.f32.mrf.mxu0  ;;  %v2298_v52 = vpop.f32.mrf.mxu1 }
  0xd7   : > { %v2875_v49 = vmax.f32 %v1731_v45, 0.0  ;;  %v1723_v51 = vadd.f32 %v5690_v42, %v1722_v48  ;;  %v3019_v53 = vmax.f32 %v2307_v47, 0.0  ;;  %v2299_v54 = vadd.f32 %v5690_v42, %v2298_v52 }
  0xd8   : > { %v4978_v55 = vpop.f32.mrf.mxu0  ;;  %v5122_v59 = vpop.f32.mrf.mxu1 }
  0xd9   : > { %v2873_v57 = vmax.f32 %v1723_v51, 0.0  ;;  %v1734_v58 = vadd.f32 %v4978_v55, %v5690_v42  ;;  %v3170_v62 = vmul.f32 %v5702_v50, %v2875_v49  ;;  %v3314_v63 = vmul.f32 %v5702_v50, %v3019_v53 }
  0xda   : > { %v3017_v0 = vmax.f32 %v2299_v54, 0.0  ;;  %v2310_v1 = vadd.f32 %v5122_v59, %v5690_v42  ;;  %v1725_v2 = vpop.f32.mrf.mxu0  ;;  %v2301_v8 = vpop.f32.mrf.mxu1 }
  0xdb   : > { %v3168_v5 = vmul.f32 %v5702_v50, %v2873_v57  ;;  %v2876_v6 = vmax.f32 %v1734_v58, 0.0  ;;  %v1726_v7 = vadd.f32 %v5690_v42, %v1725_v2  ;;  %v2302_v11 = vadd.f32 %v5690_v42, %v2301_v8 }
  0xdc   : > { %v3312_v9 = vmul.f32 %v5702_v50, %v3017_v0  ;;  %v3020_v10 = vmax.f32 %v2310_v1, 0.0  ;;  %v4981_v12 = vpop.f32.mrf.mxu0  ;;  %5076 = vmatmul.mubr.msk.bf16.gmra.mxu0 %vm1248_vm2, %v5379_v56  ;;  %v5125_v16 = vpop.f32.mrf.mxu1  ;;  %5220 = vmatmul.mubr.msk.bf16.gmra.mxu1 %vm1248_vm2, %v5380_v60  ;;  %v5729_v17 = vadd.f32 %v5717_v4, %v3170_v62  ;;  %v5732_v18 = vadd.f32 %v5717_v4, %v3314_v63 }
  0xdd   : > { %v3171_v13 = vmul.f32 %v5702_v50, %v2876_v6  ;;  %v2874_v14 = vmax.f32 %v1726_v7, 0.0  ;;  %v1747_v15 = vadd.f32 %v4981_v12, %v5690_v42  ;;  %5079 = vmatprep.mubr.msk.bf16.mxu0 %vm1248_vm2, %v5381_v61  ;;  %v3018_v19 = vmax.f32 %v2302_v11, 0.0  ;;  %5223 = vmatprep.mubr.msk.bf16.mxu1 %vm1248_vm2, %v5382_v3 }
  0xde   : > { %v2323_v20 = vadd.f32 %v5125_v16, %v5690_v42  ;;  %v1738_v21 = vpop.f32.mrf.mxu0  ;;  %v5737_v22 = vadd.f32 %v5717_v4, %v3168_v5  ;;  %v3315_v23 = vmul.f32 %v5702_v50, %v3020_v10  ;;  %v2314_v26 = vpop.f32.mrf.mxu1  ;;  %v5742_v27 = vadd.f32 %v5717_v4, %v3312_v9 }
  0xdf   : > { %v2879_v24 = vmax.f32 %v1747_v15, 0.0  ;;  %v1739_v25 = vadd.f32 %v5690_v42, %v1738_v21  ;;  %v3169_v28 = vmul.f32 %v5702_v50, %v2874_v14  ;;  %v2315_v30 = vadd.f32 %v5690_v42, %v2314_v26  ;;  %v5387_v15 = vld [vmem:[%s5486_s25 + $0x1b8] sm:$0xff]  }
  0xe0   : > { %v3023_v29 = vmax.f32 %v2323_v20, 0.0  ;;  %v4982_v31 = vpop.f32.mrf.mxu0  ;;  %v5748_v33 = vadd.f32 %v5717_v4, %v3171_v13  ;;  %v3313_v34 = vmul.f32 %v5702_v50, %v3018_v19  ;;  %v5126_v37 = vpop.f32.mrf.mxu1  ;;  %v5759_v47 = vadd.f32 %v5717_v4, %v3315_v23 }
  0xe1   : > { %v2877_v35 = vmax.f32 %v1739_v25, 0.0  ;;  %v1750_v36 = vadd.f32 %v4982_v31, %v5690_v42  ;;  %v3174_v40 = vmul.f32 %v5702_v50, %v2879_v24  ;;  %v3021_v43 = vmax.f32 %v2315_v30, 0.0  ;;  %v5388_v24 = vld [vmem:[%s5486_s25 + $0x3f8] sm:$0xff]   ;;  %v5389_v25 = vld [vmem:[%s5486_s25 + $0x1c0] sm:$0xff]  }
  0xe2   : > { %v3318_v41 = vmul.f32 %v5702_v50, %v3023_v29  ;;  %v2326_v44 = vadd.f32 %v5126_v37, %v5690_v42  ;;  %v1741_v45 = vpop.f32.mrf.mxu0  ;;  %v2317_v52 = vpop.f32.mrf.mxu1  ;;  %v5764_v53 = vadd.f32 %v5717_v4, %v3169_v28  ;;  %v5770_v58 = vadd.f32 %v5717_v4, %v3313_v34 }
  0xe3   : > { %v3172_v48 = vmul.f32 %v5702_v50, %v2877_v35  ;;  %v2880_v49 = vmax.f32 %v1750_v36, 0.0  ;;  %v1742_v51 = vadd.f32 %v5690_v42, %v1741_v45  ;;  %v3316_v54 = vmul.f32 %v5702_v50, %v3021_v43 }
  0xe4   : > { %v3024_v55 = vmax.f32 %v2326_v44, 0.0  ;;  %v2318_v56 = vadd.f32 %v5690_v42, %v2317_v52  ;;  %v4985_v57 = vpop.f32.mrf.mxu0  ;;  %5080 = vmatmul.mubr.msk.bf16.gmra.mxu0 %vm1248_vm2, %v5383_v32  ;;  %v5129_v62 = vpop.f32.mrf.mxu1  ;;  %5224 = vmatmul.mubr.msk.bf16.gmra.mxu1 %vm1248_vm2, %v5384_v38  ;;  %v5777_v63 = vadd.f32 %v5717_v4, %v3174_v40  ;;  %v5780_v0 = vadd.f32 %v5717_v4, %v3318_v41  ;;  %v5390_v32 = vld [vmem:[%s5486_s25 + $0x400] sm:$0xff]  }
  0xe5   : > { %v3175_v59 = vmul.f32 %v5702_v50, %v2880_v49  ;;  %v2878_v60 = vmax.f32 %v1742_v51, 0.0  ;;  %v1763_v61 = vadd.f32 %v4985_v57, %v5690_v42  ;;  %5083 = vmatprep.mubr.msk.bf16.mxu0 %vm1248_vm2, %v5385_v39  ;;  %v2339_v2 = vadd.f32 %v5129_v62, %v5690_v42  ;;  %5227 = vmatprep.mubr.msk.bf16.mxu1 %vm1248_vm2, %v5386_v46 }
  0xe6   : > { %v3022_v1 = vmax.f32 %v2318_v56, 0.0  ;;  %v1754_v3 = vpop.f32.mrf.mxu0  ;;  %v5785_v5 = vadd.f32 %v5717_v4, %v3172_v48  ;;  %v3319_v6 = vmul.f32 %v5702_v50, %v3024_v55  ;;  %v2330_v9 = vpop.f32.mrf.mxu1  ;;  %v5790_v10 = vadd.f32 %v5717_v4, %v3316_v54 }
  0xe7   : > { %v2883_v7 = vmax.f32 %v1763_v61, 0.0  ;;  %v1755_v8 = vadd.f32 %v5690_v42, %v1754_v3  ;;  %v3173_v11 = vmul.f32 %v5702_v50, %v2878_v60  ;;  %v3027_v12 = vmax.f32 %v2339_v2, 0.0 }
  0xe8   : > { %v2331_v13 = vadd.f32 %v5690_v42, %v2330_v9  ;;  %v4986_v14 = vpop.f32.mrf.mxu0  ;;  %v5796_v16 = vadd.f32 %v5717_v4, %v3175_v59  ;;  %v3317_v19 = vmul.f32 %v5702_v50, %v3022_v1  ;;  %v5130_v23 = vpop.f32.mrf.mxu1  ;;  %v5807_v34 = vadd.f32 %v5717_v4, %v3319_v6  ;;  %v5391_v9 = vld [vmem:[%s5486_s25 + $0x1c8] sm:$0xff]  }
  0xe9   : > { %v2881_v20 = vmax.f32 %v1755_v8, 0.0  ;;  %v1766_v21 = vadd.f32 %v4986_v14, %v5690_v42  ;;  %v3178_v26 = vmul.f32 %v5702_v50, %v2883_v7  ;;  %v3322_v28 = vmul.f32 %v5702_v50, %v3027_v12 }
  0xea   : > { %v3025_v29 = vmax.f32 %v2331_v13, 0.0  ;;  %v2342_v30 = vadd.f32 %v5130_v23, %v5690_v42  ;;  %v1757_v31 = vpop.f32.mrf.mxu0  ;;  %v2333_v38 = vpop.f32.mrf.mxu1  ;;  %v5812_v39 = vadd.f32 %v5717_v4, %v3173_v11  ;;  %v5818_v45 = vadd.f32 %v5717_v4, %v3317_v19  ;;  %v5392_v19 = vld [vmem:[%s5486_s25 + $0x408] sm:$0xff]  }
  0xeb   : > { %v3176_v35 = vmul.f32 %v5702_v50, %v2881_v20  ;;  %v2884_v36 = vmax.f32 %v1766_v21, 0.0  ;;  %v1758_v37 = vadd.f32 %v5690_v42, %v1757_v31  ;;  %v2334_v43 = vadd.f32 %v5690_v42, %v2333_v38  ;;  %v5393_v20 = vld [vmem:[%s5486_s25 + $0x1d0] sm:$0xff]  }
  0xec   : > { %v3320_v40 = vmul.f32 %v5702_v50, %v3025_v29  ;;  %v3028_v41 = vmax.f32 %v2342_v30, 0.0  ;;  %v4989_v44 = vpop.f32.mrf.mxu0  ;;  %5084 = vmatmul.mubr.msk.bf16.gmra.mxu0 %vm1248_vm2, %v5387_v15  ;;  %v5133_v51 = vpop.f32.mrf.mxu1  ;;  %5228 = vmatmul.mubr.msk.bf16.gmra.mxu1 %vm1248_vm2, %v5388_v24  ;;  %v5825_v52 = vadd.f32 %v5717_v4, %v3178_v26  ;;  %v5828_v54 = vadd.f32 %v5717_v4, %v3322_v28  ;;  %v5394_v28 = vld [vmem:[%s5486_s25 + $0x410] sm:$0xff]  }
  0xed   : > { %v3179_v46 = vmul.f32 %v5702_v50, %v2884_v36  ;;  %v2882_v48 = vmax.f32 %v1758_v37, 0.0  ;;  %v1779_v49 = vadd.f32 %v4989_v44, %v5690_v42  ;;  %5087 = vmatprep.mubr.msk.bf16.mxu0 %vm1248_vm2, %v5389_v25  ;;  %v3026_v55 = vmax.f32 %v2334_v43, 0.0  ;;  %5231 = vmatprep.mubr.msk.bf16.mxu1 %vm1248_vm2, %v5390_v32 }
  0xee   : > { %v2355_v56 = vadd.f32 %v5133_v51, %v5690_v42  ;;  %v1770_v57 = vpop.f32.mrf.mxu0  ;;  %v5833_v59 = vadd.f32 %v5717_v4, %v3176_v35  ;;  %v3323_v60 = vmul.f32 %v5702_v50, %v3028_v41  ;;  %v2346_v1 = vpop.f32.mrf.mxu1  ;;  %v5838_v2 = vadd.f32 %v5717_v4, %v3320_v40 }
  0xef   : > { %v2887_v61 = vmax.f32 %v1779_v49, 0.0  ;;  %v1771_v62 = vadd.f32 %v5690_v42, %v1770_v57  ;;  %v3177_v3 = vmul.f32 %v5702_v50, %v2882_v48  ;;  %v2347_v7 = vadd.f32 %v5690_v42, %v2346_v1 }
  0xf0   : > { %v3031_v6 = vmax.f32 %v2355_v56, 0.0  ;;  %v4990_v8 = vpop.f32.mrf.mxu0  ;;  %v5844_v11 = vadd.f32 %v5717_v4, %v3179_v46  ;;  %v3321_v12 = vmul.f32 %v5702_v50, %v3026_v55  ;;  %v5134_v15 = vpop.f32.mrf.mxu1  ;;  %v5855_v29 = vadd.f32 %v5717_v4, %v3323_v60 }
  0xf1   : > { %v2885_v13 = vmax.f32 %v1771_v62, 0.0  ;;  %v1782_v14 = vadd.f32 %v4990_v8, %v5690_v42  ;;  %v3182_v21 = vmul.f32 %v5702_v50, %v2887_v61  ;;  %v3029_v24 = vmax.f32 %v2347_v7, 0.0 }
  0xf2   : > { %v3326_v23 = vmul.f32 %v5702_v50, %v3031_v6  ;;  %v2358_v25 = vadd.f32 %v5134_v15, %v5690_v42  ;;  %v1773_v26 = vpop.f32.mrf.mxu0  ;;  %v2349_v35 = vpop.f32.mrf.mxu1  ;;  %v5860_v36 = vadd.f32 %v5717_v4, %v3177_v3  ;;  %v5866_v43 = vadd.f32 %v5717_v4, %v3321_v12 }
  0xf3   : > { %v3180_v30 = vmul.f32 %v5702_v50, %v2885_v13  ;;  %v2888_v31 = vmax.f32 %v1782_v14, 0.0  ;;  %v1774_v32 = vadd.f32 %v5690_v42, %v1773_v26  ;;  %v3324_v37 = vmul.f32 %v5702_v50, %v3029_v24  ;;  %v5395_v14 = vld [vmem:[%s5486_s25 + $0x1d8] sm:$0xff]  }
  0xf4   : > { %v3032_v38 = vmax.f32 %v2358_v25, 0.0  ;;  %v2350_v40 = vadd.f32 %v5690_v42, %v2349_v35  ;;  %v4993_v41 = vpop.f32.mrf.mxu0  ;;  %5088 = vmatmul.mubr.msk.bf16.gmra.mxu0 %vm1248_vm2, %v5391_v9  ;;  %v5137_v49 = vpop.f32.mrf.mxu1  ;;  %5232 = vmatmul.mubr.msk.bf16.gmra.mxu1 %vm1248_vm2, %v5392_v19  ;;  %v5873_v51 = vadd.f32 %v5717_v4, %v3182_v21  ;;  %v5876_v55 = vadd.f32 %v5717_v4, %v3326_v23  ;;  %v5396_v24 = vld [vmem:[%s5486_s25 + $0x418] sm:$0xff]   ;;  %v5397_v25 = vld [vmem:[%s5486_s25 + $0x1e0] sm:$0xff]  }
  0xf5   : > { %v3183_v44 = vmul.f32 %v5702_v50, %v2888_v31  ;;  %v2886_v46 = vmax.f32 %v1774_v32, 0.0  ;;  %v1795_v48 = vadd.f32 %v4993_v41, %v5690_v42  ;;  %5091 = vmatprep.mubr.msk.bf16.mxu0 %vm1248_vm2, %v5393_v20  ;;  %v2371_v57 = vadd.f32 %v5137_v49, %v5690_v42  ;;  %5235 = vmatprep.mubr.msk.bf16.mxu1 %vm1248_vm2, %v5394_v28  ;;  %v5398_v35 = vld [vmem:[%s5486_s25 + $0x420] sm:$0xff]  }
  0xf6   : > { %v3030_v56 = vmax.f32 %v2350_v40, 0.0  ;;  %v1786_v60 = vpop.f32.mrf.mxu0  ;;  %v5881_v61 = vadd.f32 %v5717_v4, %v3180_v30  ;;  %v3327_v62 = vmul.f32 %v5702_v50, %v3032_v38  ;;  %v2362_v6 = vpop.f32.mrf.mxu1  ;;  %v5886_v7 = vadd.f32 %v5717_v4, %v3324_v37 }
  0xf7   : > { %v2891_v1 = vmax.f32 %v1795_v48, 0.0  ;;  %v1787_v3 = vadd.f32 %v5690_v42, %v1786_v60  ;;  %v3181_v8 = vmul.f32 %v5702_v50, %v2886_v46  ;;  %v3035_v9 = vmax.f32 %v2371_v57, 0.0 }
  0xf8   : > { %v2363_v12 = vadd.f32 %v5690_v42, %v2362_v6  ;;  %v4994_v13 = vpop.f32.mrf.mxu0  ;;  %v5892_v15 = vadd.f32 %v5717_v4, %v3183_v44  ;;  %v3325_v19 = vmul.f32 %v5702_v50, %v3030_v56  ;;  %v5138_v23 = vpop.f32.mrf.mxu1  ;;  %v5903_v37 = vadd.f32 %v5717_v4, %v3327_v62 }
  0xf9   : > { %v2889_v20 = vmax.f32 %v1787_v3, 0.0  ;;  %v1798_v21 = vadd.f32 %v4994_v13, %v5690_v42  ;;  %v3186_v26 = vmul.f32 %v5702_v50, %v2891_v1  ;;  %v3330_v28 = vmul.f32 %v5702_v50, %v3035_v9 }
  0xfa   : > { %v3033_v30 = vmax.f32 %v2363_v12, 0.0  ;;  %v2374_v31 = vadd.f32 %v5138_v23, %v5690_v42  ;;  %v1789_v32 = vpop.f32.mrf.mxu0  ;;  %v2365_v44 = vpop.f32.mrf.mxu1  ;;  %v5908_v46 = vadd.f32 %v5717_v4, %v3181_v8  ;;  %v5914_v60 = vadd.f32 %v5717_v4, %v3325_v19 }
  0xfb   : > { %v3184_v38 = vmul.f32 %v5702_v50, %v2889_v20  ;;  %v2892_v40 = vmax.f32 %v1798_v21, 0.0  ;;  %v1790_v41 = vadd.f32 %v5690_v42, %v1789_v32  ;;  %v2366_v56 = vadd.f32 %v5690_v42, %v2365_v44  ;;  %v5399_v32 = vld [vmem:[%s5486_s25 + $0x1e8] sm:$0xff]  }
  0xfc   : > { %v3328_v48 = vmul.f32 %v5702_v50, %v3033_v30  ;;  %v3036_v49 = vmax.f32 %v2374_v31, 0.0  ;;  %v4997_v57 = vpop.f32.mrf.mxu0  ;;  %5092 = vmatmul.mubr.msk.bf16.gmra.mxu0 %vm1248_vm2, %v5395_v14  ;;  %v5141_v6 = vpop.f32.mrf.mxu1  ;;  %5236 = vmatmul.mubr.msk.bf16.gmra.mxu1 %vm1248_vm2, %v5396_v24  ;;  %v5921_v8 = vadd.f32 %v5717_v4, %v3186_v26  ;;  %v5924_v9 = vadd.f32 %v5717_v4, %v3330_v28 }
  0xfd   : > { %v3187_v62 = vmul.f32 %v5702_v50, %v2892_v40  ;;  %v2890_v1 = vmax.f32 %v1790_v41, 0.0  ;;  %v1811_v3 = vadd.f32 %v4997_v57, %v5690_v42  ;;  %5095 = vmatprep.mubr.msk.bf16.mxu0 %vm1248_vm2, %v5397_v25  ;;  %v3034_v12 = vmax.f32 %v2366_v56, 0.0  ;;  %5239 = vmatprep.mubr.msk.bf16.mxu1 %vm1248_vm2, %v5398_v35 }
  0xfe   : > { %v2387_v13 = vadd.f32 %v5141_v6, %v5690_v42  ;;  %v1802_v14 = vpop.f32.mrf.mxu0  ;;  %v5929_v19 = vadd.f32 %v5717_v4, %v3184_v38  ;;  %v3331_v20 = vmul.f32 %v5702_v50, %v3036_v49  ;;  %v2378_v24 = vpop.f32.mrf.mxu1  ;;  %v5934_v25 = vadd.f32 %v5717_v4, %v3328_v48  ;;  %v5400_v49 = vld [vmem:[%s5486_s25 + $0x428] sm:$0xff]   ;;  %v5401_v48 = vld [vmem:[%s5486_s25 + $0x1f0] sm:$0xff]  }
  0xff   : > { %v2895_v21 = vmax.f32 %v1811_v3, 0.0  ;;  %v1803_v23 = vadd.f32 %v5690_v42, %v1802_v14  ;;  %v3185_v26 = vmul.f32 %v5702_v50, %v2890_v1  ;;  %v2379_v30 = vadd.f32 %v5690_v42, %v2378_v24 }
 0x100   : > { %v3039_v28 = vmax.f32 %v2387_v13, 0.0  ;;  %v4998_v31 = vpop.f32.mrf.mxu0  ;;  %v5940_v35 = vadd.f32 %v5717_v4, %v3187_v62  ;;  %v3329_v38 = vmul.f32 %v5702_v50, %v3034_v12  ;;  %v5142_v44 = vpop.f32.mrf.mxu1  ;;  %v5402_v13 = vld [vmem:[%s5486_s25 + $0x430] sm:$0xff]   ;;  %v5951_v62 = vadd.f32 %v5717_v4, %v3331_v20 }
 0x101   : > { %v2893_v40 = vmax.f32 %v1803_v23, 0.0  ;;  %v1814_v41 = vadd.f32 %v4998_v31, %v5690_v42  ;;  %v3190_v56 = vmul.f32 %v5702_v50, %v2895_v21  ;;  %v3037_v1 = vmax.f32 %v2379_v30, 0.0 }
 0x102   : > { %v3334_v57 = vmul.f32 %v5702_v50, %v3039_v28  ;;  %v2390_v3 = vadd.f32 %v5142_v44, %v5690_v42  ;;  %v1805_v6 = vpop.f32.mrf.mxu0  ;;  %7591 = vst [vmem:[#allocation2_spill] sm:$0xff] %v5951_v62  ;;  %v2381_v24 = vpop.f32.mrf.mxu1  ;;  %v5956_v31 = vadd.f32 %v5717_v4, %v3185_v26  ;;  %v5962_v20 = vadd.f32 %v5717_v4, %v3329_v38 }
 0x103   : > { %v3188_v12 = vmul.f32 %v5702_v50, %v2893_v40  ;;  %v2896_v14 = vmax.f32 %v1814_v41, 0.0  ;;  %v1806_v23 = vadd.f32 %v5690_v42, %v1805_v6  ;;  %v3332_v21 = vmul.f32 %v5702_v50, %v3037_v1 }
 0x104   : > { %7592 = vst [vmem:[#allocation3_spill] sm:$0xff] %v5956_v31  ;;  %v3040_v28 = vmax.f32 %v2390_v3, 0.0  ;;  %v2382_v30 = vadd.f32 %v5690_v42, %v2381_v24  ;;  %v5001_v44 = vpop.f32.mrf.mxu0  ;;  %5096 = vmatmul.mubr.msk.bf16.gmra.mxu0 %vm1248_vm2, %v5399_v32  ;;  %7593 = vst [vmem:[#allocation4_spill] sm:$0xff] %v5962_v20  ;;  %v5145_v62 = vpop.f32.mrf.mxu1  ;;  %5240 = vmatmul.mubr.msk.bf16.gmra.mxu1 %vm1248_vm2, %v5400_v49  ;;  %v5969_v26 = vadd.f32 %v5717_v4, %v3190_v56  ;;  %v5406_v20 = vld [vmem:[%s5486_s25 + $0x440] sm:$0xff]  }
 0x105   : > { %v3191_v40 = vmul.f32 %v5702_v50, %v2896_v14  ;;  %v2894_v41 = vmax.f32 %v1806_v23, 0.0  ;;  %v1827_v6 = vadd.f32 %v5001_v44, %v5690_v42  ;;  %5099 = vmatprep.mubr.msk.bf16.mxu0 %vm1248_vm2, %v5401_v48  ;;  %v5972_v1 = vadd.f32 %v5717_v4, %v3334_v57  ;;  %5243 = vmatprep.mubr.msk.bf16.mxu1 %vm1248_vm2, %v5402_v13 }
 0x106   : > { %7594 = vst [vmem:[#allocation5_spill] sm:$0xff] %v5969_v26  ;;  %v3038_v32 = vmax.f32 %v2382_v30, 0.0  ;;  %v2403_v38 = vadd.f32 %v5145_v62, %v5690_v42  ;;  %v1818_v3 = vpop.f32.mrf.mxu0  ;;  %v5977_v14 = vadd.f32 %v5717_v4, %v3188_v12  ;;  %v3335_v49 = vmul.f32 %v5702_v50, %v3040_v28  ;;  %v2394_v23 = vpop.f32.mrf.mxu1  ;;  %v5403_v12 = vld [vmem:[%s5486_s25 + $0x1f8] sm:$0xff]  }
 0x107   : > { %7595 = vst [vmem:[#allocation6_spill] sm:$0xff] %v5972_v1  ;;  %v2899_v48 = vmax.f32 %v1827_v6, 0.0  ;;  %v1819_v56 = vadd.f32 %v5690_v42, %v1818_v3  ;;  %v5982_v57 = vadd.f32 %v5717_v4, %v3332_v21  ;;  %v3189_v24 = vmul.f32 %v5702_v50, %v2894_v41  ;;  %v5404_v1 = vld [vmem:[%s5486_s25 + $0x438] sm:$0xff]   ;;  %v5405_v21 = vld [vmem:[%s5486_s25 + $0x200] sm:$0xff]  }
 0x108   : > { %7596 = vst [vmem:[#allocation7_spill] sm:$0xff] %v5977_v14  ;;  %v3043_v62 = vmax.f32 %v2403_v38, 0.0  ;;  %v2395_v13 = vadd.f32 %v5690_v42, %v2394_v23  ;;  %v5002_v30 = vpop.f32.mrf.mxu0  ;;  %v5988_v44 = vadd.f32 %v5717_v4, %v3191_v40  ;;  %v3333_v28 = vmul.f32 %v5702_v50, %v3038_v32  ;;  %v5146_v14 = vpop.f32.mrf.mxu1 }
 0x109   : > { %7597 = vst [vmem:[#allocation8_spill] sm:$0xff] %v5982_v57  ;;  %v2897_v6 = vmax.f32 %v1819_v56, 0.0  ;;  %v1830_v3 = vadd.f32 %v5002_v30, %v5690_v42  ;;  %v3194_v57 = vmul.f32 %v5702_v50, %v2899_v48  ;;  %v2406_v23 = vadd.f32 %v5146_v14, %v5690_v42 }
 0x10a   : > { %7598 = vst [vmem:[#allocation9_spill] sm:$0xff] %v5988_v44  ;;  %v3338_v41 = vmul.f32 %v5702_v50, %v3043_v62  ;;  %v3041_v38 = vmax.f32 %v2395_v13, 0.0  ;;  %v1821_v26 = vpop.f32.mrf.mxu0  ;;  %v5999_v40 = vadd.f32 %v5717_v4, %v3335_v49  ;;  %v2397_v44 = vpop.f32.mrf.mxu1  ;;  %v6004_v31 = vadd.f32 %v5717_v4, %v3189_v24 }
 0x10b   : > { %v3192_v32 = vmul.f32 %v5702_v50, %v2897_v6  ;;  %v2900_v56 = vmax.f32 %v1830_v3, 0.0  ;;  %v1822_v30 = vadd.f32 %v5690_v42, %v1821_v26  ;;  %v3044_v62 = vmax.f32 %v2406_v23, 0.0 }
 0x10c   : > { %7599 = vst [vmem:[#allocation10_spill] sm:$0xff] %v5999_v40  ;;  %7600 = vst [vmem:[#allocation11_spill] sm:$0xff] %v6004_v31  ;;  %v3336_v48 = vmul.f32 %v5702_v50, %v3041_v38  ;;  %v2398_v13 = vadd.f32 %v5690_v42, %v2397_v44  ;;  %v5005_v14 = vpop.f32.mrf.mxu0  ;;  %5100 = vmatmul.mubr.msk.bf16.gmra.mxu0 %vm1248_vm2, %v5403_v12  ;;  %v6010_v49 = vadd.f32 %v5717_v4, %v3333_v28  ;;  %v5149_v40 = vpop.f32.mrf.mxu1 }
 0x10d   : > { %v3195_v6 = vmul.f32 %v5702_v50, %v2900_v56  ;;  %v2898_v3 = vmax.f32 %v1822_v30, 0.0  ;;  %v1843_v26 = vadd.f32 %v5005_v14, %v5690_v42  ;;  %5244 = vmatmul.mubr.msk.bf16.gmra.mxu1 %vm1248_vm2, %v5404_v1  ;;  %5103 = vmatprep.mubr.msk.bf16.mxu0 %vm1248_vm2, %v5405_v21  ;;  %v6017_v24 = vadd.f32 %v5717_v4, %v3194_v57 }
 0x10e   : > { %7601 = vst [vmem:[#allocation12_spill] sm:$0xff] %v6010_v49  ;;  %v6020_v44 = vadd.f32 %v5717_v4, %v3338_v41  ;;  %v3042_v12 = vmax.f32 %v2398_v13, 0.0  ;;  %v2419_v28 = vadd.f32 %v5149_v40, %v5690_v42  ;;  %v1834_v38 = vpop.f32.mrf.mxu0  ;;  %5247 = vmatprep.mubr.msk.bf16.mxu1 %vm1248_vm2, %v5406_v20  ;;  %v6025_v23 = vadd.f32 %v5717_v4, %v3192_v32  ;;  %v2410_v56 = vpop.f32.mrf.mxu1  ;;  %v5407_v32 = vld [vmem:[%s5486_s25 + $0x208] sm:$0xff]   ;;  %v5410_v49 = vld [vmem:[%s5486_s25 + $0x450] sm:$0xff]  }
 0x10f   : > { %7602 = vst [vmem:[#allocation13_spill] sm:$0xff] %v6017_v24  ;;  %v3339_v1 = vmul.f32 %v5702_v50, %v3044_v62  ;;  %v2903_v21 = vmax.f32 %v1843_v26, 0.0  ;;  %v1835_v57 = vadd.f32 %v5690_v42, %v1834_v38  ;;  %v6030_v41 = vadd.f32 %v5717_v4, %v3336_v48  ;;  %v5409_v48 = vld [vmem:[%s5486_s25 + $0x210] sm:$0xff]  }
 0x110   : > { %7603 = vst [vmem:[#allocation14_spill] sm:$0xff] %v6020_v44  ;;  %7604 = vst [vmem:[#allocation15_spill] sm:$0xff] %v6025_v23  ;;  %v3193_v30 = vmul.f32 %v5702_v50, %v2898_v3  ;;  %v3047_v40 = vmax.f32 %v2419_v28, 0.0  ;;  %v2411_v20 = vadd.f32 %v5690_v42, %v2410_v56  ;;  %v5006_v13 = vpop.f32.mrf.mxu0  ;;  %v6036_v14 = vadd.f32 %v5717_v4, %v3195_v6  ;;  %v5150_v23 = vpop.f32.mrf.mxu1  ;;  %v5408_v44 = vld [vmem:[%s5486_s25 + $0x448] sm:$0xff]  }
 0x111   : > { %7605 = vst [vmem:[#allocation16_spill] sm:$0xff] %v6030_v41  ;;  %v3337_v62 = vmul.f32 %v5702_v50, %v3042_v12  ;;  %v2901_v26 = vmax.f32 %v1835_v57, 0.0  ;;  %v1846_v38 = vadd.f32 %v5006_v13, %v5690_v42  ;;  %v3198_v41 = vmul.f32 %v5702_v50, %v2903_v21 }
 0x112   : > { %7606 = vst [vmem:[#allocation17_spill] sm:$0xff] %v6036_v14  ;;  %v3342_v3 = vmul.f32 %v5702_v50, %v3047_v40  ;;  %v3045_v28 = vmax.f32 %v2411_v20, 0.0  ;;  %v2422_v56 = vadd.f32 %v5150_v23, %v5690_v42  ;;  %v1837_v24 = vpop.f32.mrf.mxu0  ;;  %v6047_v6 = vadd.f32 %v5717_v4, %v3339_v1  ;;  %v2413_v14 = vpop.f32.mrf.mxu1 }
 0x113   : > { %v3196_v12 = vmul.f32 %v5702_v50, %v2901_v26  ;;  %v2904_v57 = vmax.f32 %v1846_v38, 0.0  ;;  %v1838_v13 = vadd.f32 %v5690_v42, %v1837_v24  ;;  %v6052_v31 = vadd.f32 %v5717_v4, %v3193_v30 }
 0x114   : > { %7607 = vst [vmem:[#allocation18_spill] sm:$0xff] %v6047_v6  ;;  %v3340_v21 = vmul.f32 %v5702_v50, %v3045_v28  ;;  %v3048_v40 = vmax.f32 %v2422_v56, 0.0  ;;  %v2414_v20 = vadd.f32 %v5690_v42, %v2413_v14  ;;  %v5009_v23 = vpop.f32.mrf.mxu0  ;;  %5104 = vmatmul.mubr.msk.bf16.gmra.mxu0 %vm1248_vm2, %v5407_v32  ;;  %v6058_v1 = vadd.f32 %v5717_v4, %v3337_v62  ;;  %v5153_v6 = vpop.f32.mrf.mxu1 }
 0x115   : > { %7608 = vst [vmem:[#allocation19_spill] sm:$0xff] %v6052_v31  ;;  %v3199_v26 = vmul.f32 %v5702_v50, %v2904_v57  ;;  %v2902_v38 = vmax.f32 %v1838_v13, 0.0  ;;  %v1859_v24 = vadd.f32 %v5009_v23, %v5690_v42  ;;  %5248 = vmatmul.mubr.msk.bf16.gmra.mxu1 %vm1248_vm2, %v5408_v44  ;;  %5107 = vmatprep.mubr.msk.bf16.mxu0 %vm1248_vm2, %v5409_v48 }
 0x116   : > { %7609 = vst [vmem:[#allocation20_spill] sm:$0xff] %v6058_v1  ;;  %v6065_v30 = vadd.f32 %v5717_v4, %v3198_v41  ;;  %v6068_v14 = vadd.f32 %v5717_v4, %v3342_v3  ;;  %v3046_v32 = vmax.f32 %v2414_v20, 0.0  ;;  %v2435_v62 = vadd.f32 %v5153_v6, %v5690_v42  ;;  %v1850_v28 = vpop.f32.mrf.mxu0  ;;  %5251 = vmatprep.mubr.msk.bf16.mxu1 %vm1248_vm2, %v5410_v49  ;;  %v2426_v57 = vpop.f32.mrf.mxu1  ;;  %v5414_v1 = vld [vmem:[%s5486_s25 + $0x460] sm:$0xff]  }
 0x117   : > { %v6073_v56 = vadd.f32 %v5717_v4, %v3196_v12  ;;  %v3343_v44 = vmul.f32 %v5702_v50, %v3048_v40  ;;  %v2907_v48 = vmax.f32 %v1859_v24, 0.0  ;;  %v1851_v41 = vadd.f32 %v5690_v42, %v1850_v28  ;;  %v5411_v12 = vld [vmem:[%s5486_s25 + $0x218] sm:$0xff]  }
 0x118   : > { %7610 = vst [vmem:[#allocation21_spill] sm:$0xff] %v6065_v30  ;;  %7611 = vst [vmem:[#allocation22_spill] sm:$0xff] %v6068_v14  ;;  %v6078_v3 = vadd.f32 %v5717_v4, %v3340_v21  ;;  %v3197_v13 = vmul.f32 %v5702_v50, %v2902_v38  ;;  %v3051_v6 = vmax.f32 %v2435_v62, 0.0  ;;  %v2427_v49 = vadd.f32 %v5690_v42, %v2426_v57  ;;  %v5010_v20 = vpop.f32.mrf.mxu0  ;;  %v5412_v14 = vld [vmem:[%s5486_s25 + $0x458] sm:$0xff]   ;;  %v5413_v21 = vld [vmem:[%s5486_s25 + $0x220] sm:$0xff]  }
 0x119   : > { %7612 = vst [vmem:[#allocation23_spill] sm:$0xff] %v6073_v56  ;;  %v6084_v23 = vadd.f32 %v5717_v4, %v3199_v26  ;;  %v3341_v40 = vmul.f32 %v5702_v50, %v3046_v32  ;;  %v2905_v24 = vmax.f32 %v1851_v41, 0.0  ;;  %v1862_v28 = vadd.f32 %v5010_v20, %v5690_v42  ;;  %v5154_v56 = vpop.f32.mrf.mxu1 }
 0x11a   : > { %7613 = vst [vmem:[#allocation24_spill] sm:$0xff] %v6078_v3  ;;  %v3202_v3 = vmul.f32 %v5702_v50, %v2907_v48  ;;  %v3346_v38 = vmul.f32 %v5702_v50, %v3051_v6  ;;  %v3049_v62 = vmax.f32 %v2427_v49, 0.0  ;;  %v2438_v57 = vadd.f32 %v5154_v56, %v5690_v42  ;;  %v1853_v30 = vpop.f32.mrf.mxu0 }
 0x11b   : > { %7614 = vst [vmem:[#allocation25_spill] sm:$0xff] %v6084_v23  ;;  %v6095_v26 = vadd.f32 %v5717_v4, %v3343_v44  ;;  %v3200_v32 = vmul.f32 %v5702_v50, %v2905_v24  ;;  %v2908_v41 = vmax.f32 %v1862_v28, 0.0  ;;  %v1854_v20 = vadd.f32 %v5690_v42, %v1853_v30  ;;  %v2429_v23 = vpop.f32.mrf.mxu1 }
 0x11c   : > { %v6100_v31 = vadd.f32 %v5717_v4, %v3197_v13  ;;  %v3344_v48 = vmul.f32 %v5702_v50, %v3049_v62  ;;  %v3052_v6 = vmax.f32 %v2438_v57, 0.0  ;;  %v2430_v49 = vadd.f32 %v5690_v42, %v2429_v23  ;;  %v5013_v56 = vpop.f32.mrf.mxu0  ;;  %5108 = vmatmul.mubr.msk.bf16.gmra.mxu0 %vm1248_vm2, %v5411_v12 }
 0x11d   : > { %7615 = vst [vmem:[#allocation26_spill] sm:$0xff] %v6095_v26  ;;  %v6106_v44 = vadd.f32 %v5717_v4, %v3341_v40  ;;  %v3203_v24 = vmul.f32 %v5702_v50, %v2908_v41  ;;  %v2906_v28 = vmax.f32 %v1854_v20, 0.0  ;;  %v1875_v30 = vadd.f32 %v5013_v56, %v5690_v42  ;;  %v5157_v26 = vpop.f32.mrf.mxu1  ;;  %5252 = vmatmul.mubr.msk.bf16.gmra.mxu1 %vm1248_vm2, %v5412_v14 }
 0x11e   : > { %7616 = vst [vmem:[#allocation27_spill] sm:$0xff] %v6100_v31  ;;  %5111 = vmatprep.mubr.msk.bf16.mxu0 %vm1248_vm2, %v5413_v21  ;;  %v6113_v13 = vadd.f32 %v5717_v4, %v3202_v3  ;;  %v6116_v23 = vadd.f32 %v5717_v4, %v3346_v38  ;;  %v3050_v12 = vmax.f32 %v2430_v49, 0.0  ;;  %v2451_v40 = vadd.f32 %v5157_v26, %v5690_v42  ;;  %v1866_v62 = vpop.f32.mrf.mxu0 }
 0x11f   : > { %7617 = vst [vmem:[#allocation28_spill] sm:$0xff] %v6106_v44  ;;  %5255 = vmatprep.mubr.msk.bf16.mxu1 %vm1248_vm2, %v5414_v1  ;;  %v6121_v57 = vadd.f32 %v5717_v4, %v3200_v32  ;;  %v3347_v14 = vmul.f32 %v5702_v50, %v3052_v6  ;;  %v2911_v21 = vmax.f32 %v1875_v30, 0.0  ;;  %v1867_v3 = vadd.f32 %v5690_v42, %v1866_v62  ;;  %v2442_v41 = vpop.f32.mrf.mxu1  ;;  %v5415_v32 = vld [vmem:[%s5486_s25 + $0x228] sm:$0xff]   ;;  %v5418_v44 = vld [vmem:[%s5486_s25 + $0x470] sm:$0xff]  }
 0x120   : > { %7618 = vst [vmem:[#allocation29_spill] sm:$0xff] %v6113_v13  ;;  %7619 = vst [vmem:[#allocation30_spill] sm:$0xff] %v6116_v23  ;;  %v6126_v38 = vadd.f32 %v5717_v4, %v3344_v48  ;;  %v3201_v20 = vmul.f32 %v5702_v50, %v2906_v28  ;;  %v3055_v26 = vmax.f32 %v2451_v40, 0.0  ;;  %v2443_v1 = vadd.f32 %v5690_v42, %v2442_v41  ;;  %v5014_v49 = vpop.f32.mrf.mxu0  ;;  %v5416_v23 = vld [vmem:[%s5486_s25 + $0x468] sm:$0xff]   ;;  %v5417_v48 = vld [vmem:[%s5486_s25 + $0x230] sm:$0xff]  }
 0x121   : > { %7620 = vst [vmem:[#allocation31_spill] sm:$0xff] %v6121_v57  ;;  %v6132_v56 = vadd.f32 %v5717_v4, %v3203_v24  ;;  %v3345_v6 = vmul.f32 %v5702_v50, %v3050_v12  ;;  %v2909_v30 = vmax.f32 %v1867_v3, 0.0  ;;  %v1878_v62 = vadd.f32 %v5014_v49, %v5690_v42  ;;  %v5158_v57 = vpop.f32.mrf.mxu1 }
 0x122   : > { %7621 = vst [vmem:[#allocation32_spill] sm:$0xff] %v6126_v38  ;;  %v3206_v38 = vmul.f32 %v5702_v50, %v2911_v21  ;;  %v3350_v28 = vmul.f32 %v5702_v50, %v3055_v26  ;;  %v3053_v40 = vmax.f32 %v2443_v1, 0.0  ;;  %v2454_v41 = vadd.f32 %v5158_v57, %v5690_v42  ;;  %v1869_v13 = vpop.f32.mrf.mxu0 }
 0x123   : > { %7622 = vst [vmem:[#allocation33_spill] sm:$0xff] %v6132_v56  ;;  %v6143_v24 = vadd.f32 %v5717_v4, %v3347_v14  ;;  %v3204_v12 = vmul.f32 %v5702_v50, %v2909_v30  ;;  %v2912_v3 = vmax.f32 %v1878_v62, 0.0  ;;  %v1870_v49 = vadd.f32 %v5690_v42, %v1869_v13  ;;  %v2445_v56 = vpop.f32.mrf.mxu1 }
 0x124   : > { %v6148_v31 = vadd.f32 %v5717_v4, %v3201_v20  ;;  %v3348_v21 = vmul.f32 %v5702_v50, %v3053_v40  ;;  %v3056_v26 = vmax.f32 %v2454_v41, 0.0  ;;  %v2446_v1 = vadd.f32 %v5690_v42, %v2445_v56  ;;  %v5017_v57 = vpop.f32.mrf.mxu0  ;;  %5112 = vmatmul.mubr.msk.bf16.gmra.mxu0 %vm1248_vm2, %v5415_v32 }
 0x125   : > { %7623 = vst [vmem:[#allocation34_spill] sm:$0xff] %v6143_v24  ;;  %v6154_v14 = vadd.f32 %v5717_v4, %v3345_v6  ;;  %v3207_v30 = vmul.f32 %v5702_v50, %v2912_v3  ;;  %v2910_v62 = vmax.f32 %v1870_v49, 0.0  ;;  %v1891_v13 = vadd.f32 %v5017_v57, %v5690_v42  ;;  %v5161_v24 = vpop.f32.mrf.mxu1  ;;  %5256 = vmatmul.mubr.msk.bf16.gmra.mxu1 %vm1248_vm2, %v5416_v23 }
 0x126   : > { %5115 = vmatprep.mubr.msk.bf16.mxu0 %vm1248_vm2, %v5417_v48  ;;  %v6161_v20 = vadd.f32 %v5717_v4, %v3206_v38  ;;  %v6164_v56 = vadd.f32 %v5717_v4, %v3350_v28  ;;  %v3054_v32 = vmax.f32 %v2446_v1, 0.0  ;;  %v2467_v6 = vadd.f32 %v5161_v24, %v5690_v42  ;;  %v1882_v40 = vpop.f32.mrf.mxu0  ;;  %5259 = vmatprep.mubr.msk.bf16.mxu1 %vm1248_vm2, %v5418_v44  ;;  %v5419_v44 = vld [vmem:[%s5486_s25 + $0x238] sm:$0xff]  }
 0x127   : > { %7624 = vst [vmem:[#allocation35_spill] sm:$0xff] %v6154_v14  ;;  %v6169_v41 = vadd.f32 %v5717_v4, %v3204_v12  ;;  %v3351_v23 = vmul.f32 %v5702_v50, %v3056_v26  ;;  %v2915_v48 = vmax.f32 %v1891_v13, 0.0  ;;  %v1883_v38 = vadd.f32 %v5690_v42, %v1882_v40  ;;  %v2458_v3 = vpop.f32.mrf.mxu1 }
 0x128   : > { %7625 = vst [vmem:[#allocation36_spill] sm:$0xff] %v6161_v20  ;;  %7626 = vst [vmem:[#allocation37_spill] sm:$0xff] %v6164_v56  ;;  %v6174_v49 = vadd.f32 %v5717_v4, %v3348_v21  ;;  %v3205_v28 = vmul.f32 %v5702_v50, %v2910_v62  ;;  %v3059_v1 = vmax.f32 %v2467_v6, 0.0  ;;  %v2459_v24 = vadd.f32 %v5690_v42, %v2458_v3  ;;  %v5018_v57 = vpop.f32.mrf.mxu0  ;;  %v5420_v56 = vld [vmem:[%s5486_s25 + $0x478] sm:$0xff]  }
 0x129   : > { %7627 = vst [vmem:[#allocation38_spill] sm:$0xff] %v6169_v41  ;;  %v6180_v12 = vadd.f32 %v5717_v4, %v3207_v30  ;;  %v3349_v41 = vmul.f32 %v5702_v50, %v3054_v32  ;;  %v2913_v26 = vmax.f32 %v1883_v38, 0.0  ;;  %v1894_v13 = vadd.f32 %v5018_v57, %v5690_v42  ;;  %v5162_v40 = vpop.f32.mrf.mxu1 }
 0x12a   : > { %7628 = vst [vmem:[#allocation39_spill] sm:$0xff] %v6174_v49  ;;  %v3210_v21 = vmul.f32 %v5702_v50, %v2915_v48  ;;  %v3354_v49 = vmul.f32 %v5702_v50, %v3059_v1  ;;  %v3057_v62 = vmax.f32 %v2459_v24, 0.0  ;;  %v2470_v6 = vadd.f32 %v5162_v40, %v5690_v42  ;;  %v1885_v3 = vpop.f32.mrf.mxu0  ;;  %v6200_v1 = vld [vmem:[%s7586_s2] ss:$0 sm:$0xff] }
 0x12b   : > { %7629 = vst [vmem:[#allocation40_spill] sm:$0xff] %v6180_v12  ;;  %v6189_v20 = vadd.f32 %v5717_v4, %v3351_v23  ;;  %v3208_v30 = vmul.f32 %v5702_v50, %v2913_v26  ;;  %v2916_v12 = vmax.f32 %v1894_v13, 0.0  ;;  %v1886_v32 = vadd.f32 %v5690_v42, %v1885_v3  ;;  %v2461_v38 = vpop.f32.mrf.mxu1 }
 0x12c   : > { %v6194_v57 = vadd.f32 %v5717_v4, %v3205_v28  ;;  %v3352_v48 = vmul.f32 %v5702_v50, %v3057_v62  ;;  %v3060_v14 = vmax.f32 %v2470_v6, 0.0  ;;  %v2462_v23 = vadd.f32 %v6200_v1, %v2461_v38  ;;  %v5021_v24 = vpop.f32.mrf.mxu0  ;;  %5116 = vmatmul.mubr.msk.bf16.gmra.mxu0 %vm1248_vm2, %v5419_v44 }
 0x12d   : > { %v6205_v26 = vadd.f32 %v5717_v4, %v3349_v41  ;;  %v3211_v42 = vmul.f32 %v5702_v50, %v2916_v12  ;;  %v2914_v28 = vmax.f32 %v1886_v32, 0.0  ;;  %v1907_v13 = vadd.f32 %v6200_v1, %v5021_v24  ;;  %v5165_v40 = vpop.f32.mrf.mxu1  ;;  %5260 = vmatmul.mubr.msk.bf16.gmra.mxu1 %vm1248_vm2, %v5420_v56  ;;  %v6223_v50 = vld [vmem:[%s7587_s3] ss:$0 sm:$0xff] }
 0x12e   : > { %7630 = vst [vmem:[#allocation41_spill] sm:$0xff] %v6194_v57  ;;  %v6211_v62 = vadd.f32 %v5717_v4, %v3210_v21  ;;  %v6214_v6 = vadd.f32 %v5717_v4, %v3354_v49  ;;  %v3058_v3 = vmax.f32 %v2462_v23, 0.0  ;;  %v2483_v44 = vadd.f32 %v6200_v1, %v5165_v40  ;;  %v1898_v38 = vpop.f32.mrf.mxu0 }
 0x12f   : > { %7631 = vst [vmem:[#allocation42_spill] sm:$0xff] %v6205_v26  ;;  %v6218_v41 = vadd.f32 %v5717_v4, %v3208_v30  ;;  %v3355_v56 = vmul.f32 %v6223_v50, %v3060_v14  ;;  %v2919_v12 = vmax.f32 %v1907_v13, 0.0  ;;  %v1899_v21 = vadd.f32 %v6200_v1, %v1898_v38  ;;  %v2474_v32 = vpop.f32.mrf.mxu1 }
 0x130   : > { %7632 = vst [vmem:[#allocation43_spill] sm:$0xff] %v6211_v62  ;;  %7633 = vst [vmem:[#allocation44_spill] sm:$0xff] %v6214_v6  ;;  %v6228_v49 = vadd.f32 %v5717_v4, %v3352_v48  ;;  %v3209_v23 = vmul.f32 %v6223_v50, %v2914_v28  ;;  %v3063_v24 = vmax.f32 %v2483_v44, 0.0  ;;  %v2475_v30 = vadd.f32 %v6200_v1, %v2474_v32  ;;  %v5022_v40 = vpop.f32.mrf.mxu0  ;;  %v6243_v32 = vld [vmem:[%s7588_s4] ss:$0 sm:$0xff] }
 0x131   : > { %7634 = vst [vmem:[#allocation45_spill] sm:$0xff] %v6218_v41  ;;  %v6233_v41 = vadd.f32 %v5717_v4, %v3211_v42  ;;  %v3353_v6 = vmul.f32 %v6223_v50, %v3058_v3  ;;  %v2917_v62 = vmax.f32 %v1899_v21, 0.0  ;;  %v1910_v14 = vadd.f32 %v6200_v1, %v5022_v40  ;;  %v5166_v13 = vpop.f32.mrf.mxu1 }
 0x132   : > { %7635 = vst [vmem:[#allocation46_spill] sm:$0xff] %v6228_v49  ;;  %v3214_v38 = vmul.f32 %v6223_v50, %v2919_v12  ;;  %v3358_v48 = vmul.f32 %v6223_v50, %v3063_v24  ;;  %v3061_v49 = vmax.f32 %v2475_v30, 0.0  ;;  %v2486_v28 = vadd.f32 %v6200_v1, %v5166_v13  ;;  %v1901_v44 = vpop.f32.mrf.mxu0 }
 0x133   : > { %7636 = vst [vmem:[#allocation47_spill] sm:$0xff] %v6233_v41  ;;  %v6246_v4 = vadd.f32 %v6243_v32, %v3355_v56  ;;  %v3212_v42 = vmul.f32 %v6223_v50, %v2917_v62  ;;  %v2920_v3 = vmax.f32 %v1910_v14, 0.0  ;;  %v1902_v21 = vadd.f32 %v6200_v1, %v1901_v44  ;;  %v2477_v12 = vpop.f32.mrf.mxu1 }
 0x134   : > { %v6251_v24 = vadd.f32 %v6243_v32, %v3209_v23  ;;  %v3356_v30 = vmul.f32 %v6223_v50, %v3061_v49  ;;  %v3064_v40 = vmax.f32 %v2486_v28, 0.0  ;;  %v2478_v13 = vadd.f32 %v6200_v1, %v2477_v12  ;;  %v5025_v41 = vpop.f32.mrf.mxu0 }
 0x135   : > { %7637 = vst [vmem:[#allocation48_spill] sm:$0xff] %v6246_v4  ;;  %v6256_v26 = vadd.f32 %v6243_v32, %v3353_v6  ;;  %v3215_v56 = vmul.f32 %v6223_v50, %v2920_v3  ;;  %v2918_v4 = vmax.f32 %v1902_v21, 0.0  ;;  %v1923_v62 = vadd.f32 %v6200_v1, %v5025_v41  ;;  %v5169_v14 = vpop.f32.mrf.mxu1 }
 0x136   : > { %7638 = vst [vmem:[#allocation49_spill] sm:$0xff] %v6251_v24  ;;  %v6261_v44 = vadd.f32 %v6243_v32, %v3214_v38  ;;  %v6264_v23 = vadd.f32 %v6243_v32, %v3358_v48  ;;  %v3062_v49 = vmax.f32 %v2478_v13, 0.0  ;;  %v2499_v28 = vadd.f32 %v6200_v1, %v5169_v14  ;;  %v1914_v12 = vpop.f32.mrf.mxu0 }
 0x137   : > { %7639 = vst [vmem:[#allocation50_spill] sm:$0xff] %v6256_v26  ;;  %v6268_v24 = vadd.f32 %v6243_v32, %v3212_v42  ;;  %v3359_v6 = vmul.f32 %v6223_v50, %v3064_v40  ;;  %v2923_v3 = vmax.f32 %v1923_v62, 0.0  ;;  %v1915_v21 = vadd.f32 %v6200_v1, %v1914_v12  ;;  %v2490_v41 = vpop.f32.mrf.mxu1 }
 0x138   : > { %7640 = vst [vmem:[#allocation51_spill] sm:$0xff] %v6261_v44  ;;  %7641 = vst [vmem:[#allocation52_spill] sm:$0xff] %v6264_v23  ;;  %v6273_v26 = vadd.f32 %v6243_v32, %v3356_v30  ;;  %v3213_v38 = vmul.f32 %v6223_v50, %v2918_v4  ;;  %v3067_v48 = vmax.f32 %v2499_v28, 0.0  ;;  %v2491_v13 = vadd.f32 %v6200_v1, %v2490_v41  ;;  %v5026_v23 = vpop.f32.mrf.mxu0 }
 0x139   : > { %7642 = vst [vmem:[#allocation53_spill] sm:$0xff] %v6268_v24  ;;  %v6278_v14 = vadd.f32 %v6243_v32, %v3215_v56  ;;  %v3357_v42 = vmul.f32 %v6223_v50, %v3062_v49  ;;  %v2921_v24 = vmax.f32 %v1915_v21, 0.0  ;;  %v1926_v40 = vadd.f32 %v6200_v1, %v5026_v23  ;;  %v5170_v62 = vpop.f32.mrf.mxu1 }
 0x13a   : > { %7643 = vst [vmem:[#allocation54_spill] sm:$0xff] %v6273_v26  ;;  %v3218_v12 = vmul.f32 %v6223_v50, %v2923_v3  ;;  %v3362_v30 = vmul.f32 %v6223_v50, %v3067_v48  ;;  %v3065_v26 = vmax.f32 %v2491_v13, 0.0  ;;  %v2502_v4 = vadd.f32 %v6200_v1, %v5170_v62  ;;  %v1917_v28 = vpop.f32.mrf.mxu0 }
 0x13b   : > { %7644 = vst [vmem:[#allocation55_spill] sm:$0xff] %v6278_v14  ;;  %v6286_v41 = vadd.f32 %v6243_v32, %v3359_v6  ;;  %v3216_v56 = vmul.f32 %v6223_v50, %v2921_v24  ;;  %v2924_v14 = vmax.f32 %v1926_v40, 0.0  ;;  %v1918_v49 = vadd.f32 %v6200_v1, %v1917_v28  ;;  %v2493_v21 = vpop.f32.mrf.mxu1 }
 0x13c   : > { %v6291_v23 = vadd.f32 %v6243_v32, %v3213_v38  ;;  %v3360_v3 = vmul.f32 %v6223_v50, %v3065_v26  ;;  %v3068_v44 = vmax.f32 %v2502_v4, 0.0  ;;  %v2494_v48 = vadd.f32 %v6200_v1, %v2493_v21  ;;  %v5029_v13 = vpop.f32.mrf.mxu0 }
 0x13d   : > { %7645 = vst [vmem:[#allocation56_spill] sm:$0xff] %v6286_v41  ;;  %v6296_v62 = vadd.f32 %v6243_v32, %v3357_v42  ;;  %v3219_v6 = vmul.f32 %v6223_v50, %v2924_v14  ;;  %v2922_v41 = vmax.f32 %v1918_v49, 0.0  ;;  %v1939_v24 = vadd.f32 %v6200_v1, %v5029_v13  ;;  %v5173_v40 = vpop.f32.mrf.mxu1 }
 0x13e   : > { %7646 = vst [vmem:[#allocation57_spill] sm:$0xff] %v6291_v23  ;;  %v6301_v28 = vadd.f32 %v6243_v32, %v3218_v12  ;;  %v6304_v38 = vadd.f32 %v6243_v32, %v3362_v30  ;;  %v3066_v26 = vmax.f32 %v2494_v48, 0.0  ;;  %v2515_v4 = vadd.f32 %v6200_v1, %v5173_v40  ;;  %v1930_v21 = vpop.f32.mrf.mxu0 }
 0x13f   : > { %7647 = vst [vmem:[#allocation58_spill] sm:$0xff] %v6296_v62  ;;  %v6308_v23 = vadd.f32 %v6243_v32, %v3216_v56  ;;  %v3363_v42 = vmul.f32 %v6223_v50, %v3068_v44  ;;  %v2927_v14 = vmax.f32 %v1939_v24, 0.0  ;;  %v1931_v49 = vadd.f32 %v6200_v1, %v1930_v21  ;;  %v2506_v13 = vpop.f32.mrf.mxu1 }
 0x140   : > { %7648 = vst [vmem:[#allocation59_spill] sm:$0xff] %v6301_v28  ;;  %7649 = vst [vmem:[#allocation60_spill] sm:$0xff] %v6304_v38  ;;  %v6313_v62 = vadd.f32 %v6243_v32, %v3360_v3  ;;  %v3217_v12 = vmul.f32 %v6223_v50, %v2922_v41  ;;  %v3071_v30 = vmax.f32 %v2515_v4, 0.0  ;;  %v2507_v48 = vadd.f32 %v6200_v1, %v2506_v13  ;;  %v5030_v38 = vpop.f32.mrf.mxu0 }
 0x141   : > { %7650 = vst [vmem:[#allocation61_spill] sm:$0xff] %v6308_v23  ;;  %v6318_v40 = vadd.f32 %v6243_v32, %v3219_v6  ;;  %v3361_v56 = vmul.f32 %v6223_v50, %v3066_v26  ;;  %v2925_v23 = vmax.f32 %v1931_v49, 0.0  ;;  %v1942_v44 = vadd.f32 %v6200_v1, %v5030_v38  ;;  %v5174_v24 = vpop.f32.mrf.mxu1 }
 0x142   : > { %7651 = vst [vmem:[#allocation62_spill] sm:$0xff] %v6313_v62  ;;  %v3222_v21 = vmul.f32 %v6223_v50, %v2927_v14  ;;  %v3366_v3 = vmul.f32 %v6223_v50, %v3071_v30  ;;  %v3069_v62 = vmax.f32 %v2507_v48, 0.0  ;;  %v2518_v41 = vadd.f32 %v6200_v1, %v5174_v24  ;;  %v1933_v4 = vpop.f32.mrf.mxu0 }
 0x143   : > { %7652 = vst [vmem:[#allocation63_spill] sm:$0xff] %v6318_v40  ;;  %v6326_v13 = vadd.f32 %v6243_v32, %v3363_v42  ;;  %v3220_v6 = vmul.f32 %v6223_v50, %v2925_v23  ;;  %v2928_v40 = vmax.f32 %v1942_v44, 0.0  ;;  %v1934_v26 = vadd.f32 %v6200_v1, %v1933_v4  ;;  %v2509_v49 = vpop.f32.mrf.mxu1 }
 0x144   : > { %v6331_v38 = vadd.f32 %v6243_v32, %v3217_v12  ;;  %v3364_v14 = vmul.f32 %v6223_v50, %v3069_v62  ;;  %v3072_v28 = vmax.f32 %v2518_v41, 0.0  ;;  %v2510_v30 = vadd.f32 %v6200_v1, %v2509_v49  ;;  %v5033_v48 = vpop.f32.mrf.mxu0 }
 0x145   : > { %7653 = vst [vmem:[#allocation64_spill] sm:$0xff] %v6326_v13  ;;  %v6336_v24 = vadd.f32 %v6243_v32, %v3361_v56  ;;  %v3223_v42 = vmul.f32 %v6223_v50, %v2928_v40  ;;  %v2926_v13 = vmax.f32 %v1934_v26, 0.0  ;;  %v1955_v23 = vadd.f32 %v6200_v1, %v5033_v48  ;;  %v5177_v44 = vpop.f32.mrf.mxu1 }
 0x146   : > { %7654 = vst [vmem:[#allocation65_spill] sm:$0xff] %v6331_v38  ;;  %v6341_v4 = vadd.f32 %v6243_v32, %v3222_v21  ;;  %v6344_v12 = vadd.f32 %v6243_v32, %v3366_v3  ;;  %v3070_v62 = vmax.f32 %v2510_v30, 0.0  ;;  %v2531_v41 = vadd.f32 %v6200_v1, %v5177_v44  ;;  %v1946_v49 = vpop.f32.mrf.mxu0 }
 0x147   : > { %7655 = vst [vmem:[#allocation66_spill] sm:$0xff] %v6336_v24  ;;  %v6348_v38 = vadd.f32 %v6243_v32, %v3220_v6  ;;  %v3367_v56 = vmul.f32 %v6223_v50, %v3072_v28  ;;  %v2931_v40 = vmax.f32 %v1955_v23, 0.0  ;;  %v1947_v26 = vadd.f32 %v6200_v1, %v1946_v49  ;;  %v2522_v48 = vpop.f32.mrf.mxu1 }
 0x148   : > { %7656 = vst [vmem:[#allocation67_spill] sm:$0xff] %v6341_v4  ;;  %7657 = vst [vmem:[#allocation68_spill] sm:$0xff] %v6344_v12  ;;  %v6353_v24 = vadd.f32 %v6243_v32, %v3364_v14  ;;  %v3221_v21 = vmul.f32 %v6223_v50, %v2926_v13  ;;  %v3075_v3 = vmax.f32 %v2531_v41, 0.0  ;;  %v2523_v30 = vadd.f32 %v6200_v1, %v2522_v48  ;;  %v5034_v12 = vpop.f32.mrf.mxu0 }
 0x149   : > { %7658 = vst [vmem:[#allocation69_spill] sm:$0xff] %v6348_v38  ;;  %v6358_v44 = vadd.f32 %v6243_v32, %v3223_v42  ;;  %v3365_v6 = vmul.f32 %v6223_v50, %v3070_v62  ;;  %v2929_v38 = vmax.f32 %v1947_v26, 0.0  ;;  %v1958_v28 = vadd.f32 %v6200_v1, %v5034_v12  ;;  %v5178_v23 = vpop.f32.mrf.mxu1 }
 0x14a   : > { %7659 = vst [vmem:[#allocation70_spill] sm:$0xff] %v6353_v24  ;;  %v3226_v49 = vmul.f32 %v6223_v50, %v2931_v40  ;;  %v3370_v14 = vmul.f32 %v6223_v50, %v3075_v3  ;;  %v3073_v24 = vmax.f32 %v2523_v30, 0.0  ;;  %v2534_v13 = vadd.f32 %v6200_v1, %v5178_v23  ;;  %v1949_v41 = vpop.f32.mrf.mxu0 }
 0x14b   : > { %7660 = vst [vmem:[#allocation71_spill] sm:$0xff] %v6358_v44  ;;  %v6366_v48 = vadd.f32 %v6243_v32, %v3367_v56  ;;  %v3224_v42 = vmul.f32 %v6223_v50, %v2929_v38  ;;  %v2932_v44 = vmax.f32 %v1958_v28, 0.0  ;;  %v1950_v62 = vadd.f32 %v6200_v1, %v1949_v41  ;;  %v2525_v26 = vpop.f32.mrf.mxu1 }
 0x14c   : > { %v6371_v12 = vadd.f32 %v6243_v32, %v3221_v21  ;;  %v3368_v40 = vmul.f32 %v6223_v50, %v3073_v24  ;;  %v3076_v4 = vmax.f32 %v2534_v13, 0.0  ;;  %v2526_v3 = vadd.f32 %v6200_v1, %v2525_v26  ;;  %v5037_v30 = vpop.f32.mrf.mxu0 }
 0x14d   : > { %7661 = vst [vmem:[#allocation72_spill] sm:$0xff] %v6366_v48  ;;  %v6376_v23 = vadd.f32 %v6243_v32, %v3365_v6  ;;  %v3227_v56 = vmul.f32 %v6223_v50, %v2932_v44  ;;  %v2930_v48 = vmax.f32 %v1950_v62, 0.0  ;;  %v1971_v38 = vadd.f32 %v6200_v1, %v5037_v30  ;;  %v5181_v28 = vpop.f32.mrf.mxu1 }
 0x14e   : > { %7662 = vst [vmem:[#allocation73_spill] sm:$0xff] %v6371_v12  ;;  %v6381_v41 = vadd.f32 %v6243_v32, %v3226_v49  ;;  %v6384_v21 = vadd.f32 %v6243_v32, %v3370_v14  ;;  %v3074_v24 = vmax.f32 %v2526_v3, 0.0  ;;  %v2547_v13 = vadd.f32 %v6200_v1, %v5181_v28  ;;  %v1962_v26 = vpop.f32.mrf.mxu0 }
 0x14f   : > { %7663 = vst [vmem:[#allocation74_spill] sm:$0xff] %v6376_v23  ;;  %v6388_v12 = vadd.f32 %v6243_v32, %v3224_v42  ;;  %v3371_v6 = vmul.f32 %v6223_v50, %v3076_v4  ;;  %v2935_v44 = vmax.f32 %v1971_v38, 0.0  ;;  %v1963_v62 = vadd.f32 %v6200_v1, %v1962_v26  ;;  %v2538_v30 = vpop.f32.mrf.mxu1 }
 0x150   : > { %7664 = vst [vmem:[#allocation75_spill] sm:$0xff] %v6381_v41  ;;  %7665 = vst [vmem:[#allocation76_spill] sm:$0xff] %v6384_v21  ;;  %v6393_v23 = vadd.f32 %v6243_v32, %v3368_v40  ;;  %v3225_v49 = vmul.f32 %v6223_v50, %v2930_v48  ;;  %v3079_v14 = vmax.f32 %v2547_v13, 0.0  ;;  %v2539_v3 = vadd.f32 %v6200_v1, %v2538_v30  ;;  %v5038_v21 = vpop.f32.mrf.mxu0 }
 0x151   : > { %7666 = vst [vmem:[#allocation77_spill] sm:$0xff] %v6388_v12  ;;  %v6398_v28 = vadd.f32 %v6243_v32, %v3227_v56  ;;  %v3369_v42 = vmul.f32 %v6223_v50, %v3074_v24  ;;  %v2933_v12 = vmax.f32 %v1963_v62, 0.0  ;;  %v1974_v4 = vadd.f32 %v6200_v1, %v5038_v21  ;;  %v5182_v38 = vpop.f32.mrf.mxu1 }
 0x152   : > { %7667 = vst [vmem:[#allocation78_spill] sm:$0xff] %v6393_v23  ;;  %v3230_v26 = vmul.f32 %v6223_v50, %v2935_v44  ;;  %v3374_v40 = vmul.f32 %v6223_v50, %v3079_v14  ;;  %v3077_v23 = vmax.f32 %v2539_v3, 0.0  ;;  %v2550_v48 = vadd.f32 %v6200_v1, %v5182_v38  ;;  %v1965_v13 = vpop.f32.mrf.mxu0 }
 0x153   : > { %7668 = vst [vmem:[#allocation79_spill] sm:$0xff] %v6398_v28  ;;  %v6406_v30 = vadd.f32 %v6243_v32, %v3371_v6  ;;  %v3228_v56 = vmul.f32 %v6223_v50, %v2933_v12  ;;  %v2936_v28 = vmax.f32 %v1974_v4, 0.0  ;;  %v1966_v24 = vadd.f32 %v6200_v1, %v1965_v13  ;;  %v2541_v62 = vpop.f32.mrf.mxu1 }
 0x154   : > { %v6411_v21 = vadd.f32 %v6243_v32, %v3225_v49  ;;  %v3372_v44 = vmul.f32 %v6223_v50, %v3077_v23  ;;  %v3080_v41 = vmax.f32 %v2550_v48, 0.0  ;;  %v2542_v14 = vadd.f32 %v6200_v1, %v2541_v62  ;;  %v5041_v3 = vpop.f32.mrf.mxu0 }
 0x155   : > { %7669 = vst [vmem:[#allocation80_spill] sm:$0xff] %v6406_v30  ;;  %v6416_v38 = vadd.f32 %v6243_v32, %v3369_v42  ;;  %v3231_v6 = vmul.f32 %v6223_v50, %v2936_v28  ;;  %v2934_v30 = vmax.f32 %v1966_v24, 0.0  ;;  %v1987_v12 = vadd.f32 %v6200_v1, %v5041_v3  ;;  %v5185_v4 = vpop.f32.mrf.mxu1 }
 0x156   : > { %7670 = vst [vmem:[#allocation81_spill] sm:$0xff] %v6411_v21  ;;  %v6421_v13 = vadd.f32 %v6243_v32, %v3230_v26  ;;  %v6424_v49 = vadd.f32 %v6243_v32, %v3374_v40  ;;  %v3078_v23 = vmax.f32 %v2542_v14, 0.0  ;;  %v2563_v48 = vadd.f32 %v6200_v1, %v5185_v4  ;;  %v1978_v62 = vpop.f32.mrf.mxu0 }
 0x157   : > { %7671 = vst [vmem:[#allocation82_spill] sm:$0xff] %v6416_v38  ;;  %v6428_v21 = vadd.f32 %v6243_v32, %v3228_v56  ;;  %v3375_v42 = vmul.f32 %v6223_v50, %v3080_v41  ;;  %v2939_v28 = vmax.f32 %v1987_v12, 0.0  ;;  %v1979_v24 = vadd.f32 %v6200_v1, %v1978_v62  ;;  %v2554_v3 = vpop.f32.mrf.mxu1 }
 0x158   : > { %7672 = vst [vmem:[#allocation83_spill] sm:$0xff] %v6421_v13  ;;  %7673 = vst [vmem:[#allocation84_spill] sm:$0xff] %v6424_v49  ;;  %v6433_v38 = vadd.f32 %v6243_v32, %v3372_v44  ;;  %v3229_v26 = vmul.f32 %v6223_v50, %v2934_v30  ;;  %v3083_v40 = vmax.f32 %v2563_v48, 0.0  ;;  %v2555_v14 = vadd.f32 %v6200_v1, %v2554_v3  ;;  %v5042_v49 = vpop.f32.mrf.mxu0 }
 0x159   : > { %7674 = vst [vmem:[#allocation85_spill] sm:$0xff] %v6428_v21  ;;  %v6438_v4 = vadd.f32 %v6243_v32, %v3231_v6  ;;  %v3373_v56 = vmul.f32 %v6223_v50, %v3078_v23  ;;  %v2937_v21 = vmax.f32 %v1979_v24, 0.0  ;;  %v1990_v41 = vadd.f32 %v6200_v1, %v5042_v49  ;;  %v5186_v12 = vpop.f32.mrf.mxu1 }
 0x15a   : > { %7675 = vst [vmem:[#allocation86_spill] sm:$0xff] %v6433_v38  ;;  %v3234_v62 = vmul.f32 %v6223_v50, %v2939_v28  ;;  %v3378_v44 = vmul.f32 %v6223_v50, %v3083_v40  ;;  %v3081_v38 = vmax.f32 %v2555_v14, 0.0  ;;  %v2566_v30 = vadd.f32 %v6200_v1, %v5186_v12  ;;  %v1981_v48 = vpop.f32.mrf.mxu0 }
 0x15b   : > { %7676 = vst [vmem:[#allocation87_spill] sm:$0xff] %v6438_v4  ;;  %v6446_v3 = vadd.f32 %v6243_v32, %v3375_v42  ;;  %v3232_v6 = vmul.f32 %v6223_v50, %v2937_v21  ;;  %v2940_v4 = vmax.f32 %v1990_v41, 0.0  ;;  %v1982_v23 = vadd.f32 %v6200_v1, %v1981_v48  ;;  %v2557_v24 = vpop.f32.mrf.mxu1 }
 0x15c   : > { %v6451_v49 = vadd.f32 %v6243_v32, %v3229_v26  ;;  %v3376_v28 = vmul.f32 %v6223_v50, %v3081_v38  ;;  %v3084_v13 = vmax.f32 %v2566_v30, 0.0  ;;  %v2558_v40 = vadd.f32 %v6200_v1, %v2557_v24  ;;  %v5045_v14 = vpop.f32.mrf.mxu0 }
 0x15d   : > { %7677 = vst [vmem:[#allocation88_spill] sm:$0xff] %v6446_v3  ;;  %v6456_v12 = vadd.f32 %v6243_v32, %v3373_v56  ;;  %v3235_v42 = vmul.f32 %v6223_v50, %v2940_v4  ;;  %v2938_v3 = vmax.f32 %v1982_v23, 0.0  ;;  %v2003_v21 = vadd.f32 %v6200_v1, %v5045_v14  ;;  %v5189_v41 = vpop.f32.mrf.mxu1 }
 0x15e   : > { %7678 = vst [vmem:[#allocation89_spill] sm:$0xff] %v6451_v49  ;;  %v6461_v48 = vadd.f32 %v6243_v32, %v3234_v62  ;;  %v6464_v26 = vadd.f32 %v6243_v32, %v3378_v44  ;;  %v3082_v38 = vmax.f32 %v2558_v40, 0.0  ;;  %v2579_v30 = vadd.f32 %v6200_v1, %v5189_v41  ;;  %v1994_v24 = vpop.f32.mrf.mxu0 }
 0x15f   : > { %7679 = vst [vmem:[#allocation90_spill] sm:$0xff] %v6456_v12  ;;  %v6468_v49 = vadd.f32 %v6243_v32, %v3232_v6  ;;  %v3379_v56 = vmul.f32 %v6223_v50, %v3084_v13  ;;  %v2943_v4 = vmax.f32 %v2003_v21, 0.0  ;;  %v1995_v23 = vadd.f32 %v6200_v1, %v1994_v24  ;;  %v2570_v14 = vpop.f32.mrf.mxu1 }
 0x160   : > { %7680 = vst [vmem:[#allocation91_spill] sm:$0xff] %v6461_v48  ;;  %7681 = vst [vmem:[#allocation92_spill] sm:$0xff] %v6464_v26  ;;  %v6473_v12 = vadd.f32 %v6243_v32, %v3376_v28  ;;  %v3233_v62 = vmul.f32 %v6223_v50, %v2938_v3  ;;  %v3087_v44 = vmax.f32 %v2579_v30, 0.0  ;;  %v2571_v40 = vadd.f32 %v6200_v1, %v2570_v14  ;;  %v5046_v26 = vpop.f32.mrf.mxu0 }
 0x161   : > { %7682 = vst [vmem:[#allocation93_spill] sm:$0xff] %v6468_v49  ;;  %v6478_v41 = vadd.f32 %v6243_v32, %v3235_v42  ;;  %v3377_v6 = vmul.f32 %v6223_v50, %v3082_v38  ;;  %v2941_v49 = vmax.f32 %v1995_v23, 0.0  ;;  %v2006_v13 = vadd.f32 %v6200_v1, %v5046_v26  ;;  %v5190_v21 = vpop.f32.mrf.mxu1 }
 0x162   : > { %7683 = vst [vmem:[#allocation94_spill] sm:$0xff] %v6473_v12  ;;  %v3238_v24 = vmul.f32 %v6223_v50, %v2943_v4  ;;  %v3382_v28 = vmul.f32 %v6223_v50, %v3087_v44  ;;  %v3085_v12 = vmax.f32 %v2571_v40, 0.0  ;;  %v2582_v3 = vadd.f32 %v6200_v1, %v5190_v21  ;;  %v1997_v30 = vpop.f32.mrf.mxu0 }
 0x163   : > { %7684 = vst [vmem:[#allocation95_spill] sm:$0xff] %v6478_v41  ;;  %v6486_v14 = vadd.f32 %v6243_v32, %v3379_v56  ;;  %v3236_v42 = vmul.f32 %v6223_v50, %v2941_v49  ;;  %v2944_v41 = vmax.f32 %v2006_v13, 0.0  ;;  %v1998_v38 = vadd.f32 %v6200_v1, %v1997_v30  ;;  %v2573_v23 = vpop.f32.mrf.mxu1 }
 0x164   : > { %v6491_v26 = vadd.f32 %v6243_v32, %v3233_v62  ;;  %v3380_v4 = vmul.f32 %v6223_v50, %v3085_v12  ;;  %v3088_v48 = vmax.f32 %v2582_v3, 0.0  ;;  %v6495_v44 = vadd.f32 %v6200_v1, %v2573_v23  ;;  %v5049_v40 = vpop.f32.mrf.mxu0 }
 0x165   : > { %7685 = vst [vmem:[#allocation96_spill] sm:$0xff] %v6486_v14  ;;  %v6498_v21 = vadd.f32 %v6243_v32, %v3377_v6  ;;  %v3239_v56 = vmul.f32 %v6223_v50, %v2944_v41  ;;  %v2942_v49 = vmax.f32 %v1998_v38, 0.0  ;;  %v2019_v13 = vadd.f32 %v6200_v1, %v5049_v40  ;;  %v5193_v30 = vpop.f32.mrf.mxu1 }
 0x166   : > { %7686 = vst [vmem:[#allocation97_spill] sm:$0xff] %v6491_v26  ;;  %7687 = vst [vmem:[#allocation98_spill] sm:$0xff] %v6495_v44  ;;  %v6503_v14 = vadd.f32 %v6243_v32, %v3238_v24  ;;  %v6506_v62 = vadd.f32 %v6243_v32, %v3382_v28  ;;  %v3383_v12 = vmul.f32 %v6223_v50, %v3088_v48  ;;  %v2010_v23 = vpop.f32.mrf.mxu0 }
 0x167   : > { %7688 = vst [vmem:[#allocation99_spill] sm:$0xff] %v6498_v21  ;;  %v2595_v3 = vadd.f32 %v6200_v1, %v5193_v30  ;;  %v6511_v6 = vadd.f32 %v6243_v32, %v3236_v42  ;;  %v6514_v41 = vadd.f32 %v6243_v32, %v3380_v4  ;;  %v2947_v40 = vmax.f32 %v2019_v13, 0.0  ;;  %v2586_v21 = vpop.f32.mrf.mxu1 }
 0x168   : > { %7689 = vst [vmem:[#allocation100_spill] sm:$0xff] %v6503_v14  ;;  %7690 = vst [vmem:[#allocation101_spill] sm:$0xff] %v6506_v62  ;;  %v6518_v24 = vadd.f32 %v6243_v32, %v3239_v56  ;;  %v6521_v28 = vmul.f32 %v6223_v50, %v2942_v49  ;;  %v2011_v30 = vadd.f32 %v6200_v1, %v2010_v23  ;;  %v5050_v62 = vpop.f32.mrf.mxu0 }
 0x169   : > { %7691 = vst [vmem:[#allocation102_spill] sm:$0xff] %v6511_v6  ;;  %7692 = vst [vmem:[#allocation103_spill] sm:$0xff] %v6514_v41  ;;  %v3091_v48 = vmax.f32 %v2595_v3, 0.0  ;;  %v3242_v42 = vmul.f32 %v6223_v50, %v2947_v40  ;;  %v2587_v4 = vadd.f32 %v6200_v1, %v2586_v21  ;;  %v2022_v41 = vadd.f32 %v6200_v1, %v5050_v62  ;;  %v5194_v38 = vpop.f32.mrf.mxu1 }
 0x16a   : > { %7693 = vst [vmem:[#allocation104_spill] sm:$0xff] %v6518_v24  ;;  %7694 = vst [vmem:[#allocation105_spill] sm:$0xff] %v6521_v28  ;;  %v6528_v13 = vadd.f32 %v6243_v32, %v3383_v12  ;;  %v2945_v49 = vmax.f32 %v2011_v30, 0.0  ;;  %v2598_v3 = vadd.f32 %v6200_v1, %v5194_v38  ;;  %v2013_v24 = vpop.f32.mrf.mxu0 }
 0x16b   : > { %v3386_v56 = vmul.f32 %v6223_v50, %v3091_v48  ;;  %v3537_v23 = vadd.f32 %v6243_v32, %v3242_v42  ;;  %v3089_v28 = vmax.f32 %v2587_v4, 0.0  ;;  %v2948_v40 = vmax.f32 %v2022_v41, 0.0  ;;  %v2589_v21 = vpop.f32.mrf.mxu1 }
 0x16c   : > { %7695 = vst [vmem:[#allocation106_spill] sm:$0xff] %v6528_v13  ;;  %v2014_v6 = vadd.f32 %v6200_v1, %v2013_v24  ;;  %v3240_v44 = vmul.f32 %v6223_v50, %v2945_v49  ;;  %v3092_v12 = vmax.f32 %v2598_v3, 0.0  ;;  %v2590_v13 = vadd.f32 %v6200_v1, %v2589_v21  ;;  %v5053_v14 = vpop.f32.mrf.mxu0 }
 0x16d   : > { %v3681_v62 = vadd.f32 %v6243_v32, %v3386_v56  ;;  %v3753_v48 = vmax.f32 %v5729_v17, %v3537_v23  ;;  %v3384_v38 = vmul.f32 %v6223_v50, %v3089_v28  ;;  %v3243_v30 = vmul.f32 %v6223_v50, %v2948_v40  ;;  %v5197_v41 = vpop.f32.mrf.mxu1 }
 0x16e   : > { %v2946_v42 = vmax.f32 %v2014_v6, 0.0  ;;  %v3535_v4 = vadd.f32 %v6243_v32, %v3240_v44  ;;  %v3387_v56 = vmul.f32 %v6223_v50, %v3092_v12  ;;  %v3090_v49 = vmax.f32 %v2590_v13, 0.0  ;;  %v2026_v3 = vpop.f32.mrf.mxu0 }
 0x16f   : > { %v3825_v24 = vmax.f32 %v5732_v18, %v3681_v62  ;;  %v3679_v21 = vadd.f32 %v6243_v32, %v3384_v38  ;;  %v3538_v26 = vadd.f32 %v6243_v32, %v3243_v30  ;;  %v2035_v28 = vadd.f32 %v6200_v1, %v5053_v14  ;;  %v2602_v23 = vpop.f32.mrf.mxu1 }
 0x170   : > { %v3241_v17 = vmul.f32 %v6223_v50, %v2946_v42  ;;  %v3751_v6 = vmax.f32 %v5737_v22, %v3535_v4  ;;  %v3682_v18 = vadd.f32 %v6243_v32, %v3387_v56  ;;  %v3385_v44 = vmul.f32 %v6223_v50, %v3090_v49  ;;  %v5054_v62 = vpop.f32.mrf.mxu0 }
 0x171   : > { %v3897_v40 = vmax.f32 %v3753_v48, %v3825_v24  ;;  %v3823_v13 = vmax.f32 %v5742_v27, %v3679_v21  ;;  %v3754_v12 = vmax.f32 %v5748_v33, %v3538_v26  ;;  %v2951_v48 = vmax.f32 %v2035_v28, 0.0  ;;  %v5198_v38 = vpop.f32.mrf.mxu1 }
 0x172   : > { %v3536_v14 = vadd.f32 %v6243_v32, %v3241_v17  ;;  %v3826_v30 = vmax.f32 %v5759_v47, %v3682_v18  ;;  %v3680_v42 = vadd.f32 %v6243_v32, %v3385_v44  ;;  %v2611_v24 = vadd.f32 %v6200_v1, %v5197_v41  ;;  %v2029_v4 = vpop.f32.mrf.mxu0 }
 0x173   : > { %v4758_v22 = vpack.c.bf16 %v3897_v40, %v3897_v40  ;;  %v3895_v56 = vmax.f32 %v3751_v6, %v3823_v13  ;;  %v3246_v57 = vmul.f32 %v6223_v50, %v2951_v48  ;;  %v2027_v27 = vadd.f32 %v6200_v1, %v2026_v3  ;;  %v2605_v33 = vpop.f32.mrf.mxu1 }
 0x174   : > { %v3752_v49 = vmax.f32 %v5764_v53, %v3536_v14  ;;  %v3898_v26 = vmax.f32 %v3754_v12, %v3826_v30  ;;  %v3824_v21 = vmax.f32 %v5770_v58, %v3680_v42  ;;  %v3095_v47 = vmax.f32 %v2611_v24, 0.0  ;;  %v5057_v28 = vpop.f32.mrf.mxu0 }
 0x175   : > { %4258 = vst.msk [vmem:[%s6554_s16 + $0x8] sm:$0xf] %vm4255_vm3, %v4758_v22  ;;  %v2603_v17 = vadd.f32 %v6200_v1, %v2602_v23  ;;  %v4756_v41 = vpack.c.bf16 %v3895_v56, %v3895_v56  ;;  %v3541_v40 = vadd.f32 %v6243_v32, %v3246_v57  ;;  %v2949_v53 = vmax.f32 %v2027_v27, 0.0  ;;  %v5201_v18 = vpop.f32.mrf.mxu1 }
 0x176   : > { %v2038_v6 = vadd.f32 %v6200_v1, %v5054_v62  ;;  %v4759_v3 = vpack.c.bf16 %v3898_v26, %v3898_v26  ;;  %v3896_v44 = vmax.f32 %v3752_v49, %v3824_v21  ;;  %v3390_v13 = vmul.f32 %v6223_v50, %v3095_v47  ;;  %v2042_v12 = vpop.f32.mrf.mxu0 }
 0x177   : > { %v3093_v14 = vmax.f32 %v2603_v17, 0.0  ;;  %4256 = vst.msk [vmem:[%s6554_s16] sm:$0xf] %vm4255_vm3, %v4756_v41  ;;  %v3757_v58 = vmax.f32 %v5777_v63, %v3541_v40  ;;  %v3244_v23 = vmul.f32 %v6223_v50, %v2949_v53  ;;  %v2614_v57 = vadd.f32 %v6200_v1, %v5198_v38  ;;  %v2618_v22 = vpop.f32.mrf.mxu1 }
 0x178   : > { %v2952_v48 = vmax.f32 %v2038_v6, 0.0  ;;  %4259 = vst.msk [vmem:[%s6554_s16 + $0xc] sm:$0xf] %vm4255_vm3, %v4759_v3  ;;  %v4757_v62 = vpack.c.bf16 %v3896_v44, %v3896_v44  ;;  %v3685_v30 = vadd.f32 %v6243_v32, %v3390_v13  ;;  %v2030_v24 = vadd.f32 %v6200_v1, %v2029_v4  ;;  %v5058_v56 = vpop.f32.mrf.mxu0 }
 0x179   : > { %v3388_v42 = vmul.f32 %v6223_v50, %v3093_v14  ;;  %v3539_v49 = vadd.f32 %v6243_v32, %v3244_v23  ;;  %v3096_v27 = vmax.f32 %v2614_v57, 0.0  ;;  %v2606_v26 = vadd.f32 %v6200_v1, %v2605_v33  ;;  %v5202_v21 = vpop.f32.mrf.mxu1 }
 0x17a   : > { %v3247_v63 = vmul.f32 %v6223_v50, %v2952_v48  ;;  %4257 = vst.msk [vmem:[%s6554_s16 + $0x4] sm:$0xf] %vm4255_vm3, %v4757_v62  ;;  %v3829_v38 = vmax.f32 %v5780_v0, %v3685_v30  ;;  %v2950_v17 = vmax.f32 %v2030_v24, 0.0  ;;  %v2051_v41 = vadd.f32 %v6200_v1, %v5057_v28  ;;  %v2045_v40 = vpop.f32.mrf.mxu0 }
 0x17b   : > { %v3683_v47 = vadd.f32 %v6243_v32, %v3388_v42  ;;  %v3755_v4 = vmax.f32 %v5785_v5, %v3539_v49  ;;  %v3391_v6 = vmul.f32 %v6223_v50, %v3096_v27  ;;  %v3094_v3 = vmax.f32 %v2606_v26, 0.0  ;;  %v2621_v44 = vpop.f32.mrf.mxu1 }
 0x17c   : > { %v3542_v53 = vadd.f32 %v6243_v32, %v3247_v63  ;;  %v3901_v33 = vmax.f32 %v3757_v58, %v3829_v38  ;;  %v3245_v14 = vmul.f32 %v6223_v50, %v2950_v17  ;;  %v2955_v0 = vmax.f32 %v2051_v41, 0.0  ;;  %v5061_v23 = vpop.f32.mrf.mxu0 }
 0x17d   : > { %v3827_v13 = vmax.f32 %v5790_v10, %v3683_v47  ;;  %v3686_v28 = vadd.f32 %v6243_v32, %v3391_v6  ;;  %v3389_v5 = vmul.f32 %v6223_v50, %v3094_v3  ;;  %v2627_v57 = vadd.f32 %v6200_v1, %v5201_v18  ;;  %v6599_v62 = vpop.f32.mrf.mxu1 }
 0x17e   : > { %v3758_v48 = vmax.f32 %v5796_v16, %v3542_v53  ;;  %v4762_v30 = vpack.c.bf16 %v3901_v33, %v3901_v33  ;;  %v3540_v58 = vadd.f32 %v6243_v32, %v3245_v14  ;;  %v3250_v10 = vmul.f32 %v6223_v50, %v2955_v0  ;;  %v6603_v24 = vpop.f32.mrf.mxu0 }
 0x17f   : > { %v3899_v42 = vmax.f32 %v3755_v4, %v3827_v13  ;;  %v3830_v49 = vmax.f32 %v5807_v34, %v3686_v28  ;;  %v3684_v16 = vadd.f32 %v6243_v32, %v3389_v5  ;;  %v3099_v63 = vmax.f32 %v2627_v57, 0.0  ;;  %v6608_v26 = vpop.f32.mrf.mxu1 }
 0x180   : > { %v2043_v27 = vadd.f32 %v6200_v1, %v2042_v12  ;;  %4262 = vst.msk [vmem:[%s6554_s16 + $0x18] sm:$0xf] %vm4255_vm3, %v4762_v30  ;;  %v3756_v38 = vmax.f32 %v5812_v39, %v3540_v58  ;;  %v3545_v47 = vadd.f32 %v6243_v32, %v3250_v10  ;;  %v2619_v17 = vadd.f32 %v6200_v1, %v2618_v22  ;;  %v6615_v41 = vpop.f32.mrf.mxu0 }
 0x181   : > { %v4760_v18 = vpack.c.bf16 %v3899_v42, %v3899_v42  ;;  %v3902_v34 = vmax.f32 %v3758_v48, %v3830_v49  ;;  %v3828_v4 = vmax.f32 %v5818_v45, %v3684_v16  ;;  %v3394_v53 = vmul.f32 %v6223_v50, %v3099_v63  ;;  %v6619_v12 = vpop.f32.mrf.mxu1 }
 0x182   : > { %v2953_v6 = vmax.f32 %v2043_v27, 0.0  ;;  %v3761_v3 = vmax.f32 %v5825_v52, %v3545_v47  ;;  %v3097_v39 = vmax.f32 %v2619_v17, 0.0  ;;  %v2054_v33 = vadd.f32 %v6200_v1, %v5058_v56  ;;  %v6626_v13 = vpop.f32.mrf.mxu0 }
 0x183   : > { %4260 = vst.msk [vmem:[%s6554_s16 + $0x10] sm:$0xf] %vm4255_vm3, %v4760_v18  ;;  %v2630_v22 = vadd.f32 %v6200_v1, %v5202_v21  ;;  %v4763_v14 = vpack.c.bf16 %v3902_v34, %v3902_v34  ;;  %v3900_v0 = vmax.f32 %v3756_v38, %v3828_v4  ;;  %v3689_v45 = vadd.f32 %v6243_v32, %v3394_v53  ;;  %v6630_v28 = vpop.f32.mrf.mxu1 }
 0x184   : > { %v3248_v48 = vmul.f32 %v6223_v50, %v2953_v6  ;;  %v3392_v5 = vmul.f32 %v6223_v50, %v3097_v39  ;;  %v2956_v57 = vmax.f32 %v2054_v33, 0.0  ;;  %v2046_v30 = vadd.f32 %v6200_v1, %v2045_v40  ;;  %v6634_v56 = vpop.f32.mrf.mxu0 }
 0x185   : > { %v3100_v52 = vmax.f32 %v2630_v22, 0.0  ;;  %4263 = vst.msk [vmem:[%s6554_s16 + $0x1c] sm:$0xf] %vm4255_vm3, %v4763_v14  ;;  %v4761_v21 = vpack.c.bf16 %v3900_v0, %v3900_v0  ;;  %v3833_v42 = vmax.f32 %v5828_v54, %v3689_v45  ;;  %v2622_v10 = vadd.f32 %v6200_v1, %v2621_v44  ;;  %v6641_v49 = vpop.f32.mrf.mxu1 }
 0x186   : > { %v3543_v58 = vadd.f32 %v6243_v32, %v3248_v48  ;;  %v3687_v16 = vadd.f32 %v6243_v32, %v3392_v5  ;;  %v3251_v63 = vmul.f32 %v6223_v50, %v2956_v57  ;;  %v2954_v40 = vmax.f32 %v2046_v30, 0.0  ;;  %v6646_v18 = vpop.f32.mrf.mxu0 }
 0x187   : > { %v3395_v27 = vmul.f32 %v6223_v50, %v3100_v52  ;;  %4261 = vst.msk [vmem:[%s6554_s16 + $0x14] sm:$0xf] %vm4255_vm3, %v4761_v21  ;;  %v3905_v38 = vmax.f32 %v3761_v3, %v3833_v42  ;;  %v3098_v47 = vmax.f32 %v2622_v10, 0.0  ;;  %v2067_v17 = vadd.f32 %v6200_v1, %v5061_v23  ;;  %v6652_v44 = vpop.f32.mrf.mxu1 }
 0x188   : > { %v3759_v54 = vmax.f32 %v5833_v59, %v3543_v58  ;;  %v3831_v34 = vmax.f32 %v5838_v2, %v3687_v16  ;;  %v3546_v4 = vadd.f32 %v6243_v32, %v3251_v63  ;;  %v3249_v6 = vmul.f32 %v6223_v50, %v2954_v40  ;;  %v6658_v39 = vpop.f32.mrf.mxu0 }
 0x189   : > { %v3690_v53 = vadd.f32 %v6243_v32, %v3395_v27  ;;  %v4766_v33 = vpack.c.bf16 %v3905_v38, %v3905_v38  ;;  %v3393_v3 = vmul.f32 %v6223_v50, %v3098_v47  ;;  %v2959_v59 = vmax.f32 %v2067_v17, 0.0  ;;  %v6663_v22 = vpop.f32.mrf.mxu1 }
 0x18a   : > { %v2643_v23 = vadd.f32 %v6200_v1, %v6599_v62  ;;  %v3903_v14 = vmax.f32 %v3759_v54, %v3831_v34  ;;  %v3762_v2 = vmax.f32 %v5844_v11, %v3546_v4  ;;  %v3544_v45 = vadd.f32 %v6243_v32, %v3249_v6  ;;  %v6668_v48 = vpop.f32.mrf.mxu0 }
 0x18b   : > { %v3834_v0 = vmax.f32 %v5855_v29, %v3690_v53  ;;  %4266 = vst.msk [vmem:[%s6554_s16 + $0x28] sm:$0xf] %vm4255_vm3, %v4766_v33  ;;  %v3688_v5 = vadd.f32 %v6243_v32, %v3393_v3  ;;  %v3254_v57 = vmul.f32 %v6223_v50, %v2959_v59  ;;  %v2059_v62 = vadd.f32 %v6200_v1, %v6603_v24  ;;  %v6676_v30 = vpop.f32.mrf.mxu1 }
 0x18c   : > { %v3103_v52 = vmax.f32 %v2643_v23, 0.0  ;;  %v4764_v11 = vpack.c.bf16 %v3903_v14, %v3903_v14  ;;  %v3760_v29 = vmax.f32 %v5860_v36, %v3544_v45  ;;  %v2635_v42 = vadd.f32 %v6200_v1, %v6608_v26  ;;  %v6681_v58 = vpop.f32.mrf.mxu0 }
 0x18d   : > { %v3906_v21 = vmax.f32 %v3762_v2, %v3834_v0  ;;  %v3832_v10 = vmax.f32 %v5866_v43, %v3688_v5  ;;  %v3549_v16 = vadd.f32 %v6243_v32, %v3254_v57  ;;  %v2957_v27 = vmax.f32 %v2059_v62, 0.0  ;;  %v6686_v24 = vpop.f32.mrf.mxu1 }
 0x18e   : > { %v3398_v63 = vmul.f32 %v6223_v50, %v3103_v52  ;;  %4264 = vst.msk [vmem:[%s6554_s16 + $0x20] sm:$0xf] %vm4255_vm3, %v4764_v11  ;;  %v3101_v38 = vmax.f32 %v2635_v42, 0.0  ;;  %v2070_v36 = vadd.f32 %v6200_v1, %v6615_v41  ;;  %v2646_v26 = vadd.f32 %v6200_v1, %v6619_v12  ;;  %v6694_v54 = vpop.f32.mrf.mxu0  ;;  %v6707_v1 = vld [vmem:[%s7586_s2] ss:$0 sm:$0xff] }
 0x18f   : > { %v4767_v40 = vpack.c.bf16 %v3906_v21, %v3906_v21  ;;  %v3904_v43 = vmax.f32 %v3760_v29, %v3832_v10  ;;  %v3765_v47 = vmax.f32 %v5873_v51, %v3549_v16  ;;  %v3252_v34 = vmul.f32 %v6223_v50, %v2957_v27  ;;  %v6699_v4 = vpop.f32.mrf.mxu1  ;;  %v6737_v29 = vld [vmem:[%s7587_s3] ss:$0 sm:$0xff] }
 0x190   : > { %v3693_v17 = vadd.f32 %v6243_v32, %v3398_v63  ;;  %v3396_v53 = vmul.f32 %v6223_v50, %v3101_v38  ;;  %v2960_v41 = vmax.f32 %v2070_v36, 0.0  ;;  %v3104_v6 = vmax.f32 %v2646_v26, 0.0  ;;  %v6711_v12 = vpop.f32.mrf.mxu0  ;;  %v6752_v38 = vld [vmem:[%s7588_s4] ss:$0 sm:$0xff] }
 0x191   : > { %4267 = vst.msk [vmem:[%s6554_s16 + $0x2c] sm:$0xf] %vm4255_vm3, %v4767_v40  ;;  %v2062_v51 = vadd.f32 %v6707_v1, %v6626_v13  ;;  %v4765_v33 = vpack.c.bf16 %v3904_v43, %v3904_v43  ;;  %v3547_v59 = vadd.f32 %v6243_v32, %v3252_v34  ;;  %v2638_v23 = vadd.f32 %v6707_v1, %v6630_v28  ;;  %v6717_v14 = vpop.f32.mrf.mxu1 }
 0x192   : > { %v3837_v3 = vmax.f32 %v5876_v55, %v3693_v17  ;;  %v3691_v2 = vadd.f32 %v6243_v32, %v3396_v53  ;;  %v3255_v0 = vmul.f32 %v6223_v50, %v2960_v41  ;;  %v3399_v45 = vmul.f32 %v6223_v50, %v3104_v6  ;;  %v6722_v13 = vpop.f32.mrf.mxu0 }
 0x193   : > { %v2958_v5 = vmax.f32 %v2062_v51, 0.0  ;;  %4265 = vst.msk [vmem:[%s6554_s16 + $0x24] sm:$0xf] %vm4255_vm3, %v4765_v33  ;;  %v3763_v55 = vmax.f32 %v5881_v61, %v3547_v59  ;;  %v3102_v52 = vmax.f32 %v2638_v23, 0.0  ;;  %v2083_v28 = vadd.f32 %v6707_v1, %v6634_v56  ;;  %v6729_v62 = vpop.f32.mrf.mxu1 }
 0x194   : > { %v3909_v57 = vmax.f32 %v3765_v47, %v3837_v3  ;;  %v3835_v11 = vmax.f32 %v5886_v7, %v3691_v2  ;;  %v3550_v21 = vadd.f32 %v6243_v32, %v3255_v0  ;;  %v3694_v50 = vadd.f32 %v6243_v32, %v3399_v45  ;;  %v6740_v42 = vpop.f32.mrf.mxu0 }
 0x195   : > { %v3253_v61 = vmul.f32 %v6737_v29, %v2958_v5  ;;  %v3397_v56 = vmul.f32 %v6737_v29, %v3102_v52  ;;  %v2963_v16 = vmax.f32 %v2083_v28, 0.0  ;;  %v2659_v7 = vadd.f32 %v6707_v1, %v6641_v49  ;;  %v6745_v63 = vpop.f32.mrf.mxu1 }
 0x196   : > { %v4770_v10 = vpack.c.bf16 %v3909_v57, %v3909_v57  ;;  %v3907_v27 = vmax.f32 %v3763_v55, %v3835_v11  ;;  %v3766_v32 = vmax.f32 %v5892_v15, %v3550_v21  ;;  %v3838_v40 = vmax.f32 %v5903_v37, %v3694_v50  ;;  %v6755_v26 = vpop.f32.mrf.mxu0 }
 0x197   : > { %v3548_v36 = vadd.f32 %v6752_v38, %v3253_v61  ;;  %v3692_v49 = vadd.f32 %v6752_v38, %v3397_v56  ;;  %v3258_v43 = vmul.f32 %v6737_v29, %v2963_v16  ;;  %v3107_v47 = vmax.f32 %v2659_v7, 0.0  ;;  %v6763_v37 = vpop.f32.mrf.mxu1 }
 0x198   : > { %4270 = vst.msk [vmem:[%s6554_s16 + $0x38] sm:$0xf] %vm4255_vm3, %v4770_v10  ;;  %v2075_v15 = vadd.f32 %v6707_v1, %v6646_v18  ;;  %v4768_v17 = vpack.c.bf16 %v3907_v27, %v3907_v27  ;;  %v3910_v34 = vmax.f32 %v3766_v32, %v3838_v40  ;;  %v2651_v41 = vadd.f32 %v6707_v1, %v6652_v44  ;;  %v6768_v6 = vpop.f32.mrf.mxu0 }
 0x199   : > { %v3764_v53 = vmax.f32 %v5908_v46, %v3548_v36  ;;  %v3836_v51 = vmax.f32 %v5914_v60, %v3692_v49  ;;  %v3553_v33 = vadd.f32 %v6752_v38, %v3258_v43  ;;  %v3402_v3 = vmul.f32 %v6737_v29, %v3107_v47  ;;  %v6773_v18 = vpop.f32.mrf.mxu1 }
 0x19a   : > { %v2961_v59 = vmax.f32 %v2075_v15, 0.0  ;;  %4268 = vst.msk [vmem:[%s6554_s16 + $0x30] sm:$0xf] %vm4255_vm3, %v4768_v17  ;;  %v4771_v23 = vpack.c.bf16 %v3910_v34, %v3910_v34  ;;  %v3105_v2 = vmax.f32 %v2651_v41, 0.0  ;;  %v2086_v46 = vadd.f32 %v6707_v1, %v6658_v39  ;;  %v6781_v0 = vpop.f32.mrf.mxu0 }
 0x19b   : > { %v2662_v44 = vadd.f32 %v6707_v1, %v6663_v22  ;;  %v3908_v60 = vmax.f32 %v3764_v53, %v3836_v51  ;;  %v3769_v45 = vmax.f32 %v5921_v8, %v3553_v33  ;;  %v3697_v5 = vadd.f32 %v6752_v38, %v3402_v3  ;;  %v6786_v55 = vpop.f32.mrf.mxu1  ;;  %v7696_v33 = vld [vmem:[#allocation2_spill] sm:$0xff] }
 0x19c   : > { %v3256_v57 = vmul.f32 %v6737_v29, %v2961_v59  ;;  %4271 = vst.msk [vmem:[%s6554_s16 + $0x3c] sm:$0xf] %vm4255_vm3, %v4771_v23  ;;  %v3400_v52 = vmul.f32 %v6737_v29, %v3105_v2  ;;  %v2964_v39 = vmax.f32 %v2086_v46, 0.0  ;;  %v2078_v22 = vadd.f32 %v6707_v1, %v6668_v48  ;;  %v6793_v11 = vpop.f32.mrf.mxu0 }
 0x19d   : > { %v3108_v28 = vmax.f32 %v2662_v44, 0.0  ;;  %v4769_v21 = vpack.c.bf16 %v3908_v60, %v3908_v60  ;;  %v3841_v8 = vmax.f32 %v5924_v9, %v3697_v5  ;;  %v2654_v61 = vadd.f32 %v6707_v1, %v6676_v30  ;;  %v6799_v10 = vpop.f32.mrf.mxu1  ;;  %v7697_v5 = vld [vmem:[#allocation3_spill] sm:$0xff] }
 0x19e   : > { %v3551_v50 = vadd.f32 %v6752_v38, %v3256_v57  ;;  %v3695_v56 = vadd.f32 %v6752_v38, %v3400_v52  ;;  %v3259_v16 = vmul.f32 %v6737_v29, %v2964_v39  ;;  %v2962_v27 = vmax.f32 %v2078_v22, 0.0  ;;  %v6804_v48 = vpop.f32.mrf.mxu0 }
 0x19f   : > { %v3403_v7 = vmul.f32 %v6737_v29, %v3108_v28  ;;  %4269 = vst.msk [vmem:[%s6554_s16 + $0x34] sm:$0xf] %vm4255_vm3, %v4769_v21  ;;  %v3913_v32 = vmax.f32 %v3769_v45, %v3841_v8  ;;  %v3106_v40 = vmax.f32 %v2654_v61, 0.0  ;;  %v2099_v30 = vadd.f32 %v6707_v1, %v6681_v58  ;;  %v6811_v36 = vpop.f32.mrf.mxu1  ;;  %v7698_v28 = vld [vmem:[#allocation4_spill] sm:$0xff] }
 0x1a0   : > { %v3767_v9 = vmax.f32 %v5929_v19, %v3551_v50  ;;  %v3839_v49 = vmax.f32 %v5934_v25, %v3695_v56  ;;  %v3554_v43 = vadd.f32 %v6752_v38, %v3259_v16  ;;  %v3257_v15 = vmul.f32 %v6737_v29, %v2962_v27  ;;  %v6817_v17 = vpop.f32.mrf.mxu0 }
 0x1a1   : > { %v3698_v47 = vadd.f32 %v6752_v38, %v3403_v7  ;;  %v4774_v34 = vpack.c.bf16 %v3913_v32, %v3913_v32  ;;  %v3401_v19 = vmul.f32 %v6737_v29, %v3106_v40  ;;  %v2967_v53 = vmax.f32 %v2099_v30, 0.0  ;;  %v6822_v41 = vpop.f32.mrf.mxu1  ;;  %v7699_v32 = vld [vmem:[#allocation5_spill] sm:$0xff] }
 0x1a2   : > { %v2675_v58 = vadd.f32 %v6707_v1, %v6686_v24  ;;  %v3911_v51 = vmax.f32 %v3767_v9, %v3839_v49  ;;  %v3770_v25 = vmax.f32 %v5940_v35, %v3554_v43  ;;  %v3552_v59 = vadd.f32 %v6752_v38, %v3257_v15  ;;  %v6827_v23 = vpop.f32.mrf.mxu0 }
 0x1a3   : > { %v3842_v3 = vmax.f32 %v7696_v33, %v3698_v47  ;;  %4274 = vst.msk [vmem:[%s6554_s16 + $0x48] sm:$0xf] %vm4255_vm3, %v4774_v34  ;;  %v3696_v2 = vadd.f32 %v6752_v38, %v3401_v19  ;;  %v3262_v46 = vmul.f32 %v6737_v29, %v2967_v53  ;;  %v2091_v24 = vadd.f32 %v6707_v1, %v6694_v54  ;;  %v6835_v60 = vpop.f32.mrf.mxu1  ;;  %v7700_v19 = vld [vmem:[#allocation6_spill] sm:$0xff] }
 0x1a4   : > { %v3111_v44 = vmax.f32 %v2675_v58, 0.0  ;;  %v4772_v35 = vpack.c.bf16 %v3911_v51, %v3911_v51  ;;  %v3768_v57 = vmax.f32 %v7697_v5, %v3552_v59  ;;  %v2667_v52 = vadd.f32 %v6707_v1, %v6699_v4  ;;  %v6840_v39 = vpop.f32.mrf.mxu0  ;;  %v7702_v5 = vld [vmem:[#allocation8_spill] sm:$0xff] }
 0x1a5   : > { %v3914_v45 = vmax.f32 %v3770_v25, %v3842_v3  ;;  %v3840_v22 = vmax.f32 %v7698_v28, %v3696_v2  ;;  %v3557_v21 = vadd.f32 %v6752_v38, %v3262_v46  ;;  %v2965_v50 = vmax.f32 %v2091_v24, 0.0  ;;  %v6845_v54 = vpop.f32.mrf.mxu1 }
 0x1a6   : > { %v3406_v8 = vmul.f32 %v6737_v29, %v3111_v44  ;;  %4272 = vst.msk [vmem:[%s6554_s16 + $0x40] sm:$0xf] %vm4255_vm3, %v4772_v35  ;;  %v3109_v56 = vmax.f32 %v2667_v52, 0.0  ;;  %v2102_v16 = vadd.f32 %v6707_v1, %v6711_v12  ;;  %v2678_v4 = vadd.f32 %v6707_v1, %v6717_v14  ;;  %v6853_v7 = vpop.f32.mrf.mxu0  ;;  %v7701_v44 = vld [vmem:[#allocation7_spill] sm:$0xff] }
 0x1a7   : > { %v4775_v61 = vpack.c.bf16 %v3914_v45, %v3914_v45  ;;  %v3912_v27 = vmax.f32 %v3768_v57, %v3840_v22  ;;  %v3773_v9 = vmax.f32 %v7699_v32, %v3557_v21  ;;  %v3260_v30 = vmul.f32 %v6737_v29, %v2965_v50  ;;  %v6858_v49 = vpop.f32.mrf.mxu1  ;;  %v7704_v32 = vld [vmem:[#allocation10_spill] sm:$0xff] }
 0x1a8   : > { %v3701_v40 = vadd.f32 %v6752_v38, %v3406_v8  ;;  %v3404_v43 = vmul.f32 %v6737_v29, %v3109_v56  ;;  %v2968_v12 = vmax.f32 %v2102_v16, 0.0  ;;  %v3112_v47 = vmax.f32 %v2678_v4, 0.0  ;;  %v6865_v15 = vpop.f32.mrf.mxu0  ;;  %v7703_v4 = vld [vmem:[#allocation9_spill] sm:$0xff] }
 0x1a9   : > { %4275 = vst.msk [vmem:[%s6554_s16 + $0x4c] sm:$0xf] %vm4255_vm3, %v4775_v61  ;;  %v2094_v14 = vadd.f32 %v6707_v1, %v6722_v13  ;;  %v4773_v34 = vpack.c.bf16 %v3912_v27, %v3912_v27  ;;  %v3555_v58 = vadd.f32 %v6752_v38, %v3260_v30  ;;  %v2670_v51 = vadd.f32 %v6707_v1, %v6729_v62  ;;  %v6871_v25 = vpop.f32.mrf.mxu1 }
 0x1aa   : > { %v3845_v53 = vmax.f32 %v7700_v19, %v3701_v40  ;;  %v3699_v33 = vadd.f32 %v6752_v38, %v3404_v43  ;;  %v3263_v3 = vmul.f32 %v6737_v29, %v2968_v12  ;;  %v3407_v59 = vmul.f32 %v6737_v29, %v3112_v47  ;;  %v6876_v13 = vpop.f32.mrf.mxu0 }
 0x1ab   : > { %v2966_v2 = vmax.f32 %v2094_v14, 0.0  ;;  %4273 = vst.msk [vmem:[%s6554_s16 + $0x44] sm:$0xf] %vm4255_vm3, %v4773_v34  ;;  %v3771_v24 = vmax.f32 %v7701_v44, %v3555_v58  ;;  %v3110_v35 = vmax.f32 %v2670_v51, 0.0  ;;  %v2115_v62 = vadd.f32 %v6707_v1, %v6740_v42  ;;  %v6883_v45 = vpop.f32.mrf.mxu1 }
 0x1ac   : > { %v3917_v46 = vmax.f32 %v3773_v9, %v3845_v53  ;;  %v3843_v57 = vmax.f32 %v7702_v5, %v3699_v33  ;;  %v3558_v52 = vadd.f32 %v6752_v38, %v3263_v3  ;;  %v3702_v28 = vadd.f32 %v6752_v38, %v3407_v59  ;;  %v6889_v21 = vpop.f32.mrf.mxu0  ;;  %v7705_v53 = vld [vmem:[#allocation11_spill] sm:$0xff]  ;;  %v7706_v33 = vld [vmem:[#allocation12_spill] sm:$0xff] }
 0x1ad   : > { %v3261_v22 = vmul.f32 %v6737_v29, %v2966_v2  ;;  %v3405_v50 = vmul.f32 %v6737_v29, %v3110_v35  ;;  %v2971_v61 = vmax.f32 %v2115_v62, 0.0  ;;  %v2691_v42 = vadd.f32 %v6707_v1, %v6745_v63  ;;  %v6894_v56 = vpop.f32.mrf.mxu1 }
 0x1ae   : > { %v4778_v8 = vpack.c.bf16 %v3917_v46, %v3917_v46  ;;  %v3915_v16 = vmax.f32 %v3771_v24, %v3843_v57  ;;  %v3774_v27 = vmax.f32 %v7703_v4, %v3558_v52  ;;  %v3846_v9 = vmax.f32 %v7704_v32, %v3702_v28  ;;  %v6899_v30 = vpop.f32.mrf.mxu0  ;;  %v7707_v57 = vld [vmem:[#allocation13_spill] sm:$0xff] }
 0x1af   : > { %v3556_v40 = vadd.f32 %v6752_v38, %v3261_v22  ;;  %v3700_v43 = vadd.f32 %v6752_v38, %v3405_v50  ;;  %v3266_v12 = vmul.f32 %v6737_v29, %v2971_v61  ;;  %v3115_v47 = vmax.f32 %v2691_v42, 0.0  ;;  %v6907_v14 = vpop.f32.mrf.mxu1  ;;  %v7708_v42 = vld [vmem:[#allocation14_spill] sm:$0xff] }
 0x1b0   : > { %4278 = vst.msk [vmem:[%s6554_s16 + $0x58] sm:$0xf] %vm4255_vm3, %v4778_v8  ;;  %v2107_v63 = vadd.f32 %v6707_v1, %v6755_v26  ;;  %v4776_v34 = vpack.c.bf16 %v3915_v16, %v3915_v16  ;;  %v3918_v19 = vmax.f32 %v3774_v27, %v3846_v9  ;;  %v2683_v51 = vadd.f32 %v6707_v1, %v6763_v37  ;;  %v6915_v44 = vpop.f32.mrf.mxu0 }
 0x1b1   : > { %v3772_v58 = vmax.f32 %v7705_v53, %v3556_v40  ;;  %v3844_v3 = vmax.f32 %v7706_v33, %v3700_v43  ;;  %v3561_v59 = vadd.f32 %v6752_v38, %v3266_v12  ;;  %v3410_v2 = vmul.f32 %v6737_v29, %v3115_v47  ;;  %v6923_v62 = vpop.f32.mrf.mxu1  ;;  %v7710_v53 = vld [vmem:[#allocation16_spill] sm:$0xff] }
 0x1b2   : > { %v2969_v46 = vmax.f32 %v2107_v63, 0.0  ;;  %4276 = vst.msk [vmem:[%s6554_s16 + $0x50] sm:$0xf] %vm4255_vm3, %v4776_v34  ;;  %v4779_v26 = vpack.c.bf16 %v3918_v19, %v3918_v19  ;;  %v3113_v24 = vmax.f32 %v2683_v51, 0.0  ;;  %v2118_v35 = vadd.f32 %v6707_v1, %v6768_v6  ;;  %v6937_v32 = vpop.f32.mrf.mxu0  ;;  %v7709_v63 = vld [vmem:[#allocation15_spill] sm:$0xff] }
 0x1b3   : > { %v2694_v37 = vadd.f32 %v6707_v1, %v6773_v18  ;;  %v3916_v5 = vmax.f32 %v3772_v58, %v3844_v3  ;;  %v3777_v52 = vmax.f32 %v7707_v57, %v3561_v59  ;;  %v3705_v28 = vadd.f32 %v6752_v38, %v3410_v2  ;;  %v6942_v47 = vpop.f32.mrf.mxu1 }
 0x1b4   : > { %v3264_v22 = vmul.f32 %v6737_v29, %v2969_v46  ;;  %4279 = vst.msk [vmem:[%s6554_s16 + $0x5c] sm:$0xf] %vm4255_vm3, %v4779_v26  ;;  %v3408_v8 = vmul.f32 %v6737_v29, %v3113_v24  ;;  %v2972_v50 = vmax.f32 %v2118_v35, 0.0  ;;  %v2110_v6 = vadd.f32 %v6707_v1, %v6781_v0  ;;  %v6956_v24 = vpop.f32.mrf.mxu0 }
 0x1b5   : > { %v3116_v61 = vmax.f32 %v2694_v37, 0.0  ;;  %v4777_v18 = vpack.c.bf16 %v3916_v5, %v3916_v5  ;;  %v3849_v16 = vmax.f32 %v7708_v42, %v3705_v28  ;;  %v2686_v27 = vadd.f32 %v6707_v1, %v6786_v55  ;;  %v7711_v37 = vld [vmem:[#allocation17_spill] sm:$0xff]  ;;  %v7712_v5 = vld [vmem:[#allocation18_spill] sm:$0xff]  ;;  %v6961_v28 = vpop.f32.mrf.mxu1 }
 0x1b6   : > { %v3559_v4 = vadd.f32 %v6752_v38, %v3264_v22  ;;  %v3703_v9 = vadd.f32 %v6752_v38, %v3408_v8  ;;  %v3267_v40 = vmul.f32 %v6737_v29, %v2972_v50  ;;  %v2970_v12 = vmax.f32 %v2110_v6, 0.0 }
 0x1b7   : > { %v3411_v43 = vmul.f32 %v6737_v29, %v3116_v61  ;;  %4277 = vst.msk [vmem:[%s6554_s16 + $0x54] sm:$0xf] %vm4255_vm3, %v4777_v18  ;;  %v3921_v0 = vmax.f32 %v3777_v52, %v3849_v16  ;;  %v3114_v19 = vmax.f32 %v2686_v27, 0.0  ;;  %v2131_v55 = vadd.f32 %v6707_v1, %v6793_v11  ;;  %v7713_v18 = vld [vmem:[#allocation19_spill] sm:$0xff] }
 0x1b8   : > { %v3775_v34 = vmax.f32 %v7709_v63, %v3559_v4  ;;  %v3847_v58 = vmax.f32 %v7710_v53, %v3703_v9  ;;  %v3562_v51 = vadd.f32 %v6752_v38, %v3267_v40  ;;  %v3265_v3 = vmul.f32 %v6737_v29, %v2970_v12  ;;  %v7714_v4 = vld [vmem:[#allocation20_spill] sm:$0xff]  ;;  %v6975_v12 = vpop.f32.mrf.mxu0 }
 0x1b9   : > { %v3706_v33 = vadd.f32 %v6752_v38, %v3411_v43  ;;  %v4782_v59 = vpack.c.bf16 %v3921_v0, %v3921_v0  ;;  %v3409_v2 = vmul.f32 %v6737_v29, %v3114_v19  ;;  %v2975_v46 = vmax.f32 %v2131_v55, 0.0  ;;  %v7715_v55 = vld [vmem:[#allocation21_spill] sm:$0xff] }
 0x1ba   : > { %v2707_v26 = vadd.f32 %v6707_v1, %v6799_v10  ;;  %v3919_v35 = vmax.f32 %v3775_v34, %v3847_v58  ;;  %v3778_v11 = vmax.f32 %v7711_v37, %v3562_v51  ;;  %v3560_v52 = vadd.f32 %v6752_v38, %v3265_v3  ;;  %v6983_v34 = vpop.f32.mrf.mxu1  ;;  %v6997_v37 = vpop.f32.mrf.mxu0 }
 0x1bb   : > { %v3850_v57 = vmax.f32 %v7712_v5, %v3706_v33  ;;  %4282 = vst.msk [vmem:[%s6554_s16 + $0x68] sm:$0xf] %vm4255_vm3, %v4782_v59  ;;  %v3704_v22 = vadd.f32 %v6752_v38, %v3409_v2  ;;  %v3270_v8 = vmul.f32 %v6737_v29, %v2975_v46  ;;  %v2123_v10 = vadd.f32 %v6707_v1, %v6804_v48  ;;  %v7716_v2 = vld [vmem:[#allocation22_spill] sm:$0xff] }
 0x1bc   : > { %v3119_v50 = vmax.f32 %v2707_v26, 0.0  ;;  %v4780_v61 = vpack.c.bf16 %v3919_v35, %v3919_v35  ;;  %v3776_v42 = vmax.f32 %v7713_v18, %v3560_v52  ;;  %v2699_v16 = vadd.f32 %v6707_v1, %v6811_v36 }
 0x1bd   : > { %v3922_v6 = vmax.f32 %v3778_v11, %v3850_v57  ;;  %v3848_v27 = vmax.f32 %v7714_v4, %v3704_v22  ;;  %v3565_v9 = vadd.f32 %v6752_v38, %v3270_v8  ;;  %v2973_v43 = vmax.f32 %v2123_v10, 0.0  ;;  %v7002_v22 = vpop.f32.mrf.mxu1  ;;  %v7717_v8 = vld [vmem:[#allocation23_spill] sm:$0xff] }
 0x1be   : > { %v3414_v40 = vmul.f32 %v6737_v29, %v3119_v50  ;;  %4280 = vst.msk [vmem:[%s6554_s16 + $0x60] sm:$0xf] %vm4255_vm3, %v4780_v61  ;;  %v3117_v0 = vmax.f32 %v2699_v16, 0.0  ;;  %v2134_v63 = vadd.f32 %v6707_v1, %v6817_v17  ;;  %v2710_v36 = vadd.f32 %v6707_v1, %v6822_v41  ;;  %v7718_v61 = vld [vmem:[#allocation24_spill] sm:$0xff] }
 0x1bf   : > { %v4783_v48 = vpack.c.bf16 %v3922_v6, %v3922_v6  ;;  %v3920_v19 = vmax.f32 %v3776_v42, %v3848_v27  ;;  %v3781_v53 = vmax.f32 %v7715_v55, %v3565_v9  ;;  %v3268_v51 = vmul.f32 %v6737_v29, %v2973_v43  ;;  %v7016_v43 = vpop.f32.mrf.mxu0  ;;  %v7021_v55 = vpop.f32.mrf.mxu1 }
 0x1c0   : > { %v3709_v58 = vadd.f32 %v6752_v38, %v3414_v40  ;;  %v3412_v33 = vmul.f32 %v6737_v29, %v3117_v0  ;;  %v2976_v3 = vmax.f32 %v2134_v63, 0.0  ;;  %v3120_v59 = vmax.f32 %v2710_v36, 0.0  ;;  %v7719_v0 = vld [vmem:[#allocation25_spill] sm:$0xff]  ;;  %v7720_v63 = vld [vmem:[#allocation26_spill] sm:$0xff] }
 0x1c1   : > { %4283 = vst.msk [vmem:[%s6554_s16 + $0x6c] sm:$0xf] %vm4255_vm3, %v4783_v48  ;;  %v2126_v17 = vadd.f32 %v6707_v1, %v6827_v23  ;;  %v4781_v41 = vpack.c.bf16 %v3920_v19, %v3920_v19  ;;  %v3563_v26 = vadd.f32 %v6752_v38, %v3268_v51  ;;  %v2702_v35 = vadd.f32 %v6707_v1, %v6835_v60 }
 0x1c2   : > { %v3853_v46 = vmax.f32 %v7716_v2, %v3709_v58  ;;  %v3707_v11 = vadd.f32 %v6752_v38, %v3412_v33  ;;  %v3271_v5 = vmul.f32 %v6737_v29, %v2976_v3  ;;  %v3415_v57 = vmul.f32 %v6737_v29, %v3120_v59  ;;  %v7721_v59 = vld [vmem:[#allocation27_spill] sm:$0xff]  ;;  %v7722_v2 = vld [vmem:[#allocation28_spill] sm:$0xff] }
 0x1c3   : > { %v2974_v52 = vmax.f32 %v2126_v17, 0.0  ;;  %4281 = vst.msk [vmem:[%s6554_s16 + $0x64] sm:$0xf] %vm4255_vm3, %v4781_v41  ;;  %v3779_v50 = vmax.f32 %v7717_v8, %v3563_v26  ;;  %v3118_v10 = vmax.f32 %v2702_v35, 0.0  ;;  %v2147_v60 = vadd.f32 %v6707_v1, %v6840_v39 }
 0x1c4   : > { %v3925_v23 = vmax.f32 %v3781_v53, %v3853_v46  ;;  %v3851_v6 = vmax.f32 %v7718_v61, %v3707_v11  ;;  %v3566_v18 = vadd.f32 %v6752_v38, %v3271_v5  ;;  %v3710_v42 = vadd.f32 %v6752_v38, %v3415_v57  ;;  %v7035_v5 = vpop.f32.mrf.mxu0 }
 0x1c5   : > { %v3269_v16 = vmul.f32 %v6737_v29, %v2974_v52  ;;  %v3413_v27 = vmul.f32 %v6737_v29, %v3118_v10  ;;  %v2979_v9 = vmax.f32 %v2147_v60, 0.0  ;;  %v2723_v40 = vadd.f32 %v6707_v1, %v6845_v54 }
 0x1c6   : > { %v4786_v4 = vpack.c.bf16 %v3925_v23, %v3925_v23  ;;  %v3923_v48 = vmax.f32 %v3779_v50, %v3851_v6  ;;  %v3782_v39 = vmax.f32 %v7719_v0, %v3566_v18  ;;  %v3854_v36 = vmax.f32 %v7720_v63, %v3710_v42  ;;  %v7043_v23 = vpop.f32.mrf.mxu1  ;;  %v7723_v50 = vld [vmem:[#allocation29_spill] sm:$0xff] }
 0x1c7   : > { %v3564_v19 = vadd.f32 %v6752_v38, %v3269_v16  ;;  %v3708_v53 = vadd.f32 %v6752_v38, %v3413_v27  ;;  %v3274_v58 = vmul.f32 %v6737_v29, %v2979_v9  ;;  %v3123_v51 = vmax.f32 %v2723_v40, 0.0  ;;  %v7724_v16 = vld [vmem:[#allocation30_spill] sm:$0xff]  ;;  %v7057_v40 = vpop.f32.mrf.mxu0 }
 0x1c8   : > { %4286 = vst.msk [vmem:[%s6554_s16 + $0x78] sm:$0xf] %vm4255_vm3, %v4786_v4  ;;  %v2139_v54 = vadd.f32 %v6707_v1, %v6853_v7  ;;  %v4784_v33 = vpack.c.bf16 %v3923_v48, %v3923_v48  ;;  %v3926_v3 = vmax.f32 %v3782_v39, %v3854_v36  ;;  %v2715_v41 = vadd.f32 %v6707_v1, %v6858_v49  ;;  %v7062_v36 = vpop.f32.mrf.mxu1 }
 0x1c9   : > { %v3780_v17 = vmax.f32 %v7721_v59, %v3564_v19  ;;  %v3852_v46 = vmax.f32 %v7722_v2, %v3708_v53  ;;  %v3569_v26 = vadd.f32 %v6752_v38, %v3274_v58  ;;  %v3418_v35 = vmul.f32 %v6737_v29, %v3123_v51  ;;  %v7725_v19 = vld [vmem:[#allocation31_spill] sm:$0xff]  ;;  %v7726_v51 = vld [vmem:[#allocation32_spill] sm:$0xff] }
 0x1ca   : > { %v2977_v11 = vmax.f32 %v2139_v54, 0.0  ;;  %4284 = vst.msk [vmem:[%s6554_s16 + $0x70] sm:$0xf] %vm4255_vm3, %v4784_v33  ;;  %v4787_v7 = vpack.c.bf16 %v3926_v3, %v3926_v3  ;;  %v3121_v57 = vmax.f32 %v2715_v41, 0.0  ;;  %v2150_v52 = vadd.f32 %v6707_v1, %v6865_v15 }
 0x1cb   : > { %v2726_v49 = vadd.f32 %v6707_v1, %v6871_v25  ;;  %v3924_v8 = vmax.f32 %v3780_v17, %v3852_v46  ;;  %v3785_v10 = vmax.f32 %v7723_v50, %v3569_v26  ;;  %v3713_v60 = vadd.f32 %v6752_v38, %v3418_v35  ;;  %v7076_v26 = vpop.f32.mrf.mxu0 }
 0x1cc   : > { %v3272_v61 = vmul.f32 %v6737_v29, %v2977_v11  ;;  %4287 = vst.msk [vmem:[%s6554_s16 + $0x7c] sm:$0xf] %vm4255_vm3, %v4787_v7  ;;  %v3416_v6 = vmul.f32 %v6737_v29, %v3121_v57  ;;  %v2980_v18 = vmax.f32 %v2150_v52, 0.0  ;;  %v2142_v15 = vadd.f32 %v6707_v1, %v6876_v13  ;;  %v7727_v11 = vld [vmem:[#allocation33_spill] sm:$0xff]  ;;  %v7728_v7 = vld [vmem:[#allocation34_spill] sm:$0xff] }
 0x1cd   : > { %v3124_v42 = vmax.f32 %v2726_v49, 0.0  ;;  %v4785_v25 = vpack.c.bf16 %v3924_v8, %v3924_v8  ;;  %v3857_v4 = vmax.f32 %v7724_v16, %v3713_v60  ;;  %v2718_v9 = vadd.f32 %v6707_v1, %v6883_v45  ;;  %v7081_v49 = vpop.f32.mrf.mxu1 }
 0x1ce   : > { %v3567_v27 = vadd.f32 %v6752_v38, %v3272_v61  ;;  %v3711_v48 = vadd.f32 %v6752_v38, %v3416_v6  ;;  %v3275_v0 = vmul.f32 %v6737_v29, %v2980_v18  ;;  %v2978_v63 = vmax.f32 %v2142_v15, 0.0 }
 0x1cf   : > { %v3419_v39 = vmul.f32 %v6737_v29, %v3124_v42  ;;  %4285 = vst.msk [vmem:[%s6554_s16 + $0x74] sm:$0xf] %vm4255_vm3, %v4785_v25  ;;  %v3929_v13 = vmax.f32 %v3785_v10, %v3857_v4  ;;  %v3122_v58 = vmax.f32 %v2718_v9, 0.0  ;;  %v2163_v45 = vadd.f32 %v6707_v1, %v6889_v21  ;;  %v7729_v42 = vld [vmem:[#allocation35_spill] sm:$0xff] }
 0x1d0   : > { %v3783_v53 = vmax.f32 %v7725_v19, %v3567_v27  ;;  %v3855_v54 = vmax.f32 %v7726_v51, %v3711_v48  ;;  %v3570_v33 = vadd.f32 %v6752_v38, %v3275_v0  ;;  %v3273_v59 = vmul.f32 %v6737_v29, %v2978_v63  ;;  %v7095_v27 = vpop.f32.mrf.mxu0  ;;  %v7103_v48 = vpop.f32.mrf.mxu1  ;;  %v7731_v51 = vld [vmem:[#allocation37_spill] sm:$0xff] }
 0x1d1   : > { %v3714_v3 = vadd.f32 %v6752_v38, %v3419_v39  ;;  %v4790_v17 = vpack.c.bf16 %v3929_v13, %v3929_v13  ;;  %v3417_v41 = vmul.f32 %v6737_v29, %v3122_v58  ;;  %v2983_v2 = vmax.f32 %v2163_v45, 0.0  ;;  %v7730_v39 = vld [vmem:[#allocation36_spill] sm:$0xff] }
 0x1d2   : > { %v2739_v46 = vadd.f32 %v6707_v1, %v6894_v56  ;;  %v3927_v35 = vmax.f32 %v3783_v53, %v3855_v54  ;;  %v3786_v21 = vmax.f32 %v7727_v11, %v3570_v33  ;;  %v3568_v52 = vadd.f32 %v6752_v38, %v3273_v59  ;;  %v7117_v59 = vpop.f32.mrf.mxu0  ;;  %v7732_v11 = vld [vmem:[#allocation38_spill] sm:$0xff] }
 0x1d3   : > { %v3858_v57 = vmax.f32 %v7728_v7, %v3714_v3  ;;  %4290 = vst.msk [vmem:[%s6554_s16 + $0x88] sm:$0xf] %vm4255_vm3, %v4790_v17  ;;  %v3712_v8 = vadd.f32 %v6752_v38, %v3417_v41  ;;  %v3278_v50 = vmul.f32 %v6737_v29, %v2983_v2  ;;  %v2155_v56 = vadd.f32 %v6707_v1, %v6899_v30 }
 0x1d4   : > { %v3127_v10 = vmax.f32 %v2739_v46, 0.0  ;;  %v4788_v60 = vpack.c.bf16 %v3927_v35, %v3927_v35  ;;  %v3784_v6 = vmax.f32 %v6148_v31, %v3568_v52  ;;  %v2731_v18 = vadd.f32 %v6707_v1, %v6907_v14  ;;  %v7122_v35 = vpop.f32.mrf.mxu1 }
 0x1d5   : > { %v3930_v61 = vmax.f32 %v3786_v21, %v3858_v57  ;;  %v3856_v15 = vmax.f32 %v7729_v42, %v3712_v8  ;;  %v3573_v25 = vadd.f32 %v6752_v38, %v3278_v50  ;;  %v2981_v4 = vmax.f32 %v2155_v56, 0.0  ;;  %v7733_v57 = vld [vmem:[#allocation39_spill] sm:$0xff] }
 0x1d6   : > { %v3422_v16 = vmul.f32 %v6737_v29, %v3127_v10  ;;  %4288 = vst.msk [vmem:[%s6554_s16 + $0x80] sm:$0xf] %vm4255_vm3, %v4788_v60  ;;  %v3125_v9 = vmax.f32 %v2731_v18, 0.0  ;;  %v2166_v31 = vadd.f32 %v6707_v1, %v6915_v44  ;;  %v2742_v14 = vadd.f32 %v6707_v1, %v6923_v62  ;;  %v7136_v18 = vpop.f32.mrf.mxu0 }
 0x1d7   : > { %v4791_v30 = vpack.c.bf16 %v3930_v61, %v3930_v61  ;;  %v3928_v0 = vmax.f32 %v3784_v6, %v3856_v15  ;;  %v3789_v63 = vmax.f32 %v7730_v39, %v3573_v25  ;;  %v3276_v19 = vmul.f32 %v6737_v29, %v2981_v4  ;;  %v7734_v15 = vld [vmem:[#allocation40_spill] sm:$0xff]  ;;  %v7141_v4 = vpop.f32.mrf.mxu1  ;;  %v7735_v39 = vld [vmem:[#allocation41_spill] sm:$0xff] }
 0x1d8   : > { %v3717_v13 = vadd.f32 %v6752_v38, %v3422_v16  ;;  %v3420_v53 = vmul.f32 %v6737_v29, %v3125_v9  ;;  %v2984_v58 = vmax.f32 %v2166_v31, 0.0  ;;  %v3128_v45 = vmax.f32 %v2742_v14, 0.0 }
 0x1d9   : > { %4291 = vst.msk [vmem:[%s6554_s16 + $0x8c] sm:$0xf] %vm4255_vm3, %v4791_v30  ;;  %v2158_v44 = vadd.f32 %v6707_v1, %v6937_v32  ;;  %v4789_v62 = vpack.c.bf16 %v3928_v0, %v3928_v0  ;;  %v3571_v33 = vadd.f32 %v6752_v38, %v3276_v19  ;;  %v2734_v3 = vadd.f32 %v6707_v1, %v6942_v47 }
 0x1da   : > { %v3861_v54 = vmax.f32 %v7731_v51, %v3717_v13  ;;  %v3715_v17 = vadd.f32 %v6752_v38, %v3420_v53  ;;  %v3279_v41 = vmul.f32 %v6737_v29, %v2984_v58  ;;  %v3423_v2 = vmul.f32 %v6737_v29, %v3128_v45  ;;  %v7736_v13 = vld [vmem:[#allocation42_spill] sm:$0xff] }
 0x1db   : > { %v2982_v46 = vmax.f32 %v2158_v44, 0.0  ;;  %4289 = vst.msk [vmem:[%s6554_s16 + $0x84] sm:$0xf] %vm4255_vm3, %v4789_v62  ;;  %v3787_v21 = vmax.f32 %v7732_v11, %v3571_v33  ;;  %v3126_v7 = vmax.f32 %v2734_v3, 0.0  ;;  %v2179_v47 = vadd.f32 %v6707_v1, %v6956_v24  ;;  %v7155_v44 = vpop.f32.mrf.mxu0  ;;  %v7737_v3 = vld [vmem:[#allocation43_spill] sm:$0xff] }
 0x1dc   : > { %v3933_v32 = vmax.f32 %v3789_v63, %v3861_v54  ;;  %v3859_v52 = vmax.f32 %v7733_v57, %v3715_v17  ;;  %v3574_v8 = vadd.f32 %v6752_v38, %v3279_v41  ;;  %v3718_v50 = vadd.f32 %v6752_v38, %v3423_v2  ;;  %v7163_v54 = vpop.f32.mrf.mxu1 }
 0x1dd   : > { %v3277_v10 = vmul.f32 %v6737_v29, %v2982_v46  ;;  %v3421_v60 = vmul.f32 %v6737_v29, %v3126_v7  ;;  %v2987_v61 = vmax.f32 %v2179_v47, 0.0  ;;  %v2755_v6 = vadd.f32 %v6707_v1, %v6961_v28 }
 0x1de   : > { %v4794_v56 = vpack.c.bf16 %v3933_v32, %v3933_v32  ;;  %v3931_v42 = vmax.f32 %v3787_v21, %v3859_v52  ;;  %v3790_v24 = vmax.f32 %v7734_v15, %v3574_v8  ;;  %v3862_v25 = vmax.f32 %v6189_v20, %v3718_v50  ;;  %v7738_v21 = vld [vmem:[#allocation44_spill] sm:$0xff]  ;;  %v7177_v52 = vpop.f32.mrf.mxu0  ;;  %v7740_v15 = vld [vmem:[#allocation46_spill] sm:$0xff] }
 0x1df   : > { %v3572_v16 = vadd.f32 %v6752_v38, %v3277_v10  ;;  %v3716_v30 = vadd.f32 %v6752_v38, %v3421_v60  ;;  %v3282_v9 = vmul.f32 %v6737_v29, %v2987_v61  ;;  %v3131_v31 = vmax.f32 %v2755_v6, 0.0  ;;  %v7182_v60 = vpop.f32.mrf.mxu1  ;;  %v7739_v61 = vld [vmem:[#allocation45_spill] sm:$0xff] }
 0x1e0   : > { %4294 = vst.msk [vmem:[%s6554_s16 + $0x98] sm:$0xf] %vm4255_vm3, %v4794_v56  ;;  %v2171_v28 = vadd.f32 %v6707_v1, %v6975_v12  ;;  %v4792_v14 = vpack.c.bf16 %v3931_v42, %v3931_v42  ;;  %v3934_v0 = vmax.f32 %v3790_v24, %v3862_v25  ;;  %v2747_v20 = vadd.f32 %v6707_v1, %v6983_v34 }
 0x1e1   : > { %v3788_v63 = vmax.f32 %v7735_v39, %v3572_v16  ;;  %v3860_v19 = vmax.f32 %v7736_v13, %v3716_v30  ;;  %v3577_v53 = vadd.f32 %v6752_v38, %v3282_v9  ;;  %v3426_v58 = vmul.f32 %v6737_v29, %v3131_v31 }
 0x1e2   : > { %v2985_v45 = vmax.f32 %v2171_v28, 0.0  ;;  %4292 = vst.msk [vmem:[%s6554_s16 + $0x90] sm:$0xf] %vm4255_vm3, %v4792_v14  ;;  %v4795_v12 = vpack.c.bf16 %v3934_v0, %v3934_v0  ;;  %v3129_v62 = vmax.f32 %v2747_v20, 0.0  ;;  %v2182_v51 = vadd.f32 %v6707_v1, %v6997_v37  ;;  %v7196_v0 = vpop.f32.mrf.mxu0  ;;  %v7742_v20 = vld [vmem:[#allocation48_spill] sm:$0xff] }
 0x1e3   : > { %v2758_v34 = vadd.f32 %v6707_v1, %v7002_v22  ;;  %v3932_v33 = vmax.f32 %v3788_v63, %v3860_v19  ;;  %v3793_v17 = vmax.f32 %v7737_v3, %v3577_v53  ;;  %v3721_v41 = vadd.f32 %v6752_v38, %v3426_v58  ;;  %v7741_v63 = vld [vmem:[#allocation47_spill] sm:$0xff]  ;;  %v7201_v53 = vpop.f32.mrf.mxu1 }
 0x1e4   : > { %v3280_v2 = vmul.f32 %v6737_v29, %v2985_v45  ;;  %4295 = vst.msk [vmem:[%s6554_s16 + $0x9c] sm:$0xf] %vm4255_vm3, %v4795_v12  ;;  %v3424_v46 = vmul.f32 %v6737_v29, %v3129_v62  ;;  %v2988_v32 = vmax.f32 %v2182_v51, 0.0  ;;  %v2174_v37 = vadd.f32 %v6707_v1, %v7016_v43 }
 0x1e5   : > { %v3132_v11 = vmax.f32 %v2758_v34, 0.0  ;;  %v4793_v22 = vpack.c.bf16 %v3932_v33, %v3932_v33  ;;  %v3865_v7 = vmax.f32 %v7738_v21, %v3721_v41  ;;  %v2750_v57 = vadd.f32 %v6707_v1, %v7021_v55  ;;  %v7743_v34 = vld [vmem:[#allocation49_spill] sm:$0xff]  ;;  %v7223_v21 = vpop.f32.mrf.mxu1 }
 0x1e6   : > { %v3575_v47 = vadd.f32 %v6752_v38, %v3280_v2  ;;  %v3719_v8 = vadd.f32 %v6752_v38, %v3424_v46  ;;  %v3283_v50 = vmul.f32 %v6737_v29, %v2988_v32  ;;  %v2986_v56 = vmax.f32 %v2174_v37, 0.0 }
 0x1e7   : > { %v3427_v10 = vmul.f32 %v6737_v29, %v3132_v11  ;;  %4293 = vst.msk [vmem:[%s6554_s16 + $0x94] sm:$0xf] %vm4255_vm3, %v4793_v22  ;;  %v3937_v43 = vmax.f32 %v3793_v17, %v3865_v7  ;;  %v3130_v42 = vmax.f32 %v2750_v57, 0.0  ;;  %v2195_v55 = vadd.f32 %v6707_v1, %v7035_v5  ;;  %v7744_v17 = vld [vmem:[#allocation50_spill] sm:$0xff]  ;;  %v7215_v11 = vpop.f32.mrf.mxu0 }
 0x1e8   : > { %v3791_v6 = vmax.f32 %v7739_v61, %v3575_v47  ;;  %v3863_v24 = vmax.f32 %v7740_v15, %v3719_v8  ;;  %v3578_v25 = vadd.f32 %v6752_v38, %v3283_v50  ;;  %v3281_v30 = vmul.f32 %v6737_v29, %v2986_v56  ;;  %v7745_v47 = vld [vmem:[#allocation51_spill] sm:$0xff]  ;;  %v7746_v61 = vld [vmem:[#allocation52_spill] sm:$0xff] }
 0x1e9   : > { %v3722_v16 = vadd.f32 %v6752_v38, %v3427_v10  ;;  %v4798_v9 = vpack.c.bf16 %v3937_v43, %v3937_v43  ;;  %v3425_v31 = vmul.f32 %v6737_v29, %v3130_v42  ;;  %v2991_v28 = vmax.f32 %v2195_v55, 0.0  ;;  %v7237_v15 = vpop.f32.mrf.mxu0 }
 0x1ea   : > { %v2771_v14 = vadd.f32 %v6707_v1, %v7043_v23  ;;  %v3935_v39 = vmax.f32 %v3791_v6, %v3863_v24  ;;  %v3794_v5 = vmax.f32 %v7741_v63, %v3578_v25  ;;  %v3576_v19 = vadd.f32 %v6752_v38, %v3281_v30 }
 0x1eb   : > { %v3866_v13 = vmax.f32 %v7742_v20, %v3722_v16  ;;  %4298 = vst.msk [vmem:[%s6554_s16 + $0xa8] sm:$0xf] %vm4255_vm3, %v4798_v9  ;;  %v3720_v58 = vadd.f32 %v6752_v38, %v3425_v31  ;;  %v3286_v45 = vmul.f32 %v6737_v29, %v2991_v28  ;;  %v2187_v23 = vadd.f32 %v6707_v1, %v7057_v40  ;;  %v7242_v9 = vpop.f32.mrf.mxu1  ;;  %v7747_v31 = vld [vmem:[#allocation53_spill] sm:$0xff] }
 0x1ec   : > { %v3135_v12 = vmax.f32 %v2771_v14, 0.0  ;;  %v4796_v62 = vpack.c.bf16 %v3935_v39, %v3935_v39  ;;  %v3792_v33 = vmax.f32 %v7743_v34, %v3576_v19  ;;  %v2763_v3 = vadd.f32 %v6707_v1, %v7062_v36  ;;  %v7748_v39 = vld [vmem:[#allocation54_spill] sm:$0xff]  ;;  %v7750_v34 = vld [vmem:[#allocation56_spill] sm:$0xff] }
 0x1ed   : > { %v3938_v51 = vmax.f32 %v3794_v5, %v3866_v13  ;;  %v3864_v41 = vmax.f32 %v7744_v17, %v3720_v58  ;;  %v3581_v2 = vadd.f32 %v6752_v38, %v3286_v45  ;;  %v2989_v32 = vmax.f32 %v2187_v23, 0.0  ;;  %v7256_v23 = vpop.f32.mrf.mxu0  ;;  %v7261_v17 = vpop.f32.mrf.mxu1 }
 0x1ee   : > { %v3430_v46 = vmul.f32 %v6737_v29, %v3135_v12  ;;  %4296 = vst.msk [vmem:[%s6554_s16 + $0xa0] sm:$0xf] %vm4255_vm3, %v4796_v62  ;;  %v3133_v37 = vmax.f32 %v2763_v3, 0.0  ;;  %v2198_v22 = vadd.f32 %v6707_v1, %v7076_v26  ;;  %v2774_v36 = vadd.f32 %v6707_v1, %v7081_v49 }
 0x1ef   : > { %v4799_v40 = vpack.c.bf16 %v3938_v51, %v3938_v51  ;;  %v3936_v7 = vmax.f32 %v3792_v33, %v3864_v41  ;;  %v3797_v57 = vmax.f32 %v7745_v47, %v3581_v2  ;;  %v3284_v50 = vmul.f32 %v6737_v29, %v2989_v32  ;;  %v7749_v51 = vld [vmem:[#allocation55_spill] sm:$0xff] }
 0x1f0   : > { %v3725_v8 = vadd.f32 %v6752_v38, %v3430_v46  ;;  %v3428_v10 = vmul.f32 %v6737_v29, %v3133_v37  ;;  %v2992_v56 = vmax.f32 %v2198_v22, 0.0  ;;  %v3136_v43 = vmax.f32 %v2774_v36, 0.0  ;;  %v7751_v37 = vld [vmem:[#allocation57_spill] sm:$0xff] }
 0x1f1   : > { %4299 = vst.msk [vmem:[%s6554_s16 + $0xac] sm:$0xf] %vm4255_vm3, %v4799_v40  ;;  %v2190_v26 = vadd.f32 %v6707_v1, %v7095_v27  ;;  %v4797_v49 = vpack.c.bf16 %v3936_v7, %v3936_v7  ;;  %v3579_v42 = vadd.f32 %v6752_v38, %v3284_v50  ;;  %v2766_v55 = vadd.f32 %v6707_v1, %v7103_v48  ;;  %v7752_v7 = vld [vmem:[#allocation58_spill] sm:$0xff] }
 0x1f2   : > { %v3869_v6 = vmax.f32 %v7746_v61, %v3725_v8  ;;  %v3723_v24 = vadd.f32 %v6752_v38, %v3428_v10  ;;  %v3287_v25 = vmul.f32 %v6737_v29, %v2992_v56  ;;  %v3431_v16 = vmul.f32 %v6737_v29, %v3136_v43  ;;  %v7280_v10 = vpop.f32.mrf.mxu0  ;;  %v7753_v61 = vld [vmem:[#allocation59_spill] sm:$0xff] }
 0x1f3   : > { %v2990_v30 = vmax.f32 %v2190_v26, 0.0  ;;  %4297 = vst.msk [vmem:[%s6554_s16 + $0xa4] sm:$0xf] %vm4255_vm3, %v4797_v49  ;;  %v3795_v28 = vmax.f32 %v7747_v31, %v3579_v42  ;;  %v3134_v14 = vmax.f32 %v2766_v55, 0.0  ;;  %v2211_v48 = vadd.f32 %v6707_v1, %v7117_v59  ;;  %v7288_v26 = vpop.f32.mrf.mxu1  ;;  %v7295_v42 = vld [vmem:[%s7587_s3] ss:$0 sm:$0xff] }
 0x1f4   : > { %v3941_v27 = vmax.f32 %v3797_v57, %v3869_v6  ;;  %v3867_v63 = vmax.f32 %v7748_v39, %v3723_v24  ;;  %v3582_v5 = vadd.f32 %v6752_v38, %v3287_v25  ;;  %v3726_v20 = vadd.f32 %v6752_v38, %v3431_v16 }
 0x1f5   : > { %v3285_v13 = vmul.f32 %v6737_v29, %v2990_v30  ;;  %v3429_v58 = vmul.f32 %v6737_v29, %v3134_v14  ;;  %v2995_v45 = vmax.f32 %v2211_v48, 0.0  ;;  %v2787_v12 = vadd.f32 %v6707_v1, %v7122_v35  ;;  %v7270_v1 = vld [vmem:[%s7586_s2] ss:$0 sm:$0xff]  ;;  %v7754_v30 = vld [vmem:[#allocation60_spill] sm:$0xff]  ;;  %v7307_v14 = vpop.f32.mrf.mxu0 }
 0x1f6   : > { %v4802_v19 = vpack.c.bf16 %v3941_v27, %v3941_v27  ;;  %v3939_v62 = vmax.f32 %v3795_v28, %v3867_v63  ;;  %v3798_v59 = vmax.f32 %v7749_v51, %v3582_v5  ;;  %v3870_v33 = vmax.f32 %v7750_v34, %v3726_v20  ;;  %v7312_v48 = vld [vmem:[%s7588_s4] ss:$0 sm:$0xff]  ;;  %v7317_v20 = vpop.f32.mrf.mxu1 }
 0x1f7   : > { %v3580_v3 = vadd.f32 %v6752_v38, %v3285_v13  ;;  %v3724_v41 = vadd.f32 %v6752_v38, %v3429_v58  ;;  %v3290_v2 = vmul.f32 %v6737_v29, %v2995_v45  ;;  %v3139_v46 = vmax.f32 %v2787_v12, 0.0  ;;  %v7756_v45 = vld [vmem:[#allocation62_spill] sm:$0xff] }
 0x1f8   : > { %4302 = vst.msk [vmem:[%s6554_s16 + $0xb8] sm:$0xf] %vm4255_vm3, %v4802_v19  ;;  %v2203_v35 = vadd.f32 %v7270_v1, %v7136_v18  ;;  %v4800_v32 = vpack.c.bf16 %v3939_v62, %v3939_v62  ;;  %v3942_v40 = vmax.f32 %v3798_v59, %v3870_v33  ;;  %v2779_v36 = vadd.f32 %v7270_v1, %v7141_v4 }
 0x1f9   : > { %v3796_v22 = vmax.f32 %v7751_v37, %v3580_v3  ;;  %v3868_v47 = vmax.f32 %v7752_v7, %v3724_v41  ;;  %v3585_v57 = vadd.f32 %v6752_v38, %v3290_v2  ;;  %v3434_v8 = vmul.f32 %v6737_v29, %v3139_v46  ;;  %v7331_v2 = vpop.f32.mrf.mxu0 }
 0x1fa   : > { %v2993_v50 = vmax.f32 %v2203_v35, 0.0  ;;  %4300 = vst.msk [vmem:[%s6554_s16 + $0xb0] sm:$0xf] %vm4255_vm3, %v4800_v32  ;;  %v4803_v18 = vpack.c.bf16 %v3942_v40, %v3942_v40  ;;  %v3137_v56 = vmax.f32 %v2779_v36, 0.0  ;;  %v2214_v43 = vadd.f32 %v7270_v1, %v7155_v44  ;;  %v7757_v35 = vld [vmem:[#allocation63_spill] sm:$0xff]  ;;  %v7758_v32 = vld [vmem:[#allocation64_spill] sm:$0xff] }
 0x1fb   : > { %v2790_v4 = vadd.f32 %v7270_v1, %v7163_v54  ;;  %v3940_v49 = vmax.f32 %v3796_v22, %v3868_v47  ;;  %v3801_v6 = vmax.f32 %v7753_v61, %v3585_v57  ;;  %v3729_v29 = vadd.f32 %v6752_v38, %v3434_v8  ;;  %v7336_v22 = vpop.f32.mrf.mxu1 }
 0x1fc   : > { %v3288_v55 = vmul.f32 %v7295_v42, %v2993_v50  ;;  %4303 = vst.msk [vmem:[%s6554_s16 + $0xbc] sm:$0xf] %vm4255_vm3, %v4803_v18  ;;  %v3432_v44 = vmul.f32 %v7295_v42, %v3137_v56  ;;  %v2996_v54 = vmax.f32 %v2214_v43, 0.0  ;;  %v2206_v25 = vadd.f32 %v7270_v1, %v7177_v52  ;;  %v7759_v50 = vld [vmem:[#allocation65_spill] sm:$0xff]  ;;  %v7760_v43 = vld [vmem:[#allocation66_spill] sm:$0xff] }
 0x1fd   : > { %v3140_v24 = vmax.f32 %v2790_v4, 0.0  ;;  %v4801_v16 = vpack.c.bf16 %v3940_v49, %v3940_v49  ;;  %v3873_v27 = vmax.f32 %v7754_v30, %v3729_v29  ;;  %v2782_v28 = vadd.f32 %v7270_v1, %v7182_v60  ;;  %v7755_v60 = vld [vmem:[#allocation61_spill] sm:$0xff]  ;;  %v7350_v29 = vpop.f32.mrf.mxu0 }
 0x1fe   : > { %v3583_v31 = vadd.f32 %v6752_v38, %v3288_v55  ;;  %v3727_v39 = vadd.f32 %v7312_v48, %v3432_v44  ;;  %v3291_v63 = vmul.f32 %v7295_v42, %v2996_v54  ;;  %v2994_v5 = vmax.f32 %v2206_v25, 0.0  ;;  %v7358_v54 = vpop.f32.mrf.mxu1  ;;  %v7761_v25 = vld [vmem:[#allocation67_spill] sm:$0xff] }
 0x1ff   : > { %v3435_v52 = vmul.f32 %v7295_v42, %v3140_v24  ;;  %4301 = vst.msk [vmem:[%s6554_s16 + $0xb4] sm:$0xf] %vm4255_vm3, %v4801_v16  ;;  %v3945_v38 = vmax.f32 %v3801_v6, %v3873_v27  ;;  %v3138_v19 = vmax.f32 %v2782_v28, 0.0  ;;  %v2227_v58 = vadd.f32 %v7270_v1, %v7196_v0 }
 0x200   : > { %v3799_v13 = vmax.f32 %v7755_v60, %v3583_v31  ;;  %v3871_v12 = vmax.f32 %v7756_v45, %v3727_v39  ;;  %v3586_v62 = vadd.f32 %v7312_v48, %v3291_v63  ;;  %v3289_v59 = vmul.f32 %v7295_v42, %v2994_v5  ;;  %v7762_v63 = vld [vmem:[#allocation68_spill] sm:$0xff]  ;;  %v7372_v60 = vpop.f32.mrf.mxu0 }
 0x201   : > { %v3730_v51 = vadd.f32 %v7312_v48, %v3435_v52  ;;  %v4806_v34 = vpack.c.bf16 %v3945_v38, %v3945_v38  ;;  %v3433_v33 = vmul.f32 %v7295_v42, %v3138_v19  ;;  %v2999_v3 = vmax.f32 %v2227_v58, 0.0 }
 0x202   : > { %v2803_v41 = vadd.f32 %v7270_v1, %v7201_v53  ;;  %v3943_v46 = vmax.f32 %v3799_v13, %v3871_v12  ;;  %v3802_v0 = vmax.f32 %v7757_v35, %v3586_v62  ;;  %v3584_v37 = vadd.f32 %v7312_v48, %v3289_v59  ;;  %v7377_v12 = vpop.f32.mrf.mxu1  ;;  %v7763_v62 = vld [vmem:[#allocation69_spill] sm:$0xff] }
 0x203   : > { %v3874_v40 = vmax.f32 %v7758_v32, %v3730_v51  ;;  %4306 = vst.msk [vmem:[%s6554_s16 + $0xc8] sm:$0xf] %vm4255_vm3, %v4806_v34  ;;  %v3728_v36 = vadd.f32 %v7312_v48, %v3433_v33  ;;  %v3294_v7 = vmul.f32 %v7295_v42, %v2999_v3  ;;  %v2219_v53 = vadd.f32 %v7270_v1, %v7215_v11  ;;  %v7764_v34 = vld [vmem:[#allocation70_spill] sm:$0xff] }
 0x204   : > { %v3143_v47 = vmax.f32 %v2803_v41, 0.0  ;;  %v4804_v57 = vpack.c.bf16 %v3943_v46, %v3943_v46  ;;  %v3800_v18 = vmax.f32 %v7759_v50, %v3584_v37  ;;  %v2795_v56 = vadd.f32 %v7270_v1, %v7223_v21  ;;  %v7391_v37 = vpop.f32.mrf.mxu0 }
 0x205   : > { %v3946_v8 = vmax.f32 %v3802_v0, %v3874_v40  ;;  %v3872_v4 = vmax.f32 %v7760_v43, %v3728_v36  ;;  %v3589_v49 = vadd.f32 %v7312_v48, %v3294_v7  ;;  %v2997_v6 = vmax.f32 %v2219_v53, 0.0  ;;  %v7765_v7 = vld [vmem:[#allocation71_spill] sm:$0xff] }
 0x206   : > { %v3438_v61 = vmul.f32 %v7295_v42, %v3143_v47  ;;  %4304 = vst.msk [vmem:[%s6554_s16 + $0xc0] sm:$0xf] %vm4255_vm3, %v4804_v57  ;;  %v3141_v55 = vmax.f32 %v2795_v56, 0.0  ;;  %v2230_v44 = vadd.f32 %v7270_v1, %v7237_v15  ;;  %v2806_v21 = vadd.f32 %v7270_v1, %v7242_v9  ;;  %v7766_v47 = vld [vmem:[#allocation72_spill] sm:$0xff] }
 0x207   : > { %v4807_v11 = vpack.c.bf16 %v3946_v8, %v3946_v8  ;;  %v3944_v24 = vmax.f32 %v3800_v18, %v3872_v4  ;;  %v3805_v16 = vmax.f32 %v7761_v25, %v3589_v49  ;;  %v3292_v27 = vmul.f32 %v7295_v42, %v2997_v6  ;;  %v7396_v8 = vpop.f32.mrf.mxu1  ;;  %v7767_v49 = vld [vmem:[#allocation73_spill] sm:$0xff]  ;;  %v5110_v25 = vpop.f32.mrf.mxu0 }
 0x208   : > { %v3733_v30 = vadd.f32 %v7312_v48, %v3438_v61  ;;  %v3436_v31 = vmul.f32 %v7295_v42, %v3141_v55  ;;  %v3000_v28 = vmax.f32 %v2230_v44, 0.0  ;;  %v3144_v39 = vmax.f32 %v2806_v21, 0.0 }
 0x209   : > { %4307 = vst.msk [vmem:[%s6554_s16 + $0xcc] sm:$0xf] %vm4255_vm3, %v4807_v11  ;;  %v2222_v15 = vadd.f32 %v7270_v1, %v7256_v23  ;;  %v4805_v9 = vpack.c.bf16 %v3944_v24, %v3944_v24  ;;  %v3587_v5 = vadd.f32 %v7312_v48, %v3292_v27  ;;  %v2798_v38 = vadd.f32 %v7270_v1, %v7261_v17  ;;  %v7768_v11 = vld [vmem:[#allocation74_spill] sm:$0xff] }
 0x20a   : > { %v3877_v52 = vmax.f32 %v7762_v63, %v3733_v30  ;;  %v3731_v13 = vadd.f32 %v7312_v48, %v3436_v31  ;;  %v3295_v19 = vmul.f32 %v7295_v42, %v3000_v28  ;;  %v3439_v58 = vmul.f32 %v7295_v42, %v3144_v39  ;;  %v7769_v28 = vld [vmem:[#allocation75_spill] sm:$0xff] }
 0x20b   : > { %v2998_v45 = vmax.f32 %v2222_v15, 0.0  ;;  %4305 = vst.msk [vmem:[%s6554_s16 + $0xc4] sm:$0xf] %vm4255_vm3, %v4805_v9  ;;  %v3803_v51 = vmax.f32 %v7763_v62, %v3587_v5  ;;  %v3142_v59 = vmax.f32 %v2798_v38, 0.0  ;;  %v2243_v17 = vadd.f32 %v7270_v1, %v7280_v10 }
 0x20c   : > { %v3949_v23 = vmax.f32 %v3805_v16, %v3877_v52  ;;  %v3875_v33 = vmax.f32 %v7764_v34, %v3731_v13  ;;  %v3590_v3 = vadd.f32 %v7312_v48, %v3295_v19  ;;  %v3734_v41 = vadd.f32 %v7312_v48, %v3439_v58  ;;  %v7771_v34 = vld [vmem:[#allocation77_spill] sm:$0xff] }
 0x20d   : > { %v3293_v46 = vmul.f32 %v7295_v42, %v2998_v45  ;;  %v3437_v0 = vmul.f32 %v7295_v42, %v3142_v59  ;;  %v3003_v32 = vmax.f32 %v2243_v17, 0.0  ;;  %v2819_v40 = vadd.f32 %v7270_v1, %v7288_v26  ;;  %v2253_v45 = vpop.f32.mrf.mxu0 }
 0x20e   : > { %v4810_v35 = vpack.c.bf16 %v3949_v23, %v3949_v23  ;;  %v3947_v36 = vmax.f32 %v3803_v51, %v3875_v33  ;;  %v3806_v10 = vmax.f32 %v7765_v7, %v3590_v3  ;;  %v3878_v53 = vmax.f32 %v7766_v47, %v3734_v41 }
 0x20f   : > { %v3588_v57 = vadd.f32 %v7312_v48, %v3293_v46  ;;  %v3732_v50 = vadd.f32 %v7312_v48, %v3437_v0  ;;  %v3298_v18 = vmul.f32 %v7295_v42, %v3003_v32  ;;  %v3147_v56 = vmax.f32 %v2819_v40, 0.0  ;;  %v5113_v47 = vpop.f32.mrf.mxu0 }
 0x210   : > { %4310 = vst.msk [vmem:[%s6554_s16 + $0xd8] sm:$0xf] %vm4255_vm3, %v4810_v35  ;;  %v2235_v26 = vadd.f32 %v7270_v1, %v7307_v14  ;;  %v4808_v43 = vpack.c.bf16 %v3947_v36, %v3947_v36  ;;  %v3950_v4 = vmax.f32 %v3806_v10, %v3878_v53  ;;  %v2811_v6 = vadd.f32 %v7270_v1, %v7317_v20  ;;  %v5254_v20 = vpop.f32.mrf.mxu1 }
 0x211   : > { %v3804_v61 = vmax.f32 %v7767_v49, %v3588_v57  ;;  %v3876_v55 = vmax.f32 %v7768_v11, %v3732_v50  ;;  %v3593_v44 = vadd.f32 %v7312_v48, %v3298_v18  ;;  %v3442_v21 = vmul.f32 %v7295_v42, %v3147_v56  ;;  %v7773_v57 = vld [vmem:[#allocation79_spill] sm:$0xff]  ;;  %v7775_v11 = vld [vmem:[#allocation81_spill] sm:$0xff] }
 0x212   : > { %v3001_v24 = vmax.f32 %v2235_v26, 0.0  ;;  %4308 = vst.msk [vmem:[%s6554_s16 + $0xd0] sm:$0xf] %vm4255_vm3, %v4808_v43  ;;  %v4811_v16 = vpack.c.bf16 %v3950_v4, %v3950_v4  ;;  %v3145_v14 = vmax.f32 %v2811_v6, 0.0  ;;  %v2246_v30 = vadd.f32 %v7270_v1, %v7331_v2  ;;  %v2829_v17 = vpop.f32.mrf.mxu1 }
 0x213   : > { %v2822_v27 = vadd.f32 %v7270_v1, %v7336_v22  ;;  %v3948_v31 = vmax.f32 %v3804_v61, %v3876_v55  ;;  %v3809_v39 = vmax.f32 %v7769_v28, %v3593_v44  ;;  %v3737_v15 = vadd.f32 %v7312_v48, %v3442_v21  ;;  %v7770_v22 = vld [vmem:[#allocation76_spill] sm:$0xff]  ;;  %v7776_v21 = vld [vmem:[#allocation82_spill] sm:$0xff] }
 0x214   : > { %v3296_v9 = vmul.f32 %v7295_v42, %v3001_v24  ;;  %4311 = vst.msk [vmem:[%s6554_s16 + $0xdc] sm:$0xf] %vm4255_vm3, %v4811_v16  ;;  %v3440_v63 = vmul.f32 %v7295_v42, %v3145_v14  ;;  %v3004_v52 = vmax.f32 %v2246_v30, 0.0  ;;  %v2238_v2 = vadd.f32 %v7270_v1, %v7350_v29  ;;  %v5257_v26 = vpop.f32.mrf.mxu1 }
 0x215   : > { %v3148_v5 = vmax.f32 %v2822_v27, 0.0  ;;  %v4809_v38 = vpack.c.bf16 %v3948_v31, %v3948_v31  ;;  %v3881_v13 = vmax.f32 %v7770_v22, %v3737_v15  ;;  %v2814_v58 = vadd.f32 %v7270_v1, %v7358_v54  ;;  %v7772_v54 = vld [vmem:[#allocation78_spill] sm:$0xff]  ;;  %v2266_v27 = vpop.f32.mrf.mxu0 }
 0x216   : > { %v3591_v19 = vadd.f32 %v7312_v48, %v3296_v9  ;;  %v3735_v23 = vadd.f32 %v7312_v48, %v3440_v63  ;;  %v3299_v62 = vmul.f32 %v7295_v42, %v3004_v52  ;;  %v3002_v59 = vmax.f32 %v2238_v2, 0.0  ;;  %v2842_v15 = vpop.f32.mrf.mxu1 }
 0x217   : > { %v3443_v51 = vmul.f32 %v7295_v42, %v3148_v5  ;;  %4309 = vst.msk [vmem:[%s6554_s16 + $0xd4] sm:$0xf] %vm4255_vm3, %v4809_v38  ;;  %v3953_v29 = vmax.f32 %v3809_v39, %v3881_v13  ;;  %v3146_v3 = vmax.f32 %v2814_v58, 0.0  ;;  %v2259_v41 = vadd.f32 %v7270_v1, %v7372_v60  ;;  %v7774_v60 = vld [vmem:[#allocation80_spill] sm:$0xff] }
 0x218   : > { %v3807_v33 = vmax.f32 %v7771_v34, %v3591_v19  ;;  %v3879_v46 = vmax.f32 %v7772_v54, %v3735_v23  ;;  %v3594_v35 = vadd.f32 %v7312_v48, %v3299_v62  ;;  %v3297_v32 = vmul.f32 %v7295_v42, %v3002_v59  ;;  %v7778_v19 = vld [vmem:[#allocation84_spill] sm:$0xff]  ;;  %v5114_v62 = vpop.f32.mrf.mxu0 }
 0x219   : > { %v3738_v0 = vadd.f32 %v7312_v48, %v3443_v51  ;;  %v4814_v40 = vpack.c.bf16 %v3953_v29, %v3953_v29  ;;  %v3441_v36 = vmul.f32 %v7295_v42, %v3146_v3  ;;  %v3007_v7 = vmax.f32 %v2259_v41, 0.0 }
 0x21a   : > { %v2835_v10 = vadd.f32 %v7270_v1, %v7377_v12  ;;  %v3951_v53 = vmax.f32 %v3807_v33, %v3879_v46  ;;  %v3810_v50 = vmax.f32 %v7773_v57, %v3594_v35  ;;  %v3592_v56 = vadd.f32 %v7312_v48, %v3297_v32  ;;  %v5258_v33 = vpop.f32.mrf.mxu1  ;;  %v7780_v35 = vld [vmem:[#allocation86_spill] sm:$0xff]  ;;  %v2269_v57 = vpop.f32.mrf.mxu0 }
 0x21b   : > { %v3882_v18 = vmax.f32 %v7774_v60, %v3738_v0  ;;  %4314 = vst.msk [vmem:[%s6554_s16 + $0xe8] sm:$0xf] %vm4255_vm3, %v4814_v40  ;;  %v3736_v43 = vadd.f32 %v7312_v48, %v3441_v36  ;;  %v3302_v4 = vmul.f32 %v7295_v42, %v3007_v7  ;;  %v2251_v12 = vadd.f32 %v7270_v1, %v7391_v37  ;;  %v7781_v60 = vld [vmem:[#allocation87_spill] sm:$0xff] }
 0x21c   : > { %v3151_v49 = vmax.f32 %v2835_v10, 0.0  ;;  %v4812_v61 = vpack.c.bf16 %v3951_v53, %v3951_v53  ;;  %v3808_v55 = vmax.f32 %v7775_v11, %v3592_v56  ;;  %v2827_v44 = vadd.f32 %v7270_v1, %v7396_v8  ;;  %v7777_v8 = vld [vmem:[#allocation83_spill] sm:$0xff]  ;;  %v7782_v56 = vld [vmem:[#allocation88_spill] sm:$0xff] }
 0x21d   : > { %v3954_v6 = vmax.f32 %v3810_v50, %v3882_v18  ;;  %v3880_v24 = vmax.f32 %v7776_v21, %v3736_v43  ;;  %v3597_v16 = vadd.f32 %v7312_v48, %v3302_v4  ;;  %v3005_v30 = vmax.f32 %v2251_v12, 0.0  ;;  %v2845_v4 = vpop.f32.mrf.mxu1 }
 0x21e   : > { %v3446_v14 = vmul.f32 %v7295_v42, %v3151_v49  ;;  %4312 = vst.msk [vmem:[%s6554_s16 + $0xe0] sm:$0xf] %vm4255_vm3, %v4812_v61  ;;  %v3149_v37 = vmax.f32 %v2827_v44, 0.0  ;;  %v2262_v28 = vadd.f32 %v7270_v1, %v5110_v25  ;;  %v2838_v39 = vadd.f32 %v7270_v1, %v5254_v20 }
 0x21f   : > { %v4815_v31 = vpack.c.bf16 %v3954_v6, %v3954_v6  ;;  %v3952_v9 = vmax.f32 %v3808_v55, %v3880_v24  ;;  %v3813_v63 = vmax.f32 %v7777_v8, %v3597_v16  ;;  %v3300_v5 = vmul.f32 %v7295_v42, %v3005_v30  ;;  %v7783_v55 = vld [vmem:[#allocation89_spill] sm:$0xff]  ;;  %v7784_v24 = vld [vmem:[#allocation90_spill] sm:$0xff]  ;;  %v5261_v8 = vpop.f32.mrf.mxu1 }
 0x220   : > { %v3741_v52 = vadd.f32 %v7312_v48, %v3446_v14  ;;  %v3444_v2 = vmul.f32 %v7295_v42, %v3149_v37  ;;  %v3008_v38 = vmax.f32 %v2262_v28, 0.0  ;;  %v3152_v22 = vmax.f32 %v2838_v39, 0.0  ;;  %v5117_v37 = vpop.f32.mrf.mxu0 }
 0x221   : > { %4315 = vst.msk [vmem:[%s6554_s16 + $0xec] sm:$0xf] %vm4255_vm3, %v4815_v31  ;;  %v2254_v13 = vadd.f32 %v7270_v1, %v2253_v45  ;;  %v4813_v25 = vpack.c.bf16 %v3952_v9, %v3952_v9  ;;  %v3595_v58 = vadd.f32 %v7312_v48, %v3300_v5  ;;  %v2830_v23 = vadd.f32 %v7270_v1, %v2829_v17  ;;  %v7779_v45 = vld [vmem:[#allocation85_spill] sm:$0xff] }
 0x222   : > { %v3885_v20 = vmax.f32 %v7778_v19, %v3741_v52  ;;  %v3739_v51 = vadd.f32 %v7312_v48, %v3444_v2  ;;  %v3303_v59 = vmul.f32 %v7295_v42, %v3008_v38  ;;  %v3447_v29 = vmul.f32 %v7295_v42, %v3152_v22 }
 0x223   : > { %v3006_v34 = vmax.f32 %v2254_v13, 0.0  ;;  %4313 = vst.msk [vmem:[%s6554_s16 + $0xe4] sm:$0xf] %vm4255_vm3, %v4813_v25  ;;  %v3811_v41 = vmax.f32 %v7779_v45, %v3595_v58  ;;  %v3150_v54 = vmax.f32 %v2830_v23, 0.0  ;;  %v2275_v46 = vadd.f32 %v7270_v1, %v5113_v47 }
 0x224   : > { %v3957_v3 = vmax.f32 %v3813_v63, %v3885_v20  ;;  %v3883_v17 = vmax.f32 %v7780_v35, %v3739_v51  ;;  %v3598_v0 = vadd.f32 %v7312_v48, %v3303_v59  ;;  %v3742_v32 = vadd.f32 %v7312_v48, %v3447_v29  ;;  %v7786_v20 = vld [vmem:[#allocation92_spill] sm:$0xff]  ;;  %v2282_v51 = vpop.f32.mrf.mxu0 }
 0x225   : > { %v3301_v40 = vmul.f32 %v7295_v42, %v3006_v34  ;;  %v3445_v7 = vmul.f32 %v7295_v42, %v3150_v54  ;;  %v3011_v10 = vmax.f32 %v2275_v46, 0.0  ;;  %v2851_v53 = vadd.f32 %v7270_v1, %v5257_v26 }
 0x226   : > { %v4818_v36 = vpack.c.bf16 %v3957_v3, %v3957_v3  ;;  %v3955_v50 = vmax.f32 %v3811_v41, %v3883_v17  ;;  %v3814_v18 = vmax.f32 %v7781_v60, %v3598_v0  ;;  %v3886_v47 = vmax.f32 %v7782_v56, %v3742_v32  ;;  %v2858_v3 = vpop.f32.mrf.mxu1  ;;  %v7787_v41 = vld [vmem:[#allocation93_spill] sm:$0xff]  ;;  %v7788_v17 = vld [vmem:[#allocation94_spill] sm:$0xff] }
 0x227   : > { %v3596_v43 = vadd.f32 %v7312_v48, %v3301_v40  ;;  %v3740_v49 = vadd.f32 %v7312_v48, %v3445_v7  ;;  %v3306_v12 = vmul.f32 %v7295_v42, %v3011_v10  ;;  %v3155_v61 = vmax.f32 %v2851_v53, 0.0 }
 0x228   : > { %4318 = vst.msk [vmem:[%s6554_s16 + $0xf8] sm:$0xf] %vm4255_vm3, %v4818_v36  ;;  %v2267_v6 = vadd.f32 %v7270_v1, %v2266_v27  ;;  %v4816_v26 = vpack.c.bf16 %v3955_v50, %v3955_v50  ;;  %v3958_v11 = vmax.f32 %v3814_v18, %v3886_v47  ;;  %v2843_v21 = vadd.f32 %v7270_v1, %v2842_v15  ;;  %v7785_v15 = vld [vmem:[#allocation91_spill] sm:$0xff]  ;;  %v5118_v50 = vpop.f32.mrf.mxu0  ;;  %v7790_v47 = vld [vmem:[#allocation96_spill] sm:$0xff] }
 0x229   : > { %v3812_v44 = vmax.f32 %v7783_v55, %v3596_v43  ;;  %v3884_v16 = vmax.f32 %v7784_v24, %v3740_v49  ;;  %v3601_v14 = vadd.f32 %v7312_v48, %v3306_v12  ;;  %v3450_v30 = vmul.f32 %v7295_v42, %v3155_v61  ;;  %v7789_v18 = vld [vmem:[#allocation95_spill] sm:$0xff]  ;;  %v5262_v49 = vpop.f32.mrf.mxu1 }
 0x22a   : > { %v3009_v31 = vmax.f32 %v2267_v6, 0.0  ;;  %4316 = vst.msk [vmem:[%s6554_s16 + $0xf0] sm:$0xf] %vm4255_vm3, %v4816_v26  ;;  %v4819_v28 = vpack.c.bf16 %v3958_v11, %v3958_v11  ;;  %v3153_v39 = vmax.f32 %v2843_v21, 0.0  ;;  %v2278_v27 = vadd.f32 %v7270_v1, %v5114_v62 }
 0x22b   : > { %v2854_v9 = vadd.f32 %v7270_v1, %v5258_v33  ;;  %v3956_v63 = vmax.f32 %v3812_v44, %v3884_v16  ;;  %v3817_v52 = vmax.f32 %v7785_v15, %v3601_v14  ;;  %v3745_v5 = vadd.f32 %v7312_v48, %v3450_v30  ;;  %v7791_v44 = vld [vmem:[#allocation97_spill] sm:$0xff]  ;;  %v7792_v16 = vld [vmem:[#allocation99_spill] sm:$0xff] }
 0x22c   : > { %v3304_v2 = vmul.f32 %v7295_v42, %v3009_v31  ;;  %4319 = vst.msk [vmem:[%s6554_s16 + $0xfc] sm:$0xf] %vm4255_vm3, %v4819_v28  ;;  %v3448_v38 = vmul.f32 %v7295_v42, %v3153_v39  ;;  %v3012_v22 = vmax.f32 %v2278_v27, 0.0  ;;  %v2270_v25 = vadd.f32 %v7270_v1, %v2269_v57  ;;  %v2285_v28 = vpop.f32.mrf.mxu0 }
 0x22d   : > { %v3156_v13 = vmax.f32 %v2854_v9, 0.0  ;;  %v4817_v19 = vpack.c.bf16 %v3956_v63, %v3956_v63  ;;  %v3889_v58 = vmax.f32 %v7786_v20, %v3745_v5  ;;  %v2846_v62 = vadd.f32 %v7270_v1, %v2845_v4  ;;  %v2861_v63 = vpop.f32.mrf.mxu1 }
 0x22e   : > { %v3599_v23 = vadd.f32 %v7312_v48, %v3304_v2  ;;  %v3743_v59 = vadd.f32 %v7312_v48, %v3448_v38  ;;  %v3307_v29 = vmul.f32 %v7295_v42, %v3012_v22  ;;  %v3010_v33 = vmax.f32 %v2270_v25, 0.0 }
 0x22f   : > { %v3451_v34 = vmul.f32 %v7295_v42, %v3156_v13  ;;  %4317 = vst.msk [vmem:[%s6554_s16 + $0xf4] sm:$0xf] %vm4255_vm3, %v4817_v19  ;;  %v3961_v45 = vmax.f32 %v3817_v52, %v3889_v58  ;;  %v3154_v46 = vmax.f32 %v2846_v62, 0.0  ;;  %v2291_v35 = vadd.f32 %v7270_v1, %v5117_v37  ;;  %v7793_v52 = vld [vmem:[#allocation100_spill] sm:$0xff]  ;;  %v7794_v58 = vld [vmem:[#allocation101_spill] sm:$0xff] }
 0x230   : > { %v3815_v54 = vmax.f32 %v7787_v41, %v3599_v23  ;;  %v3887_v0 = vmax.f32 %v7788_v17, %v3743_v59  ;;  %v3602_v32 = vadd.f32 %v7312_v48, %v3307_v29  ;;  %v3305_v36 = vmul.f32 %v7295_v42, %v3010_v33 }
 0x231   : > { %v3746_v40 = vadd.f32 %v7312_v48, %v3451_v34  ;;  %v4822_v7 = vpack.c.bf16 %v3961_v45, %v3961_v45  ;;  %v3449_v10 = vmul.f32 %v7295_v42, %v3154_v46  ;;  %v3015_v53 = vmax.f32 %v2291_v35, 0.0  ;;  %v7797_v46 = vld [vmem:[#allocation102_spill] sm:$0xff] }
 0x232   : > { %v2867_v57 = vadd.f32 %v7270_v1, %v5261_v8  ;;  %v3959_v60 = vmax.f32 %v3815_v54, %v3887_v0  ;;  %v3818_v56 = vmax.f32 %v7789_v18, %v3602_v32  ;;  %v3600_v4 = vadd.f32 %v7312_v48, %v3305_v36  ;;  %v7798_v0 = vld [vmem:[#allocation103_spill] sm:$0xff] }
 0x233   : > { %v3890_v43 = vmax.f32 %v7790_v47, %v3746_v40  ;;  %4322 = vst.msk [vmem:[%s6554_s16 + $0x108] sm:$0xf] %vm4255_vm3, %v4822_v7  ;;  %v3744_v12 = vadd.f32 %v7312_v48, %v3449_v10  ;;  %v3310_v61 = vmul.f32 %v7295_v42, %v3015_v53  ;;  %v2283_v26 = vadd.f32 %v7270_v1, %v2282_v51  ;;  %v7799_v7 = vld [vmem:[#allocation105_spill] sm:$0xff] }
 0x234   : > { %v3159_v6 = vmax.f32 %v2867_v57, 0.0  ;;  %v4820_v11 = vpack.c.bf16 %v3959_v60, %v3959_v60  ;;  %v3816_v21 = vmax.f32 %v7791_v44, %v3600_v4  ;;  %v2859_v24 = vadd.f32 %v7270_v1, %v2858_v3  ;;  %v7795_v3 = vld [vmem:[#allocation98_spill] sm:$0xff]  ;;  %v7800_v60 = vld [vmem:[#allocation104_spill] sm:$0xff] }
 0x235   : > { %v3962_v55 = vmax.f32 %v3818_v56, %v3890_v43  ;;  %v3888_v14 = vmax.f32 %v7792_v16, %v3744_v12  ;;  %v3605_v30 = vadd.f32 %v7312_v48, %v3310_v61  ;;  %v3013_v37 = vmax.f32 %v2283_v26, 0.0  ;;  %v7801_v56 = vld [vmem:[#allocation106_spill] sm:$0xff] }
 0x236   : > { %v3454_v31 = vmul.f32 %v7295_v42, %v3159_v6  ;;  %4320 = vst.msk [vmem:[%s6554_s16 + $0x100] sm:$0xf] %vm4255_vm3, %v4820_v11  ;;  %v3157_v27 = vmax.f32 %v2859_v24, 0.0  ;;  %v2294_v9 = vadd.f32 %v7270_v1, %v5118_v50  ;;  %v2870_v8 = vadd.f32 %v7270_v1, %v5262_v49 }
 0x237   : > { %v4823_v39 = vpack.c.bf16 %v3962_v55, %v3962_v55  ;;  %v3960_v15 = vmax.f32 %v3816_v21, %v3888_v14  ;;  %v3821_v5 = vmax.f32 %v7793_v52, %v3605_v30  ;;  %v3308_v38 = vmul.f32 %v7295_v42, %v3013_v37 }
 0x238   : > { %v3749_v2 = vadd.f32 %v7312_v48, %v3454_v31  ;;  %v3452_v22 = vmul.f32 %v7295_v42, %v3157_v27  ;;  %v3016_v13 = vmax.f32 %v2294_v9, 0.0  ;;  %v3160_v25 = vmax.f32 %v2870_v8, 0.0 }
 0x239   : > { %4323 = vst.msk [vmem:[%s6554_s16 + $0x10c] sm:$0xf] %vm4255_vm3, %v4823_v39  ;;  %v2286_v19 = vadd.f32 %v7270_v1, %v2285_v28  ;;  %v4821_v20 = vpack.c.bf16 %v3960_v15, %v3960_v15  ;;  %v3603_v62 = vadd.f32 %v7312_v48, %v3308_v38  ;;  %v2862_v51 = vadd.f32 %v7270_v1, %v2861_v63 }
 0x23a   : > { %v3893_v23 = vmax.f32 %v7794_v58, %v3749_v2  ;;  %v3747_v59 = vadd.f32 %v7312_v48, %v3452_v22  ;;  %v3311_v29 = vmul.f32 %v7295_v42, %v3016_v13  ;;  %v3455_v34 = vmul.f32 %v7295_v42, %v3160_v25 }
 0x23b   : > { %v3014_v33 = vmax.f32 %v2286_v19, 0.0  ;;  %v7796_v45 = vmax.f32 %v7795_v3, 0.0  ;;  %4321 = vst.msk [vmem:[%s6554_s16 + $0x104] sm:$0xf] %vm4255_vm3, %v4821_v20  ;;  %v3819_v35 = vmax.f32 %v7797_v46, %v3603_v62  ;;  %v3158_v17 = vmax.f32 %v2862_v51, 0.0 }
 0x23c   : > { %v3965_v54 = vmax.f32 %v3821_v5, %v3893_v23  ;;  %v3891_v1 = vmax.f32 %v7798_v0, %v3747_v59  ;;  %v3606_v32 = vadd.f32 %v7312_v48, %v3311_v29  ;;  %v3750_v40 = vadd.f32 %v7312_v48, %v3455_v34 }
 0x23d   : > { %v3381_v41 = vmul.f32 %v7295_v42, %v7796_v45  ;;  %v3309_v36 = vmul.f32 %v7295_v42, %v3014_v33  ;;  %v3532_v10 = vadd.f32 %v7312_v48, %v7799_v7  ;;  %v3453_v57 = vmul.f32 %v7295_v42, %v3158_v17 }
 0x23e   : > { %v4826_v53 = vpack.c.bf16 %v3965_v54, %v3965_v54  ;;  %v3963_v50 = vmax.f32 %v3819_v35, %v3891_v1  ;;  %v3822_v18 = vmax.f32 %v7800_v60, %v3606_v32  ;;  %v3894_v47 = vmax.f32 %v7801_v56, %v3750_v40 }
 0x23f   : > { %v3604_v43 = vadd.f32 %v7312_v48, %v3309_v36  ;;  %v3676_v4 = vadd.f32 %v7312_v48, %v3381_v41  ;;  %v3748_v49 = vadd.f32 %v7312_v48, %v3453_v57 }
 0x240   : > { %4326 = vst.msk [vmem:[%s6554_s16 + $0x118] sm:$0xf] %vm4255_vm3, %v4826_v53  ;;  %v4824_v12 = vpack.c.bf16 %v3963_v50, %v3963_v50  ;;  %v3966_v61 = vmax.f32 %v3822_v18, %v3894_v47 }
 0x241   : > { %v3820_v6 = vmax.f32 %v3532_v10, %v3604_v43  ;;  %v3892_v26 = vmax.f32 %v3676_v4, %v3748_v49 }
 0x242   : > { %4324 = vst.msk [vmem:[%s6554_s16 + $0x110] sm:$0xf] %vm4255_vm3, %v4824_v12  ;;  %v4827_v42 = vpack.c.bf16 %v3966_v61, %v3966_v61 }
 0x243   : > { %v3964_v11 = vmax.f32 %v3820_v6, %v3892_v26 }
 0x244   : > { %4327 = vst.msk [vmem:[%s6554_s16 + $0x11c] sm:$0xf] %vm4255_vm3, %v4827_v42 }
 0x245   : > { %v4825_v55 = vpack.c.bf16 %v3964_v11, %v3964_v11 }
 0x247   : > { %4325 = vst.msk [vmem:[%s6554_s16 + $0x114] sm:$0xf] %vm4255_vm3, %v4825_v55 }
 0x248 PF: > { %s15_s18 = sadd.s32 1, %s5436_s18  }
 0x249   : > { %p12_p4 = scmp.ge.s32.totalorder %s15_s18, 4  }
 0x24b   :  { %14 = sbr.rel (!%p12_p4) target bundleno = 1 (0x1), region = 70 }

// kernel: simple_cnn_forward.5
= control target key start
LH: loop header
LB: loop body
LE: loop exit
PB: predicated region body
PF: predicated region fallthrough
CT: control target
= control target key end

     0   :  { %s2811_s18 = smov 0   ;;  %s3798_s0 = inlined_call_operand.vmem [shape: bf16[2,4,144,288], index: 0, kind: input, shape index: {}]   ;;  %s3799_s1 = inlined_call_operand.vmem [shape: bf16[288,32], index: 1, kind: input, shape index: {}]   ;;  %s3800_s2 = inlined_call_operand.vmem [shape: f32[1,32], index: 2, kind: input, shape index: {}]   ;;  %s3801_s3 = inlined_call_operand.vmem [shape: f32[1,32], index: 3, kind: input, shape index: {}]   ;;  %s3802_s4 = inlined_call_operand.vmem [shape: f32[1,32], index: 4, kind: input, shape index: {}]   ;;  %s3803_s5 = inlined_call_operand.vmem [shape: bf16[2,144,32], index: 5, kind: output, shape index: {}]  }
   0x1 LB: > { %s2242_s19 = sadd.s32 4294967295, %s2778_s18   ;;  %p2246_p0 = scmp.ge.s32.totalorder %s2778_s18, 1  ;;  %s2778_s18 = sphi %s2811_s18, %s15_s18  }
   0x2   : > { %p187_p1 = scmp.lt.s32.totalorder %s2778_s18, 3 }
   0x4   : > { %p188_p2 = pnand %p2246_p0, %p187_p1 }
   0x6   : > { %191 = sbr.rel (%p188_p2) target bundleno = 506 (0x1fa), region = 40 }
   0xb   : > { %v2609_v0 = vld [vmem:[%s3799_s1 + $0x38] sm:$0xff]   ;;  %v2780_v1 = vmov 0   ;;  %v2610_v2 = vld [vmem:[%s3799_s1 + $0x30] sm:$0xff]   ;;  %p215_p3 = scmp.lt.s32.totalorder %s2242_s19, 1  ;;  %v2611_v3 = vld [vmem:[%s3799_s1 + $0x28] sm:$0xff]   ;;  %vm1061_vm0 = vcmask 261120  }
   0xc   : > { %1170 = vmatprep.subr.bf16.mxu0 %v2780_v1  ;;  %2566 = vmatprep.subr.bf16.mxu1 %v2780_v1  ;;  %v2612_v4 = vld [vmem:[%s3799_s1 + $0x20] sm:$0xff]   ;;  %v2613_v5 = vld [vmem:[%s3799_s1 + $0x18] sm:$0xff]   ;;  %v2614_v7 = vld [vmem:[%s3799_s1 + $0x10] sm:$0xff]   ;;  %vm2168_vm1 = vcmask 257024  }
   0xd   : > { %1171 = vmatpush1.bf16.msra.mxu0 %v2609_v0  ;;  %2582 = vmatpush1.bf16.msra.mxu1 %v2609_v0  ;;  %s3896_s19 = smov (!%p215_p3, %s2242_s19), 1  ;;  %v2615_v9 = vld [vmem:[%s3799_s1 + $0x8] sm:$0xff]   ;;  %v2616_v10 = vld [vmem:[%s3799_s1] sm:$0xff]   ;;  %v2617_v11 = vld [vmem:[%s3799_s1 + $0x78] sm:$0xff]  }
   0xe   : > { %1172 = vmatprep.subr.bf16.mxu0 %v2780_v1  ;;  %2567 = vmatprep.subr.bf16.mxu1 %v2780_v1  ;;  %s2598_s28 = smul.u32 864, %s3896_s19  ;;  %v2618_v12 = vld [vmem:[%s3799_s1 + $0x70] sm:$0xff]   ;;  %v2619_v13 = vld [vmem:[%s3799_s1 + $0x68] sm:$0xff]   ;;  %v2620_v14 = vld [vmem:[%s3799_s1 + $0x60] sm:$0xff]  }
   0xf   : > { %v2621_v15 = vld [vmem:[%s3799_s1 + $0x58] sm:$0xff]   ;;  %v2622_v16 = vld [vmem:[%s3799_s1 + $0x50] sm:$0xff]   ;;  %v2623_v17 = vld [vmem:[%s3799_s1 + $0x48] sm:$0xff]   ;;  %s2599_s20 = smul.u32 72, %s3896_s19 }
  0x10   : > { %s2848_s8 = scalar_lea.vmem %s3798_s0, %s2598_s28  ;;  %v2624_v18 = vld [vmem:[%s3799_s1 + $0x40] sm:$0xff]   ;;  %v2631_v19 = vld [vmem:[%s3799_s1 + $0x88] sm:$0xff]  }
  0x11   : > { %1173 = vmatpush1.bf16.msra.mxu0 %v2610_v2  ;;  %2583 = vmatpush1.bf16.msra.mxu1 %v2610_v2  ;;  %v2627_v6 = vld [vmem:[%s2848_s8 + $0x4] ss:$12 sps:$4 sm:$0xff]   ;;  %v2630_v8 = vld [vmem:[%s2848_s8 + $0x28c] ss:$12 sps:$4 sm:$0xff]   ;;  %v2628_v21 = vld [vmem:[%s2848_s8 + $0x288] ss:$12 sps:$4 sm:$0xff]   ;;  %s3607_s22 = scalar_lea.vmem %s3803_s5, %s2599_s20 }
  0x12   : > { %1174 = vmatprep.subr.bf16.mxu0 %v2780_v1  ;;  %2568 = vmatprep.subr.bf16.mxu1 %v2780_v1  ;;  %v2625_v20 = vld [vmem:[%s2848_s8] ss:$12 sps:$4 sm:$0xff]   ;;  %v2632_v22 = vld [vmem:[%s2848_s8 + $0x1c] ss:$12 sps:$4 sm:$0xff]   ;;  %v2634_v23 = vld [vmem:[%s2848_s8 + $0x2a4] ss:$12 sps:$4 sm:$0xff]  }
  0x13   : > { %1202 = vmatprep.mubr.bf16.mxu0 %v2627_v6  ;;  %1418 = vmatprep.mubr.bf16.mxu1 %v2630_v8  ;;  %v2656_v24 = vld [vmem:[%s3799_s1 + $0x80] sm:$0xff]   ;;  %v2640_v28 = vld [vmem:[%s2848_s8 + $0x2bc] ss:$12 sps:$4 sm:$0xff]   ;;  %v2644_v31 = vld [vmem:[%s2848_s8 + $0x4c] ss:$12 sps:$4 sm:$0xff]  }
  0x14   : > { %v2636_v25 = vld [vmem:[%s2848_s8 + $0x18] ss:$12 sps:$4 sm:$0xff]   ;;  %v2637_v26 = vld [vmem:[%s2848_s8 + $0x2a0] ss:$12 sps:$4 sm:$0xff]   ;;  %v2642_v29 = vld [vmem:[%s2848_s8 + $0x30] ss:$12 sps:$4 sm:$0xff]  }
  0x15   : > { %1175 = vmatpush1.bf16.msra.mxu0 %v2611_v3  ;;  %2584 = vmatpush1.bf16.msra.mxu1 %v2611_v3  ;;  %v2638_v27 = vld [vmem:[%s2848_s8 + $0x34] ss:$12 sps:$4 sm:$0xff]   ;;  %v2643_v30 = vld [vmem:[%s2848_s8 + $0x2b8] ss:$12 sps:$4 sm:$0xff]   ;;  %v2649_v34 = vld [vmem:[%s2848_s8 + $0x2d0] ss:$12 sps:$4 sm:$0xff]  }
  0x16   : > { %1176 = vmatprep.subr.bf16.mxu0 %v2780_v1  ;;  %2569 = vmatprep.subr.bf16.mxu1 %v2780_v1  ;;  %v2646_v32 = vld [vmem:[%s2848_s8 + $0x2d4] ss:$12 sps:$4 sm:$0xff]   ;;  %v2650_v35 = vld [vmem:[%s2848_s8 + $0x64] ss:$12 sps:$4 sm:$0xff]   ;;  %v2652_v36 = vld [vmem:[%s2848_s8 + $0x2ec] ss:$12 sps:$4 sm:$0xff]  }
  0x17   : > { %v2648_v33 = vld [vmem:[%s2848_s8 + $0x48] ss:$12 sps:$4 sm:$0xff]   ;;  %v2654_v37 = vld [vmem:[%s2848_s8 + $0x60] ss:$12 sps:$4 sm:$0xff]   ;;  %v2659_v40 = vld [vmem:[%s2848_s8 + $0x304] ss:$12 sps:$4 sm:$0xff]  }
  0x18   : > { %v2655_v38 = vld [vmem:[%s2848_s8 + $0x2e8] ss:$12 sps:$4 sm:$0xff]   ;;  %v2661_v41 = vld [vmem:[%s2848_s8 + $0x78] ss:$12 sps:$4 sm:$0xff]   ;;  %v2662_v42 = vld [vmem:[%s2848_s8 + $0x300] ss:$12 sps:$4 sm:$0xff]  }
  0x19   : > { %1177 = vmatpush1.bf16.msra.mxu0 %v2612_v4  ;;  %2585 = vmatpush1.bf16.msra.mxu1 %v2612_v4  ;;  %v2657_v39 = vld [vmem:[%s2848_s8 + $0x7c] ss:$12 sps:$4 sm:$0xff]   ;;  %v2663_v43 = vld [vmem:[%s2848_s8 + $0x94] ss:$12 sps:$4 sm:$0xff]   ;;  %v2668_v46 = vld [vmem:[%s2848_s8 + $0x318] ss:$12 sps:$4 sm:$0xff]  }
  0x1a   : > { %1178 = vmatprep.subr.bf16.mxu0 %v2780_v1  ;;  %2570 = vmatprep.subr.bf16.mxu1 %v2780_v1  ;;  %v2665_v44 = vld [vmem:[%s2848_s8 + $0x31c] ss:$12 sps:$4 sm:$0xff]   ;;  %v2669_v47 = vld [vmem:[%s2848_s8 + $0xac] ss:$12 sps:$4 sm:$0xff]   ;;  %v2671_v48 = vld [vmem:[%s2848_s8 + $0x334] ss:$12 sps:$4 sm:$0xff]  }
  0x1b   : > { %v2667_v45 = vld [vmem:[%s2848_s8 + $0x90] ss:$12 sps:$4 sm:$0xff]   ;;  %v2673_v49 = vld [vmem:[%s2848_s8 + $0xa8] ss:$12 sps:$4 sm:$0xff]   ;;  %v2677_v52 = vld [vmem:[%s2848_s8 + $0x34c] ss:$12 sps:$4 sm:$0xff]  }
  0x1c   : > { %v2674_v50 = vld [vmem:[%s2848_s8 + $0x330] ss:$12 sps:$4 sm:$0xff]   ;;  %v2679_v53 = vld [vmem:[%s2848_s8 + $0xc0] ss:$12 sps:$4 sm:$0xff]   ;;  %v2680_v54 = vld [vmem:[%s2848_s8 + $0x348] ss:$12 sps:$4 sm:$0xff]  }
  0x1d   : > { %1179 = vmatpush1.bf16.msra.mxu0 %v2613_v5  ;;  %2586 = vmatpush1.bf16.msra.mxu1 %v2613_v5  ;;  %v2675_v51 = vld [vmem:[%s2848_s8 + $0xc4] ss:$12 sps:$4 sm:$0xff]   ;;  %v2681_v55 = vld [vmem:[%s2848_s8 + $0xdc] ss:$12 sps:$4 sm:$0xff]   ;;  %v2685_v58 = vld [vmem:[%s2848_s8 + $0x20] ss:$12 sps:$4 sm:$0xff]  }
  0x1e   : > { %1180 = vmatprep.subr.bf16.mxu0 %v2780_v1  ;;  %2571 = vmatprep.subr.bf16.mxu1 %v2780_v1  ;;  %v2683_v56 = vld [vmem:[%s2848_s8 + $0x8] ss:$12 sps:$4 sm:$0xff]   ;;  %v2684_v57 = vld [vmem:[%s2848_s8 + $0xd8] ss:$12 sps:$4 sm:$0xff]   ;;  %v2689_v61 = vld [vmem:[%s2848_s8 + $0xf0] ss:$12 sps:$4 sm:$0xff]  }
  0x1f   : > { %v2686_v59 = vld [vmem:[%s2848_s8 + $0xf4] ss:$12 sps:$4 sm:$0xff]   ;;  %v2688_v60 = vld [vmem:[%s2848_s8 + $0x38] ss:$12 sps:$4 sm:$0xff]   ;;  %v2690_v62 = vld [vmem:[%s2848_s8 + $0x50] ss:$12 sps:$4 sm:$0xff]  }
  0x20   : > { %v2691_v63 = vld [vmem:[%s2848_s8 + $0x10c] ss:$12 sps:$4 sm:$0xff]   ;;  %v2693_v0 = vld [vmem:[%s2848_s8 + $0x68] ss:$12 sps:$4 sm:$0xff]   ;;  %v2696_v3 = vld [vmem:[%s2848_s8 + $0x124] ss:$12 sps:$4 sm:$0xff]  }
  0x21   : > { %1181 = vmatpush1.bf16.msra.mxu0 %v2614_v7  ;;  %2587 = vmatpush1.bf16.msra.mxu1 %v2614_v7  ;;  %v2695_v2 = vld [vmem:[%s2848_s8 + $0x80] ss:$12 sps:$4 sm:$0xff]   ;;  %v2698_v4 = vld [vmem:[%s2848_s8 + $0x98] ss:$12 sps:$4 sm:$0xff]   ;;  %v2700_v6 = vld [vmem:[%s2848_s8 + $0xb0] ss:$12 sps:$4 sm:$0xff]  }
  0x22   : > { %1182 = vmatprep.subr.bf16.mxu0 %v2780_v1  ;;  %2572 = vmatprep.subr.bf16.mxu1 %v2780_v1  ;;  %v2699_v5 = vld [vmem:[%s2848_s8 + $0x120] ss:$12 sps:$4 sm:$0xff]   ;;  %v2701_v7 = vld [vmem:[%s2848_s8 + $0x13c] ss:$12 sps:$4 sm:$0xff]  }
  0x23   : > { %v2703_v8 = vld [vmem:[%s2848_s8 + $0xc8] ss:$12 sps:$4 sm:$0xff]  }
  0x25   : > { %1183 = vmatpush1.bf16.msra.mxu0 %v2615_v9  ;;  %2588 = vmatpush1.bf16.msra.mxu1 %v2615_v9  ;;  %v2704_v9 = vld [vmem:[%s2848_s8 + $0x138] ss:$12 sps:$4 sm:$0xff]  }
  0x26   : > { %1184 = vmatprep.subr.bf16.mxu0 %v2780_v1  ;;  %2573 = vmatprep.subr.bf16.mxu1 %v2780_v1 }
  0x29   : > { %1185 = vmatpush1.bf16.msra.mxu0 %v2616_v10  ;;  %2589 = vmatpush1.bf16.msra.mxu1 %v2616_v10  ;;  %v2705_v10 = vld [vmem:[%s2848_s8 + $0xe0] ss:$12 sps:$4 sm:$0xff]  }
  0x2a   : > { %1186 = vmatprep.subr.bf16.mxu0 %v2780_v1  ;;  %2574 = vmatprep.subr.bf16.mxu1 %v2780_v1 }
  0x2d   : > { %1187 = vmatpush2.bf16.msra.mxu0 %v2617_v11  ;;  %2590 = vmatpush2.bf16.msra.mxu1 %v2617_v11  ;;  %v2706_v11 = vld [vmem:[%s2848_s8 + $0x154] ss:$12 sps:$4 sm:$0xff]  }
  0x2e   : > { %1188 = vmatprep.subr.bf16.mxu0 %v2780_v1  ;;  %2575 = vmatprep.subr.bf16.mxu1 %v2780_v1 }
  0x31   : > { %1189 = vmatpush2.bf16.msra.mxu0 %v2618_v12  ;;  %2591 = vmatpush2.bf16.msra.mxu1 %v2618_v12  ;;  %v2708_v12 = vld [vmem:[%s2848_s8 + $0xf8] ss:$12 sps:$4 sm:$0xff]  }
  0x32   : > { %1190 = vmatprep.subr.bf16.mxu0 %v2780_v1  ;;  %2576 = vmatprep.subr.bf16.mxu1 %v2780_v1 }
  0x35   : > { %1191 = vmatpush2.bf16.msra.mxu0 %v2619_v13  ;;  %2592 = vmatpush2.bf16.msra.mxu1 %v2619_v13  ;;  %v2709_v13 = vld [vmem:[%s2848_s8 + $0x150] ss:$12 sps:$4 sm:$0xff]  }
  0x36   : > { %1192 = vmatprep.subr.bf16.mxu0 %v2780_v1  ;;  %2577 = vmatprep.subr.bf16.mxu1 %v2780_v1 }
  0x39   : > { %1193 = vmatpush2.bf16.msra.mxu0 %v2620_v14  ;;  %2593 = vmatpush2.bf16.msra.mxu1 %v2620_v14  ;;  %v2710_v14 = vld [vmem:[%s2848_s8 + $0x110] ss:$12 sps:$4 sm:$0xff]  }
  0x3a   : > { %1194 = vmatprep.subr.bf16.mxu0 %v2780_v1  ;;  %2578 = vmatprep.subr.bf16.mxu1 %v2780_v1 }
  0x3d   : > { %1195 = vmatpush2.bf16.msra.mxu0 %v2621_v15  ;;  %2594 = vmatpush2.bf16.msra.mxu1 %v2621_v15  ;;  %v2711_v15 = vld [vmem:[%s2848_s8 + $0x16c] ss:$12 sps:$4 sm:$0xff]  }
  0x3e   : > { %1196 = vmatprep.subr.bf16.mxu0 %v2780_v1  ;;  %2579 = vmatprep.subr.bf16.mxu1 %v2780_v1 }
  0x41   : > { %1197 = vmatpush2.bf16.msra.mxu0 %v2622_v16  ;;  %2595 = vmatpush2.bf16.msra.mxu1 %v2622_v16  ;;  %v2713_v16 = vld [vmem:[%s2848_s8 + $0x128] ss:$12 sps:$4 sm:$0xff]  }
  0x42   : > { %1198 = vmatprep.subr.bf16.mxu0 %v2780_v1  ;;  %2580 = vmatprep.subr.bf16.mxu1 %v2780_v1 }
  0x45   : > { %1199 = vmatpush2.bf16.msra.mxu0 %v2623_v17  ;;  %2596 = vmatpush2.bf16.msra.mxu1 %v2623_v17  ;;  %v2714_v17 = vld [vmem:[%s2848_s8 + $0x168] ss:$12 sps:$4 sm:$0xff]  }
  0x46   : > { %1200 = vmatprep.subr.bf16.mxu0 %v2780_v1  ;;  %2581 = vmatprep.subr.bf16.mxu1 %v2780_v1  ;;  %v2694_v1 = vld [vmem:[%s2848_s8 + $0x108] ss:$12 sps:$4 sm:$0xff]  }
  0x49   : > { %1201 = vmatpush2.bf16.msra.mxu0 %v2624_v18  ;;  %2597 = vmatpush2.bf16.msra.mxu1 %v2624_v18  ;;  %v2715_v18 = vld [vmem:[%s2848_s8 + $0x140] ss:$12 sps:$4 sm:$0xff]  }
  0x4a   : > { %2490 = vmatprep.subr.bf16.mxu1 %v2631_v19 }
  0x4c   : > { %1203 = vmatmul.mubr.bf16.vlgmr.msra.gmra.mxu0 %v2625_v20  ;;  %1419 = vmatmul.mubr.bf16.vlgmr.msra.gmra.mxu1 %v2628_v21  ;;  %v2718_v20 = vld [vmem:[%s2848_s8 + $0x158] ss:$12 sps:$4 sm:$0xff]   ;;  %v2719_v21 = vld [vmem:[%s2848_s8 + $0x180] ss:$12 sps:$4 sm:$0xff]  }
  0x4d   : > { %2491 = vmatpush3.bf16.msra.mxu1 %v2631_v19  ;;  %1210 = vmatprep.mubr.bf16.mxu0 %v2632_v22  ;;  %v2716_v19 = vld [vmem:[%s2848_s8 + $0x184] ss:$12 sps:$4 sm:$0xff]  }
  0x4e   : > { %1426 = vmatprep.mubr.bf16.mxu1 %v2634_v23  ;;  %2492 = vmatprep.subr.bf16.mxu1 %v2656_v24  ;;  %v2720_v22 = vld [vmem:[%s2848_s8 + $0x170] ss:$12 sps:$4 sm:$0xff]  }
  0x4f   : > { %v2721_v23 = vld [vmem:[%s2848_s8 + $0x19c] ss:$12 sps:$4 sm:$0xff]  }
  0x51   : > { %2493 = vmatpush3.bf16.msra.mxu1 %v2656_v24  ;;  %v2723_v24 = vld [vmem:[%s2848_s8 + $0x188] ss:$12 sps:$4 sm:$0xff]  }
  0x54   : > { %1211 = vmatmul.mubr.bf16.gmra.mxu0 %v2636_v25  ;;  %1427 = vmatmul.mubr.bf16.gmra.mxu1 %v2637_v26  ;;  %v2724_v25 = vld [vmem:[%s2848_s8 + $0x198] ss:$12 sps:$4 sm:$0xff]   ;;  %v2725_v26 = vld [vmem:[%s2848_s8 + $0x1a0] ss:$12 sps:$4 sm:$0xff]  }
  0x55   : > { %1218 = vmatprep.mubr.bf16.mxu0 %v2638_v27  ;;  %1434 = vmatprep.mubr.bf16.mxu1 %v2640_v28  ;;  %v2726_v27 = vld [vmem:[%s2848_s8 + $0x1b4] ss:$12 sps:$4 sm:$0xff]   ;;  %v2728_v28 = vld [vmem:[%s2848_s8 + $0x1b8] ss:$12 sps:$4 sm:$0xff]  }
  0x5c   : > { %1219 = vmatmul.mubr.bf16.gmra.mxu0 %v2642_v29  ;;  %1435 = vmatmul.mubr.bf16.gmra.mxu1 %v2643_v30  ;;  %v2729_v29 = vld [vmem:[%s2848_s8 + $0x1b0] ss:$12 sps:$4 sm:$0xff]  }
  0x5d   : > { %1226 = vmatprep.mubr.bf16.mxu0 %v2644_v31  ;;  %1442 = vmatprep.mubr.bf16.mxu1 %v2646_v32  ;;  %v2730_v30 = vld [vmem:[%s2848_s8 + $0x1d0] ss:$12 sps:$4 sm:$0xff]   ;;  %v2731_v31 = vld [vmem:[%s2848_s8 + $0x1cc] ss:$12 sps:$4 sm:$0xff]   ;;  %v2733_v32 = vld [vmem:[%s2848_s8 + $0x1e8] ss:$12 sps:$4 sm:$0xff]  }
  0x64   : > { %1227 = vmatmul.mubr.bf16.gmra.mxu0 %v2648_v33  ;;  %1443 = vmatmul.mubr.bf16.gmra.mxu1 %v2649_v34  ;;  %v2734_v33 = vld [vmem:[%s2848_s8 + $0x1c8] ss:$12 sps:$4 sm:$0xff]   ;;  %v2735_v34 = vld [vmem:[%s2848_s8 + $0x200] ss:$12 sps:$4 sm:$0xff]  }
  0x65   : > { %1234 = vmatprep.mubr.bf16.mxu0 %v2650_v35  ;;  %1450 = vmatprep.mubr.bf16.mxu1 %v2652_v36  ;;  %v2736_v35 = vld [vmem:[%s2848_s8 + $0x1e4] ss:$12 sps:$4 sm:$0xff]  }
  0x66   : > { %v2738_v36 = vld [vmem:[%s2848_s8 + $0x218] ss:$12 sps:$4 sm:$0xff]  }
  0x6c   : > { %1235 = vmatmul.mubr.bf16.gmra.mxu0 %v2654_v37  ;;  %1451 = vmatmul.mubr.bf16.gmra.mxu1 %v2655_v38  ;;  %v2739_v37 = vld [vmem:[%s2848_s8 + $0x1e0] ss:$12 sps:$4 sm:$0xff]   ;;  %v2740_v38 = vld [vmem:[%s2848_s8 + $0x230] ss:$12 sps:$4 sm:$0xff]  }
  0x6d   : > { %1242 = vmatprep.mubr.bf16.mxu0 %v2657_v39  ;;  %1458 = vmatprep.mubr.bf16.mxu1 %v2659_v40  ;;  %v2741_v39 = vld [vmem:[%s2848_s8 + $0x1fc] ss:$12 sps:$4 sm:$0xff]  }
  0x6e   : > { %v2743_v40 = vld [vmem:[%s2848_s8 + $0x248] ss:$12 sps:$4 sm:$0xff]  }
  0x74   : > { %1243 = vmatmul.mubr.bf16.gmra.mxu0 %v2661_v41  ;;  %1459 = vmatmul.mubr.bf16.gmra.mxu1 %v2662_v42  ;;  %v2744_v41 = vld [vmem:[%s2848_s8 + $0x1f8] ss:$12 sps:$4 sm:$0xff]   ;;  %v2745_v42 = vld [vmem:[%s2848_s8 + $0x260] ss:$12 sps:$4 sm:$0xff]  }
  0x75   : > { %1250 = vmatprep.mubr.bf16.mxu0 %v2663_v43  ;;  %1466 = vmatprep.mubr.bf16.mxu1 %v2665_v44  ;;  %v2746_v43 = vld [vmem:[%s2848_s8 + $0x214] ss:$12 sps:$4 sm:$0xff]   ;;  %v2748_v44 = vld [vmem:[%s2848_s8 + $0x278] ss:$12 sps:$4 sm:$0xff]  }
  0x7c   : > { %1251 = vmatmul.mubr.bf16.gmra.mxu0 %v2667_v45  ;;  %1467 = vmatmul.mubr.bf16.gmra.mxu1 %v2668_v46  ;;  %v2749_v45 = vld [vmem:[%s2848_s8 + $0x210] ss:$12 sps:$4 sm:$0xff]  }
  0x7d   : > { %1258 = vmatprep.mubr.bf16.mxu0 %v2669_v47  ;;  %1474 = vmatprep.mubr.bf16.mxu1 %v2671_v48  ;;  %v2750_v46 = vld [vmem:[%s2848_s8 + $0x290] ss:$12 sps:$4 sm:$0xff]   ;;  %v2751_v47 = vld [vmem:[%s2848_s8 + $0x22c] ss:$12 sps:$4 sm:$0xff]   ;;  %v2753_v48 = vld [vmem:[%s2848_s8 + $0x2a8] ss:$12 sps:$4 sm:$0xff]  }
  0x84   : > { %1259 = vmatmul.mubr.bf16.gmra.mxu0 %v2673_v49  ;;  %1475 = vmatmul.mubr.bf16.gmra.mxu1 %v2674_v50  ;;  %v2754_v49 = vld [vmem:[%s2848_s8 + $0x228] ss:$12 sps:$4 sm:$0xff]   ;;  %v2755_v50 = vld [vmem:[%s2848_s8 + $0x2c0] ss:$12 sps:$4 sm:$0xff]  }
  0x85   : > { %1266 = vmatprep.mubr.bf16.mxu0 %v2675_v51  ;;  %1482 = vmatprep.mubr.bf16.mxu1 %v2677_v52  ;;  %v2756_v51 = vld [vmem:[%s2848_s8 + $0x244] ss:$12 sps:$4 sm:$0xff]  }
  0x86   : > { %v2758_v52 = vld [vmem:[%s2848_s8 + $0x2d8] ss:$12 sps:$4 sm:$0xff]  }
  0x8c   : > { %1267 = vmatmul.mubr.bf16.gmra.mxu0 %v2679_v53  ;;  %1483 = vmatmul.mubr.bf16.gmra.mxu1 %v2680_v54  ;;  %v2759_v53 = vld [vmem:[%s2848_s8 + $0x240] ss:$12 sps:$4 sm:$0xff]   ;;  %v2760_v54 = vld [vmem:[%s2848_s8 + $0x2f0] ss:$12 sps:$4 sm:$0xff]  }
  0x8d   : > { %1274 = vmatprep.mubr.bf16.mxu0 %v2681_v55  ;;  %2494 = vmatprep.mubr.msk.bf16.mxu1 %vm1061_vm0, %v2683_v56  ;;  %v2761_v55 = vld [vmem:[%s2848_s8 + $0x25c] ss:$12 sps:$4 sm:$0xff]  }
  0x8e   : > { %v2763_v56 = vld [vmem:[%s2848_s8 + $0x308] ss:$12 sps:$4 sm:$0xff]  }
  0x94   : > { %1275 = vmatmul.mubr.bf16.gmra.mxu0 %v2684_v57  ;;  %2495 = vmatmul.mubr.msk.bf16.vlgmr.msra.gmra.mxu1 %vm1061_vm0, %v2685_v58 }
  0x95   : > { %1282 = vmatprep.mubr.bf16.mxu0 %v2686_v59  ;;  %2498 = vmatprep.mubr.msk.bf16.mxu1 %vm1061_vm0, %v2688_v60 }
  0x9c   : > { %1283 = vmatmul.mubr.bf16.gmra.mxu0 %v2689_v61  ;;  %2499 = vmatmul.mubr.msk.bf16.gmra.mxu1 %vm1061_vm0, %v2690_v62 }
  0x9d   : > { %1290 = vmatprep.mubr.bf16.mxu0 %v2691_v63  ;;  %2502 = vmatprep.mubr.msk.bf16.mxu1 %vm1061_vm0, %v2693_v0  ;;  %v2764_v63 = vld [vmem:[%s2848_s8 + $0x258] ss:$12 sps:$4 sm:$0xff]   ;;  %v2765_v0 = vld [vmem:[%s2848_s8 + $0x320] ss:$12 sps:$4 sm:$0xff]  }
  0xa4   : > { %1291 = vmatmul.mubr.bf16.gmra.mxu0 %v2694_v1  ;;  %2503 = vmatmul.mubr.msk.bf16.gmra.mxu1 %vm1061_vm0, %v2695_v2  ;;  %v2766_v1 = vld [vmem:[%s2848_s8 + $0x274] ss:$12 sps:$4 sm:$0xff]   ;;  %v2768_v2 = vld [vmem:[%s2848_s8 + $0x338] ss:$12 sps:$4 sm:$0xff]  }
  0xa5   : > { %1298 = vmatprep.mubr.bf16.mxu0 %v2696_v3  ;;  %2506 = vmatprep.mubr.msk.bf16.mxu1 %vm1061_vm0, %v2698_v4 }
  0xac   : > { %1299 = vmatmul.mubr.bf16.gmra.mxu0 %v2699_v5  ;;  %2507 = vmatmul.mubr.msk.bf16.gmra.mxu1 %vm1061_vm0, %v2700_v6 }
  0xad   : > { %1306 = vmatprep.mubr.bf16.mxu0 %v2701_v7  ;;  %2510 = vmatprep.mubr.msk.bf16.mxu1 %vm1061_vm0, %v2703_v8 }
  0xb4   : > { %1307 = vmatmul.mubr.bf16.gmra.mxu0 %v2704_v9  ;;  %2511 = vmatmul.mubr.msk.bf16.gmra.mxu1 %vm1061_vm0, %v2705_v10 }
  0xb5   : > { %1314 = vmatprep.mubr.bf16.mxu0 %v2706_v11  ;;  %2514 = vmatprep.mubr.msk.bf16.mxu1 %vm1061_vm0, %v2708_v12  ;;  %v2769_v11 = vld [vmem:[%s2848_s8 + $0x270] ss:$12 sps:$4 sm:$0xff]  }
  0xb6   : > { %v2770_v12 = vld [vmem:[%s2848_s8 + $0x350] ss:$12 sps:$4 sm:$0xff]  }
  0xbc   : > { %1315 = vmatmul.mubr.bf16.gmra.mxu0 %v2709_v13  ;;  %2515 = vmatmul.mubr.msk.bf16.gmra.mxu1 %vm1061_vm0, %v2710_v14 }
  0xbd   : > { %1322 = vmatprep.mubr.bf16.mxu0 %v2711_v15  ;;  %2518 = vmatprep.mubr.msk.bf16.mxu1 %vm1061_vm0, %v2713_v16 }
  0xc4   : > { %1323 = vmatmul.mubr.bf16.gmra.mxu0 %v2714_v17  ;;  %2519 = vmatmul.mubr.msk.bf16.gmra.mxu1 %vm1061_vm0, %v2715_v18 }
  0xc5   : > { %1330 = vmatprep.mubr.bf16.mxu0 %v2716_v19  ;;  %2522 = vmatprep.mubr.msk.bf16.mxu1 %vm1061_vm0, %v2718_v20 }
  0xcc   : > { %1331 = vmatmul.mubr.bf16.gmra.mxu0 %v2719_v21  ;;  %2523 = vmatmul.mubr.msk.bf16.gmra.mxu1 %vm1061_vm0, %v2720_v22 }
  0xcd   : > { %1338 = vmatprep.mubr.bf16.mxu0 %v2721_v23  ;;  %2526 = vmatprep.mubr.msk.bf16.mxu1 %vm1061_vm0, %v2723_v24 }
  0xd4   : > { %1339 = vmatmul.mubr.bf16.gmra.mxu0 %v2724_v25  ;;  %2527 = vmatmul.mubr.msk.bf16.gmra.mxu1 %vm1061_vm0, %v2725_v26 }
  0xd5   : > { %1346 = vmatprep.mubr.bf16.mxu0 %v2726_v27  ;;  %2530 = vmatprep.mubr.msk.bf16.mxu1 %vm1061_vm0, %v2728_v28 }
  0xdc   : > { %1347 = vmatmul.mubr.bf16.gmra.mxu0 %v2729_v29  ;;  %2531 = vmatmul.mubr.msk.bf16.gmra.mxu1 %vm1061_vm0, %v2730_v30 }
  0xdd   : > { %1354 = vmatprep.mubr.bf16.mxu0 %v2731_v31  ;;  %2534 = vmatprep.mubr.msk.bf16.mxu1 %vm1061_vm0, %v2733_v32 }
  0xe4   : > { %1355 = vmatmul.mubr.bf16.gmra.mxu0 %v2734_v33  ;;  %2535 = vmatmul.mubr.msk.bf16.gmra.mxu1 %vm1061_vm0, %v2735_v34 }
  0xe5   : > { %1362 = vmatprep.mubr.bf16.mxu0 %v2736_v35  ;;  %2538 = vmatprep.mubr.msk.bf16.mxu1 %vm1061_vm0, %v2738_v36 }
  0xec   : > { %1363 = vmatmul.mubr.bf16.gmra.mxu0 %v2739_v37  ;;  %2539 = vmatmul.mubr.msk.bf16.gmra.mxu1 %vm1061_vm0, %v2740_v38 }
  0xed   : > { %1370 = vmatprep.mubr.bf16.mxu0 %v2741_v39  ;;  %2542 = vmatprep.mubr.msk.bf16.mxu1 %vm1061_vm0, %v2743_v40 }
  0xf4   : > { %1371 = vmatmul.mubr.bf16.gmra.mxu0 %v2744_v41  ;;  %2543 = vmatmul.mubr.msk.bf16.gmra.mxu1 %vm1061_vm0, %v2745_v42 }
  0xf5   : > { %1378 = vmatprep.mubr.bf16.mxu0 %v2746_v43  ;;  %2546 = vmatprep.mubr.msk.bf16.mxu1 %vm1061_vm0, %v2748_v44 }
  0xfc   : > { %1379 = vmatmul.mubr.bf16.gmra.mxu0 %v2749_v45  ;;  %2547 = vmatmul.mubr.msk.bf16.gmra.mxu1 %vm1061_vm0, %v2750_v46 }
  0xfd   : > { %1386 = vmatprep.mubr.bf16.mxu0 %v2751_v47  ;;  %2550 = vmatprep.mubr.msk.bf16.mxu1 %vm1061_vm0, %v2753_v48 }
 0x104   : > { %1387 = vmatmul.mubr.bf16.gmra.mxu0 %v2754_v49  ;;  %2551 = vmatmul.mubr.msk.bf16.gmra.mxu1 %vm1061_vm0, %v2755_v50 }
 0x105   : > { %1394 = vmatprep.mubr.bf16.mxu0 %v2756_v51  ;;  %2554 = vmatprep.mubr.msk.bf16.mxu1 %vm1061_vm0, %v2758_v52 }
 0x10c   : > { %v3046_v57 = vpop.f32.mrf.mxu0  ;;  %1395 = vmatmul.mubr.bf16.gmra.mxu0 %v2759_v53  ;;  %v3048_v58 = vpop.f32.mrf.mxu1  ;;  %2555 = vmatmul.mubr.msk.bf16.gmra.mxu1 %vm1061_vm0, %v2760_v54 }
 0x10d   : > { %1402 = vmatprep.mubr.bf16.mxu0 %v2761_v55  ;;  %2558 = vmatprep.mubr.msk.bf16.mxu1 %vm1061_vm0, %v2763_v56 }
 0x10e   : > { %v1206_v59 = vpop.f32.mrf.mxu0  ;;  %v1422_v60 = vpop.f32.mrf.mxu1 }
 0x110   : > { %v3052_v61 = vpop.f32.mrf.mxu0  ;;  %v3054_v62 = vpop.f32.mrf.mxu1 }
 0x112   : > { %v1209_v3 = vpop.f32.mrf.mxu0  ;;  %v1425_v4 = vpop.f32.mrf.mxu1 }
 0x114   : > { %v3060_v5 = vpop.f32.mrf.mxu0  ;;  %1403 = vmatmul.mubr.bf16.gmra.mxu0 %v2764_v63  ;;  %v3062_v6 = vpop.f32.mrf.mxu1  ;;  %2559 = vmatmul.mubr.msk.bf16.gmra.mxu1 %vm1061_vm0, %v2765_v0 }
 0x115   : > { %1410 = vmatprep.mubr.bf16.mxu0 %v2766_v1  ;;  %2562 = vmatprep.mubr.msk.bf16.mxu1 %vm1061_vm0, %v2768_v2 }
 0x116   : > { %v1214_v7 = vpop.f32.mrf.mxu0  ;;  %v1430_v8 = vpop.f32.mrf.mxu1 }
 0x118   : > { %v3066_v9 = vpop.f32.mrf.mxu0  ;;  %v3068_v10 = vpop.f32.mrf.mxu1 }
 0x11a   : > { %v1217_v13 = vpop.f32.mrf.mxu0  ;;  %v1433_v14 = vpop.f32.mrf.mxu1 }
 0x11b   : > { %v3132_v13 = vld [vmem:[%s3800_s2] ss:$0 sm:$0xff] }
 0x11c   : > { %v3072_v15 = vpop.f32.mrf.mxu0  ;;  %1411 = vmatmul.mubr.bf16.gmra.mxu0 %v2769_v11  ;;  %v3074_v16 = vpop.f32.mrf.mxu1  ;;  %2563 = vmatmul.mubr.msk.bf16.gmra.mxu1 %vm1061_vm0, %v2770_v12 }
 0x11e   : > { %v1222_v17 = vpop.f32.mrf.mxu0  ;;  %v1438_v18 = vpop.f32.mrf.mxu1 }
 0x11f   : > { %v1213_v18 = vadd.f32 %v3132_v13, %v3060_v5  ;;  %v1208_v5 = vadd.f32 %v3132_v13, %v3052_v61 }
 0x120   : > { %v3077_v19 = vpop.f32.mrf.mxu0  ;;  %v3079_v20 = vpop.f32.mrf.mxu1 }
 0x122   : > { %v1225_v21 = vpop.f32.mrf.mxu0  ;;  %v1441_v22 = vpop.f32.mrf.mxu1 }
 0x124   : > { %v3081_v23 = vpop.f32.mrf.mxu0  ;;  %v3083_v24 = vpop.f32.mrf.mxu1 }
 0x126   : > { %v1230_v25 = vpop.f32.mrf.mxu0  ;;  %v1446_v26 = vpop.f32.mrf.mxu1 }
 0x127   : > { %v1205_v25 = vadd.f32 %v3132_v13, %v3046_v57 }
 0x128   : > { %v3085_v27 = vpop.f32.mrf.mxu0  ;;  %v3087_v28 = vpop.f32.mrf.mxu1 }
 0x129   : > { %v1232_v61 = vadd.f32 %v3132_v13, %v3085_v27 }
 0x12a   : > { %v1233_v29 = vpop.f32.mrf.mxu0  ;;  %v1449_v30 = vpop.f32.mrf.mxu1 }
 0x12c   : > { %v3089_v31 = vpop.f32.mrf.mxu0  ;;  %v3091_v32 = vpop.f32.mrf.mxu1 }
 0x12e   : > { %v1238_v33 = vpop.f32.mrf.mxu0  ;;  %v1454_v34 = vpop.f32.mrf.mxu1 }
 0x12f   : > { %v1216_v33 = vadd.f32 %v3132_v13, %v3066_v9 }
 0x130   : > { %v3093_v35 = vpop.f32.mrf.mxu0  ;;  %v3095_v36 = vpop.f32.mrf.mxu1 }
 0x132   : > { %v1241_v37 = vpop.f32.mrf.mxu0  ;;  %v1457_v38 = vpop.f32.mrf.mxu1 }
 0x134   : > { %v3097_v39 = vpop.f32.mrf.mxu0  ;;  %v3099_v40 = vpop.f32.mrf.mxu1 }
 0x136   : > { %v1246_v41 = vpop.f32.mrf.mxu0  ;;  %v1462_v42 = vpop.f32.mrf.mxu1 }
 0x138   : > { %v3101_v43 = vpop.f32.mrf.mxu0  ;;  %v3103_v44 = vpop.f32.mrf.mxu1 }
 0x13a   : > { %v1249_v45 = vpop.f32.mrf.mxu0  ;;  %v1465_v46 = vpop.f32.mrf.mxu1 }
 0x13b   : > { %v1229_v46 = vadd.f32 %v3132_v13, %v3081_v23  ;;  %v1224_v23 = vadd.f32 %v3132_v13, %v3077_v19  ;;  %v1248_v19 = vadd.f32 %v3132_v13, %v3101_v43 }
 0x13c   : > { %v3105_v47 = vpop.f32.mrf.mxu0  ;;  %v3107_v48 = vpop.f32.mrf.mxu1 }
 0x13e   : > { %v1254_v49 = vpop.f32.mrf.mxu0  ;;  %v1470_v50 = vpop.f32.mrf.mxu1 }
 0x13f   : > { %v1221_v50 = vadd.f32 %v3132_v13, %v3072_v15 }
 0x140   : > { %v3109_v51 = vpop.f32.mrf.mxu0  ;;  %v3111_v52 = vpop.f32.mrf.mxu1 }
 0x142   : > { %v1257_v53 = vpop.f32.mrf.mxu0  ;;  %v1473_v54 = vpop.f32.mrf.mxu1 }
 0x144   : > { %v3113_v55 = vpop.f32.mrf.mxu0  ;;  %v3115_v56 = vpop.f32.mrf.mxu1 }
 0x146   : > { %v1262_v59 = vpop.f32.mrf.mxu0  ;;  %v1478_v60 = vpop.f32.mrf.mxu1 }
 0x148   : > { %v3117_v63 = vpop.f32.mrf.mxu0  ;;  %v3119_v0 = vpop.f32.mrf.mxu1 }
 0x14a   : > { %v1265_v1 = vpop.f32.mrf.mxu0  ;;  %v1481_v2 = vpop.f32.mrf.mxu1 }
 0x14c   : > { %v3121_v3 = vpop.f32.mrf.mxu0  ;;  %v3123_v4 = vpop.f32.mrf.mxu1 }
 0x14e   : > { %v1270_v7 = vpop.f32.mrf.mxu0  ;;  %v1486_v8 = vpop.f32.mrf.mxu1 }
 0x150   : > { %v3125_v11 = vpop.f32.mrf.mxu0  ;;  %v3127_v12 = vpop.f32.mrf.mxu1 }
 0x152   : > { %v1273_v14 = vpop.f32.mrf.mxu0  ;;  %v1489_v17 = vpop.f32.mrf.mxu1 }
 0x153   : > { %v1245_v17 = vadd.f32 %v3132_v13, %v3097_v39  ;;  %v1240_v39 = vadd.f32 %v3132_v13, %v3093_v35  ;;  %v1264_v35 = vadd.f32 %v3132_v13, %v3117_v63 }
 0x154   : > { %v3136_v21 = vpop.f32.mrf.mxu0  ;;  %v2496_v22 = vpop.f32.mrf.mxu1 }
 0x155   : > { %v3140_v26 = vadd.f32 %v2496_v22, %v1213_v18  ;;  %v1237_v22 = vadd.f32 %v3132_v13, %v3089_v31 }
 0x156   : > { %v1278_v29 = vpop.f32.mrf.mxu0  ;;  %v1525_v30 = vpop.f32.mrf.mxu1 }
 0x157   : > { %v3144_v34 = vadd.f32 %v1525_v30, %v1205_v25 }
 0x158   : > { %v3146_v37 = vpop.f32.mrf.mxu0  ;;  %v2497_v38 = vpop.f32.mrf.mxu1 }
 0x159   : > { %v3150_v41 = vadd.f32 %v2497_v38, %v1216_v33 }
 0x15a   : > { %v1281_v42 = vpop.f32.mrf.mxu0  ;;  %v1528_v45 = vpop.f32.mrf.mxu1 }
 0x15b   : > { %v3152_v57 = vadd.f32 %v1528_v45, %v1208_v5 }
 0x15c   : > { %v3156_v49 = vpop.f32.mrf.mxu0  ;;  %v2500_v9 = vpop.f32.mrf.mxu1 }
 0x15d   : > { %v3160_v53 = vadd.f32 %v2500_v9, %v1229_v46  ;;  %v1261_v9 = vadd.f32 %v3132_v13, %v3113_v55  ;;  %v1256_v55 = vadd.f32 %v3132_v13, %v3109_v51  ;;  %v3224_v51 = vld [vmem:[%s3801_s3] ss:$0 sm:$0xff] }
 0x15e   : > { %v1286_v54 = vpop.f32.mrf.mxu0  ;;  %v1541_v59 = vpop.f32.mrf.mxu1 }
 0x15f   : > { %v3164_v60 = vadd.f32 %v1541_v59, %v1221_v50  ;;  %v1253_v54 = vadd.f32 %v3132_v13, %v3105_v47 }
 0x160   : > { %v3166_v1 = vpop.f32.mrf.mxu0  ;;  %v2501_v2 = vpop.f32.mrf.mxu1 }
 0x161   : > { %v3170_v7 = vadd.f32 %v2501_v2, %v1232_v61 }
 0x162   : > { %v1289_v8 = vpop.f32.mrf.mxu0  ;;  %v1544_v14 = vpop.f32.mrf.mxu1 }
 0x163   : > { %v3172_v15 = vadd.f32 %v1544_v14, %v1224_v23 }
 0x164   : > { %v3176_v18 = vpop.f32.mrf.mxu0  ;;  %v2504_v27 = vpop.f32.mrf.mxu1 }
 0x165   : > { %v3180_v25 = vadd.f32 %v2504_v27, %v1245_v17  ;;  %v1812_v27 = vmax.f32 %v3144_v34, 0.0  ;;  %v1814_v34 = vmax.f32 %v3140_v26, 0.0  ;;  %v1272_v26 = vadd.f32 %v3132_v13, %v3125_v11 }
 0x166   : > { %v1294_v29 = vpop.f32.mrf.mxu0  ;;  %v1557_v30 = vpop.f32.mrf.mxu1 }
 0x167   : > { %v3184_v33 = vadd.f32 %v1557_v30, %v1237_v22  ;;  %v1277_v30 = vadd.f32 %v3132_v13, %v3136_v21 }
 0x168   : > { %v3186_v38 = vpop.f32.mrf.mxu0  ;;  %v2505_v5 = vpop.f32.mrf.mxu1 }
 0x169   : > { %v3190_v42 = vadd.f32 %v2505_v5, %v1248_v19  ;;  %v1269_v5 = vadd.f32 %v3132_v13, %v3121_v3 }
 0x16a   : > { %v1297_v45 = vpop.f32.mrf.mxu0  ;;  %v1560_v46 = vpop.f32.mrf.mxu1 }
 0x16b   : > { %v3192_v31 = vadd.f32 %v1560_v46, %v1240_v39  ;;  %v1891_v39 = vmul.f32 %v3224_v51, %v1812_v27  ;;  %v1815_v45 = vmax.f32 %v3150_v41, 0.0  ;;  %v3241_v41 = vld [vmem:[%s3802_s4] ss:$0 sm:$0xff] }
 0x16c   : > { %v3196_v50 = vpop.f32.mrf.mxu0  ;;  %v2508_v43 = vpop.f32.mrf.mxu1 }
 0x16d   : > { %v3200_v59 = vadd.f32 %v2508_v43, %v1261_v9  ;;  %v1280_v43 = vadd.f32 %v3132_v13, %v3146_v37  ;;  %v1893_v37 = vmul.f32 %v3224_v51, %v1814_v34  ;;  %v1894_v27 = vmul.f32 %v3224_v51, %v1815_v45 }
 0x16e   : > { %v1302_v61 = vpop.f32.mrf.mxu0  ;;  %v1573_v2 = vpop.f32.mrf.mxu1  ;;  %v1817_v34 = vmax.f32 %v3172_v15, 0.0 }
 0x16f   : > { %v3204_v23 = vadd.f32 %v1573_v2, %v1253_v54  ;;  %v1813_v54 = vmax.f32 %v3152_v57, 0.0  ;;  %v3246_v57 = vadd.f32 %v3241_v41, %v1891_v39  ;;  %v1293_v39 = vadd.f32 %v3132_v13, %v3176_v18 }
 0x170   : > { %v3206_v8 = vpop.f32.mrf.mxu0  ;;  %v2509_v14 = vpop.f32.mrf.mxu1  ;;  %v3271_v15 = vadd.f32 %v3241_v41, %v1894_v27  ;;  %v1896_v27 = vmul.f32 %v3224_v51, %v1817_v34  ;;  %v1820_v34 = vmax.f32 %v3184_v33, 0.0 }
 0x171   : > { %v3210_v17 = vadd.f32 %v2509_v14, %v1264_v35  ;;  %v1818_v14 = vmax.f32 %v3160_v53, 0.0  ;;  %v1892_v11 = vmul.f32 %v3224_v51, %v1813_v54  ;;  %v1819_v53 = vmax.f32 %v3170_v7, 0.0 }
 0x172   : > { %v1305_v47 = vpop.f32.mrf.mxu0  ;;  %v1576_v22 = vpop.f32.mrf.mxu1  ;;  %v3268_v7 = vadd.f32 %v3241_v41, %v1893_v37 }
 0x173   : > { %v3213_v29 = vadd.f32 %v1576_v22, %v1256_v55  ;;  %v1898_v37 = vmul.f32 %v3224_v51, %v1819_v53  ;;  %v1822_v53 = vmax.f32 %v3180_v25, 0.0  ;;  %v3308_v25 = vadd.f32 %v3241_v41, %v1896_v27 }
 0x174   : > { %v3217_v63 = vpop.f32.mrf.mxu0  ;;  %v2512_v19 = vpop.f32.mrf.mxu1 }
 0x175   : > { %v1598_v46 = vadd.f32 %v2512_v19, %v1277_v30  ;;  %v1816_v19 = vmax.f32 %v3164_v60, 0.0  ;;  %v1897_v60 = vmul.f32 %v3224_v51, %v1818_v14 }
 0x176   : > { %v1310_v9 = vpop.f32.mrf.mxu0  ;;  %v1589_v21 = vpop.f32.mrf.mxu1 }
 0x177   : > { %v3232_v3 = vadd.f32 %v1589_v21, %v1269_v5  ;;  %v1830_v61 = vmax.f32 %v1598_v46, 0.0 }
 0x178   : > { %v3234_v2 = vpop.f32.mrf.mxu0  ;;  %v2513_v35 = vpop.f32.mrf.mxu1 }
 0x179   : > { %v1601_v55 = vadd.f32 %v2513_v35, %v1280_v43  ;;  %v1909_v47 = vmul.f32 %v3224_v51, %v1830_v61  ;;  %v1285_v43 = vadd.f32 %v3132_v13, %v3156_v49  ;;  %v1895_v49 = vmul.f32 %v3224_v51, %v1816_v19 }
 0x17a   : > { %v1313_v22 = vpop.f32.mrf.mxu0  ;;  %v1592_v30 = vpop.f32.mrf.mxu1  ;;  %v1288_v19 = vadd.f32 %v3132_v13, %v3166_v1 }
 0x17b   : > { %v1831_v5 = vmax.f32 %v1601_v55, 0.0  ;;  %v3252_v46 = vadd.f32 %v1592_v30, %v1272_v26  ;;  %v3259_v45 = vadd.f32 %v3241_v41, %v1909_v47  ;;  %v3276_v55 = vadd.f32 %v3241_v41, %v1892_v11 }
 0x17c   : > { %v3261_v9 = vpop.f32.mrf.mxu0  ;;  %v2516_v21 = vpop.f32.mrf.mxu1  ;;  %v1296_v22 = vadd.f32 %v3132_v13, %v3186_v38  ;;  %v3289_v11 = vadd.f32 %v3241_v41, %v1897_v60  ;;  %v1309_v60 = vadd.f32 %v3132_v13, %v3217_v63 }
 0x17d   : > { %v1910_v54 = vmul.f32 %v3224_v51, %v1831_v5  ;;  %v1614_v61 = vadd.f32 %v2516_v21, %v1293_v39 }
 0x17e   : > { %v1318_v35 = vpop.f32.mrf.mxu0  ;;  %v1605_v26 = vpop.f32.mrf.mxu1 }
 0x17f   : > { %v3280_v14 = vadd.f32 %v3241_v41, %v1910_v54  ;;  %v1606_v47 = vadd.f32 %v1605_v26, %v1285_v43  ;;  %v1834_v30 = vmax.f32 %v1614_v61, 0.0  ;;  %v3299_v26 = vadd.f32 %v3241_v41, %v1895_v49 }
 0x180   : > { %v3286_v5 = vpop.f32.mrf.mxu0  ;;  %v2517_v39 = vpop.f32.mrf.mxu1  ;;  %v1301_v49 = vadd.f32 %v3132_v13, %v3196_v50 }
 0x181   : > { %3827 = vst [vmem:[#allocation2_spill] sm:$0xff] %v3280_v14  ;;  %v1832_v43 = vmax.f32 %v1606_v47, 0.0  ;;  %v1913_v38 = vmul.f32 %v3224_v51, %v1834_v30  ;;  %v1617_v54 = vadd.f32 %v2517_v39, %v1296_v22  ;;  %v3305_v47 = vadd.f32 %v3241_v41, %v1898_v37 }
 0x182   : > { %v1321_v61 = vpop.f32.mrf.mxu0  ;;  %v1608_v35 = vpop.f32.mrf.mxu1  ;;  %v1901_v37 = vmul.f32 %v3224_v51, %v1822_v53  ;;  %v1821_v53 = vmax.f32 %v3192_v31, 0.0 }
 0x183   : > { %v1911_v1 = vmul.f32 %v3224_v51, %v1832_v43  ;;  %v1609_v18 = vadd.f32 %v1608_v35, %v1288_v19  ;;  %3828 = vst [vmem:[#allocation3_spill] sm:$0xff] %v3305_v47  ;;  %v3311_v33 = vadd.f32 %v3241_v41, %v1913_v38  ;;  %v1835_v22 = vmax.f32 %v1617_v54, 0.0 }
 0x184   : > { %v1324_v30 = vpop.f32.mrf.mxu0  ;;  %v2520_v39 = vpop.f32.mrf.mxu1  ;;  %v1899_v61 = vmul.f32 %v3224_v51, %v1820_v34  ;;  %v1312_v34 = vadd.f32 %v3132_v13, %v3234_v2 }
 0x185   : > { %v3316_v63 = vadd.f32 %v3241_v41, %v1911_v1  ;;  %v1833_v43 = vmax.f32 %v1609_v18, 0.0  ;;  %v1630_v19 = vadd.f32 %v2520_v39, %v1309_v60  ;;  %v1914_v38 = vmul.f32 %v3224_v51, %v1835_v22 }
 0x186   : > { %v1326_v54 = vpop.f32.mrf.mxu0  ;;  %v1621_v35 = vpop.f32.mrf.mxu1  ;;  %v1823_v18 = vmax.f32 %v3190_v42, 0.0  ;;  %v3340_v42 = vadd.f32 %v3241_v41, %v1901_v37  ;;  %v3343_v31 = vadd.f32 %v3241_v41, %v1899_v61  ;;  %v1900_v37 = vmul.f32 %v3224_v51, %v1821_v53 }
 0x187   : > { %3829 = vst [vmem:[#allocation4_spill] sm:$0xff] %v3316_v63  ;;  %v1912_v50 = vmul.f32 %v3224_v51, %v1833_v43  ;;  %v1838_v1 = vmax.f32 %v1630_v19, 0.0  ;;  %v1622_v14 = vadd.f32 %v1621_v35, %v1301_v49  ;;  %v3331_v60 = vadd.f32 %v3241_v41, %v1914_v38 }
 0x188   : > { %v1327_v22 = vpop.f32.mrf.mxu0  ;;  %v2521_v39 = vpop.f32.mrf.mxu1  ;;  %v1304_v54 = vadd.f32 %v3132_v13, %v3206_v8  ;;  %3830 = vst [vmem:[#allocation5_spill] sm:$0xff] %v3340_v42  ;;  %v1824_v61 = vmax.f32 %v3204_v23, 0.0  ;;  %v1325_v27 = vadd.f32 %v3132_v13, %v1324_v30  ;;  %v1825_v53 = vmax.f32 %v3213_v29, 0.0 }
 0x189   : > { %v3336_v21 = vadd.f32 %v3241_v41, %v1912_v50  ;;  %v1917_v49 = vmul.f32 %v3224_v51, %v1838_v1  ;;  %v1836_v43 = vmax.f32 %v1622_v14, 0.0  ;;  %v1633_v19 = vadd.f32 %v2521_v39, %v1312_v34 }
 0x18a   : > { %v1329_v38 = vpop.f32.mrf.mxu0  ;;  %v1624_v35 = vpop.f32.mrf.mxu1  ;;  %v1317_v39 = vadd.f32 %v3132_v13, %v3261_v9  ;;  %v1328_v9 = vadd.f32 %v3132_v13, %v1327_v22 }
 0x18b   : > { %v3350_v50 = vadd.f32 %v3241_v41, %v1917_v49  ;;  %v1915_v14 = vmul.f32 %v3224_v51, %v1836_v43  ;;  %v1625_v1 = vadd.f32 %v1624_v35, %v1304_v54  ;;  %v1839_v63 = vmax.f32 %v1633_v19, 0.0 }
 0x18c   : > { %v1332_v2 = vpop.f32.mrf.mxu0  ;;  %v2524_v34 = vpop.f32.mrf.mxu1  ;;  %v1902_v54 = vmul.f32 %v3224_v51, %v1823_v18  ;;  %v1903_v18 = vmul.f32 %v3224_v51, %v1824_v61 }
 0x18d   : > { %3831 = vst [vmem:[#allocation6_spill] sm:$0xff] %v3350_v50  ;;  %v3361_v49 = vadd.f32 %v3241_v41, %v1915_v14  ;;  %v1837_v43 = vmax.f32 %v1625_v1, 0.0  ;;  %v1918_v23 = vmul.f32 %v3224_v51, %v1839_v63  ;;  %v1646_v30 = vadd.f32 %v2524_v34, %v1325_v27 }
 0x18e   : > { %v1334_v19 = vpop.f32.mrf.mxu0  ;;  %v1637_v35 = vpop.f32.mrf.mxu1  ;;  %v3371_v14 = vadd.f32 %v3241_v41, %v1900_v37  ;;  %v1320_v34 = vadd.f32 %v3132_v13, %v3286_v5  ;;  %v1904_v37 = vmul.f32 %v3224_v51, %v1825_v53  ;;  %v1828_v53 = vmax.f32 %v3232_v3, 0.0 }
 0x18f   : > { %v1916_v38 = vmul.f32 %v3224_v51, %v1837_v43  ;;  %v1638_v50 = vadd.f32 %v1637_v35, %v1317_v39  ;;  %v3375_v29 = vadd.f32 %v3241_v41, %v1918_v23  ;;  %v1842_v63 = vmax.f32 %v1646_v30, 0.0 }
 0x190   : > { %3832 = vst [vmem:[#allocation7_spill] sm:$0xff] %v3371_v14  ;;  %v1335_v27 = vpop.f32.mrf.mxu0  ;;  %v2525_v1 = vpop.f32.mrf.mxu1  ;;  %v3383_v39 = vadd.f32 %v3241_v41, %v1902_v54  ;;  %v3394_v54 = vadd.f32 %v3241_v41, %v1903_v18  ;;  %v3407_v18 = vadd.f32 %v3241_v41, %v1904_v37  ;;  %v1333_v3 = vadd.f32 %v3132_v13, %v1332_v2 }
 0x191   : > { %3833 = vst [vmem:[#allocation8_spill] sm:$0xff] %v3375_v29  ;;  %v3380_v19 = vadd.f32 %v3241_v41, %v1916_v38  ;;  %v1840_v22 = vmax.f32 %v1638_v50, 0.0  ;;  %v1649_v43 = vadd.f32 %v2525_v1, %v1328_v9  ;;  %v1921_v23 = vmul.f32 %v3224_v51, %v1842_v63 }
 0x192   : > { %3835 = vst [vmem:[#allocation10_spill] sm:$0xff] %v3383_v39  ;;  %v1337_v30 = vpop.f32.mrf.mxu0  ;;  %v1640_v35 = vpop.f32.mrf.mxu1  ;;  %v1826_v9 = vmax.f32 %v3200_v59, 0.0  ;;  %3836 = vst [vmem:[#allocation11_spill] sm:$0xff] %v3394_v54  ;;  %v1827_v59 = vmax.f32 %v3210_v17, 0.0  ;;  %v1907_v17 = vmul.f32 %v3224_v51, %v1828_v53  ;;  %v1829_v37 = vmax.f32 %v3252_v46, 0.0 }
 0x193   : > { %3834 = vst [vmem:[#allocation9_spill] sm:$0xff] %v3380_v19  ;;  %v1919_v38 = vmul.f32 %v3224_v51, %v1840_v22  ;;  %v1843_v8 = vmax.f32 %v1649_v43, 0.0  ;;  %v1641_v50 = vadd.f32 %v1640_v35, %v1320_v34  ;;  %v3398_v1 = vadd.f32 %v3241_v41, %v1921_v23  ;;  %3839 = vst [vmem:[#allocation14_spill] sm:$0xff] %v3407_v18 }
 0x194   : > { %v1340_v63 = vpop.f32.mrf.mxu0  ;;  %v2528_v30 = vpop.f32.mrf.mxu1  ;;  %v1336_v2 = vadd.f32 %v3132_v13, %v1335_v27 }
 0x195   : > { %3837 = vst [vmem:[#allocation12_spill] sm:$0xff] %v3398_v1  ;;  %v3401_v61 = vadd.f32 %v3241_v41, %v1919_v38  ;;  %v1922_v5 = vmul.f32 %v3224_v51, %v1843_v8  ;;  %v1841_v22 = vmax.f32 %v1641_v50, 0.0  ;;  %v1341_v34 = vadd.f32 %v3132_v13, %v1340_v63 }
 0x196   : > { %v1342_v23 = vpop.f32.mrf.mxu0  ;;  %v1653_v35 = vpop.f32.mrf.mxu1  ;;  %v3484_v1 = vadd.f32 %v3132_v13, %v3054_v62  ;;  %v3499_v62 = vadd.f32 %v3132_v13, %v3074_v16  ;;  %v3515_v16 = vadd.f32 %v3132_v13, %v3087_v28  ;;  %v3534_v28 = vadd.f32 %v3132_v13, %v3103_v44 }
 0x197   : > { %3838 = vst [vmem:[#allocation13_spill] sm:$0xff] %v3401_v61  ;;  %v3415_v8 = vadd.f32 %v3241_v41, %v1922_v5  ;;  %v1920_v50 = vmul.f32 %v3224_v51, %v1841_v22  ;;  %v1662_v63 = vadd.f32 %v2528_v30, %v1341_v34  ;;  %v1654_v19 = vadd.f32 %v1653_v35, %v1333_v3 }
 0x198   : > { %v1343_v47 = vpop.f32.mrf.mxu0  ;;  %v2529_v43 = vpop.f32.mrf.mxu1  ;;  %v1905_v30 = vmul.f32 %v3224_v51, %v1826_v9  ;;  %v1906_v23 = vmul.f32 %v3224_v51, %v1827_v59 }
 0x199   : > { %3840 = vst [vmem:[#allocation15_spill] sm:$0xff] %v3415_v8  ;;  %v3424_v38 = vadd.f32 %v3241_v41, %v1920_v50  ;;  %v1846_v5 = vmax.f32 %v1662_v63, 0.0  ;;  %v1344_v61 = vadd.f32 %v3132_v13, %v1343_v47  ;;  %v1844_v22 = vmax.f32 %v1654_v19, 0.0 }
 0x19a   : > { %v1345_v53 = vpop.f32.mrf.mxu0  ;;  %v1656_v34 = vpop.f32.mrf.mxu1  ;;  %v3433_v50 = vadd.f32 %v3241_v41, %v1907_v17  ;;  %v1908_v19 = vmul.f32 %v3224_v51, %v1829_v37 }
 0x19b   : > { %3841 = vst [vmem:[#allocation16_spill] sm:$0xff] %v3424_v38  ;;  %v1925_v27 = vmul.f32 %v3224_v51, %v1846_v5  ;;  %v1665_v3 = vadd.f32 %v2529_v43, %v1344_v61  ;;  %v1657_v35 = vadd.f32 %v1656_v34, %v1336_v2  ;;  %v1923_v63 = vmul.f32 %v3224_v51, %v1844_v22 }
 0x19c   : > { %3842 = vst [vmem:[#allocation17_spill] sm:$0xff] %v3433_v50  ;;  %v1348_v47 = vpop.f32.mrf.mxu0  ;;  %v2532_v8 = vpop.f32.mrf.mxu1  ;;  %v3441_v5 = vadd.f32 %v3241_v41, %v1905_v30  ;;  %v3453_v30 = vadd.f32 %v3241_v41, %v1906_v23 }
 0x19d   : > { %v3438_v9 = vadd.f32 %v3241_v41, %v1925_v27  ;;  %v1847_v53 = vmax.f32 %v1665_v3, 0.0  ;;  %v1845_v46 = vmax.f32 %v1657_v35, 0.0  ;;  %v3444_v61 = vadd.f32 %v3241_v41, %v1923_v63 }
 0x19e   : > { %3844 = vst [vmem:[#allocation19_spill] sm:$0xff] %v3441_v5  ;;  %v1350_v59 = vpop.f32.mrf.mxu0  ;;  %v1669_v43 = vpop.f32.mrf.mxu1  ;;  %3846 = vst [vmem:[#allocation21_spill] sm:$0xff] %v3453_v30  ;;  %v3456_v3 = vadd.f32 %v3241_v41, %v1908_v19 }
 0x19f   : > { %3843 = vst [vmem:[#allocation18_spill] sm:$0xff] %v3438_v9  ;;  %3845 = vst [vmem:[#allocation20_spill] sm:$0xff] %v3444_v61  ;;  %v1926_v2 = vmul.f32 %v3224_v51, %v1847_v53  ;;  %v1924_v37 = vmul.f32 %v3224_v51, %v1845_v46  ;;  %v1349_v46 = vadd.f32 %v3132_v13, %v1348_v47 }
 0x1a0   : > { %v1351_v34 = vpop.f32.mrf.mxu0  ;;  %v2533_v27 = vpop.f32.mrf.mxu1  ;;  %3847 = vst [vmem:[#allocation22_spill] sm:$0xff] %v3456_v3 }
 0x1a1   : > { %v3459_v35 = vadd.f32 %v3241_v41, %v1926_v2  ;;  %v3462_v63 = vadd.f32 %v3241_v41, %v1924_v37  ;;  %v1670_v47 = vadd.f32 %v1669_v43, %v1349_v46 }
 0x1a2   : > { %v1353_v53 = vpop.f32.mrf.mxu0  ;;  %v1672_v59 = vpop.f32.mrf.mxu1 }
 0x1a3   : > { %3848 = vst [vmem:[#allocation23_spill] sm:$0xff] %v3459_v35  ;;  %3849 = vst [vmem:[#allocation24_spill] sm:$0xff] %v3462_v63 }
 0x1a4   : > { %v1356_v17 = vpop.f32.mrf.mxu0  ;;  %v2536_v23 = vpop.f32.mrf.mxu1 }
 0x1a5   : > { %v1357_v3 = vadd.f32 %v3132_v13, %v1356_v17  ;;  %v3491_v17 = vadd.f32 %v3132_v13, %v3062_v6  ;;  %v3507_v6 = vadd.f32 %v3132_v13, %v3079_v20  ;;  %v1848_v20 = vmax.f32 %v1670_v47, 0.0 }
 0x1a6   : > { %v1358_v61 = vpop.f32.mrf.mxu0  ;;  %v1685_v5 = vpop.f32.mrf.mxu1 }
 0x1a7   : > { %v1352_v61 = vadd.f32 %v3132_v13, %v1351_v34  ;;  %v3495_v34 = vadd.f32 %v3132_v13, %v3068_v10  ;;  %v3511_v10 = vadd.f32 %v3132_v13, %v3083_v24  ;;  %v3530_v24 = vadd.f32 %v3132_v13, %v3099_v40 }
 0x1a8   : > { %v1359_v19 = vpop.f32.mrf.mxu0  ;;  %v2537_v9 = vpop.f32.mrf.mxu1 }
 0x1aa   : > { %v1361_v50 = vpop.f32.mrf.mxu0  ;;  %v1688_v2 = vpop.f32.mrf.mxu1 }
 0x1ab   : > { %v1360_v50 = vadd.f32 %v3132_v13, %v1359_v19  ;;  %v1673_v19 = vadd.f32 %v1672_v59, %v1352_v61 }
 0x1ac   : > { %v1364_v38 = vpop.f32.mrf.mxu0  ;;  %v3468_v39 = vpop.f32.mrf.mxu1 }
 0x1ad   : > { %v1681_v43 = vadd.f32 %v2533_v27, %v1360_v50  ;;  %v3524_v27 = vadd.f32 %v3132_v13, %v3095_v36  ;;  %v1849_v61 = vmax.f32 %v1673_v19, 0.0  ;;  %v3538_v50 = vadd.f32 %v3132_v13, %v3107_v48 }
 0x1ae   : > { %v1366_v37 = vpop.f32.mrf.mxu0  ;;  %v1701_v53 = vpop.f32.mrf.mxu1  ;;  %v3547_v19 = vadd.f32 %v3132_v13, %v3115_v56  ;;  %v3551_v48 = vadd.f32 %v3132_v13, %v3119_v0  ;;  %v3560_v56 = vadd.f32 %v3132_v13, %v3123_v4 }
 0x1af   : > { %v1421_v37 = vadd.f32 %v3132_v13, %v3048_v58  ;;  %v1678_v58 = vadd.f32 %v2532_v8, %v1357_v3  ;;  %v1851_v36 = vmax.f32 %v1681_v43, 0.0 }
 0x1b0   : > { %v1367_v18 = vpop.f32.mrf.mxu0  ;;  %v3470_v42 = vpop.f32.mrf.mxu1 }
 0x1b2   : > { %v1369_v35 = vpop.f32.mrf.mxu0  ;;  %v3473_v22 = vpop.f32.mrf.mxu1 }
 0x1b3   : > { %v1365_v35 = vadd.f32 %v3132_v13, %v1364_v38  ;;  %v1368_v38 = vadd.f32 %v3132_v13, %v1367_v18  ;;  %v3520_v18 = vadd.f32 %v3132_v13, %v3091_v32  ;;  %v1850_v32 = vmax.f32 %v1678_v58, 0.0 }
 0x1b4   : > { %v1372_v63 = vpop.f32.mrf.mxu0  ;;  %v3478_v30 = vpop.f32.mrf.mxu1 }
 0x1b5   : > { %v1686_v3 = vadd.f32 %v1685_v5, %v1365_v35  ;;  %v1689_v47 = vadd.f32 %v1688_v2, %v1368_v38 }
 0x1b6   : > { %v1374_v54 = vpop.f32.mrf.mxu0  ;;  %v3487_v29 = vpop.f32.mrf.mxu1 }
 0x1b7   : > { %v1373_v54 = vadd.f32 %v3132_v13, %v1372_v63  ;;  %v1852_v2 = vmax.f32 %v1686_v3, 0.0  ;;  %v1853_v0 = vmax.f32 %v1689_v47, 0.0 }
 0x1b8   : > { %v1375_v46 = vpop.f32.mrf.mxu0  ;;  %v3503_v14 = vpop.f32.mrf.mxu1 }
 0x1b9   : > { %3850 = vst [vmem:[#allocation25_spill] sm:$0xff] %v3503_v14  ;;  %v1376_v8 = vadd.f32 %v3132_v13, %v1375_v46  ;;  %v1694_v5 = vadd.f32 %v2536_v23, %v1373_v54  ;;  %v1927_v23 = vmul.f32 %v3224_v51, %v1848_v20  ;;  %v1930_v54 = vmul.f32 %v3224_v51, %v1851_v36 }
 0x1ba   : > { %v1377_v63 = vpop.f32.mrf.mxu0  ;;  %v3526_v59 = vpop.f32.mrf.mxu1 }
 0x1bb   : > { %v3542_v63 = vadd.f32 %v3132_v13, %v3111_v52  ;;  %v1697_v40 = vadd.f32 %v2537_v9, %v1376_v8  ;;  %v1928_v52 = vmul.f32 %v3224_v51, %v1849_v61  ;;  %v1929_v9 = vmul.f32 %v3224_v51, %v1850_v32 }
 0x1bc   : > { %v1380_v35 = vpop.f32.mrf.mxu0  ;;  %v2548_v46 = vpop.f32.mrf.mxu1  ;;  %v1854_v8 = vmax.f32 %v1694_v5, 0.0  ;;  %v2006_v4 = vadd.f32 %v3241_v41, %v1927_v23  ;;  %v1931_v32 = vmul.f32 %v3224_v51, %v1852_v2  ;;  %v1932_v23 = vmul.f32 %v3224_v51, %v1853_v0 }
 0x1bd   : > { %v1381_v14 = vadd.f32 %v3132_v13, %v1380_v35  ;;  %v1742_v44 = vadd.f32 %v2548_v46, %v1421_v37  ;;  %v3565_v35 = vadd.f32 %v3132_v13, %v3127_v12  ;;  %v1855_v61 = vmax.f32 %v1697_v40, 0.0 }
 0x1be   : > { %v1382_v58 = vpop.f32.mrf.mxu0  ;;  %v3554_v43 = vpop.f32.mrf.mxu1  ;;  %v3576_v12 = vadd.f32 %v3241_v41, %v1929_v9  ;;  %v1933_v2 = vmul.f32 %v3224_v51, %v1854_v8 }
 0x1bf   : > { %v1702_v38 = vadd.f32 %v1701_v53, %v1381_v14  ;;  %v1866_v37 = vmax.f32 %v1742_v44, 0.0  ;;  %v2007_v44 = vadd.f32 %v3241_v41, %v1928_v52  ;;  %v1934_v52 = vmul.f32 %v3224_v51, %v1855_v61 }
 0x1c0   : > { %v1383_v20 = vpop.f32.mrf.mxu0  ;;  %v2549_v3 = vpop.f32.mrf.mxu1 }
 0x1c1   : > { %v1945_v14 = vmul.f32 %v3224_v51, %v1866_v37  ;;  %v1384_v53 = vadd.f32 %v3132_v13, %v1383_v20  ;;  %v1856_v36 = vmax.f32 %v1702_v38, 0.0  ;;  %v1745_v47 = vadd.f32 %v2549_v3, %v3484_v1 }
 0x1c2   : > { %v1385_v5 = vpop.f32.mrf.mxu0  ;;  %v3572_v46 = vpop.f32.mrf.mxu1  ;;  %v3581_v37 = vadd.f32 %v3241_v41, %v1930_v54 }
 0x1c3   : > { %3851 = vst [vmem:[#allocation26_spill] sm:$0xff] %v3572_v46  ;;  %v2024_v40 = vadd.f32 %v3241_v41, %v1945_v14  ;;  %v1705_v58 = vadd.f32 %v3473_v22, %v1384_v53  ;;  %v1867_v1 = vmax.f32 %v1745_v47, 0.0  ;;  %v2010_v14 = vadd.f32 %v3241_v41, %v1931_v32 }
 0x1c4   : > { %v1388_v38 = vpop.f32.mrf.mxu0  ;;  %v2552_v20 = vpop.f32.mrf.mxu1  ;;  %v1935_v22 = vmul.f32 %v3224_v51, %v1856_v36  ;;  %v3852_v47 = vmax.f32 %v3246_v57, %v3259_v45  ;;  %v3599_v32 = vadd.f32 %v3241_v41, %v1932_v23  ;;  %v3602_v36 = vadd.f32 %v3241_v41, %v1933_v2 }
 0x1c5   : > { %v2060_v3 = vmax.f32 %v2006_v4, %v2024_v40  ;;  %v1857_v9 = vmax.f32 %v1705_v58, 0.0  ;;  %v1389_v5 = vadd.f32 %v3132_v13, %v1388_v38  ;;  %v1946_v54 = vmul.f32 %v3224_v51, %v1867_v1 }
 0x1c6   : > { %v1758_v0 = vadd.f32 %v2552_v20, %v3499_v62  ;;  %v1390_v53 = vpop.f32.mrf.mxu0  ;;  %v1749_v8 = vpop.f32.mrf.mxu1 }
 0x1c7   : > { %v2078_v46 = vmax.f32 %v3852_v47, %v2060_v3  ;;  %v1936_v61 = vmul.f32 %v3224_v51, %v1857_v9  ;;  %v1710_v4 = vadd.f32 %v3468_v39, %v1389_v5  ;;  %v1750_v40 = vadd.f32 %v1749_v8, %v3491_v17 }
 0x1c8   : > { %v2025_v57 = vadd.f32 %v3241_v41, %v1946_v54  ;;  %v1870_v45 = vmax.f32 %v1758_v0, 0.0  ;;  %v1391_v62 = vpop.f32.mrf.mxu0  ;;  %v2553_v58 = vpop.f32.mrf.mxu1  ;;  %v3611_v39 = vadd.f32 %v3241_v41, %v1934_v52  ;;  %v3617_v54 = vadd.f32 %v3241_v41, %v1935_v22  ;;  %v3853_v0 = vld [vmem:[#allocation2_spill] sm:$0xff] }
 0x1c9   : > { %v2434_v17 = vpack.c.bf16 %v2078_v46, %v2078_v46  ;;  %v1858_v23 = vmax.f32 %v1710_v4, 0.0  ;;  %v1868_v1 = vmax.f32 %v1750_v40, 0.0  ;;  %v1392_v20 = vadd.f32 %v3132_v13, %v1391_v62 }
 0x1ca   : > { %v2061_v38 = vmax.f32 %v2007_v44, %v2025_v57  ;;  %v1949_v2 = vmul.f32 %v3224_v51, %v1870_v45  ;;  %v1761_v3 = vadd.f32 %v2553_v58, %v3507_v6  ;;  %v1393_v9 = vpop.f32.mrf.mxu0  ;;  %v1752_v5 = vpop.f32.mrf.mxu1  ;;  %v3622_v52 = vadd.f32 %v3241_v41, %v1936_v61 }
 0x1cb   : > { %2169 = vst.msk [vmem:[%s3607_s22] sm:$0xf] %vm2168_vm1, %v2434_v17  ;;  %v1947_v46 = vmul.f32 %v3224_v51, %v1868_v1  ;;  %v1753_v44 = vadd.f32 %v1752_v5, %v3495_v34  ;;  %v3854_v53 = vmax.f32 %v3276_v55, %v3853_v0  ;;  %v1713_v47 = vadd.f32 %v3470_v42, %v1392_v20  ;;  %v3856_v0 = vld [vmem:[#allocation4_spill] sm:$0xff] }
 0x1cc   : > { %v2028_v6 = vadd.f32 %v3241_v41, %v1949_v2  ;;  %v1871_v4 = vmax.f32 %v1761_v3, 0.0  ;;  %v1396_v22 = vpop.f32.mrf.mxu0  ;;  %v2556_v40 = vpop.f32.mrf.mxu1  ;;  %v1937_v57 = vmul.f32 %v3224_v51, %v1858_v23  ;;  %v3855_v3 = vmax.f32 %v3299_v26, %v3311_v33 }
 0x1cd   : > { %v2079_v8 = vmax.f32 %v3854_v53, %v2061_v38  ;;  %v2026_v61 = vadd.f32 %v3241_v41, %v1947_v46  ;;  %v1869_v45 = vmax.f32 %v1753_v44, 0.0  ;;  %v1397_v62 = vadd.f32 %v3132_v13, %v1396_v22 }
 0x1ce   : > { %v2064_v58 = vmax.f32 %v2010_v14, %v2028_v6  ;;  %v1859_v17 = vmax.f32 %v1713_v47, 0.0  ;;  %v1950_v55 = vmul.f32 %v3224_v51, %v1871_v4  ;;  %v1398_v1 = vpop.f32.mrf.mxu0  ;;  %v1765_v38 = vpop.f32.mrf.mxu1  ;;  %v1774_v23 = vadd.f32 %v2556_v40, %v3520_v18 }
 0x1cf   : > { %v2435_v34 = vpack.c.bf16 %v2079_v8, %v2079_v8  ;;  %v2062_v42 = vmax.f32 %v3576_v12, %v2026_v61  ;;  %v1948_v2 = vmul.f32 %v3224_v51, %v1869_v45  ;;  %v1718_v20 = vadd.f32 %v3487_v29, %v1397_v62 }
 0x1d0   : > { %v2082_v9 = vmax.f32 %v3855_v3, %v2064_v58  ;;  %v1938_v14 = vmul.f32 %v3224_v51, %v1859_v17  ;;  %v2029_v5 = vadd.f32 %v3241_v41, %v1950_v55  ;;  %v1766_v46 = vadd.f32 %v1765_v38, %v3511_v10  ;;  %v1399_v44 = vpop.f32.mrf.mxu0  ;;  %v2557_v12 = vpop.f32.mrf.mxu1 }
 0x1d1   : > { %2170 = vst.msk [vmem:[%s3607_s22 + $0x4] sm:$0xf] %vm2168_vm1, %v2435_v34  ;;  %v3857_v29 = vmax.f32 %v3268_v7, %v3856_v0  ;;  %v2027_v18 = vadd.f32 %v3241_v41, %v1948_v2  ;;  %v1860_v8 = vmax.f32 %v1718_v20, 0.0  ;;  %v1874_v6 = vmax.f32 %v1774_v23, 0.0  ;;  %v3860_v0 = vld [vmem:[#allocation6_spill] sm:$0xff] }
 0x1d2   : > { %v3652_v26 = vadd.f32 %v3241_v41, %v1937_v57  ;;  %v2438_v33 = vpack.c.bf16 %v2082_v9, %v2082_v9  ;;  %v2065_v47 = vmax.f32 %v3599_v32, %v2029_v5  ;;  %v1872_v4 = vmax.f32 %v1766_v46, 0.0  ;;  %v1401_v10 = vpop.f32.mrf.mxu0  ;;  %v1768_v22 = vpop.f32.mrf.mxu1 }
 0x1d3   : > { %v2080_v53 = vmax.f32 %v3857_v29, %v2062_v42  ;;  %v3656_v61 = vadd.f32 %v3241_v41, %v1938_v14  ;;  %v2063_v7 = vmax.f32 %v3581_v37, %v2027_v18  ;;  %v1953_v45 = vmul.f32 %v3224_v51, %v1874_v6 }
 0x1d4   : > { %2173 = vst.msk [vmem:[%s3607_s22 + $0x10] sm:$0xf] %vm2168_vm1, %v2438_v33  ;;  %v3858_v57 = vmax.f32 %v3308_v25, %v3331_v60  ;;  %v1951_v34 = vmul.f32 %v3224_v51, %v1872_v4  ;;  %v1400_v32 = vadd.f32 %v3132_v13, %v1399_v44  ;;  %v1777_v58 = vadd.f32 %v2557_v12, %v3524_v27  ;;  %v1404_v17 = vpop.f32.mrf.mxu0  ;;  %v2560_v55 = vpop.f32.mrf.mxu1 }
 0x1d5   : > { %v2436_v40 = vpack.c.bf16 %v2080_v53, %v2080_v53  ;;  %v3859_v37 = vmax.f32 %v3271_v15, %v3336_v21  ;;  %v1939_v38 = vmul.f32 %v3224_v51, %v1860_v8  ;;  %v2032_v25 = vadd.f32 %v3241_v41, %v1953_v45 }
 0x1d6   : > { %v2083_v62 = vmax.f32 %v3858_v57, %v2065_v47  ;;  %v1769_v60 = vadd.f32 %v1768_v22, %v3515_v16  ;;  %v2030_v2 = vadd.f32 %v3241_v41, %v1951_v34  ;;  %v1721_v27 = vadd.f32 %v3526_v59, %v1400_v32  ;;  %v1406_v23 = vpop.f32.mrf.mxu0  ;;  %v1781_v3 = vpop.f32.mrf.mxu1  ;;  %v2771_v32 = vld [vmem:[%s3800_s2] ss:$0 sm:$0xff] }
 0x1d7   : > { %2171 = vst.msk [vmem:[%s3607_s22 + $0x8] sm:$0xf] %vm2168_vm1, %v2436_v40  ;;  %v2081_v1 = vmax.f32 %v3859_v37, %v2063_v7  ;;  %v1875_v20 = vmax.f32 %v1777_v58, 0.0  ;;  %v2068_v14 = vmax.f32 %v3617_v54, %v2032_v25  ;;  %v1405_v21 = vadd.f32 %v3132_v13, %v1404_v17  ;;  %v3864_v17 = vld [vmem:[#allocation8_spill] sm:$0xff] }
 0x1d8   : > { %v2439_v42 = vpack.c.bf16 %v2083_v62, %v2083_v62  ;;  %v1873_v15 = vmax.f32 %v1769_v60, 0.0  ;;  %v2066_v5 = vmax.f32 %v3602_v36, %v2030_v2  ;;  %v1861_v16 = vmax.f32 %v1721_v27, 0.0  ;;  %v1407_v12 = vpop.f32.mrf.mxu0  ;;  %v2561_v59 = vpop.f32.mrf.mxu1  ;;  %v3867_v2 = vld [vmem:[#allocation9_spill] sm:$0xff] }
 0x1d9   : > { %v2437_v9 = vpack.c.bf16 %v2081_v1, %v2081_v1  ;;  %v1954_v46 = vmul.f32 %v3224_v51, %v1875_v20  ;;  %v1790_v44 = vadd.f32 %v2560_v55, %v3538_v50  ;;  %v3861_v29 = vmax.f32 %v3343_v31, %v3860_v0  ;;  %v3870_v0 = vld [vmem:[#allocation11_spill] sm:$0xff] }
 0x1da   : > { %2174 = vst.msk [vmem:[%s3607_s22 + $0x14] sm:$0xf] %vm2168_vm1, %v2439_v42  ;;  %v1952_v53 = vmul.f32 %v3224_v51, %v1873_v15  ;;  %v1726_v13 = vadd.f32 %v3478_v30, %v1405_v21  ;;  %v1782_v18 = vadd.f32 %v1781_v3, %v3530_v24  ;;  %v3862_v36 = vmax.f32 %v3289_v11, %v3361_v49  ;;  %v1409_v47 = vpop.f32.mrf.mxu0  ;;  %v1784_v4 = vpop.f32.mrf.mxu1  ;;  %v3866_v42 = vld [vmem:[#allocation3_spill] sm:$0xff] }
 0x1db   : > { %2172 = vst.msk [vmem:[%s3607_s22 + $0xc] sm:$0xf] %vm2168_vm1, %v2437_v9  ;;  %v2086_v54 = vmax.f32 %v3861_v29, %v2068_v14  ;;  %v1940_v50 = vmul.f32 %v3224_v51, %v1861_v16  ;;  %v2033_v6 = vadd.f32 %v3241_v41, %v1954_v46  ;;  %v1878_v33 = vmax.f32 %v1790_v44, 0.0  ;;  %v3869_v9 = vld [vmem:[#allocation25_spill] sm:$0xff]  ;;  %v3871_v29 = vld [vmem:[#allocation12_spill] sm:$0xff] }
 0x1dc   : > { %v2084_v8 = vmax.f32 %v3862_v36, %v2066_v5  ;;  %v2031_v10 = vadd.f32 %v3241_v41, %v1952_v53  ;;  %v1862_v22 = vmax.f32 %v1726_v13, 0.0  ;;  %v1876_v30 = vmax.f32 %v1782_v18, 0.0  ;;  %v1412_v7 = vpop.f32.mrf.mxu0  ;;  %v2564_v45 = vpop.f32.mrf.mxu1 }
 0x1dd   : > { %v2442_v31 = vpack.c.bf16 %v2086_v54, %v2086_v54  ;;  %v2018_v24 = vadd.f32 %v3241_v41, %v1939_v38  ;;  %v2069_v11 = vmax.f32 %v3622_v52, %v2033_v6  ;;  %v1957_v49 = vmul.f32 %v3224_v51, %v1878_v33  ;;  %v3863_v52 = vld [vmem:[#allocation7_spill] sm:$0xff]  ;;  %v3874_v6 = vld [vmem:[#allocation13_spill] sm:$0xff] }
 0x1de   : > { %v2440_v40 = vpack.c.bf16 %v2084_v8, %v2084_v8  ;;  %v2019_v57 = vadd.f32 %v3241_v41, %v1940_v50  ;;  %v2067_v62 = vmax.f32 %v3611_v39, %v2031_v10  ;;  %v1955_v34 = vmul.f32 %v3224_v51, %v1876_v30  ;;  %v1414_v39 = vpop.f32.mrf.mxu0  ;;  %v1797_v60 = vpop.f32.mrf.mxu1  ;;  %v3873_v50 = vld [vmem:[#allocation5_spill] sm:$0xff] }
 0x1df   : > { %2177 = vst.msk [vmem:[%s3607_s22 + $0x20] sm:$0xf] %vm2168_vm1, %v2442_v31  ;;  %v1408_v58 = vadd.f32 %v2771_v32, %v1407_v12  ;;  %v3865_v55 = vmax.f32 %v3863_v52, %v3864_v17  ;;  %v2036_v1 = vadd.f32 %v3241_v41, %v1957_v49  ;;  %v1793_v38 = vadd.f32 %v2561_v59, %v3542_v63 }
 0x1e0   : > { %2175 = vst.msk [vmem:[%s3607_s22 + $0x18] sm:$0xf] %vm2168_vm1, %v2440_v40  ;;  %v1785_v25 = vadd.f32 %v1784_v4, %v3534_v28  ;;  %v3868_v27 = vmax.f32 %v3866_v42, %v3867_v2  ;;  %v1941_v23 = vmul.f32 %v3224_v51, %v1862_v22  ;;  %v2034_v3 = vadd.f32 %v3241_v41, %v1955_v34  ;;  %v1415_v16 = vpop.f32.mrf.mxu0  ;;  %v2565_v28 = vpop.f32.mrf.mxu1 }
 0x1e1   : > { %v2087_v37 = vmax.f32 %v3865_v55, %v2069_v11  ;;  %v1729_v14 = vadd.f32 %v3869_v9, %v1408_v58  ;;  %v2072_v21 = vmax.f32 %v2018_v24, %v2036_v1  ;;  %v1879_v5 = vmax.f32 %v1793_v38, 0.0  ;;  %v3876_v55 = vld [vmem:[#allocation14_spill] sm:$0xff] }
 0x1e2   : > { %v2085_v20 = vmax.f32 %v3868_v27, %v2067_v62  ;;  %v1877_v63 = vmax.f32 %v1785_v25, 0.0  ;;  %v2070_v44 = vmax.f32 %v3652_v26, %v2034_v3  ;;  %v1413_v59 = vadd.f32 %v2771_v32, %v1412_v7  ;;  %v1417_v8 = vpop.f32.mrf.mxu0  ;;  %v1800_v24 = vpop.f32.mrf.mxu1  ;;  %v3879_v38 = vld [vmem:[#allocation10_spill] sm:$0xff] }
 0x1e3   : > { %v2443_v15 = vpack.c.bf16 %v2087_v37, %v2087_v37  ;;  %v1863_v12 = vmax.f32 %v1729_v14, 0.0  ;;  %v3872_v54 = vmax.f32 %v3870_v0, %v3871_v29  ;;  %v1958_v13 = vmul.f32 %v3224_v51, %v1879_v5  ;;  %v3877_v37 = vld [vmem:[#allocation15_spill] sm:$0xff] }
 0x1e4   : > { %v2441_v46 = vpack.c.bf16 %v2085_v20, %v2085_v20  ;;  %v1956_v18 = vmul.f32 %v3224_v51, %v1877_v63  ;;  %v1806_v36 = vadd.f32 %v2564_v45, %v3560_v56  ;;  %v2020_v26 = vadd.f32 %v3241_v41, %v1941_v23 }
 0x1e5   : > { %2178 = vst.msk [vmem:[%s3607_s22 + $0x24] sm:$0xf] %vm2168_vm1, %v2443_v15  ;;  %v2090_v53 = vmax.f32 %v3872_v54, %v2072_v21  ;;  %v3875_v33 = vmax.f32 %v3873_v50, %v3874_v6  ;;  %v1734_v4 = vadd.f32 %v3554_v43, %v1413_v59  ;;  %v1798_v31 = vadd.f32 %v1797_v60, %v3547_v19  ;;  %v3882_v60 = vld [vmem:[#allocation26_spill] sm:$0xff]  ;;  %v3887_v59 = vld [vmem:[#allocation20_spill] sm:$0xff] }
 0x1e6   : > { %2176 = vst.msk [vmem:[%s3607_s22 + $0x1c] sm:$0xf] %vm2168_vm1, %v2441_v46  ;;  %v2037_v22 = vadd.f32 %v3241_v41, %v1958_v13  ;;  %v2035_v56 = vadd.f32 %v3241_v41, %v1956_v18  ;;  %v1882_v30 = vmax.f32 %v1806_v36, 0.0  ;;  %v1942_v11 = vmul.f32 %v3224_v51, %v1863_v12  ;;  %v3886_v12 = vld [vmem:[#allocation19_spill] sm:$0xff]  ;;  %v3890_v50 = vld [vmem:[#allocation24_spill] sm:$0xff] }
 0x1e7   : > { %v2088_v47 = vmax.f32 %v3875_v33, %v2070_v44  ;;  %v2446_v10 = vpack.c.bf16 %v2090_v53, %v2090_v53  ;;  %v1864_v49 = vmax.f32 %v1734_v4, 0.0  ;;  %v1880_v7 = vmax.f32 %v1798_v31, 0.0  ;;  %v3893_v4 = vld [vmem:[#allocation23_spill] sm:$0xff] }
 0x1e8   : > { %v2073_v45 = vmax.f32 %v2019_v57, %v2037_v22  ;;  %v2071_v43 = vmax.f32 %v3656_v61, %v2035_v56  ;;  %v1961_v62 = vmul.f32 %v3224_v51, %v1882_v30  ;;  %v1416_v19 = vadd.f32 %v2771_v32, %v1415_v16  ;;  %v3880_v61 = vld [vmem:[#allocation16_spill] sm:$0xff]  ;;  %v3883_v16 = vld [vmem:[#allocation17_spill] sm:$0xff] }
 0x1e9   : > { %v2444_v40 = vpack.c.bf16 %v2088_v47, %v2088_v47  ;;  %2181 = vst.msk [vmem:[%s3607_s22 + $0x30] sm:$0xf] %vm2168_vm1, %v2446_v10  ;;  %v1943_v34 = vmul.f32 %v3224_v51, %v1864_v49  ;;  %v1959_v58 = vmul.f32 %v3224_v51, %v1880_v7  ;;  %v1809_v52 = vadd.f32 %v2565_v28, %v3565_v35  ;;  %v3884_v28 = vld [vmem:[#allocation18_spill] sm:$0xff] }
 0x1ea   : > { %v1801_v17 = vadd.f32 %v1800_v24, %v3551_v48  ;;  %v3878_v1 = vmax.f32 %v3876_v55, %v3877_v37  ;;  %v3881_v25 = vmax.f32 %v3879_v38, %v3880_v61  ;;  %v2040_v39 = vadd.f32 %v3241_v41, %v1961_v62  ;;  %v3892_v47 = vld [vmem:[#allocation22_spill] sm:$0xff] }
 0x1eb   : > { %2179 = vst.msk [vmem:[%s3607_s22 + $0x28] sm:$0xf] %vm2168_vm1, %v2444_v40  ;;  %v1737_v42 = vadd.f32 %v3882_v60, %v1416_v19  ;;  %v2022_v2 = vadd.f32 %v3241_v41, %v1943_v34  ;;  %v2038_v35 = vadd.f32 %v3241_v41, %v1959_v58  ;;  %v1883_v27 = vmax.f32 %v1809_v52, 0.0 }
 0x1ec   : > { %v2091_v57 = vmax.f32 %v3878_v1, %v2073_v45  ;;  %v2089_v32 = vmax.f32 %v3881_v25, %v2071_v43  ;;  %v1881_v48 = vmax.f32 %v1801_v17, 0.0  ;;  %v2021_v63 = vadd.f32 %v3241_v41, %v1942_v11 }
 0x1ed   : > { %v1865_v3 = vmax.f32 %v1737_v42, 0.0  ;;  %v2076_v9 = vmax.f32 %v2022_v2, %v2040_v39  ;;  %v2074_v14 = vmax.f32 %v2020_v26, %v2038_v35  ;;  %v1962_v15 = vmul.f32 %v3224_v51, %v1883_v27  ;;  %v3889_v26 = vld [vmem:[#allocation21_spill] sm:$0xff] }
 0x1ee   : > { %v2447_v20 = vpack.c.bf16 %v2091_v57, %v2091_v57  ;;  %v2445_v23 = vpack.c.bf16 %v2089_v32, %v2089_v32  ;;  %v1960_v21 = vmul.f32 %v3224_v51, %v1881_v48  ;;  %v3885_v46 = vmax.f32 %v3883_v16, %v3884_v28 }
 0x1ef   : > { %v1944_v5 = vmul.f32 %v3224_v51, %v1865_v3  ;;  %v3888_v0 = vmax.f32 %v3886_v12, %v3887_v59  ;;  %v2041_v13 = vadd.f32 %v3241_v41, %v1962_v15  ;;  %v3891_v6 = vmax.f32 %v3889_v26, %v3890_v50 }
 0x1f0   : > { %2182 = vst.msk [vmem:[%s3607_s22 + $0x34] sm:$0xf] %vm2168_vm1, %v2447_v20  ;;  %2180 = vst.msk [vmem:[%s3607_s22 + $0x2c] sm:$0xf] %vm2168_vm1, %v2445_v23  ;;  %v2094_v44 = vmax.f32 %v3885_v46, %v2076_v9  ;;  %v2039_v54 = vadd.f32 %v3241_v41, %v1960_v21  ;;  %v3894_v31 = vmax.f32 %v3892_v47, %v3893_v4 }
 0x1f1   : > { %v2092_v29 = vmax.f32 %v3888_v0, %v2074_v14  ;;  %v2023_v53 = vadd.f32 %v3241_v41, %v1944_v5 }
 0x1f2   : > { %v2450_v18 = vpack.c.bf16 %v2094_v44, %v2094_v44  ;;  %v2075_v36 = vmax.f32 %v2021_v63, %v2039_v54 }
 0x1f3   : > { %v2448_v51 = vpack.c.bf16 %v2092_v29, %v2092_v29  ;;  %v2077_v8 = vmax.f32 %v2023_v53, %v2041_v13 }
 0x1f4   : > { %2185 = vst.msk [vmem:[%s3607_s22 + $0x40] sm:$0xf] %vm2168_vm1, %v2450_v18  ;;  %v2093_v33 = vmax.f32 %v3891_v6, %v2075_v36 }
 0x1f5   : > { %2183 = vst.msk [vmem:[%s3607_s22 + $0x38] sm:$0xf] %vm2168_vm1, %v2448_v51  ;;  %v2095_v10 = vmax.f32 %v3894_v31, %v2077_v8 }
 0x1f6   : > { %v2449_v22 = vpack.c.bf16 %v2093_v33, %v2093_v33 }
 0x1f7   : > { %v2451_v56 = vpack.c.bf16 %v2095_v10, %v2095_v10 }
 0x1f8   : > { %2184 = vst.msk [vmem:[%s3607_s22 + $0x3c] sm:$0xf] %vm2168_vm1, %v2449_v22 }
 0x1f9   : > { %2186 = vst.msk [vmem:[%s3607_s22 + $0x44] sm:$0xf] %vm2168_vm1, %v2451_v56 }
 0x1fa PF: > { %s15_s18 = sadd.s32 1, %s2778_s18  }
 0x1fb   : > { %p12_p4 = scmp.ge.s32.totalorder %s15_s18, 4  }
 0x1fd   :  { %14 = sbr.rel (!%p12_p4) target bundleno = 1 (0x1), region = 70 }

// kernel: simple_cnn_forward.6
= control target key start
LH: loop header
LB: loop body
LE: loop exit
PB: predicated region body
PF: predicated region fallthrough
CT: control target
= control target key end

     0   :  { %s1177_s18 = smov 0   ;;  %s1362_s0 = inlined_call_operand.vmem [shape: bf16[2,4,32,288], index: 0, kind: input, shape index: {}]   ;;  %s1363_s1 = inlined_call_operand.vmem [shape: bf16[288,32], index: 1, kind: input, shape index: {}]   ;;  %s1364_s2 = inlined_call_operand.vmem [shape: f32[1,32], index: 2, kind: input, shape index: {}]   ;;  %s1365_s3 = inlined_call_operand.vmem [shape: f32[1,32], index: 3, kind: input, shape index: {}]   ;;  %s1366_s4 = inlined_call_operand.vmem [shape: f32[1,32], index: 4, kind: input, shape index: {}]   ;;  %s1367_s5 = inlined_call_operand.vmem [shape: bf16[2,32,32], index: 5, kind: output, shape index: {}]  }
   0x1 LB: > { %s898_s19 = sadd.s32 4294967295, %s1145_s18   ;;  %p902_p0 = scmp.ge.s32.totalorder %s1145_s18, 1  ;;  %s1145_s18 = sphi %s1177_s18, %s15_s18  }
   0x2   : > { %p187_p1 = scmp.lt.s32.totalorder %s1145_s18, 3 }
   0x4   : > { %p188_p2 = pnand %p902_p0, %p187_p1 }
   0x5   : > { %p215_p3 = scmp.lt.s32.totalorder (!%p188_p2), %s898_s19, 1 }
   0x6   : > { %191 = sbr.rel (%p188_p2) target bundleno = 302 (0x12e), region = 40 }
   0xb   : > { %v1089_v0 = vld [vmem:[%s1363_s1 + $0x78] sm:$0xff]   ;;  %v1091_v2 = vld [vmem:[%s1363_s1 + $0x70] sm:$0xff]   ;;  %v1093_v4 = vld [vmem:[%s1363_s1 + $0x68] sm:$0xff]   ;;  %s1369_s19 = smov (!%p215_p3, %s898_s19), 1  ;;  %vm529_vm0 = vcmask 261120   ;;  %vm838_vm1 = vcmask 257024  }
   0xc   : > { %v1090_v1 = vld [vmem:[%s1363_s1 + $0x38] sm:$0xff]   ;;  %970 = vmatprep.subr.bf16.mxu0 %v1089_v0  ;;  %1064 = vmatprep.subr.bf16.mxu1 %v1089_v0  ;;  %v1092_v3 = vld [vmem:[%s1363_s1 + $0x30] sm:$0xff]   ;;  %v1094_v5 = vld [vmem:[%s1363_s1 + $0x28] sm:$0xff]   ;;  %s1080_s9 = smul.u32 192, %s1369_s19  ;;  %s965_s20 = sshll.u32 %s1369_s19, 4 }
   0xd   : > { %971 = vmatpush3.bf16.msra.mxu0 %v1090_v1  ;;  %1072 = vmatpush3.bf16.msra.mxu1 %v1090_v1  ;;  %v1095_v6 = vld [vmem:[%s1363_s1 + $0x60] sm:$0xff]   ;;  %v1097_v8 = vld [vmem:[%s1363_s1 + $0x58] sm:$0xff]   ;;  %v1099_v10 = vld [vmem:[%s1363_s1 + $0x50] sm:$0xff]   ;;  %s224_s22 = scalar_lea.vmem %s1367_s5, %s965_s20 }
   0xe   : > { %972 = vmatprep.subr.bf16.mxu0 %v1091_v2  ;;  %1065 = vmatprep.subr.bf16.mxu1 %v1091_v2  ;;  %v1096_v7 = vld [vmem:[%s1363_s1 + $0x20] sm:$0xff]   ;;  %s1218_s16 = scalar_lea.vmem %s1362_s0, %s1080_s9  ;;  %v1098_v9 = vld [vmem:[%s1363_s1 + $0x18] sm:$0xff]   ;;  %v1100_v13 = vld [vmem:[%s1363_s1 + $0x10] sm:$0xff]  }
   0xf   : > { %v1107_v11 = vld [vmem:[%s1218_s16 + $0x4] ss:$12 sps:$4 sm:$0xff]   ;;  %v1110_v12 = vld [vmem:[%s1218_s16 + $0x94] ss:$12 sps:$4 sm:$0xff]   ;;  %v1101_v14 = vld [vmem:[%s1363_s1 + $0x48] sm:$0xff]  }
  0x10   : > { %586 = vmatprep.mubr.bf16.mxu0 %v1107_v11  ;;  %634 = vmatprep.mubr.bf16.mxu1 %v1110_v12  ;;  %v1102_v15 = vld [vmem:[%s1363_s1 + $0x8] sm:$0xff]   ;;  %v1103_v16 = vld [vmem:[%s1363_s1 + $0x40] sm:$0xff]   ;;  %v1108_v20 = vld [vmem:[%s1218_s16 + $0x90] ss:$12 sps:$4 sm:$0xff]  }
  0x11   : > { %973 = vmatpush3.bf16.msra.mxu0 %v1092_v3  ;;  %1073 = vmatpush3.bf16.msra.mxu1 %v1092_v3  ;;  %v1104_v17 = vld [vmem:[%s1363_s1] sm:$0xff]   ;;  %v1111_v19 = vld [vmem:[%s1363_s1 + $0x88] sm:$0xff]   ;;  %v1122_v28 = vld [vmem:[%s1218_s16 + $0x30] ss:$12 sps:$4 sm:$0xff]  }
  0x12   : > { %974 = vmatprep.subr.bf16.mxu0 %v1093_v4  ;;  %1066 = vmatprep.subr.bf16.mxu1 %v1093_v4  ;;  %v1105_v18 = vld [vmem:[%s1218_s16] ss:$12 sps:$4 sm:$0xff]   ;;  %v1112_v21 = vld [vmem:[%s1218_s16 + $0x1c] ss:$12 sps:$4 sm:$0xff]   ;;  %v1116_v24 = vld [vmem:[%s1218_s16 + $0x18] ss:$12 sps:$4 sm:$0xff]  }
  0x13   : > { %v1114_v22 = vld [vmem:[%s1218_s16 + $0xac] ss:$12 sps:$4 sm:$0xff]   ;;  %v1118_v23 = vld [vmem:[%s1363_s1 + $0x80] sm:$0xff]   ;;  %v1117_v25 = vld [vmem:[%s1218_s16 + $0xa8] ss:$12 sps:$4 sm:$0xff]  }
  0x14   : > { %v1119_v26 = vld [vmem:[%s1218_s16 + $0x34] ss:$12 sps:$4 sm:$0xff]   ;;  %v1124_v30 = vld [vmem:[%s1218_s16 + $0x4c] ss:$12 sps:$4 sm:$0xff]   ;;  %v1128_v33 = vld [vmem:[%s1218_s16 + $0x50] ss:$12 sps:$4 sm:$0xff]  }
  0x15   : > { %975 = vmatpush3.bf16.msra.mxu0 %v1094_v5  ;;  %1074 = vmatpush3.bf16.msra.mxu1 %v1094_v5  ;;  %v1121_v27 = vld [vmem:[%s1218_s16 + $0x8] ss:$12 sps:$4 sm:$0xff]   ;;  %v1123_v29 = vld [vmem:[%s1218_s16 + $0x20] ss:$12 sps:$4 sm:$0xff]   ;;  %v1126_v31 = vld [vmem:[%s1218_s16 + $0x38] ss:$12 sps:$4 sm:$0xff]  }
  0x16   : > { %976 = vmatprep.subr.bf16.mxu0 %v1095_v6  ;;  %1067 = vmatprep.subr.bf16.mxu1 %v1095_v6  ;;  %v1127_v32 = vld [vmem:[%s1218_s16 + $0x48] ss:$12 sps:$4 sm:$0xff]   ;;  %v1129_v34 = vld [vmem:[%s1218_s16 + $0x64] ss:$12 sps:$4 sm:$0xff]   ;;  %v1132_v36 = vld [vmem:[%s1218_s16 + $0x60] ss:$12 sps:$4 sm:$0xff]  }
  0x17   : > { %v1131_v35 = vld [vmem:[%s1218_s16 + $0x68] ss:$12 sps:$4 sm:$0xff]   ;;  %v1133_v37 = vld [vmem:[%s1218_s16 + $0x80] ss:$12 sps:$4 sm:$0xff]   ;;  %v1136_v39 = vld [vmem:[%s1218_s16 + $0x98] ss:$12 sps:$4 sm:$0xff]  }
  0x18   : > { %v1134_v38 = vld [vmem:[%s1218_s16 + $0x7c] ss:$12 sps:$4 sm:$0xff]   ;;  %v1137_v40 = vld [vmem:[%s1218_s16 + $0x78] ss:$12 sps:$4 sm:$0xff]  }
  0x19   : > { %977 = vmatpush3.bf16.msra.mxu0 %v1096_v7  ;;  %1075 = vmatpush3.bf16.msra.mxu1 %v1096_v7  ;;  %v1138_v41 = vld [vmem:[%s1218_s16 + $0xb0] ss:$12 sps:$4 sm:$0xff]  }
  0x1a   : > { %978 = vmatprep.subr.bf16.mxu0 %v1097_v8  ;;  %1068 = vmatprep.subr.bf16.mxu1 %v1097_v8  ;;  %v1282_v8 = vld [vmem:[%s1364_s2] ss:$0 sm:$0xff] }
  0x1d   : > { %979 = vmatpush3.bf16.msra.mxu0 %v1098_v9  ;;  %1076 = vmatpush3.bf16.msra.mxu1 %v1098_v9 }
  0x1e   : > { %980 = vmatprep.subr.bf16.mxu0 %v1099_v10  ;;  %1069 = vmatprep.subr.bf16.mxu1 %v1099_v10 }
  0x21   : > { %981 = vmatpush3.bf16.msra.mxu0 %v1100_v13  ;;  %1077 = vmatpush3.bf16.msra.mxu1 %v1100_v13 }
  0x22   : > { %982 = vmatprep.subr.bf16.mxu0 %v1101_v14  ;;  %1070 = vmatprep.subr.bf16.mxu1 %v1101_v14 }
  0x25   : > { %983 = vmatpush3.bf16.msra.mxu0 %v1102_v15  ;;  %1078 = vmatpush3.bf16.msra.mxu1 %v1102_v15 }
  0x26   : > { %984 = vmatprep.subr.bf16.mxu0 %v1103_v16  ;;  %1071 = vmatprep.subr.bf16.mxu1 %v1103_v16 }
  0x29   : > { %985 = vmatpush3.bf16.msra.mxu0 %v1104_v17  ;;  %1079 = vmatpush3.bf16.msra.mxu1 %v1104_v17 }
  0x2a   : > { %1044 = vmatprep.subr.bf16.mxu1 %v1111_v19 }
  0x2c   : > { %587 = vmatmul.mubr.bf16.vlgmr.msra.gmra.mxu0 %v1105_v18  ;;  %635 = vmatmul.mubr.bf16.vlgmr.msra.gmra.mxu1 %v1108_v20 }
  0x2d   : > { %1045 = vmatpush3.bf16.msra.mxu1 %v1111_v19  ;;  %594 = vmatprep.mubr.bf16.mxu0 %v1112_v21 }
  0x2e   : > { %642 = vmatprep.mubr.bf16.mxu1 %v1114_v22  ;;  %1046 = vmatprep.subr.bf16.mxu1 %v1118_v23 }
  0x31   : > { %1047 = vmatpush3.bf16.msra.mxu1 %v1118_v23 }
  0x34   : > { %595 = vmatmul.mubr.bf16.gmra.mxu0 %v1116_v24  ;;  %643 = vmatmul.mubr.bf16.gmra.mxu1 %v1117_v25 }
  0x35   : > { %602 = vmatprep.mubr.bf16.mxu0 %v1119_v26  ;;  %1048 = vmatprep.mubr.msk.bf16.mxu1 %vm529_vm0, %v1121_v27 }
  0x3c   : > { %603 = vmatmul.mubr.bf16.gmra.mxu0 %v1122_v28  ;;  %1049 = vmatmul.mubr.msk.bf16.vlgmr.msra.gmra.mxu1 %vm529_vm0, %v1123_v29 }
  0x3d   : > { %610 = vmatprep.mubr.bf16.mxu0 %v1124_v30  ;;  %1052 = vmatprep.mubr.msk.bf16.mxu1 %vm529_vm0, %v1126_v31 }
  0x44   : > { %611 = vmatmul.mubr.bf16.gmra.mxu0 %v1127_v32  ;;  %1053 = vmatmul.mubr.msk.bf16.gmra.mxu1 %vm529_vm0, %v1128_v33 }
  0x45   : > { %618 = vmatprep.mubr.bf16.mxu0 %v1129_v34  ;;  %1056 = vmatprep.mubr.msk.bf16.mxu1 %vm529_vm0, %v1131_v35 }
  0x4c   : > { %619 = vmatmul.mubr.bf16.gmra.mxu0 %v1132_v36  ;;  %1057 = vmatmul.mubr.msk.bf16.gmra.mxu1 %vm529_vm0, %v1133_v37 }
  0x4d   : > { %626 = vmatprep.mubr.bf16.mxu0 %v1134_v38  ;;  %1060 = vmatprep.mubr.msk.bf16.mxu1 %vm529_vm0, %v1136_v39 }
  0x54   : > { %627 = vmatmul.mubr.bf16.gmra.mxu0 %v1137_v40  ;;  %1061 = vmatmul.mubr.msk.bf16.gmra.mxu1 %vm529_vm0, %v1138_v41  ;;  %v1299_v41 = vld [vmem:[%s1365_s3] ss:$0 sm:$0xff] }
  0xec   : > { %v986_v42 = vpop.f32.mrf.mxu0  ;;  %v1022_v43 = vpop.f32.mrf.mxu1 }
  0xee   : > { %v987_v44 = vpop.f32.mrf.mxu0  ;;  %v1023_v45 = vpop.f32.mrf.mxu1 }
  0xef   : > { %v988_v4 = vadd.f32 %v987_v44, %v986_v42  ;;  %v1024_v24 = vadd.f32 %v1023_v45, %v1022_v43 }
  0xf0   : > { %v989_v46 = vpop.f32.mrf.mxu0  ;;  %v1025_v47 = vpop.f32.mrf.mxu1 }
  0xf1   : > { %v589_v13 = vadd.f32 %v988_v4, %v1282_v8  ;;  %v637_v43 = vadd.f32 %v1024_v24, %v1282_v8 }
  0xf2   : > { %v990_v48 = vpop.f32.mrf.mxu0  ;;  %v1026_v49 = vpop.f32.mrf.mxu1 }
  0xf3   : > { %v991_v16 = vadd.f32 %v990_v48, %v989_v46  ;;  %v1027_v39 = vadd.f32 %v1026_v49, %v1025_v47 }
  0xf4   : > { %v992_v50 = vpop.f32.mrf.mxu0  ;;  %v1028_v51 = vpop.f32.mrf.mxu1 }
  0xf5   : > { %v592_v31 = vadd.f32 %v991_v16, %v1282_v8 }
  0xf6   : > { %v993_v52 = vpop.f32.mrf.mxu0  ;;  %v1029_v53 = vpop.f32.mrf.mxu1 }
  0xf7   : > { %v994_v5 = vadd.f32 %v993_v52, %v992_v50  ;;  %v1030_v29 = vadd.f32 %v1029_v53, %v1028_v51 }
  0xf8   : > { %v995_v54 = vpop.f32.mrf.mxu0  ;;  %v1031_v55 = vpop.f32.mrf.mxu1 }
  0xf9   : > { %v597_v12 = vadd.f32 %v994_v5, %v1282_v8  ;;  %v645_v49 = vadd.f32 %v1030_v29, %v1282_v8 }
  0xfa   : > { %v996_v56 = vpop.f32.mrf.mxu0  ;;  %v1032_v57 = vpop.f32.mrf.mxu1 }
  0xfb   : > { %v997_v17 = vadd.f32 %v996_v56, %v995_v54  ;;  %v1033_v40 = vadd.f32 %v1032_v57, %v1031_v55 }
  0xfc   : > { %v998_v58 = vpop.f32.mrf.mxu0  ;;  %v1050_v59 = vpop.f32.mrf.mxu1 }
  0xfd   : > { %v694_v19 = vadd.f32 %v1050_v59, %v597_v12  ;;  %v600_v30 = vadd.f32 %v997_v17, %v1282_v8 }
  0xfe   : > { %v999_v60 = vpop.f32.mrf.mxu0  ;;  %v685_v61 = vpop.f32.mrf.mxu1 }
  0xff   : > { %v1000_v9 = vadd.f32 %v999_v60, %v998_v58  ;;  %v686_v20 = vadd.f32 %v685_v61, %v589_v13  ;;  %v750_v33 = vmax.f32 %v694_v19, 0.0  ;;  %v1311_v60 = vld [vmem:[%s1366_s4] ss:$0 sm:$0xff] }
 0x100   : > { %v1001_v62 = vpop.f32.mrf.mxu0  ;;  %v1051_v63 = vpop.f32.mrf.mxu1 }
 0x101   : > { %v605_v21 = vadd.f32 %v1000_v9, %v1282_v8  ;;  %v748_v34 = vmax.f32 %v686_v20, 0.0  ;;  %v697_v44 = vadd.f32 %v1051_v63, %v600_v30  ;;  %v773_v54 = vmul.f32 %v1299_v41, %v750_v33 }
 0x102   : > { %v1002_v0 = vpop.f32.mrf.mxu0  ;;  %v688_v1 = vpop.f32.mrf.mxu1  ;;  %v648_v63 = vadd.f32 %v1033_v40, %v1282_v8 }
 0x103   : > { %v1003_v25 = vadd.f32 %v1002_v0, %v1001_v62  ;;  %v689_v45 = vadd.f32 %v688_v1, %v592_v31  ;;  %v771_v55 = vmul.f32 %v1299_v41, %v748_v34  ;;  %v640_v0 = vadd.f32 %v1027_v39, %v1282_v8 }
 0x104   : > { %v1004_v2 = vpop.f32.mrf.mxu0  ;;  %v1054_v3 = vpop.f32.mrf.mxu1  ;;  %v751_v1 = vmax.f32 %v697_v44, 0.0  ;;  %v796_v13 = vadd.f32 %v1311_v60, %v773_v54 }
 0x105   : > { %v608_v42 = vadd.f32 %v1003_v25, %v1282_v8 }
 0x106   : > { %v1005_v6 = vpop.f32.mrf.mxu0  ;;  %v701_v7 = vpop.f32.mrf.mxu1  ;;  %v774_v24 = vmul.f32 %v1299_v41, %v751_v1 }
 0x107   : > { %v1006_v18 = vadd.f32 %v1005_v6, %v1004_v2  ;;  %v702_v26 = vadd.f32 %v701_v7, %v605_v21  ;;  %v749_v2 = vmax.f32 %v689_v45, 0.0 }
 0x108   : > { %v1007_v10 = vpop.f32.mrf.mxu0  ;;  %v1284_v11 = vpop.f32.mrf.mxu1 }
 0x109   : > { %v613_v32 = vadd.f32 %v1006_v18, %v1282_v8  ;;  %v752_v46 = vmax.f32 %v702_v26, 0.0  ;;  %v772_v25 = vmul.f32 %v1299_v41, %v749_v2 }
 0x10a   : > { %v1008_v14 = vpop.f32.mrf.mxu0  ;;  %v704_v15 = vpop.f32.mrf.mxu1 }
 0x10b   : > { %v1009_v35 = vadd.f32 %v1008_v14, %v1007_v10  ;;  %v710_v52 = vadd.f32 %v1054_v3, %v613_v32  ;;  %v705_v53 = vadd.f32 %v704_v15, %v608_v42  ;;  %v775_v3 = vmul.f32 %v1299_v41, %v752_v46 }
 0x10c   : > { %v1010_v22 = vpop.f32.mrf.mxu0  ;;  %v1289_v23 = vpop.f32.mrf.mxu1  ;;  %v794_v14 = vadd.f32 %v1311_v60, %v771_v55  ;;  %v795_v54 = vadd.f32 %v1311_v60, %v772_v25 }
 0x10d   : > { %v616_v56 = vadd.f32 %v1009_v35, %v1282_v8  ;;  %v754_v7 = vmax.f32 %v710_v52, 0.0  ;;  %v753_v9 = vmax.f32 %v705_v53, 0.0 }
 0x10e   : > { %v1011_v27 = vpop.f32.mrf.mxu0  ;;  %v717_v28 = vpop.f32.mrf.mxu1 }
 0x10f   : > { %v1012_v36 = vadd.f32 %v1011_v27, %v1010_v22  ;;  %v713_v15 = vadd.f32 %v1284_v11, %v616_v56  ;;  %v777_v30 = vmul.f32 %v1299_v41, %v754_v7  ;;  %v798_v11 = vadd.f32 %v1311_v60, %v775_v3 }
 0x110   : > { %v1013_v37 = vpop.f32.mrf.mxu0  ;;  %v1294_v38 = vpop.f32.mrf.mxu1  ;;  %v776_v31 = vmul.f32 %v1299_v41, %v753_v9 }
 0x111   : > { %v621_v48 = vadd.f32 %v1012_v36, %v1282_v8  ;;  %v755_v33 = vmax.f32 %v713_v15, 0.0 }
 0x112   : > { %v1014_v50 = vpop.f32.mrf.mxu0  ;;  %v720_v51 = vpop.f32.mrf.mxu1 }
 0x113   : > { %v1015_v47 = vadd.f32 %v1014_v50, %v1013_v37  ;;  %v718_v57 = vadd.f32 %v717_v28, %v621_v48  ;;  %v810_v48 = vmax.f32 %v794_v14, %v798_v11  ;;  %v799_v50 = vadd.f32 %v1311_v60, %v776_v31 }
 0x114   : > { %v1016_v58 = vpop.f32.mrf.mxu0  ;;  %v1062_v59 = vpop.f32.mrf.mxu1  ;;  %v778_v52 = vmul.f32 %v1299_v41, %v755_v33 }
 0x115   : > { %v624_v61 = vadd.f32 %v1015_v47, %v1282_v8  ;;  %v742_v62 = vadd.f32 %v1062_v59, %v645_v49  ;;  %v756_v4 = vmax.f32 %v718_v57, 0.0 }
 0x116   : > { %v1017_v5 = vpop.f32.mrf.mxu0  ;;  %v733_v6 = vpop.f32.mrf.mxu1 }
 0x117   : > { %v721_v10 = vadd.f32 %v720_v51, %v624_v61  ;;  %v1018_v12 = vadd.f32 %v1017_v5, %v1016_v58  ;;  %v734_v16 = vadd.f32 %v733_v6, %v637_v43  ;;  %v779_v19 = vmul.f32 %v1299_v41, %v756_v4 }
 0x118   : > { %v1019_v17 = vpop.f32.mrf.mxu0  ;;  %v1063_v18 = vpop.f32.mrf.mxu1  ;;  %v762_v21 = vmax.f32 %v742_v62, 0.0  ;;  %v797_v5 = vadd.f32 %v1311_v60, %v774_v24 }
 0x119   : > { %v757_v20 = vmax.f32 %v721_v10, 0.0  ;;  %v629_v22 = vadd.f32 %v1018_v12, %v1282_v8  ;;  %v760_v26 = vmax.f32 %v734_v16, 0.0  ;;  %v745_v27 = vadd.f32 %v1063_v18, %v648_v63 }
 0x11a   : > { %v1020_v28 = vpop.f32.mrf.mxu0  ;;  %v736_v29 = vpop.f32.mrf.mxu1  ;;  %v802_v37 = vadd.f32 %v1311_v60, %v779_v19  ;;  %v785_v40 = vmul.f32 %v1299_v41, %v762_v21  ;;  %v811_v63 = vmax.f32 %v795_v54, %v799_v50 }
 0x11b   : > { %v726_v32 = vadd.f32 %v1289_v23, %v629_v22  ;;  %v783_v34 = vmul.f32 %v1299_v41, %v760_v26  ;;  %v1021_v35 = vadd.f32 %v1020_v28, %v1019_v17  ;;  %v737_v36 = vadd.f32 %v736_v29, %v640_v0 }
 0x11c   : > { %v780_v39 = vmul.f32 %v1299_v41, %v757_v20  ;;  %v763_v44 = vmax.f32 %v745_v27, 0.0  ;;  %v800_v23 = vadd.f32 %v1311_v60, %v777_v30  ;;  %v808_v55 = vadd.f32 %v1311_v60, %v785_v40 }
 0x11d   : > { %v758_v42 = vmax.f32 %v726_v32, 0.0  ;;  %v806_v43 = vadd.f32 %v1311_v60, %v783_v34  ;;  %v632_v45 = vadd.f32 %v1021_v35, %v1282_v8  ;;  %v761_v46 = vmax.f32 %v737_v36, 0.0 }
 0x11e   : > { %v803_v8 = vadd.f32 %v1311_v60, %v780_v39  ;;  %v786_v58 = vmul.f32 %v1299_v41, %v763_v44  ;;  %v812_v62 = vmax.f32 %v796_v13, %v800_v23  ;;  %v801_v0 = vadd.f32 %v1311_v60, %v778_v52 }
 0x11f   : > { %v781_v51 = vmul.f32 %v1299_v41, %v758_v42  ;;  %v814_v53 = vmax.f32 %v802_v37, %v806_v43  ;;  %v729_v47 = vadd.f32 %v1294_v38, %v632_v45  ;;  %v784_v49 = vmul.f32 %v1299_v41, %v761_v46 }
 0x120   : > { %v809_v6 = vadd.f32 %v1311_v60, %v786_v58  ;;  %v813_v12 = vmax.f32 %v797_v5, %v801_v0 }
 0x121   : > { %v804_v56 = vadd.f32 %v1311_v60, %v781_v51  ;;  %v818_v57 = vmax.f32 %v810_v48, %v814_v53  ;;  %v759_v59 = vmax.f32 %v729_v47, 0.0  ;;  %v807_v61 = vadd.f32 %v1311_v60, %v784_v49 }
 0x123   : > { %v816_v38 = vmax.f32 %v804_v56, %v808_v55  ;;  %v966_v1 = vpack.c.bf16 %v818_v57, %v818_v57  ;;  %v782_v2 = vmul.f32 %v1299_v41, %v759_v59  ;;  %v815_v3 = vmax.f32 %v803_v8, %v807_v61 }
 0x125   : > { %v820_v4 = vmax.f32 %v812_v62, %v816_v38  ;;  %839 = vst.msk [vmem:[%s224_s22] sm:$0xf] %vm838_vm1, %v966_v1  ;;  %v805_v7 = vadd.f32 %v1311_v60, %v782_v2  ;;  %v819_v9 = vmax.f32 %v811_v63, %v815_v3 }
 0x127   : > { %v968_v10 = vpack.c.bf16 %v820_v4, %v820_v4  ;;  %v817_v13 = vmax.f32 %v805_v7, %v809_v6  ;;  %v967_v14 = vpack.c.bf16 %v819_v9, %v819_v9 }
 0x129   : > { %841 = vst.msk [vmem:[%s224_s22 + $0x8] sm:$0xf] %vm838_vm1, %v968_v10  ;;  %v821_v15 = vmax.f32 %v813_v12, %v817_v13  ;;  %840 = vst.msk [vmem:[%s224_s22 + $0x4] sm:$0xf] %vm838_vm1, %v967_v14 }
 0x12b   : > { %v969_v41 = vpack.c.bf16 %v821_v15, %v821_v15 }
 0x12d   : > { %842 = vst.msk [vmem:[%s224_s22 + $0xc] sm:$0xf] %vm838_vm1, %v969_v41 }
 0x12e PF: > { %s15_s18 = sadd.s32 1, %s1145_s18  }
 0x12f   : > { %p12_p4 = scmp.ge.s32.totalorder %s15_s18, 4  }
 0x131   :  { %14 = sbr.rel (!%p12_p4) target bundleno = 1 (0x1), region = 70 }

// kernel: simple_cnn_forward.7
= control target key start
LH: loop header
LB: loop body
LE: loop exit
PB: predicated region body
PF: predicated region fallthrough
CT: control target
= control target key end

     0   :  { %v141_v29 = vlaneseq  ;;  %v998_v33 = vmov 1966171168   ;;  %v999_v40 = vmov 0.0   ;;  %vm1000_vm0 = vmmov 0   ;;  %s1234_s0 = inlined_call_operand.vmem [shape: bf16[2,800], index: 0, kind: input, shape index: {}]   ;;  %s1235_s1 = inlined_call_operand.vmem [shape: bf16[800,32], index: 1, kind: input, shape index: {}]   ;;  %s1236_s2 = inlined_call_operand.vmem [shape: f32[1,32], index: 2, kind: input, shape index: {}]   ;;  %s1237_s3 = inlined_call_operand.vmem [shape: f32[1,32], index: 3, kind: input, shape index: {}]   ;;  %s1238_s4 = inlined_call_operand.vmem [shape: f32[1,32], index: 4, kind: input, shape index: {}]   ;;  %s1239_s5 = inlined_call_operand.vmem [shape: f32[32,7], index: 5, kind: input, shape index: {}]   ;;  %s1240_s6 = inlined_call_operand.vmem [shape: f32[1,7], index: 6, kind: input, shape index: {}]   ;;  %s1241_s7 = inlined_call_operand.hbm [shape: f32[2,7], index: 7, kind: output, shape index: {}]  }
   0x1   :  { %v925_v0 = vld [vmem:[%s1235_s1 + $0x78] sm:$0xff]   ;;  %v929_v4 = vld [vmem:[%s1235_s1 + $0x70] sm:$0xff]   ;;  %v933_v8 = vld [vmem:[%s1235_s1 + $0x68] sm:$0xff]   ;;  %v139_v34 = vunpack.c.l.s4 %v998_v33 }
   0x2   :  { %v926_v1 = vld [vmem:[%s1235_s1 + $0x38] sm:$0xff]   ;;  %828 = vmatprep.subr.bf16.mxu0 %v925_v0  ;;  %v930_v5 = vld [vmem:[%s1235_s1 + $0x30] sm:$0xff]   ;;  %v934_v9 = vld [vmem:[%s1235_s1 + $0x28] sm:$0xff]   ;;  %v142_v35 = vshrl.u32 %v141_v29, 7 }
   0x3   :  { %v927_v2 = vld [vmem:[%s1235_s1 + $0xf8] sm:$0xff]   ;;  %829 = vmatpush3.bf16.msra.mxu0 %v926_v1  ;;  %v931_v6 = vld [vmem:[%s1235_s1 + $0xf0] sm:$0xff]   ;;  %v935_v10 = vld [vmem:[%s1235_s1 + $0xe8] sm:$0xff]   ;;  %v140_v39 = vunpack.c.0.s8 %v139_v34 }
   0x4   :  { %v928_v3 = vld [vmem:[%s1235_s1 + $0xb8] sm:$0xff]   ;;  %850 = vmatprep.subr.bf16.mxu1 %v927_v2  ;;  %830 = vmatprep.subr.bf16.mxu0 %v929_v4  ;;  %v932_v7 = vld [vmem:[%s1235_s1 + $0xb0] sm:$0xff]   ;;  %v936_v11 = vld [vmem:[%s1235_s1 + $0xa8] sm:$0xff]  }
   0x5   :  { %851 = vmatpush3.bf16.msra.mxu1 %v928_v3  ;;  %v937_v12 = vld [vmem:[%s1235_s1 + $0x60] sm:$0xff]   ;;  %v941_v16 = vld [vmem:[%s1235_s1 + $0x58] sm:$0xff]   ;;  %v945_v20 = vld [vmem:[%s1235_s1 + $0x50] sm:$0xff]   ;;  %v143_v41 = vsub.s32 %v140_v39, %v142_v35 }
   0x6   :  { %852 = vmatprep.subr.bf16.mxu1 %v931_v6  ;;  %v938_v13 = vld [vmem:[%s1235_s1 + $0x20] sm:$0xff]   ;;  %v942_v17 = vld [vmem:[%s1235_s1 + $0x18] sm:$0xff]   ;;  %v946_v21 = vld [vmem:[%s1235_s1 + $0x10] sm:$0xff]  }
   0x7   :  { %831 = vmatpush3.bf16.msra.mxu0 %v930_v5  ;;  %v939_v14 = vld [vmem:[%s1235_s1 + $0xe0] sm:$0xff]   ;;  %v943_v18 = vld [vmem:[%s1235_s1 + $0xd8] sm:$0xff]   ;;  %v947_v22 = vld [vmem:[%s1235_s1 + $0xd0] sm:$0xff]  }
   0x8   :  { %832 = vmatprep.subr.bf16.mxu0 %v933_v8  ;;  %v940_v15 = vld [vmem:[%s1235_s1 + $0xa0] sm:$0xff]   ;;  %v944_v19 = vld [vmem:[%s1235_s1 + $0x98] sm:$0xff]   ;;  %v948_v23 = vld [vmem:[%s1235_s1 + $0x90] sm:$0xff]  }
   0x9   :  { %853 = vmatpush3.bf16.msra.mxu1 %v932_v7  ;;  %v949_v24 = vld [vmem:[%s1235_s1 + $0x48] sm:$0xff]   ;;  %v953_v28 = vld [vmem:[%s1235_s1 + $0x40] sm:$0xff]   ;;  %v958_v37 = vld [vmem:[%s1235_s1 + $0x178] sm:$0xff]  }
   0xa   :  { %854 = vmatprep.subr.bf16.mxu1 %v935_v10  ;;  %v950_v25 = vld [vmem:[%s1235_s1 + $0x8] sm:$0xff]   ;;  %v954_v30 = vld [vmem:[%s1235_s1] sm:$0xff]   ;;  %v959_v48 = vld [vmem:[%s1235_s1 + $0x138] sm:$0xff]  }
   0xb   :  { %833 = vmatpush3.bf16.msra.mxu0 %v934_v9  ;;  %v951_v26 = vld [vmem:[%s1235_s1 + $0xc8] sm:$0xff]   ;;  %v955_v31 = vld [vmem:[%s1235_s1 + $0xc0] sm:$0xff]   ;;  %v960_v50 = vld [vmem:[%s1235_s1 + $0x170] sm:$0xff]  }
   0xc   :  { %834 = vmatprep.subr.bf16.mxu0 %v937_v12  ;;  %v952_v27 = vld [vmem:[%s1235_s1 + $0x88] sm:$0xff]   ;;  %v28_v32 = vld [vmem:[%s1234_s0] sm:$0x7f]  ;;  %v961_v53 = vld [vmem:[%s1235_s1 + $0x130] sm:$0xff]  }
   0xd   :  { %855 = vmatpush3.bf16.msra.mxu1 %v936_v11  ;;  %v957_v36 = vld [vmem:[%s1235_s1 + $0x80] sm:$0xff]   ;;  %v137_v38 = vcombine.high %v28_v32, %v28_v32  ;;  %v144_v42 = vrot.slane %v28_v32, %v143_v41  ;;  %v962_v54 = vld [vmem:[%s1235_s1 + $0x168] sm:$0xff]  }
   0xe   :  { %856 = vmatprep.subr.bf16.mxu1 %v939_v14  ;;  %v972_v55 = vld [vmem:[%s1235_s1 + $0x188] sm:$0xff]   ;;  %v975_v58 = vld [vmem:[%s1235_s1 + $0x180] sm:$0xff]  }
   0xf   :  { %835 = vmatpush3.bf16.msra.mxu0 %v938_v13  ;;  %v151_v43 = vrot.slane %v137_v38, %v143_v41  ;;  %v152_v44 = vcombine.high %v144_v42, %v144_v42  ;;  %v160_v45 = vrot.slane %v144_v42, %v143_v41  ;;  %v963_v57 = vld [vmem:[%s1235_s1 + $0x128] sm:$0xff]  }
  0x10   :  { %836 = vmatprep.subr.bf16.mxu0 %v941_v16 }
  0x11   :  { %857 = vmatpush3.bf16.msra.mxu1 %v940_v15  ;;  %v153_v46 = vcombine.high %v151_v43, %v151_v43  ;;  %v174_v47 = vrot.slane %v152_v44, %v143_v41  ;;  %v182_v49 = vcombine.high %v160_v45, %v160_v45  ;;  %v167_v56 = vrot.slane %v151_v43, %v143_v41 }
  0x12   :  { %858 = vmatprep.subr.bf16.mxu1 %v943_v18 }
  0x13   :  { %837 = vmatpush3.bf16.msra.mxu0 %v942_v17  ;;  %527 = vmatprep.mubr.bf16.mxu0 %v174_v47  ;;  %v184_v51 = vcombine.high %v174_v47, %v174_v47  ;;  %v181_v52 = vrot.slane %v153_v46, %v143_v41 }
  0x14   :  { %838 = vmatprep.subr.bf16.mxu0 %v945_v20 }
  0x15   :  { %859 = vmatpush3.bf16.msra.mxu1 %v944_v19  ;;  %567 = vmatprep.mubr.bf16.mxu1 %v184_v51 }
  0x16   :  { %860 = vmatprep.subr.bf16.mxu1 %v947_v22 }
  0x17   :  { %839 = vmatpush3.bf16.msra.mxu0 %v946_v21 }
  0x18   :  { %840 = vmatprep.subr.bf16.mxu0 %v949_v24 }
  0x19   :  { %861 = vmatpush3.bf16.msra.mxu1 %v948_v23 }
  0x1a   :  { %862 = vmatprep.subr.bf16.mxu1 %v951_v26 }
  0x1b   :  { %841 = vmatpush3.bf16.msra.mxu0 %v950_v25 }
  0x1c   :  { %842 = vmatprep.subr.bf16.mxu0 %v953_v28 }
  0x1d   :  { %863 = vmatpush3.bf16.msra.mxu1 %v952_v27 }
  0x1e   :  { %864 = vmatprep.subr.bf16.mxu1 %v955_v31 }
  0x1f   :  { %843 = vmatpush3.bf16.msra.mxu0 %v954_v30 }
  0x20   :  { %872 = vmatprep.subr.bf16.mxu0 %v958_v37 }
  0x21   :  { %865 = vmatpush3.bf16.msra.mxu1 %v957_v36 }
  0x22   :  { %902 = vmatprep.subr.bf16.mxu1 %v999_v40  ;;  %528 = vmatmul.mubr.bf16.vlgmr.msra.gmra.mxu0 %v160_v45 }
  0x23   :  { %873 = vmatpush3.bf16.msra.mxu0 %v959_v48  ;;  %607 = vmatprep.mubr.bf16.mxu0 %v181_v52 }
  0x24   :  { %568 = vmatmul.mubr.bf16.vlgmr.msra.gmra.mxu1 %v182_v49  ;;  %874 = vmatprep.subr.bf16.mxu0 %v960_v50 }
  0x25   :  { %906 = vmatprep.mubr.msk.bf16.mxu1 %vm1000_vm0, %v999_v40  ;;  %903 = vmatpush3.bf16.msra.mxu1 %v972_v55 }
  0x26   :  { %904 = vmatprep.subr.bf16.mxu1 %v999_v40 }
  0x27   :  { %875 = vmatpush3.bf16.msra.mxu0 %v961_v53 }
  0x28   :  { %12 = vsyncpa [#allocation3], 0  ;;  %876 = vmatprep.subr.bf16.mxu0 %v962_v54  ;;  %v964_v59 = vld [vmem:[%s1235_s1 + $0x160] sm:$0xff]   ;;  %v183_v60 = vcombine.high %v167_v56, %v167_v56  ;;  %vm491_vm1 = vcmask 261120   ;;  %v966_v62 = vld [vmem:[%s1235_s1 + $0x158] sm:$0xff]   ;;  %s1001_s22 = smov [#allocation2]  }
  0x29   :  { %905 = vmatpush3.bf16.msra.mxu1 %v975_v58  ;;  %v965_v61 = vld [vmem:[%s1235_s1 + $0x120] sm:$0xff]   ;;  %v967_v63 = vld [vmem:[%s1235_s1 + $0x118] sm:$0xff]   ;;  %v968_v0 = vld [vmem:[%s1235_s1 + $0x150] sm:$0xff]   ;;  %s764_s0 = sshll.u32 %s1001_s22, 4  ;;  %vm756_vm2 = vcmask 50176   ;;  %s765_s0 = int_to_ptr.vmem [resolvable:$true] %s764_s0 }
  0x2a   :  { %910 = vmatprep.subr.mxu1 %v999_v40  ;;  %v969_v1 = vld [vmem:[%s1235_s1 + $0x110] sm:$0xff]   ;;  %v970_v2 = vld [vmem:[%s1235_s1 + $0x148] sm:$0xff]   ;;  %v973_v4 = vld [vmem:[%s1235_s1 + $0x140] sm:$0xff]   ;;  %p981_p1 = scmp.lt.s32.totalorder %s765_s0, %s765_s0 }
  0x2b   :  { %877 = vmatpush3.bf16.msra.mxu0 %v963_v57  ;;  %v971_v3 = vld [vmem:[%s1235_s1 + $0x108] sm:$0xff]   ;;  %v974_v5 = vld [vmem:[%s1235_s1 + $0x100] sm:$0xff]   ;;  %v675_v6 = vld [vmem:[%s1239_s5 + $0x18] sm:$0xff] }
  0x2c   :  { %878 = vmatprep.subr.bf16.mxu0 %v964_v59  ;;  %907 = vmatmul.mubr.msk.bf16.vlgmr.msra.gmra.mxu1 %vm491_vm1, %v183_v60  ;;  %v674_v7 = vld [vmem:[%s1239_s5 + $0x10] sm:$0xff]  ;;  %v673_v8 = vld [vmem:[%s1239_s5 + $0x8] sm:$0xff]  ;;  %v672_v9 = vld [vmem:[%s1239_s5] sm:$0xff] }
  0x2d   :  { %918 = vmatprep.mubr.msk.f32.mxu1 %vm1000_vm0, %v999_v40  ;;  %911 = vmatpush3.msra.mxu1 %v675_v6  ;;  %v772_v23 = vld [vmem:[%s1236_s2] ss:$0 sm:$0xff] }
  0x2e   :  { %912 = vmatprep.subr.mxu1 %v999_v40  ;;  %v824_v34 = vld [vmem:[%s1237_s3] ss:$0 sm:$0xff]  ;;  %s976_s3 = scalar_lea.vmem %s765_s0, 32 }
  0x2f   :  { %879 = vmatpush3.bf16.msra.mxu0 %v965_v61  ;;  %913 = vmatpush3.msra.mxu1 %v674_v7  ;;  %v825_v36 = vld [vmem:[%s1238_s4] ss:$0 sm:$0xff]  ;;  %p977_p0 = scmp.ne.s32.totalorder %s765_s0, %s976_s3  ;;  %p982_p2 = scmp.lt.s32.totalorder %s976_s3, %s976_s3 }
  0x30   :  { %880 = vmatprep.subr.bf16.mxu0 %v966_v62  ;;  %914 = vmatprep.subr.mxu1 %v999_v40  ;;  %v826_v39 = vld [vmem:[%s1240_s6] ss:$0 sm:$0xff] }
  0x31   :  { %915 = vmatpush3.msra.mxu1 %v673_v8  ;;  %p983_p3 = por %p982_p2, %p981_p1 }
  0x32   :  { %916 = vmatprep.subr.mxu1 %v999_v40 }
  0x33   :  { %881 = vmatpush3.bf16.msra.mxu0 %v967_v63  ;;  %917 = vmatpush3.msra.mxu1 %v672_v9  ;;  %p984_p4 = pnand %p983_p3, %p977_p0 }
  0x34   :  { %882 = vmatprep.subr.bf16.mxu0 %v968_v0 }
  0x37   :  { %883 = vmatpush3.bf16.msra.mxu0 %v969_v1 }
  0x38   :  { %884 = vmatprep.subr.bf16.mxu0 %v970_v2 }
  0x3b   :  { %885 = vmatpush3.bf16.msra.mxu0 %v971_v3 }
  0x3c   :  { %886 = vmatprep.subr.bf16.mxu0 %v973_v4 }
  0x3f   :  { %887 = vmatpush3.bf16.msra.mxu0 %v974_v5 }
  0x42   :  { %608 = vmatmul.mubr.bf16.vlgmr.msra.gmra.mxu0 %v167_v56 }
  0xe2   :  { %v844_v10 = vpop.f32.mrf.mxu0 }
  0xe4   :  { %v845_v11 = vpop.f32.mrf.mxu0  ;;  %v866_v12 = vpop.f32.mrf.mxu1 }
  0xe5   :  { %v846_v22 = vadd.f32 %v845_v11, %v844_v10 }
  0xe6   :  { %v847_v13 = vpop.f32.mrf.mxu0  ;;  %v867_v14 = vpop.f32.mrf.mxu1 }
  0xe7   :  { %v530_v24 = vadd.f32 %v846_v22, %v772_v23  ;;  %v868_v25 = vadd.f32 %v867_v14, %v866_v12 }
  0xe8   :  { %v848_v15 = vpop.f32.mrf.mxu0  ;;  %v869_v16 = vpop.f32.mrf.mxu1 }
  0xe9   :  { %v570_v28 = vadd.f32 %v868_v25, %v530_v24 }
  0xea   :  { %v870_v17 = vpop.f32.mrf.mxu1 }
  0xec   :  { %v649_v18 = vpop.f32.mrf.mxu1 }
  0xee   :  { %v908_v19 = vpop.f32.mrf.mxu1 }
  0xf0   :  { %v652_v20 = vpop.f32.mrf.mxu1 }
  0xf2   :  { %v909_v21 = vpop.f32.mrf.mxu1 }
 0x102   :  { %v888_v26 = vpop.f32.mrf.mxu0 }
 0x104   :  { %v889_v27 = vpop.f32.mrf.mxu0 }
 0x105   :  { %v890_v29 = vadd.f32 %v889_v27, %v888_v26 }
 0x106   :  { %v891_v30 = vpop.f32.mrf.mxu0 }
 0x107   :  { %v610_v31 = vadd.f32 %v890_v29, %v570_v28 }
 0x108   :  { %v892_v32 = vpop.f32.mrf.mxu0 }
 0x109   :  { %v650_v33 = vadd.f32 %v649_v18, %v610_v31 }
 0x10b   :  { %v655_v35 = vmax.f32 %v650_v33, 0.0 }
 0x10d   :  { %v663_v37 = vmul.f32 %v824_v34, %v655_v35 }
 0x10f   :  { %v671_v38 = vadd.f32 %v825_v36, %v663_v37 }
 0x111   :  { %919 = vmatmul.mubr.msk.f32.vlgmr.msra.gmra.mxu1 %vm491_vm1, %v671_v38 }
 0x1d1   :  { %v752_v40 = vpop.f32.mrf.mxu1 }
 0x1d2   :  { %v753_v41 = vadd.f32 %v826_v39, %v752_v40 }
 0x1d3   :  { %v920_v42 = vpop.f32.mrf.mxu1 }
 0x1d4   :  { %757 = vst.msk [vmem:[#allocation2] sm:$0x3] %vm756_vm2, %v753_v41 }
 0x1d5   :  { %987 = shalt.err (!%p984_p4)
}
 0x1d6   :  { %767 = dma.vmem_to_hbm [thread:$0]  %s765_s0, 32, %s1241_s7, [#allocation3]  }
 0x1d7   :  { %996 = dma.done.wait [#allocation3], 32  }
 0x1d8   :  { %997 = vsyncadd [#allocation3], 4294967264 }
 0x1d9   :  { %771 = vsyncpa [#allocation3], 1 }

</bundles_post_ra>
